<compile_context>
chip_gen: v6e
topology: v6e:2x2x1
jax: 0.10.0
libtpu: 0.0.40
codegen_flags: <defaults>
</compile_context>

<pallas_src>
import math

import numpy as np
import jax
import jax.numpy as jnp
from jax import lax
from jax.experimental import pallas as pl
from jax.experimental.pallas import tpu as pltpu

# ----------------------------------------------------------------------------
# Module constants (original repo values in comments).
CENTER_CROP = (24, 32)                            # original: (150, 200)
DIM1 = 20                                         # original: 140
DIM2 = DIM1 + (CENTER_CROP[1] - CENTER_CROP[0])   # dim1 + 8   (orig: 190)
NB_CH = 4                                         # self.nb_channels
OUT_CH = 3                                        # self.out_nb_channels
DIM_LAST_LAYER = 512                              # TYPE_ARCH == '1default'
K3 = CENTER_CROP[0] - (DIM1 - 1)                  # conv3 kernel size (orig: 11)

KP, SP, PP = 5, 2, 2                              # MaxPool2d(5, stride=2, pad=2)
K45, S45, P45 = 6, 2, 2                           # conv4/conv5 (6, stride=2, pad=2)
assert (K45, S45, P45) == (6, 2, 2)               # phase decomposition assumes this

# Derived per-stage spatial sizes.
H0, W0 = DIM1, DIM2                               # linear1 output map
H1, W1 = H0 + K3 - 1, W0 + K3 - 1                 # conv3 output
H2 = (H1 + 2 * PP - KP) // SP + 1                 # maxpool 1 output
W2 = (W1 + 2 * PP - KP) // SP + 1
H3, W3 = S45 * H2, S45 * W2                       # conv4 output
H4 = (H3 + 2 * PP - KP) // SP + 1                 # maxpool 2 output
W4 = (W3 + 2 * PP - KP) // SP + 1
H5, W5 = S45 * H4, S45 * W4                       # conv5 output

assert (H5, W5) == CENTER_CROP                    # final .view is a no-op reshape
assert (H1, W1) == (H3, W3) and (H2, W2) == (H4, W4)

HP3 = H0 + 2 * (K3 - 1)                           # conv3 input + row halo
W1P = W1 + 2 * PP                                 # per-channel block width, pool inputs
SW_X3 = NB_CH * W0                                # stacked conv3-input width
SW_MP = OUT_CH * W1P                              # stacked pool-input width
SW_PC = OUT_CH * W2                               # stacked conv4/conv5-input width
SW_OUT = OUT_CH * W5                              # stacked final output width


# ----------------------------------------------------------------------------
# Kernel 1: Linear layer  y = x @ W + b
#   * W stored bf16 (half the HBM stream), f32 accumulation on the MXU.
#   * lane-dense 4096-wide output tiles (v7x-safe double-buffered VMEM).
def _linear_kernel(x_ref, w_ref, b_ref, o_ref):
    o_ref[...] = (
        jnp.dot(x_ref[...].astype(jnp.bfloat16), w_ref[...],
                preferred_element_type=jnp.float32)
        + b_ref[...]
    )


def linear_pallas(x, w_bf16, b_row, tile_n=4096):
    """x: (B, K) f32, w_bf16: (K, N) bf16, b_row: (1, N) f32 -> (B, N) f32."""
    B, K = x.shape
    N = w_bf16.shape[1]
    if N <= tile_n:                       # single full block (demo sizes)
        tile_n, grid_n = N, 1
    else:                                 # lane-aligned tiles, ragged last block
        tile_n = (tile_n // 128) * 128
        grid_n = pl.cdiv(N, tile_n)
    # double-buffered bf16 weight tile dominates; keep the limit v7x-safe.
    vmem_bytes = (2 * K * tile_n * 2 + 2 * B * tile_n * 4
                  + 2 * tile_n * 4 + 2 * B * K * 4 + (8 << 20))
    vmem_bytes = int(min(max(vmem_bytes, 24 << 20), 48 << 20))
    return pl.pallas_call(
        _linear_kernel,
        out_shape=jax.ShapeDtypeStruct((B, N), jnp.float32),
        grid=(grid_n,),
        in_specs=[
            pl.BlockSpec((B, K), lambda j: (0, 0)),
            pl.BlockSpec((K, tile_n), lambda j: (0, j)),
            pl.BlockSpec((1, tile_n), lambda j: (0, j)),
        ],
        out_specs=pl.BlockSpec((B, tile_n), lambda j: (0, j)),
        compiler_params=pltpu.CompilerParams(
            dimension_semantics=("parallel",),
            vmem_limit_bytes=vmem_bytes),
    )(x, w_bf16, b_row)


# ----------------------------------------------------------------------------
# Kernel 2: fused  conv3 -> relu -> maxpool -> conv4 -> relu -> maxpool
#                  -> conv5 -> sigmoid        (one grid step per batch image)
#
# All tap contractions are MXU matmuls against host-precomputed banded weight
# matrices; pools / phase interleave use exact 0/1 selection matmuls.
def _decoder_tail_kernel(x_ref, b3w_ref, b4w_ref, b5w_ref, pcol_ref, prow_ref,
                         ur_ref, b3r_ref, b4r_ref, b5r_ref,
                         o_ref, s_x3, s_mp, s_pc):
    f32 = jnp.float32
    hi = lax.Precision.HIGHEST   # exact for the 0/1 selections; ~f32 for bands

    # ---- per-step halo init: row halos only (interiors and the zero gap
    #      columns between channel blocks are fully rewritten every step).
    s_x3[0:K3 - 1, :] = jnp.zeros((K3 - 1, SW_X3), f32)
    s_x3[K3 - 1 + H0:, :] = jnp.zeros((K3 - 1, SW_X3), f32)
    s_mp[0:PP, :] = jnp.zeros((PP, SW_MP), f32)
    s_mp[PP + H1:, :] = jnp.zeros((PP, SW_MP), f32)
    s_pc[0:1, :] = jnp.zeros((1, SW_PC), f32)
    s_pc[1 + H2:, :] = jnp.zeros((1, SW_PC), f32)

    # ---- stage conv3 input: lane-stacked channels, single store -------------
    s_x3[K3 - 1:K3 - 1 + H0, :] = x_ref[0]

    # ---- conv3 (stride-1 ConvTranspose2d == full correlation) as K3 banded
    #      MXU matmuls; result lands directly in the stacked pool-1 layout.
    s_mp[PP:PP + H1, :] = (
        jnp.dot(s_x3[0:H1, :], b3w_ref[0], preferred_element_type=f32,
                precision=hi) + b3r_ref[...])
    for p in range(1, K3):
        s_mp[PP:PP + H1, :] += jnp.dot(
            s_x3[p:p + H1, :], b3w_ref[p], preferred_element_type=f32,
            precision=hi)
    s_mp[PP:PP + H1, :] = jnp.maximum(s_mp[PP:PP + H1, :], 0.0)      # ReLU

    # ---- MaxPool2d(5, stride=2, pad=2): separable running max on the stacked
    #      slab + exact 0/1 selection matmuls for the stride-2 subsample and
    #      the channel restack into the conv4/conv5 input layout.
    #      (0-padding is exact here because the pool input is post-ReLU >= 0.)
    def maxpool():
        hw = SW_MP - (KP - 1)
        hm = s_mp[:, 0:hw]
        for q in range(1, KP):
            hm = jnp.maximum(hm, s_mp[:, q:q + hw])
        vm = hm[0:H1, :]
        for p in range(1, KP):
            vm = jnp.maximum(vm, hm[p:p + H1, :])
        sub = jnp.dot(prow_ref[...], vm, preferred_element_type=f32,
                      precision=hi)                      # stride-2 rows
        s_pc[1:1 + H2, :] = jnp.dot(sub, pcol_ref[...],
                                    preferred_element_type=f32,
                                    precision=hi)        # stride-2 cols + restack

    # ---- stride-2 ConvTranspose2d (k=6, pad=2) via per-phase banded matmuls
    #      (ky = ry + 2*ty, a = A + 1 - ty) + exact 0/1 row-interleave matmuls.
    def conv_s2(bw_ref):
        out = None
        for ry in range(S45):
            ph = None
            for ty in range(3):
                t = jnp.dot(s_pc[2 - ty:2 - ty + H2, :], bw_ref[ry * 3 + ty],
                            preferred_element_type=f32, precision=hi)
                ph = t if ph is None else ph + t
            r = jnp.dot(ur_ref[ry], ph, preferred_element_type=f32,
                        precision=hi)
            out = r if out is None else out + r
        return out

    maxpool()                                                    # pool 1
    y4 = conv_s2(b4w_ref)                                        # conv4
    s_mp[PP:PP + H3, :] = jnp.maximum(y4 + b4r_ref[...], 0.0)    # + ReLU
    maxpool()                                                    # pool 2
    y5 = conv_s2(b5w_ref)                                        # conv5
    o_ref[0, :, :] = 1.0 / (1.0 + jnp.exp(-(y5 + b5r_ref[...]))) # sigmoid


def decoder_tail_pallas(x, prep):
    """x: (B, H0, NB_CH*W0) f32 -> (B, H5, OUT_CH*W5) f32 (lane-stacked)."""
    B = x.shape[0]
    cmap2 = lambda i: (0, 0)
    cmap3 = lambda i: (0, 0, 0)
    # NOTE: at original sizes the conv3 band (K3, NB_CH*W0, SW_MP) gets large;
    # it should then be streamed over an extra grid axis (one row-tap per step)
    # or single-buffered to stay inside v7x's 64 MiB VMEM.
    return pl.pallas_call(
        _decoder_tail_kernel,
        out_shape=jax.ShapeDtypeStruct((B, H5, SW_OUT), jnp.float32),
        grid=(B,),
        in_specs=[
            pl.BlockSpec((1, H0, SW_X3), lambda i: (i, 0, 0)),       # x
            pl.BlockSpec(prep["b3_band"].shape, cmap3),              # conv3 bands
            pl.BlockSpec(prep["b4_band"].shape, cmap3),              # conv4 bands
            pl.BlockSpec(prep["b5_band"].shape, cmap3),              # conv5 bands
            pl.BlockSpec(prep["pool_col"].shape, cmap2),             # 0/1 col select
            pl.BlockSpec(prep["pool_row"].shape, cmap2),             # 0/1 row select
            pl.BlockSpec(prep["row_interleave"].shape, cmap3),       # 0/1 interleave
            pl.BlockSpec(prep["b3_row"].shape, cmap2),               # bias rows
            pl.BlockSpec(prep["b4_row"].shape, cmap2),
            pl.BlockSpec(prep["b5_row"].shape, cmap2),
        ],
        out_specs=pl.BlockSpec((1, H5, SW_OUT), lambda i: (i, 0, 0)),
        scratch_shapes=[
            pltpu.VMEM((HP3, SW_X3), jnp.float32),            # conv3 input (+halo)
            pltpu.VMEM((H1 + 2 * PP, SW_MP), jnp.float32),    # pool1/pool2 input
            pltpu.VMEM((H2 + 2, SW_PC), jnp.float32),         # conv4/conv5 input
        ],
        compiler_params=pltpu.CompilerParams(
            dimension_semantics=("parallel",)),   # batch -> both TCs on v7x
    )(x, prep["b3_band"], prep["b4_band"], prep["b5_band"],
      prep["pool_col"], prep["pool_row"], prep["row_interleave"],
      prep["b3_row"], prep["b4_row"], prep["b5_row"])


# ----------------------------------------------------------------------------
# Host-side (one-time) parameter preparation: banded conv matrices, 0/1
# selection matrices, stacked bias rows, permuted + bf16 linear weight.
def _build_tail_constants(w3, b3, w4, b4, w5, b5):
    w3 = np.asarray(w3, np.float32); b3 = np.asarray(b3, np.float32)
    w4 = np.asarray(w4, np.float32); b4 = np.asarray(b4, np.float32)
    w5 = np.asarray(w5, np.float32); b5 = np.asarray(b5, np.float32)

    # conv3 band per row-tap p:
    #   out3[co, y, x] = sum_{p,ci,v} Xp[y, ci*W0+v] * B3[p][ci*W0+v, co*W1P+PP+x]
    #   with B3 entry = w3[ci, co, K3-1-p, K3-1-q], v = x + q - (K3-1).
    B3 = np.zeros((K3, SW_X3, SW_MP), np.float32)
    for p in range(K3):
        for ci in range(NB_CH):
            for co in range(OUT_CH):
                for x in range(W1):
                    for q in range(K3):
                        v = x + q - (K3 - 1)
                        if 0 <= v < W0:
                            B3[p, ci * W0 + v, co * W1P + PP + x] = \
                                w3[ci, co, K3 - 1 - p, K3 - 1 - q]

    # conv4/conv5 phase bands per (ry, ty):  out col x = 2*Bc + rx,
    #   band row n = Bc + 1 - tx, entry = w[ci, co, ry+2ty, rx+2tx].
    def band_s2(w, blk_w, off):
        Bm = np.zeros((S45 * 3, SW_PC, OUT_CH * blk_w), np.float32)
        for ry in range(S45):
            for ty in range(3):
                for ci in range(OUT_CH):
                    for co in range(OUT_CH):
                        for x in range(S45 * W2):
                            rx, bc = x % S45, x // S45
                            for tx in range(3):
                                n = bc + 1 - tx
                                if 0 <= n < W2:
                                    Bm[ry * 3 + ty, ci * W2 + n,
                                       co * blk_w + off + x] = \
                                        w[ci, co, ry + 2 * ty, rx + 2 * tx]
        return Bm

    B4 = band_s2(w4, W1P, PP)      # lands in stacked pool-2 input layout
    B5 = band_s2(w5, W5, 0)        # lands in stacked final output layout

    # exact 0/1 selection matrices (stride-2 subsample, restack, interleave)
    hw = SW_MP - (KP - 1)
    pcol = np.zeros((hw, SW_PC), np.float32)
    for c in range(OUT_CH):
        for j2 in range(W2):
            pcol[c * W1P + SP * j2, c * W2 + j2] = 1.0
    prow = np.zeros((H2, H1), np.float32)
    for i2 in range(H2):
        prow[i2, SP * i2] = 1.0
    ur = np.zeros((S45, H3, H2), np.float32)
    for r in range(S45):
        for a in range(H2):
            ur[r, S45 * a + r, a] = 1.0

    # bias rows (zero in the inter-channel gap columns)
    b3r = np.zeros((1, SW_MP), np.float32)
    b4r = np.zeros((1, SW_MP), np.float32)
    b5r = np.zeros((1, SW_OUT), np.float32)
    for co in range(OUT_CH):
        b3r[0, co * W1P + PP: co * W1P + PP + W1] = b3[co]
        b4r[0, co * W1P + PP: co * W1P + PP + W3] = b4[co]
        b5r[0, co * W5: (co + 1) * W5] = b5[co]

    f = lambda a: jnp.asarray(a, jnp.float32)
    return {
        "b3_band": f(B3), "b4_band": f(B4), "b5_band": f(B5),
        "pool_col": f(pcol), "pool_row": f(prow), "row_interleave": f(ur),
        "b3_row": f(b3r), "b4_row": f(b4r), "b5_row": f(b5r),
    }


def prepare_params(params):
    """One-time host-side parameter preparation (call outside jit)."""
    n = NB_CH * DIM1 * DIM2
    w = np.asarray(params["linear_w"], np.float32)
    b = np.asarray(params["linear_b"], np.float32)
    # Permute output features (ci, i, j) -> (i, ci, j) so the linear output is
    # directly the lane-stacked conv3 input; compress weight to bf16 (halves
    # the dominant HBM stream; MXU accumulation stays f32).
    w = w.reshape(DIM_LAST_LAYER, NB_CH, DIM1, DIM2).transpose(0, 2, 1, 3)
    b = b.reshape(NB_CH, DIM1, DIM2).transpose(1, 0, 2)
    prep = {
        "linear_w": jnp.asarray(w.reshape(DIM_LAST_LAYER, n), jnp.bfloat16),
        "linear_b_row": jnp.asarray(b.reshape(1, n), jnp.float32),
    }
    prep.update(_build_tail_constants(
        params["conv3_w"], params["conv3_b"],
        params["conv4_w"], params["conv4_b"],
        params["conv5_w"], params["conv5_b"]))
    return prep


# ----------------------------------------------------------------------------
# DecoderNet forward (mirrors the PyTorch module).
def decoder_forward(prep, data):
    B = data.shape[0]
    y = linear_pallas(data, prep["linear_w"], prep["linear_b_row"])   # linear1
    x = y.reshape(B, H0, NB_CH * W0)                                  # .view (stacked)
    out = decoder_tail_pallas(x, prep)                                # conv3..sigmoid
    out = out.reshape(B, H5, OUT_CH, W5).transpose(0, 2, 1, 3)        # de-stack
    return out                                                        # (B, 3, *CENTER_CROP)


def init_params(key):
    """Deterministic synthetic parameters in PyTorch layouts/initialisation."""
    n = NB_CH * DIM1 * DIM2
    ks = jax.random.split(key, 8)

    def unif(k, shape, fan_in):
        bound = 1.0 / math.sqrt(fan_in)
        return jax.random.uniform(k, shape, jnp.float32, -bound, bound)

    return {
        # stored as (in, out) so the kernel computes x @ W directly
        "linear_w": unif(ks[0], (DIM_LAST_LAYER, n), DIM_LAST_LAYER),
        "linear_b": unif(ks[1], (n,), DIM_LAST_LAYER),
        # ConvTranspose2d weights keep PyTorch layout (Cin, Cout, K, K)
        "conv3_w": unif(ks[2], (NB_CH, OUT_CH, K3, K3), NB_CH * K3 * K3),
        "conv3_b": unif(ks[3], (OUT_CH,), NB_CH * K3 * K3),
        "conv4_w": unif(ks[4], (OUT_CH, OUT_CH, K45, K45), OUT_CH * K45 * K45),
        "conv4_b": unif(ks[5], (OUT_CH,), OUT_CH * K45 * K45),
        "conv5_w": unif(ks[6], (OUT_CH, OUT_CH, K45, K45), OUT_CH * K45 * K45),
        "conv5_b": unif(ks[7], (OUT_CH,), OUT_CH * K45 * K45),
    }


if __name__ == "__main__":
    key = jax.random.PRNGKey(0)
    pkey, dkey = jax.random.split(key)
    params = init_params(pkey)
    prep = prepare_params(params)                       # host-side, outside jit
    data = jax.random.normal(dkey, (2, DIM_LAST_LAYER), jnp.float32)  # (B, 512)

    out = jax.jit(decoder_forward)(prep, data)
    out = jax.block_until_ready(out)

    assert out.shape == (2, OUT_CH, CENTER_CROP[0], CENTER_CROP[1]), out.shape
    assert out.dtype == jnp.float32
    assert bool(jnp.all(jnp.isfinite(out)))
    assert bool(jnp.all((out >= 0.0) & (out <= 1.0)))   # sigmoid range
    print("KERNEL_OK")
</pallas_src>

<mosaic_0001>
module attributes {stable_mosaic.version = 11 : i64} {
  func.func @_linear_kernel(%arg0: i32, %arg1: memref<2x512xf32, #tpu.memory_space<vmem>>, %arg2: memref<512x2240xbf16, #tpu.memory_space<vmem>>, %arg3: memref<1x2240xf32, #tpu.memory_space<vmem>>, %arg4: memref<2x2240xf32, #tpu.memory_space<vmem>>) attributes {dimension_semantics = [#tpu.dimension_semantics<parallel>], iteration_bounds = array<i64: 1>, scalar_prefetch = 0 : i64, scratch_operands = 0 : i64, tpu.core_type = #tpu.core_type<tc>, window_params = [{pipeline_mode = #tpu.pipeline_mode<synchronous>, transform_indices = @transform_0, window_bounds = array<i64: 2, 512>}, {transform_indices = @transform_1, window_bounds = array<i64: 512, 2240>}, {transform_indices = @transform_2, window_bounds = array<i64: 1, 2240>}, {transform_indices = @transform_3, window_bounds = array<i64: 2, 2240>}]} {
    %c0 = arith.constant 0 : index
    %c0_0 = arith.constant 0 : index
    %0 = vector.load %arg1[%c0, %c0_0] : memref<2x512xf32, #tpu.memory_space<vmem>>, vector<2x512xf32>
    %1 = arith.truncf %0 : vector<2x512xf32> to vector<2x512xbf16>
    %c0_1 = arith.constant 0 : index
    %c0_2 = arith.constant 0 : index
    %2 = vector.load %arg2[%c0_1, %c0_2] : memref<512x2240xbf16, #tpu.memory_space<vmem>>, vector<512x2240xbf16>
    %cst = arith.constant dense<0.000000e+00> : vector<2x2240xf32>
    %3 = tpu.matmul %1, %2, %cst {dimension_numbers = #tpu.dot_dimension_numbers<[1], [0], [0], [1], [0, 0, 1, 1], [], []>} : vector<2x512xbf16>, vector<512x2240xbf16>, vector<2x2240xf32> -> vector<2x2240xf32>
    %c0_3 = arith.constant 0 : index
    %c0_4 = arith.constant 0 : index
    %4 = vector.load %arg3[%c0_3, %c0_4] : memref<1x2240xf32, #tpu.memory_space<vmem>>, vector<1x2240xf32>
    %5 = vector.broadcast %4 : vector<1x2240xf32> to vector<2x2240xf32>
    %6 = arith.addf %3, %5 : vector<2x2240xf32>
    %c0_5 = arith.constant 0 : index
    %c0_6 = arith.constant 0 : index
    %7 = vector.load %arg4[%c0_5, %c0_6] : memref<2x2240xf32, #tpu.memory_space<vmem>>, vector<2x2240xf32>
    tpu.vector_store %arg4[%c0_5, %c0_6], %6 {strides = array<i32>} : memref<2x2240xf32, #tpu.memory_space<vmem>>, vector<2x2240xf32>,
    return
  }
  func.func @transform_0(%arg0: i32) -> (i32, i32) {
    %c0_i32 = arith.constant 0 : i32
    %c0_i32_0 = arith.constant 0 : i32
    %c0_i32_1 = arith.constant 0 : i32
    return %c0_i32, %c0_i32_0 : i32, i32
  }
  func.func @transform_1(%arg0: i32) -> (i32, i32) {
    %c0_i32 = arith.constant 0 : i32
    %c0_i32_0 = arith.constant 0 : i32
    return %c0_i32, %arg0 : i32, i32
  }
  func.func @transform_2(%arg0: i32) -> (i32, i32) {
    %c0_i32 = arith.constant 0 : i32
    %c0_i32_0 = arith.constant 0 : i32
    return %c0_i32, %arg0 : i32, i32
  }
  func.func @transform_3(%arg0: i32) -> (i32, i32) {
    %c0_i32 = arith.constant 0 : i32
    %c0_i32_0 = arith.constant 0 : i32
    return %c0_i32, %arg0 : i32, i32
  }
}

module attributes {stable_mosaic.version = 11 : i64} {
  func.func @_decoder_tail_kernel(%arg0: i32, %arg1: memref<1x20x112xf32, #tpu.memory_space<vmem>>, %arg2: memref<5x112x108xf32, #tpu.memory_space<vmem>>, %arg3: memref<6x48x108xf32, #tpu.memory_space<vmem>>, %arg4: memref<6x48x96xf32, #tpu.memory_space<vmem>>, %arg5: memref<104x48xf32, #tpu.memory_space<vmem>>, %arg6: memref<12x24xf32, #tpu.memory_space<vmem>>, %arg7: memref<2x24x12xf32, #tpu.memory_space<vmem>>, %arg8: memref<1x108xf32, #tpu.memory_space<vmem>>, %arg9: memref<1x108xf32, #tpu.memory_space<vmem>>, %arg10: memref<1x96xf32, #tpu.memory_space<vmem>>, %arg11: memref<1x24x96xf32, #tpu.memory_space<vmem>>, %arg12: memref<28x112xf32, #tpu.memory_space<vmem>>, %arg13: memref<28x108xf32, #tpu.memory_space<vmem>>, %arg14: memref<14x48xf32, #tpu.memory_space<vmem>>) attributes {dimension_semantics = [#tpu.dimension_semantics<parallel>], iteration_bounds = array<i64: 2>, scalar_prefetch = 0 : i64, scratch_operands = 3 : i64, tpu.core_type = #tpu.core_type<tc>, window_params = [{transform_indices = @transform_0, window_bounds = array<i64: 1, 20, 112>}, {pipeline_mode = #tpu.pipeline_mode<synchronous>, transform_indices = @transform_1, window_bounds = array<i64: 5, 112, 108>}, {pipeline_mode = #tpu.pipeline_mode<synchronous>, transform_indices = @transform_2, window_bounds = array<i64: 6, 48, 108>}, {pipeline_mode = #tpu.pipeline_mode<synchronous>, transform_indices = @transform_3, window_bounds = array<i64: 6, 48, 96>}, {pipeline_mode = #tpu.pipeline_mode<synchronous>, transform_indices = @transform_4, window_bounds = array<i64: 104, 48>}, {pipeline_mode = #tpu.pipeline_mode<synchronous>, transform_indices = @transform_5, window_bounds = array<i64: 12, 24>}, {pipeline_mode = #tpu.pipeline_mode<synchronous>, transform_indices = @transform_6, window_bounds = array<i64: 2, 24, 12>}, {pipeline_mode = #tpu.pipeline_mode<synchronous>, transform_indices = @transform_7, window_bounds = array<i64: 1, 108>}, {pipeline_mode = #tpu.pipeline_mode<synchronous>, transform_indices = @transform_8, window_bounds = array<i64: 1, 108>}, {pipeline_mode = #tpu.pipeline_mode<synchronous>, transform_indices = @transform_9, window_bounds = array<i64: 1, 96>}, {transform_indices = @transform_10, window_bounds = array<i64: 1, 24, 96>}]} {
    %cst = arith.constant 0.000000e+00 : f32
    %0 = vector.broadcast %cst : f32 to vector<4x112xf32>
    %c0 = arith.constant 0 : index
    %c0_0 = arith.constant 0 : index
    %1 = vector.load %arg12[%c0, %c0_0] : memref<28x112xf32, #tpu.memory_space<vmem>>, vector<4x112xf32>
    tpu.vector_store %arg12[%c0, %c0_0], %0 {strides = array<i32>} : memref<28x112xf32, #tpu.memory_space<vmem>>, vector<4x112xf32>,
    %cst_1 = arith.constant 0.000000e+00 : f32
    %2 = vector.broadcast %cst_1 : f32 to vector<4x112xf32>
    %c24 = arith.constant 24 : index
    %c0_2 = arith.constant 0 : index
    %3 = vector.load %arg12[%c24, %c0_2] : memref<28x112xf32, #tpu.memory_space<vmem>>, vector<4x112xf32>
    tpu.vector_store %arg12[%c24, %c0_2], %2 {strides = array<i32>} : memref<28x112xf32, #tpu.memory_space<vmem>>, vector<4x112xf32>,
    %cst_3 = arith.constant 0.000000e+00 : f32
    %4 = vector.broadcast %cst_3 : f32 to vector<2x108xf32>
    %c0_4 = arith.constant 0 : index
    %c0_5 = arith.constant 0 : index
    %5 = vector.load %arg13[%c0_4, %c0_5] : memref<28x108xf32, #tpu.memory_space<vmem>>, vector<2x108xf32>
    tpu.vector_store %arg13[%c0_4, %c0_5], %4 {strides = array<i32>} : memref<28x108xf32, #tpu.memory_space<vmem>>, vector<2x108xf32>,
    %cst_6 = arith.constant 0.000000e+00 : f32
    %6 = vector.broadcast %cst_6 : f32 to vector<2x108xf32>
    %c26 = arith.constant 26 : index
    %c0_7 = arith.constant 0 : index
    %7 = vector.load %arg13[%c26, %c0_7] : memref<28x108xf32, #tpu.memory_space<vmem>>, vector<2x108xf32>
    tpu.vector_store %arg13[%c26, %c0_7], %6 {strides = array<i32>} : memref<28x108xf32, #tpu.memory_space<vmem>>, vector<2x108xf32>,
    %cst_8 = arith.constant 0.000000e+00 : f32
    %8 = vector.broadcast %cst_8 : f32 to vector<1x48xf32>
    %c0_9 = arith.constant 0 : index
    %c0_10 = arith.constant 0 : index
    %9 = vector.load %arg14[%c0_9, %c0_10] : memref<14x48xf32, #tpu.memory_space<vmem>>, vector<1x48xf32>
    tpu.vector_store %arg14[%c0_9, %c0_10], %8 {strides = array<i32>} : memref<14x48xf32, #tpu.memory_space<vmem>>, vector<1x48xf32>,
    %cst_11 = arith.constant 0.000000e+00 : f32
    %10 = vector.broadcast %cst_11 : f32 to vector<1x48xf32>
    %c13 = arith.constant 13 : index
    %c0_12 = arith.constant 0 : index
    %11 = vector.load %arg14[%c13, %c0_12] : memref<14x48xf32, #tpu.memory_space<vmem>>, vector<1x48xf32>
    tpu.vector_store %arg14[%c13, %c0_12], %10 {strides = array<i32>} : memref<14x48xf32, #tpu.memory_space<vmem>>, vector<1x48xf32>,
    %c0_13 = arith.constant 0 : index
    %c0_14 = arith.constant 0 : index
    %c0_15 = arith.constant 0 : index
    %12 = vector.load %arg1[%c0_13, %c0_14, %c0_15] : memref<1x20x112xf32, #tpu.memory_space<vmem>>, vector<1x20x112xf32>
    %13 = vector.shape_cast %12 : vector<1x20x112xf32> to vector<20x112xf32>
    %c4 = arith.constant 4 : index
    %c0_16 = arith.constant 0 : index
    %14 = vector.load %arg12[%c4, %c0_16] : memref<28x112xf32, #tpu.memory_space<vmem>>, vector<20x112xf32>
    tpu.vector_store %arg12[%c4, %c0_16], %13 {strides = array<i32>} : memref<28x112xf32, #tpu.memory_space<vmem>>, vector<20x112xf32>,
    %c0_17 = arith.constant 0 : index
    %c0_18 = arith.constant 0 : index
    %15 = vector.load %arg12[%c0_17, %c0_18] : memref<28x112xf32, #tpu.memory_space<vmem>>, vector<24x112xf32>
    %c0_19 = arith.constant 0 : index
    %c0_20 = arith.constant 0 : index
    %c0_21 = arith.constant 0 : index
    %16 = vector.load %arg2[%c0_19, %c0_20, %c0_21] : memref<5x112x108xf32, #tpu.memory_space<vmem>>, vector<1x112x108xf32>
    %17 = vector.shape_cast %16 : vector<1x112x108xf32> to vector<112x108xf32>
    %cst_22 = arith.constant dense<0.000000e+00> : vector<24x108xf32>
    %18 = tpu.matmul %15, %17, %cst_22 {dimension_numbers = #tpu.dot_dimension_numbers<[1], [0], [0], [1], [0, 0, 1, 1], [], []>, precision = #tpu.contract_precision<fp32>} : vector<24x112xf32>, vector<112x108xf32>, vector<24x108xf32> -> vector<24x108xf32>
    %c0_23 = arith.constant 0 : index
    %c0_24 = arith.constant 0 : index
    %19 = vector.load %arg8[%c0_23, %c0_24] : memref<1x108xf32, #tpu.memory_space<vmem>>, vector<1x108xf32>
    %20 = vector.broadcast %19 : vector<1x108xf32> to vector<24x108xf32>
    %21 = arith.addf %18, %20 : vector<24x108xf32>
    %c2 = arith.constant 2 : index
    %c0_25 = arith.constant 0 : index
    %22 = vector.load %arg13[%c2, %c0_25] : memref<28x108xf32, #tpu.memory_space<vmem>>, vector<24x108xf32>
    tpu.vector_store %arg13[%c2, %c0_25], %21 {strides = array<i32>} : memref<28x108xf32, #tpu.memory_space<vmem>>, vector<24x108xf32>,
    %c2_26 = arith.constant 2 : index
    %c0_27 = arith.constant 0 : index
    %23 = vector.load %arg13[%c2_26, %c0_27] : memref<28x108xf32, #tpu.memory_space<vmem>>, vector<24x108xf32>
    %c1 = arith.constant 1 : index
    %c0_28 = arith.constant 0 : index
    %24 = vector.load %arg12[%c1, %c0_28] : memref<28x112xf32, #tpu.memory_space<vmem>>, vector<24x112xf32>
    %c1_29 = arith.constant 1 : index
    %c0_30 = arith.constant 0 : index
    %c0_31 = arith.constant 0 : index
    %25 = vector.load %arg2[%c1_29, %c0_30, %c0_31] : memref<5x112x108xf32, #tpu.memory_space<vmem>>, vector<1x112x108xf32>
    %26 = vector.shape_cast %25 : vector<1x112x108xf32> to vector<112x108xf32>
    %cst_32 = arith.constant dense<0.000000e+00> : vector<24x108xf32>
    %27 = tpu.matmul %24, %26, %cst_32 {dimension_numbers = #tpu.dot_dimension_numbers<[1], [0], [0], [1], [0, 0, 1, 1], [], []>, precision = #tpu.contract_precision<fp32>} : vector<24x112xf32>, vector<112x108xf32>, vector<24x108xf32> -> vector<24x108xf32>
    %28 = arith.addf %23, %27 : vector<24x108xf32>
    %c2_33 = arith.constant 2 : index
    %c0_34 = arith.constant 0 : index
    %29 = vector.load %arg13[%c2_33, %c0_34] : memref<28x108xf32, #tpu.memory_space<vmem>>, vector<24x108xf32>
    tpu.vector_store %arg13[%c2_33, %c0_34], %28 {strides = array<i32>} : memref<28x108xf32, #tpu.memory_space<vmem>>, vector<24x108xf32>,
    %c2_35 = arith.constant 2 : index
    %c0_36 = arith.constant 0 : index
    %30 = vector.load %arg13[%c2_35, %c0_36] : memref<28x108xf32, #tpu.memory_space<vmem>>, vector<24x108xf32>
    %c2_37 = arith.constant 2 : index
    %c0_38 = arith.constant 0 : index
    %31 = vector.load %arg12[%c2_37, %c0_38] : memref<28x112xf32, #tpu.memory_space<vmem>>, vector<24x112xf32>
    %c2_39 = arith.constant 2 : index
    %c0_40 = arith.constant 0 : index
    %c0_41 = arith.constant 0 : index
    %32 = vector.load %arg2[%c2_39, %c0_40, %c0_41] : memref<5x112x108xf32, #tpu.memory_space<vmem>>, vector<1x112x108xf32>
    %33 = vector.shape_cast %32 : vector<1x112x108xf32> to vector<112x108xf32>
    %cst_42 = arith.constant dense<0.000000e+00> : vector<24x108xf32>
    %34 = tpu.matmul %31, %33, %cst_42 {dimension_numbers = #tpu.dot_dimension_numbers<[1], [0], [0], [1], [0, 0, 1, 1], [], []>, precision = #tpu.contract_precision<fp32>} : vector<24x112xf32>, vector<112x108xf32>, vector<24x108xf32> -> vector<24x108xf32>
    %35 = arith.addf %30, %34 : vector<24x108xf32>
    %c2_43 = arith.constant 2 : index
    %c0_44 = arith.constant 0 : index
    %36 = vector.load %arg13[%c2_43, %c0_44] : memref<28x108xf32, #tpu.memory_space<vmem>>, vector<24x108xf32>
    tpu.vector_store %arg13[%c2_43, %c0_44], %35 {strides = array<i32>} : memref<28x108xf32, #tpu.memory_space<vmem>>, vector<24x108xf32>,
    %c2_45 = arith.constant 2 : index
    %c0_46 = arith.constant 0 : index
    %37 = vector.load %arg13[%c2_45, %c0_46] : memref<28x108xf32, #tpu.memory_space<vmem>>, vector<24x108xf32>
    %c3 = arith.constant 3 : index
    %c0_47 = arith.constant 0 : index
    %38 = vector.load %arg12[%c3, %c0_47] : memref<28x112xf32, #tpu.memory_space<vmem>>, vector<24x112xf32>
    %c3_48 = arith.constant 3 : index
    %c0_49 = arith.constant 0 : index
    %c0_50 = arith.constant 0 : index
    %39 = vector.load %arg2[%c3_48, %c0_49, %c0_50] : memref<5x112x108xf32, #tpu.memory_space<vmem>>, vector<1x112x108xf32>
    %40 = vector.shape_cast %39 : vector<1x112x108xf32> to vector<112x108xf32>
    %cst_51 = arith.constant dense<0.000000e+00> : vector<24x108xf32>
    %41 = tpu.matmul %38, %40, %cst_51 {dimension_numbers = #tpu.dot_dimension_numbers<[1], [0], [0], [1], [0, 0, 1, 1], [], []>, precision = #tpu.contract_precision<fp32>} : vector<24x112xf32>, vector<112x108xf32>, vector<24x108xf32> -> vector<24x108xf32>
    %42 = arith.addf %37, %41 : vector<24x108xf32>
    %c2_52 = arith.constant 2 : index
    %c0_53 = arith.constant 0 : index
    %43 = vector.load %arg13[%c2_52, %c0_53] : memref<28x108xf32, #tpu.memory_space<vmem>>, vector<24x108xf32>
    tpu.vector_store %arg13[%c2_52, %c0_53], %42 {strides = array<i32>} : memref<28x108xf32, #tpu.memory_space<vmem>>, vector<24x108xf32>,
    %c2_54 = arith.constant 2 : index
    %c0_55 = arith.constant 0 : index
    %44 = vector.load %arg13[%c2_54, %c0_55] : memref<28x108xf32, #tpu.memory_space<vmem>>, vector<24x108xf32>
    %c4_56 = arith.constant 4 : index
    %c0_57 = arith.constant 0 : index
    %45 = vector.load %arg12[%c4_56, %c0_57] : memref<28x112xf32, #tpu.memory_space<vmem>>, vector<24x112xf32>
    %c4_58 = arith.constant 4 : index
    %c0_59 = arith.constant 0 : index
    %c0_60 = arith.constant 0 : index
    %46 = vector.load %arg2[%c4_58, %c0_59, %c0_60] : memref<5x112x108xf32, #tpu.memory_space<vmem>>, vector<1x112x108xf32>
    %47 = vector.shape_cast %46 : vector<1x112x108xf32> to vector<112x108xf32>
    %cst_61 = arith.constant dense<0.000000e+00> : vector<24x108xf32>
    %48 = tpu.matmul %45, %47, %cst_61 {dimension_numbers = #tpu.dot_dimension_numbers<[1], [0], [0], [1], [0, 0, 1, 1], [], []>, precision = #tpu.contract_precision<fp32>} : vector<24x112xf32>, vector<112x108xf32>, vector<24x108xf32> -> vector<24x108xf32>
    %49 = arith.addf %44, %48 : vector<24x108xf32>
    %c2_62 = arith.constant 2 : index
    %c0_63 = arith.constant 0 : index
    %50 = vector.load %arg13[%c2_62, %c0_63] : memref<28x108xf32, #tpu.memory_space<vmem>>, vector<24x108xf32>
    tpu.vector_store %arg13[%c2_62, %c0_63], %49 {strides = array<i32>} : memref<28x108xf32, #tpu.memory_space<vmem>>, vector<24x108xf32>,
    %c2_64 = arith.constant 2 : index
    %c0_65 = arith.constant 0 : index
    %51 = vector.load %arg13[%c2_64, %c0_65] : memref<28x108xf32, #tpu.memory_space<vmem>>, vector<24x108xf32>
    %cst_66 = arith.constant 0.000000e+00 : f32
    %52 = vector.broadcast %cst_66 : f32 to vector<24x108xf32>
    %53 = arith.maximumf %51, %52 : vector<24x108xf32>
    %c2_67 = arith.constant 2 : index
    %c0_68 = arith.constant 0 : index
    %54 = vector.load %arg13[%c2_67, %c0_68] : memref<28x108xf32, #tpu.memory_space<vmem>>, vector<24x108xf32>
    tpu.vector_store %arg13[%c2_67, %c0_68], %53 {strides = array<i32>} : memref<28x108xf32, #tpu.memory_space<vmem>>, vector<24x108xf32>,
    %c0_69 = arith.constant 0 : index
    %c0_70 = arith.constant 0 : index
    %55 = vector.load %arg13[%c0_69, %c0_70] : memref<28x108xf32, #tpu.memory_space<vmem>>, vector<28x104xf32>
    %c0_71 = arith.constant 0 : index
    %c1_72 = arith.constant 1 : index
    %56 = vector.load %arg13[%c0_71, %c1_72] : memref<28x108xf32, #tpu.memory_space<vmem>>, vector<28x104xf32>
    %57 = arith.maximumf %55, %56 : vector<28x104xf32>
    %c0_73 = arith.constant 0 : index
    %c2_74 = arith.constant 2 : index
    %58 = vector.load %arg13[%c0_73, %c2_74] : memref<28x108xf32, #tpu.memory_space<vmem>>, vector<28x104xf32>
    %59 = arith.maximumf %57, %58 : vector<28x104xf32>
    %c0_75 = arith.constant 0 : index
    %c3_76 = arith.constant 3 : index
    %60 = vector.load %arg13[%c0_75, %c3_76] : memref<28x108xf32, #tpu.memory_space<vmem>>, vector<28x104xf32>
    %61 = arith.maximumf %59, %60 : vector<28x104xf32>
    %c0_77 = arith.constant 0 : index
    %c4_78 = arith.constant 4 : index
    %62 = vector.load %arg13[%c0_77, %c4_78] : memref<28x108xf32, #tpu.memory_space<vmem>>, vector<28x104xf32>
    %63 = arith.maximumf %61, %62 : vector<28x104xf32>
    %64 = vector.extract_strided_slice %63 {offsets = [0, 0], sizes = [24, 104], strides = [1, 1]} : vector<28x104xf32> to vector<24x104xf32>
    %65 = vector.extract_strided_slice %63 {offsets = [1, 0], sizes = [24, 104], strides = [1, 1]} : vector<28x104xf32> to vector<24x104xf32>
    %66 = arith.maximumf %64, %65 : vector<24x104xf32>
    %67 = vector.extract_strided_slice %63 {offsets = [2, 0], sizes = [24, 104], strides = [1, 1]} : vector<28x104xf32> to vector<24x104xf32>
    %68 = arith.maximumf %66, %67 : vector<24x104xf32>
    %69 = vector.extract_strided_slice %63 {offsets = [3, 0], sizes = [24, 104], strides = [1, 1]} : vector<28x104xf32> to vector<24x104xf32>
    %70 = arith.maximumf %68, %69 : vector<24x104xf32>
    %71 = vector.extract_strided_slice %63 {offsets = [4, 0], sizes = [24, 104], strides = [1, 1]} : vector<28x104xf32> to vector<24x104xf32>
    %72 = arith.maximumf %70, %71 : vector<24x104xf32>
    %c0_79 = arith.constant 0 : index
    %c0_80 = arith.constant 0 : index
    %73 = vector.load %arg6[%c0_79, %c0_80] : memref<12x24xf32, #tpu.memory_space<vmem>>, vector<12x24xf32>
    %cst_81 = arith.constant dense<0.000000e+00> : vector<12x104xf32>
    %74 = tpu.matmul %73, %72, %cst_81 {dimension_numbers = #tpu.dot_dimension_numbers<[1], [0], [0], [1], [0, 0, 1, 1], [], []>, precision = #tpu.contract_precision<fp32>} : vector<12x24xf32>, vector<24x104xf32>, vector<12x104xf32> -> vector<12x104xf32>
    %c0_82 = arith.constant 0 : index
    %c0_83 = arith.constant 0 : index
    %75 = vector.load %arg5[%c0_82, %c0_83] : memref<104x48xf32, #tpu.memory_space<vmem>>, vector<104x48xf32>
    %cst_84 = arith.constant dense<0.000000e+00> : vector<12x48xf32>
    %76 = tpu.matmul %74, %75, %cst_84 {dimension_numbers = #tpu.dot_dimension_numbers<[1], [0], [0], [1], [0, 0, 1, 1], [], []>, precision = #tpu.contract_precision<fp32>} : vector<12x104xf32>, vector<104x48xf32>, vector<12x48xf32> -> vector<12x48xf32>
    %c1_85 = arith.constant 1 : index
    %c0_86 = arith.constant 0 : index
    %77 = vector.load %arg14[%c1_85, %c0_86] : memref<14x48xf32, #tpu.memory_space<vmem>>, vector<12x48xf32>
    tpu.vector_store %arg14[%c1_85, %c0_86], %76 {strides = array<i32>} : memref<14x48xf32, #tpu.memory_space<vmem>>, vector<12x48xf32>,
    %c2_87 = arith.constant 2 : index
    %c0_88 = arith.constant 0 : index
    %78 = vector.load %arg14[%c2_87, %c0_88] : memref<14x48xf32, #tpu.memory_space<vmem>>, vector<12x48xf32>
    %c0_89 = arith.constant 0 : index
    %c0_90 = arith.constant 0 : index
    %c0_91 = arith.constant 0 : index
    %79 = vector.load %arg3[%c0_89, %c0_90, %c0_91] : memref<6x48x108xf32, #tpu.memory_space<vmem>>, vector<1x48x108xf32>
    %80 = vector.shape_cast %79 : vector<1x48x108xf32> to vector<48x108xf32>
    %cst_92 = arith.constant dense<0.000000e+00> : vector<12x108xf32>
    %81 = tpu.matmul %78, %80, %cst_92 {dimension_numbers = #tpu.dot_dimension_numbers<[1], [0], [0], [1], [0, 0, 1, 1], [], []>, precision = #tpu.contract_precision<fp32>} : vector<12x48xf32>, vector<48x108xf32>, vector<12x108xf32> -> vector<12x108xf32>
    %c1_93 = arith.constant 1 : index
    %c0_94 = arith.constant 0 : index
    %82 = vector.load %arg14[%c1_93, %c0_94] : memref<14x48xf32, #tpu.memory_space<vmem>>, vector<12x48xf32>
    %c1_95 = arith.constant 1 : index
    %c0_96 = arith.constant 0 : index
    %c0_97 = arith.constant 0 : index
    %83 = vector.load %arg3[%c1_95, %c0_96, %c0_97] : memref<6x48x108xf32, #tpu.memory_space<vmem>>, vector<1x48x108xf32>
    %84 = vector.shape_cast %83 : vector<1x48x108xf32> to vector<48x108xf32>
    %cst_98 = arith.constant dense<0.000000e+00> : vector<12x108xf32>
    %85 = tpu.matmul %82, %84, %cst_98 {dimension_numbers = #tpu.dot_dimension_numbers<[1], [0], [0], [1], [0, 0, 1, 1], [], []>, precision = #tpu.contract_precision<fp32>} : vector<12x48xf32>, vector<48x108xf32>, vector<12x108xf32> -> vector<12x108xf32>
    %86 = arith.addf %81, %85 : vector<12x108xf32>
    %c0_99 = arith.constant 0 : index
    %c0_100 = arith.constant 0 : index
    %87 = vector.load %arg14[%c0_99, %c0_100] : memref<14x48xf32, #tpu.memory_space<vmem>>, vector<12x48xf32>
    %c2_101 = arith.constant 2 : index
    %c0_102 = arith.constant 0 : index
    %c0_103 = arith.constant 0 : index
    %88 = vector.load %arg3[%c2_101, %c0_102, %c0_103] : memref<6x48x108xf32, #tpu.memory_space<vmem>>, vector<1x48x108xf32>
    %89 = vector.shape_cast %88 : vector<1x48x108xf32> to vector<48x108xf32>
    %cst_104 = arith.constant dense<0.000000e+00> : vector<12x108xf32>
    %90 = tpu.matmul %87, %89, %cst_104 {dimension_numbers = #tpu.dot_dimension_numbers<[1], [0], [0], [1], [0, 0, 1, 1], [], []>, precision = #tpu.contract_precision<fp32>} : vector<12x48xf32>, vector<48x108xf32>, vector<12x108xf32> -> vector<12x108xf32>
    %91 = arith.addf %86, %90 : vector<12x108xf32>
    %c0_105 = arith.constant 0 : index
    %c0_106 = arith.constant 0 : index
    %c0_107 = arith.constant 0 : index
    %92 = vector.load %arg7[%c0_105, %c0_106, %c0_107] : memref<2x24x12xf32, #tpu.memory_space<vmem>>, vector<1x24x12xf32>
    %93 = vector.shape_cast %92 : vector<1x24x12xf32> to vector<24x12xf32>
    %cst_108 = arith.constant dense<0.000000e+00> : vector<24x108xf32>
    %94 = tpu.matmul %93, %91, %cst_108 {dimension_numbers = #tpu.dot_dimension_numbers<[1], [0], [0], [1], [0, 0, 1, 1], [], []>, precision = #tpu.contract_precision<fp32>} : vector<24x12xf32>, vector<12x108xf32>, vector<24x108xf32> -> vector<24x108xf32>
    %c2_109 = arith.constant 2 : index
    %c0_110 = arith.constant 0 : index
    %95 = vector.load %arg14[%c2_109, %c0_110] : memref<14x48xf32, #tpu.memory_space<vmem>>, vector<12x48xf32>
    %c3_111 = arith.constant 3 : index
    %c0_112 = arith.constant 0 : index
    %c0_113 = arith.constant 0 : index
    %96 = vector.load %arg3[%c3_111, %c0_112, %c0_113] : memref<6x48x108xf32, #tpu.memory_space<vmem>>, vector<1x48x108xf32>
    %97 = vector.shape_cast %96 : vector<1x48x108xf32> to vector<48x108xf32>
    %cst_114 = arith.constant dense<0.000000e+00> : vector<12x108xf32>
    %98 = tpu.matmul %95, %97, %cst_114 {dimension_numbers = #tpu.dot_dimension_numbers<[1], [0], [0], [1], [0, 0, 1, 1], [], []>, precision = #tpu.contract_precision<fp32>} : vector<12x48xf32>, vector<48x108xf32>, vector<12x108xf32> -> vector<12x108xf32>
    %c1_115 = arith.constant 1 : index
    %c0_116 = arith.constant 0 : index
    %99 = vector.load %arg14[%c1_115, %c0_116] : memref<14x48xf32, #tpu.memory_space<vmem>>, vector<12x48xf32>
    %c4_117 = arith.constant 4 : index
    %c0_118 = arith.constant 0 : index
    %c0_119 = arith.constant 0 : index
    %100 = vector.load %arg3[%c4_117, %c0_118, %c0_119] : memref<6x48x108xf32, #tpu.memory_space<vmem>>, vector<1x48x108xf32>
    %101 = vector.shape_cast %100 : vector<1x48x108xf32> to vector<48x108xf32>
    %cst_120 = arith.constant dense<0.000000e+00> : vector<12x108xf32>
    %102 = tpu.matmul %99, %101, %cst_120 {dimension_numbers = #tpu.dot_dimension_numbers<[1], [0], [0], [1], [0, 0, 1, 1], [], []>, precision = #tpu.contract_precision<fp32>} : vector<12x48xf32>, vector<48x108xf32>, vector<12x108xf32> -> vector<12x108xf32>
    %103 = arith.addf %98, %102 : vector<12x108xf32>
    %c0_121 = arith.constant 0 : index
    %c0_122 = arith.constant 0 : index
    %104 = vector.load %arg14[%c0_121, %c0_122] : memref<14x48xf32, #tpu.memory_space<vmem>>, vector<12x48xf32>
    %c5 = arith.constant 5 : index
    %c0_123 = arith.constant 0 : index
    %c0_124 = arith.constant 0 : index
    %105 = vector.load %arg3[%c5, %c0_123, %c0_124] : memref<6x48x108xf32, #tpu.memory_space<vmem>>, vector<1x48x108xf32>
    %106 = vector.shape_cast %105 : vector<1x48x108xf32> to vector<48x108xf32>
    %cst_125 = arith.constant dense<0.000000e+00> : vector<12x108xf32>
    %107 = tpu.matmul %104, %106, %cst_125 {dimension_numbers = #tpu.dot_dimension_numbers<[1], [0], [0], [1], [0, 0, 1, 1], [], []>, precision = #tpu.contract_precision<fp32>} : vector<12x48xf32>, vector<48x108xf32>, vector<12x108xf32> -> vector<12x108xf32>
    %108 = arith.addf %103, %107 : vector<12x108xf32>
    %c1_126 = arith.constant 1 : index
    %c0_127 = arith.constant 0 : index
    %c0_128 = arith.constant 0 : index
    %109 = vector.load %arg7[%c1_126, %c0_127, %c0_128] : memref<2x24x12xf32, #tpu.memory_space<vmem>>, vector<1x24x12xf32>
    %110 = vector.shape_cast %109 : vector<1x24x12xf32> to vector<24x12xf32>
    %cst_129 = arith.constant dense<0.000000e+00> : vector<24x108xf32>
    %111 = tpu.matmul %110, %108, %cst_129 {dimension_numbers = #tpu.dot_dimension_numbers<[1], [0], [0], [1], [0, 0, 1, 1], [], []>, precision = #tpu.contract_precision<fp32>} : vector<24x12xf32>, vector<12x108xf32>, vector<24x108xf32> -> vector<24x108xf32>
    %112 = arith.addf %94, %111 : vector<24x108xf32>
    %c0_130 = arith.constant 0 : index
    %c0_131 = arith.constant 0 : index
    %113 = vector.load %arg9[%c0_130, %c0_131] : memref<1x108xf32, #tpu.memory_space<vmem>>, vector<1x108xf32>
    %114 = vector.broadcast %113 : vector<1x108xf32> to vector<24x108xf32>
    %115 = arith.addf %112, %114 : vector<24x108xf32>
    %cst_132 = arith.constant 0.000000e+00 : f32
    %116 = vector.broadcast %cst_132 : f32 to vector<24x108xf32>
    %117 = arith.maximumf %115, %116 : vector<24x108xf32>
    %c2_133 = arith.constant 2 : index
    %c0_134 = arith.constant 0 : index
    %118 = vector.load %arg13[%c2_133, %c0_134] : memref<28x108xf32, #tpu.memory_space<vmem>>, vector<24x108xf32>
    tpu.vector_store %arg13[%c2_133, %c0_134], %117 {strides = array<i32>} : memref<28x108xf32, #tpu.memory_space<vmem>>, vector<24x108xf32>,
    %c0_135 = arith.constant 0 : index
    %c0_136 = arith.constant 0 : index
    %119 = vector.load %arg13[%c0_135, %c0_136] : memref<28x108xf32, #tpu.memory_space<vmem>>, vector<28x104xf32>
    %c0_137 = arith.constant 0 : index
    %c1_138 = arith.constant 1 : index
    %120 = vector.load %arg13[%c0_137, %c1_138] : memref<28x108xf32, #tpu.memory_space<vmem>>, vector<28x104xf32>
    %121 = arith.maximumf %119, %120 : vector<28x104xf32>
    %c0_139 = arith.constant 0 : index
    %c2_140 = arith.constant 2 : index
    %122 = vector.load %arg13[%c0_139, %c2_140] : memref<28x108xf32, #tpu.memory_space<vmem>>, vector<28x104xf32>
    %123 = arith.maximumf %121, %122 : vector<28x104xf32>
    %c0_141 = arith.constant 0 : index
    %c3_142 = arith.constant 3 : index
    %124 = vector.load %arg13[%c0_141, %c3_142] : memref<28x108xf32, #tpu.memory_space<vmem>>, vector<28x104xf32>
    %125 = arith.maximumf %123, %124 : vector<28x104xf32>
    %c0_143 = arith.constant 0 : index
    %c4_144 = arith.constant 4 : index
    %126 = vector.load %arg13[%c0_143, %c4_144] : memref<28x108xf32, #tpu.memory_space<vmem>>, vector<28x104xf32>
    %127 = arith.maximumf %125, %126 : vector<28x104xf32>
    %128 = vector.extract_strided_slice %127 {offsets = [0, 0], sizes = [24, 104], strides = [1, 1]} : vector<28x104xf32> to vector<24x104xf32>
    %129 = vector.extract_strided_slice %127 {offsets = [1, 0], sizes = [24, 104], strides = [1, 1]} : vector<28x104xf32> to vector<24x104xf32>
    %130 = arith.maximumf %128, %129 : vector<24x104xf32>
    %131 = vector.extract_strided_slice %127 {offsets = [2, 0], sizes = [24, 104], strides = [1, 1]} : vector<28x104xf32> to vector<24x104xf32>
    %132 = arith.maximumf %130, %131 : vector<24x104xf32>
    %133 = vector.extract_strided_slice %127 {offsets = [3, 0], sizes = [24, 104], strides = [1, 1]} : vector<28x104xf32> to vector<24x104xf32>
    %134 = arith.maximumf %132, %133 : vector<24x104xf32>
    %135 = vector.extract_strided_slice %127 {offsets = [4, 0], sizes = [24, 104], strides = [1, 1]} : vector<28x104xf32> to vector<24x104xf32>
    %136 = arith.maximumf %134, %135 : vector<24x104xf32>
    %c0_145 = arith.constant 0 : index
    %c0_146 = arith.constant 0 : index
    %137 = vector.load %arg6[%c0_145, %c0_146] : memref<12x24xf32, #tpu.memory_space<vmem>>, vector<12x24xf32>
    %cst_147 = arith.constant dense<0.000000e+00> : vector<12x104xf32>
    %138 = tpu.matmul %137, %136, %cst_147 {dimension_numbers = #tpu.dot_dimension_numbers<[1], [0], [0], [1], [0, 0, 1, 1], [], []>, precision = #tpu.contract_precision<fp32>} : vector<12x24xf32>, vector<24x104xf32>, vector<12x104xf32> -> vector<12x104xf32>
    %c0_148 = arith.constant 0 : index
    %c0_149 = arith.constant 0 : index
    %139 = vector.load %arg5[%c0_148, %c0_149] : memref<104x48xf32, #tpu.memory_space<vmem>>, vector<104x48xf32>
    %cst_150 = arith.constant dense<0.000000e+00> : vector<12x48xf32>
    %140 = tpu.matmul %138, %139, %cst_150 {dimension_numbers = #tpu.dot_dimension_numbers<[1], [0], [0], [1], [0, 0, 1, 1], [], []>, precision = #tpu.contract_precision<fp32>} : vector<12x104xf32>, vector<104x48xf32>, vector<12x48xf32> -> vector<12x48xf32>
    %c1_151 = arith.constant 1 : index
    %c0_152 = arith.constant 0 : index
    %141 = vector.load %arg14[%c1_151, %c0_152] : memref<14x48xf32, #tpu.memory_space<vmem>>, vector<12x48xf32>
    tpu.vector_store %arg14[%c1_151, %c0_152], %140 {strides = array<i32>} : memref<14x48xf32, #tpu.memory_space<vmem>>, vector<12x48xf32>,
    %c2_153 = arith.constant 2 : index
    %c0_154 = arith.constant 0 : index
    %142 = vector.load %arg14[%c2_153, %c0_154] : memref<14x48xf32, #tpu.memory_space<vmem>>, vector<12x48xf32>
    %c0_155 = arith.constant 0 : index
    %c0_156 = arith.constant 0 : index
    %c0_157 = arith.constant 0 : index
    %143 = vector.load %arg4[%c0_155, %c0_156, %c0_157] : memref<6x48x96xf32, #tpu.memory_space<vmem>>, vector<1x48x96xf32>
    %144 = vector.shape_cast %143 : vector<1x48x96xf32> to vector<48x96xf32>
    %cst_158 = arith.constant dense<0.000000e+00> : vector<12x96xf32>
    %145 = tpu.matmul %142, %144, %cst_158 {dimension_numbers = #tpu.dot_dimension_numbers<[1], [0], [0], [1], [0, 0, 1, 1], [], []>, precision = #tpu.contract_precision<fp32>} : vector<12x48xf32>, vector<48x96xf32>, vector<12x96xf32> -> vector<12x96xf32>
    %c1_159 = arith.constant 1 : index
    %c0_160 = arith.constant 0 : index
    %146 = vector.load %arg14[%c1_159, %c0_160] : memref<14x48xf32, #tpu.memory_space<vmem>>, vector<12x48xf32>
    %c1_161 = arith.constant 1 : index
    %c0_162 = arith.constant 0 : index
    %c0_163 = arith.constant 0 : index
    %147 = vector.load %arg4[%c1_161, %c0_162, %c0_163] : memref<6x48x96xf32, #tpu.memory_space<vmem>>, vector<1x48x96xf32>
    %148 = vector.shape_cast %147 : vector<1x48x96xf32> to vector<48x96xf32>
    %cst_164 = arith.constant dense<0.000000e+00> : vector<12x96xf32>
    %149 = tpu.matmul %146, %148, %cst_164 {dimension_numbers = #tpu.dot_dimension_numbers<[1], [0], [0], [1], [0, 0, 1, 1], [], []>, precision = #tpu.contract_precision<fp32>} : vector<12x48xf32>, vector<48x96xf32>, vector<12x96xf32> -> vector<12x96xf32>
    %150 = arith.addf %145, %149 : vector<12x96xf32>
    %c0_165 = arith.constant 0 : index
    %c0_166 = arith.constant 0 : index
    %151 = vector.load %arg14[%c0_165, %c0_166] : memref<14x48xf32, #tpu.memory_space<vmem>>, vector<12x48xf32>
    %c2_167 = arith.constant 2 : index
    %c0_168 = arith.constant 0 : index
    %c0_169 = arith.constant 0 : index
    %152 = vector.load %arg4[%c2_167, %c0_168, %c0_169] : memref<6x48x96xf32, #tpu.memory_space<vmem>>, vector<1x48x96xf32>
    %153 = vector.shape_cast %152 : vector<1x48x96xf32> to vector<48x96xf32>
    %cst_170 = arith.constant dense<0.000000e+00> : vector<12x96xf32>
    %154 = tpu.matmul %151, %153, %cst_170 {dimension_numbers = #tpu.dot_dimension_numbers<[1], [0], [0], [1], [0, 0, 1, 1], [], []>, precision = #tpu.contract_precision<fp32>} : vector<12x48xf32>, vector<48x96xf32>, vector<12x96xf32> -> vector<12x96xf32>
    %155 = arith.addf %150, %154 : vector<12x96xf32>
    %c0_171 = arith.constant 0 : index
    %c0_172 = arith.constant 0 : index
    %c0_173 = arith.constant 0 : index
    %156 = vector.load %arg7[%c0_171, %c0_172, %c0_173] : memref<2x24x12xf32, #tpu.memory_space<vmem>>, vector<1x24x12xf32>
    %157 = vector.shape_cast %156 : vector<1x24x12xf32> to vector<24x12xf32>
    %cst_174 = arith.constant dense<0.000000e+00> : vector<24x96xf32>
    %158 = tpu.matmul %157, %155, %cst_174 {dimension_numbers = #tpu.dot_dimension_numbers<[1], [0], [0], [1], [0, 0, 1, 1], [], []>, precision = #tpu.contract_precision<fp32>} : vector<24x12xf32>, vector<12x96xf32>, vector<24x96xf32> -> vector<24x96xf32>
    %c2_175 = arith.constant 2 : index
    %c0_176 = arith.constant 0 : index
    %159 = vector.load %arg14[%c2_175, %c0_176] : memref<14x48xf32, #tpu.memory_space<vmem>>, vector<12x48xf32>
    %c3_177 = arith.constant 3 : index
    %c0_178 = arith.constant 0 : index
    %c0_179 = arith.constant 0 : index
    %160 = vector.load %arg4[%c3_177, %c0_178, %c0_179] : memref<6x48x96xf32, #tpu.memory_space<vmem>>, vector<1x48x96xf32>
    %161 = vector.shape_cast %160 : vector<1x48x96xf32> to vector<48x96xf32>
    %cst_180 = arith.constant dense<0.000000e+00> : vector<12x96xf32>
    %162 = tpu.matmul %159, %161, %cst_180 {dimension_numbers = #tpu.dot_dimension_numbers<[1], [0], [0], [1], [0, 0, 1, 1], [], []>, precision = #tpu.contract_precision<fp32>} : vector<12x48xf32>, vector<48x96xf32>, vector<12x96xf32> -> vector<12x96xf32>
    %c1_181 = arith.constant 1 : index
    %c0_182 = arith.constant 0 : index
    %163 = vector.load %arg14[%c1_181, %c0_182] : memref<14x48xf32, #tpu.memory_space<vmem>>, vector<12x48xf32>
    %c4_183 = arith.constant 4 : index
    %c0_184 = arith.constant 0 : index
    %c0_185 = arith.constant 0 : index
    %164 = vector.load %arg4[%c4_183, %c0_184, %c0_185] : memref<6x48x96xf32, #tpu.memory_space<vmem>>, vector<1x48x96xf32>
    %165 = vector.shape_cast %164 : vector<1x48x96xf32> to vector<48x96xf32>
    %cst_186 = arith.constant dense<0.000000e+00> : vector<12x96xf32>
    %166 = tpu.matmul %163, %165, %cst_186 {dimension_numbers = #tpu.dot_dimension_numbers<[1], [0], [0], [1], [0, 0, 1, 1], [], []>, precision = #tpu.contract_precision<fp32>} : vector<12x48xf32>, vector<48x96xf32>, vector<12x96xf32> -> vector<12x96xf32>
    %167 = arith.addf %162, %166 : vector<12x96xf32>
    %c0_187 = arith.constant 0 : index
    %c0_188 = arith.constant 0 : index
    %168 = vector.load %arg14[%c0_187, %c0_188] : memref<14x48xf32, #tpu.memory_space<vmem>>, vector<12x48xf32>
    %c5_189 = arith.constant 5 : index
    %c0_190 = arith.constant 0 : index
    %c0_191 = arith.constant 0 : index
    %169 = vector.load %arg4[%c5_189, %c0_190, %c0_191] : memref<6x48x96xf32, #tpu.memory_space<vmem>>, vector<1x48x96xf32>
    %170 = vector.shape_cast %169 : vector<1x48x96xf32> to vector<48x96xf32>
    %cst_192 = arith.constant dense<0.000000e+00> : vector<12x96xf32>
    %171 = tpu.matmul %168, %170, %cst_192 {dimension_numbers = #tpu.dot_dimension_numbers<[1], [0], [0], [1], [0, 0, 1, 1], [], []>, precision = #tpu.contract_precision<fp32>} : vector<12x48xf32>, vector<48x96xf32>, vector<12x96xf32> -> vector<12x96xf32>
    %172 = arith.addf %167, %171 : vector<12x96xf32>
    %c1_193 = arith.constant 1 : index
    %c0_194 = arith.constant 0 : index
    %c0_195 = arith.constant 0 : index
    %173 = vector.load %arg7[%c1_193, %c0_194, %c0_195] : memref<2x24x12xf32, #tpu.memory_space<vmem>>, vector<1x24x12xf32>
    %174 = vector.shape_cast %173 : vector<1x24x12xf32> to vector<24x12xf32>
    %cst_196 = arith.constant dense<0.000000e+00> : vector<24x96xf32>
    %175 = tpu.matmul %174, %172, %cst_196 {dimension_numbers = #tpu.dot_dimension_numbers<[1], [0], [0], [1], [0, 0, 1, 1], [], []>, precision = #tpu.contract_precision<fp32>} : vector<24x12xf32>, vector<12x96xf32>, vector<24x96xf32> -> vector<24x96xf32>
    %176 = arith.addf %158, %175 : vector<24x96xf32>
    %c0_197 = arith.constant 0 : index
    %c0_198 = arith.constant 0 : index
    %177 = vector.load %arg10[%c0_197, %c0_198] : memref<1x96xf32, #tpu.memory_space<vmem>>, vector<1x96xf32>
    %178 = vector.broadcast %177 : vector<1x96xf32> to vector<24x96xf32>
    %179 = arith.addf %176, %178 : vector<24x96xf32>
    %cst_199 = arith.constant 0.000000e+00 : f32
    %180 = vector.broadcast %cst_199 : f32 to vector<24x96xf32>
    %181 = arith.subf %180, %179 : vector<24x96xf32>
    %182 = math.exp %181 : vector<24x96xf32>
    %cst_200 = arith.constant 1.000000e+00 : f32
    %183 = vector.broadcast %cst_200 : f32 to vector<24x96xf32>
    %184 = arith.addf %183, %182 : vector<24x96xf32>
    %cst_201 = arith.constant 1.000000e+00 : f32
    %185 = vector.broadcast %cst_201 : f32 to vector<24x96xf32>
    %186 = arith.divf %185, %184 : vector<24x96xf32>
    %c0_202 = arith.constant 0 : index
    %c0_203 = arith.constant 0 : index
    %c0_204 = arith.constant 0 : index
    %187 = vector.load %arg11[%c0_202, %c0_203, %c0_204] : memref<1x24x96xf32, #tpu.memory_space<vmem>>, vector<1x24x96xf32>
    %188 = vector.shape_cast %187 : vector<1x24x96xf32> to vector<24x96xf32>
    %189 = vector.shape_cast %186 : vector<24x96xf32> to vector<1x24x96xf32>
    tpu.vector_store %arg11[%c0_202, %c0_203, %c0_204], %189 {strides = array<i32>} : memref<1x24x96xf32, #tpu.memory_space<vmem>>, vector<1x24x96xf32>,
    return
  }
  func.func @transform_0(%arg0: i32) -> (i32, i32, i32) {
    %c0_i32 = arith.constant 0 : i32
    %c0_i32_0 = arith.constant 0 : i32
    %c0_i32_1 = arith.constant 0 : i32
    return %arg0, %c0_i32, %c0_i32_0 : i32, i32, i32
  }
  func.func @transform_1(%arg0: i32) -> (i32, i32, i32) {
    %c0_i32 = arith.constant 0 : i32
    %c0_i32_0 = arith.constant 0 : i32
    %c0_i32_1 = arith.constant 0 : i32
    %c0_i32_2 = arith.constant 0 : i32
    return %c0_i32, %c0_i32_0, %c0_i32_1 : i32, i32, i32
  }
  func.func @transform_2(%arg0: i32) -> (i32, i32, i32) {
    %c0_i32 = arith.constant 0 : i32
    %c0_i32_0 = arith.constant 0 : i32
    %c0_i32_1 = arith.constant 0 : i32
    %c0_i32_2 = arith.constant 0 : i32
    return %c0_i32, %c0_i32_0, %c0_i32_1 : i32, i32, i32
  }
  func.func @transform_3(%arg0: i32) -> (i32, i32, i32) {
    %c0_i32 = arith.constant 0 : i32
    %c0_i32_0 = arith.constant 0 : i32
    %c0_i32_1 = arith.constant 0 : i32
    %c0_i32_2 = arith.constant 0 : i32
    return %c0_i32, %c0_i32_0, %c0_i32_1 : i32, i32, i32
  }
  func.func @transform_4(%arg0: i32) -> (i32, i32) {
    %c0_i32 = arith.constant 0 : i32
    %c0_i32_0 = arith.constant 0 : i32
    %c0_i32_1 = arith.constant 0 : i32
    return %c0_i32, %c0_i32_0 : i32, i32
  }
  func.func @transform_5(%arg0: i32) -> (i32, i32) {
    %c0_i32 = arith.constant 0 : i32
    %c0_i32_0 = arith.constant 0 : i32
    %c0_i32_1 = arith.constant 0 : i32
    return %c0_i32, %c0_i32_0 : i32, i32
  }
  func.func @transform_6(%arg0: i32) -> (i32, i32, i32) {
    %c0_i32 = arith.constant 0 : i32
    %c0_i32_0 = arith.constant 0 : i32
    %c0_i32_1 = arith.constant 0 : i32
    %c0_i32_2 = arith.constant 0 : i32
    return %c0_i32, %c0_i32_0, %c0_i32_1 : i32, i32, i32
  }
  func.func @transform_7(%arg0: i32) -> (i32, i32) {
    %c0_i32 = arith.constant 0 : i32
    %c0_i32_0 = arith.constant 0 : i32
    %c0_i32_1 = arith.constant 0 : i32
    return %c0_i32, %c0_i32_0 : i32, i32
  }
  func.func @transform_8(%arg0: i32) -> (i32, i32) {
    %c0_i32 = arith.constant 0 : i32
    %c0_i32_0 = arith.constant 0 : i32
    %c0_i32_1 = arith.constant 0 : i32
    return %c0_i32, %c0_i32_0 : i32, i32
  }
  func.func @transform_9(%arg0: i32) -> (i32, i32) {
    %c0_i32 = arith.constant 0 : i32
    %c0_i32_0 = arith.constant 0 : i32
    %c0_i32_1 = arith.constant 0 : i32
    return %c0_i32, %c0_i32_0 : i32, i32
  }
  func.func @transform_10(%arg0: i32) -> (i32, i32, i32) {
    %c0_i32 = arith.constant 0 : i32
    %c0_i32_0 = arith.constant 0 : i32
    %c0_i32_1 = arith.constant 0 : i32
    return %arg0, %c0_i32, %c0_i32_0 : i32, i32, i32
  }
}

</mosaic_0001>

<bundles_post_ra>
// kernel: decoder_forward.2
= control target key start
LH: loop header
LB: loop body
LE: loop exit
PB: predicated region body
PF: predicated region fallthrough
CT: control target
= control target key end

     0   :  { %v5885_v36 = vmov 1983009808   ;;  %v20_v38 = vlaneseq  ;;  %vm4434_vm0 = vcmask 1041408   ;;  %vm4435_vm1 = vcmask 519170   ;;  %s7815_s1 = inlined_call_operand.vmem [shape: bf16[512,2240], index: 1, kind: input, shape index: {}]   ;;  %s7816_s0 = inlined_call_operand.vmem [shape: f32[2,512], index: 0, kind: input, shape index: {}]   ;;  %s7817_s2 = inlined_call_operand.vmem [shape: f32[1,2240], index: 2, kind: input, shape index: {}]   ;;  %s7818_s3 = inlined_call_operand.vmem [shape: f32[2,2240], index: 3, kind: output, shape index: {}]  }
   0x1   :  { %v5019_v0 = vld [vmem:[%s7815_s1 + $0x3f4] ss:$72 sps:$4 sm:$0xff]   ;;  %v5023_v2 = vld [vmem:[%s7815_s1 + $0x3f0] ss:$72 sps:$4 sm:$0xff]   ;;  %v5025_v4 = vld [vmem:[%s7815_s1 + $0x364] ss:$72 sps:$4 sm:$0xff]   ;;  %v18_v37 = vunpack.c.l.s4 %v5885_v36 }
   0x2   :  { %v5021_v1 = vld [vmem:[%s7815_s1 + $0xcf4] ss:$72 sps:$4 sm:$0xff]   ;;  %3593 = vmatprep.subr.bf16.mxu0 %v5019_v0  ;;  %v5024_v3 = vld [vmem:[%s7815_s1 + $0xcf0] ss:$72 sps:$4 sm:$0xff]   ;;  %v5027_v5 = vld [vmem:[%s7815_s1 + $0xc64] ss:$72 sps:$4 sm:$0xff]  }
   0x3   :  { %3634 = vmatprep.subr.bf16.mxu1 %v5021_v1  ;;  %3594 = vmatpush1.bf16.msra.mxu0 %v5023_v2  ;;  %v5029_v6 = vld [vmem:[%s7815_s1 + $0x360] ss:$72 sps:$4 sm:$0xff]   ;;  %v5031_v8 = vld [vmem:[%s7815_s1 + $0x2d4] ss:$72 sps:$4 sm:$0xff]   ;;  %v5035_v10 = vld [vmem:[%s7815_s1 + $0x2d0] ss:$72 sps:$4 sm:$0xff]   ;;  %v19_v42 = vunpack.c.0.s8 %v18_v37 }
   0x4   :  { %3635 = vmatpush1.bf16.msra.mxu1 %v5024_v3  ;;  %3595 = vmatprep.subr.bf16.mxu0 %v5025_v4  ;;  %v5030_v7 = vld [vmem:[%s7815_s1 + $0xc60] ss:$72 sps:$4 sm:$0xff]   ;;  %v5033_v9 = vld [vmem:[%s7815_s1 + $0xbd4] ss:$72 sps:$4 sm:$0xff]   ;;  %v5036_v11 = vld [vmem:[%s7815_s1 + $0xbd0] ss:$72 sps:$4 sm:$0xff]  }
   0x5   :  { %3636 = vmatprep.subr.bf16.mxu1 %v5027_v5  ;;  %v5037_v12 = vld [vmem:[%s7815_s1 + $0x244] ss:$72 sps:$4 sm:$0xff]   ;;  %v5041_v14 = vld [vmem:[%s7815_s1 + $0x240] ss:$72 sps:$4 sm:$0xff]   ;;  %v5043_v16 = vld [vmem:[%s7815_s1 + $0x1b4] ss:$72 sps:$4 sm:$0xff]  }
   0x6   :  { %v5039_v13 = vld [vmem:[%s7815_s1 + $0xb44] ss:$72 sps:$4 sm:$0xff]   ;;  %v5042_v15 = vld [vmem:[%s7815_s1 + $0xb40] ss:$72 sps:$4 sm:$0xff]   ;;  %v5045_v17 = vld [vmem:[%s7815_s1 + $0xab4] ss:$72 sps:$4 sm:$0xff]  }
   0x7   :  { %3596 = vmatpush1.bf16.msra.mxu0 %v5029_v6  ;;  %v5047_v18 = vld [vmem:[%s7815_s1 + $0x1b0] ss:$72 sps:$4 sm:$0xff]   ;;  %v5049_v20 = vld [vmem:[%s7815_s1 + $0x124] ss:$72 sps:$4 sm:$0xff]   ;;  %v5053_v22 = vld [vmem:[%s7815_s1 + $0x120] ss:$72 sps:$4 sm:$0xff]  }
   0x8   :  { %3637 = vmatpush1.bf16.msra.mxu1 %v5030_v7  ;;  %3597 = vmatprep.subr.bf16.mxu0 %v5031_v8  ;;  %v5048_v19 = vld [vmem:[%s7815_s1 + $0xab0] ss:$72 sps:$4 sm:$0xff]   ;;  %v5051_v21 = vld [vmem:[%s7815_s1 + $0xa24] ss:$72 sps:$4 sm:$0xff]   ;;  %v5054_v23 = vld [vmem:[%s7815_s1 + $0xa20] ss:$72 sps:$4 sm:$0xff]  }
   0x9   :  { %3638 = vmatprep.subr.bf16.mxu1 %v5033_v9  ;;  %v5055_v24 = vld [vmem:[%s7815_s1 + $0x94] ss:$72 sps:$4 sm:$0xff]   ;;  %v5059_v26 = vld [vmem:[%s7815_s1 + $0x90] ss:$72 sps:$4 sm:$0xff]   ;;  %v5061_v28 = vld [vmem:[%s7815_s1 + $0x4] ss:$72 sps:$4 sm:$0xff]  }
   0xa   :  { %v5057_v25 = vld [vmem:[%s7815_s1 + $0x994] ss:$72 sps:$4 sm:$0xff]   ;;  %v5060_v27 = vld [vmem:[%s7815_s1 + $0x990] ss:$72 sps:$4 sm:$0xff]   ;;  %v5063_v29 = vld [vmem:[%s7815_s1 + $0x904] ss:$72 sps:$4 sm:$0xff]  }
   0xb   :  { %3598 = vmatpush1.bf16.msra.mxu0 %v5035_v10  ;;  %v5065_v30 = vld [vmem:[%s7815_s1] ss:$72 sps:$4 sm:$0xff]   ;;  %v5067_v32 = vld [vmem:[%s7815_s1 + $0x874] ss:$72 sps:$4 sm:$0xff]   ;;  %v5071_v34 = vld [vmem:[%s7815_s1 + $0x870] ss:$72 sps:$4 sm:$0xff]  }
   0xc   :  { %3639 = vmatpush1.bf16.msra.mxu1 %v5036_v11  ;;  %3599 = vmatprep.subr.bf16.mxu0 %v5037_v12  ;;  %v5066_v31 = vld [vmem:[%s7815_s1 + $0x900] ss:$72 sps:$4 sm:$0xff]   ;;  %v5069_v33 = vld [vmem:[%s7815_s1 + $0x1174] ss:$72 sps:$4 sm:$0xff]   ;;  %v5072_v35 = vld [vmem:[%s7815_s1 + $0x1170] ss:$72 sps:$4 sm:$0xff]  }
   0xd   :  { %3640 = vmatprep.subr.bf16.mxu1 %v5039_v13  ;;  %v5073_v39 = vld [vmem:[%s7815_s1 + $0x7e4] ss:$72 sps:$4 sm:$0xff]   ;;  %v5077_v41 = vld [vmem:[%s7815_s1 + $0x7e0] ss:$72 sps:$4 sm:$0xff]   ;;  %v6023_v43 = vshrl.u32 %v20_v38, 7  ;;  %vm4436_vm2 = vmor %vm4435_vm1, %vm4434_vm0 }
   0xe   :  { %v5075_v40 = vld [vmem:[%s7815_s1 + $0x10e4] ss:$72 sps:$4 sm:$0xff]   ;;  %v5078_v44 = vld [vmem:[%s7815_s1 + $0x10e0] ss:$72 sps:$4 sm:$0xff]   ;;  %v5079_v45 = vld [vmem:[%s7815_s1 + $0x754] ss:$72 sps:$4 sm:$0xff]  }
   0xf   :  { %3600 = vmatpush1.bf16.msra.mxu0 %v5041_v14  ;;  %v5081_v46 = vld [vmem:[%s7815_s1 + $0x1054] ss:$72 sps:$4 sm:$0xff]   ;;  %v5083_v47 = vld [vmem:[%s7815_s1 + $0x750] ss:$72 sps:$4 sm:$0xff]   ;;  %v6041_v49 = vsub.s32 %v19_v42, %v6023_v43  ;;  %v5085_v50 = vld [vmem:[%s7815_s1 + $0x6c4] ss:$72 sps:$4 sm:$0xff]  }
  0x10   :  { %3641 = vmatpush1.bf16.msra.mxu1 %v5042_v15  ;;  %3601 = vmatprep.subr.bf16.mxu0 %v5043_v16  ;;  %v5084_v48 = vld [vmem:[%s7815_s1 + $0x1050] ss:$72 sps:$4 sm:$0xff]   ;;  %v5087_v51 = vld [vmem:[%s7815_s1 + $0xfc4] ss:$72 sps:$4 sm:$0xff]   ;;  %v5089_v53 = vld [vmem:[%s7815_s1 + $0x6c0] ss:$72 sps:$4 sm:$0xff]  }
  0x11   :  { %3642 = vmatprep.subr.bf16.mxu1 %v5045_v17  ;;  %v14_v52 = vld [vmem:[%s7816_s0] sm:$0xff]  ;;  %v5091_v57 = vld [vmem:[%s7815_s1 + $0x634] ss:$72 sps:$4 sm:$0xff]   ;;  %v5095_v61 = vld [vmem:[%s7815_s1 + $0x630] ss:$72 sps:$4 sm:$0xff]  }
  0x12   :  { %v23_v54 = vrot.slane %v14_v52, %v6041_v49  ;;  %v16_v55 = vcombine.high %v14_v52, %v14_v52  ;;  %v5090_v56 = vld [vmem:[%s7815_s1 + $0xfc0] ss:$72 sps:$4 sm:$0xff]   ;;  %v5093_v58 = vld [vmem:[%s7815_s1 + $0xf34] ss:$72 sps:$4 sm:$0xff]   ;;  %v5096_v0 = vld [vmem:[%s7815_s1 + $0xf30] ss:$72 sps:$4 sm:$0xff]  }
  0x13   :  { %3602 = vmatpush1.bf16.msra.mxu0 %v5047_v18  ;;  %v5097_v1 = vld [vmem:[%s7815_s1 + $0x5a4] ss:$72 sps:$4 sm:$0xff]   ;;  %v5101_v4 = vld [vmem:[%s7815_s1 + $0x5a0] ss:$72 sps:$4 sm:$0xff]   ;;  %v5103_v6 = vld [vmem:[%s7815_s1 + $0x514] ss:$72 sps:$4 sm:$0xff]  }
  0x14   :  { %3643 = vmatpush1.bf16.msra.mxu1 %v5048_v19  ;;  %3603 = vmatprep.subr.bf16.mxu0 %v5049_v20  ;;  %v31_v59 = vcombine.high %v23_v54, %v23_v54  ;;  %v30_v60 = vrot.slane %v16_v55, %v6041_v49  ;;  %v5099_v2 = vld [vmem:[%s7815_s1 + $0xea4] ss:$72 sps:$4 sm:$0xff]   ;;  %v5102_v5 = vld [vmem:[%s7815_s1 + $0xea0] ss:$72 sps:$4 sm:$0xff]   ;;  %v5105_v7 = vld [vmem:[%s7815_s1 + $0xe14] ss:$72 sps:$4 sm:$0xff]   ;;  %v6120_v16 = vpack.c.bf16 %v23_v54, %v23_v54 }
  0x15   :  { %3644 = vmatprep.subr.bf16.mxu1 %v5051_v21  ;;  %v5107_v8 = vld [vmem:[%s7815_s1 + $0x510] ss:$72 sps:$4 sm:$0xff]   ;;  %v5109_v10 = vld [vmem:[%s7815_s1 + $0x484] ss:$72 sps:$4 sm:$0xff]   ;;  %v5113_v12 = vld [vmem:[%s7815_s1 + $0x480] ss:$72 sps:$4 sm:$0xff]  }
  0x16   :  { %v6069_v62 = vpack.c.bf16 %v31_v59, %v31_v59  ;;  %v32_v63 = vcombine.high %v30_v60, %v30_v60  ;;  %v5108_v9 = vld [vmem:[%s7815_s1 + $0xe10] ss:$72 sps:$4 sm:$0xff]   ;;  %v5111_v11 = vld [vmem:[%s7815_s1 + $0xd84] ss:$72 sps:$4 sm:$0xff]   ;;  %v5114_v13 = vld [vmem:[%s7815_s1 + $0xd80] ss:$72 sps:$4 sm:$0xff]   ;;  %v6122_v17 = vpack.c.bf16 %v30_v60, %v30_v60 }
  0x17   :  { %3604 = vmatpush1.bf16.msra.mxu0 %v5053_v22  ;;  %v5118_v14 = vld [vmem:[%s7815_s1 + $0x3fc] ss:$72 sps:$4 sm:$0xff]   ;;  %v5116_v18 = vld [vmem:[%s7815_s1 + $0x3f8] ss:$72 sps:$4 sm:$0xff]   ;;  %v5124_v20 = vld [vmem:[%s7815_s1 + $0x36c] ss:$72 sps:$4 sm:$0xff]  }
  0x18   :  { %3645 = vmatpush1.bf16.msra.mxu1 %v5054_v23  ;;  %3605 = vmatprep.subr.bf16.mxu0 %v5055_v24  ;;  %v6080_v3 = vpack.c.bf16 %v32_v63, %v32_v63  ;;  %v5121_v15 = vld [vmem:[%s7815_s1 + $0xcfc] ss:$72 sps:$4 sm:$0xff]   ;;  %v5119_v19 = vld [vmem:[%s7815_s1 + $0xcf8] ss:$72 sps:$4 sm:$0xff]   ;;  %v5127_v21 = vld [vmem:[%s7815_s1 + $0xc6c] ss:$72 sps:$4 sm:$0xff]  }
  0x19   :  { %3646 = vmatprep.subr.bf16.mxu1 %v5057_v25  ;;  %3625 = vmatprep.mubr.bf16.mxu0 %v6069_v62  ;;  %v5122_v22 = vld [vmem:[%s7815_s1 + $0x368] ss:$72 sps:$4 sm:$0xff]   ;;  %v5130_v24 = vld [vmem:[%s7815_s1 + $0x2dc] ss:$72 sps:$4 sm:$0xff]   ;;  %v5148_v36 = vld [vmem:[%s7815_s1 + $0x12c] ss:$72 sps:$4 sm:$0xff]  }
  0x1a   :  { %3666 = vmatprep.mubr.bf16.mxu1 %v6080_v3  ;;  %v5125_v23 = vld [vmem:[%s7815_s1 + $0xc68] ss:$72 sps:$4 sm:$0xff]   ;;  %v5133_v25 = vld [vmem:[%s7815_s1 + $0xbdc] ss:$72 sps:$4 sm:$0xff]   ;;  %v5151_v37 = vld [vmem:[%s7815_s1 + $0xa2c] ss:$72 sps:$4 sm:$0xff]  }
  0x1b   :  { %3606 = vmatpush1.bf16.msra.mxu0 %v5059_v26  ;;  %v5128_v26 = vld [vmem:[%s7815_s1 + $0x2d8] ss:$72 sps:$4 sm:$0xff]   ;;  %v5146_v38 = vld [vmem:[%s7815_s1 + $0x128] ss:$72 sps:$4 sm:$0xff]   ;;  %v5172_v54 = vld [vmem:[%s7815_s1 + $0x7ec] ss:$72 sps:$4 sm:$0xff]  }
  0x1c   :  { %3647 = vmatpush1.bf16.msra.mxu1 %v5060_v27  ;;  %3607 = vmatprep.subr.bf16.mxu0 %v5061_v28  ;;  %v5131_v27 = vld [vmem:[%s7815_s1 + $0xbd8] ss:$72 sps:$4 sm:$0xff]   ;;  %v5136_v28 = vld [vmem:[%s7815_s1 + $0x24c] ss:$72 sps:$4 sm:$0xff]   ;;  %v5181_v59 = vld [vmem:[%s7815_s1 + $0x105c] ss:$72 sps:$4 sm:$0xff]  }
  0x1d   :  { %3648 = vmatprep.subr.bf16.mxu1 %v5063_v29  ;;  %v5139_v29 = vld [vmem:[%s7815_s1 + $0xb4c] ss:$72 sps:$4 sm:$0xff]   ;;  %v5152_v42 = vld [vmem:[%s7815_s1 + $0x98] ss:$72 sps:$4 sm:$0xff]  }
  0x1e   :  { %v5164_v52 = vld [vmem:[%s7815_s1 + $0x878] ss:$72 sps:$4 sm:$0xff]   ;;  %v5175_v55 = vld [vmem:[%s7815_s1 + $0x10ec] ss:$72 sps:$4 sm:$0xff]  }
  0x1f   :  { %3608 = vmatpush1.bf16.msra.mxu0 %v5065_v30  ;;  %v5134_v30 = vld [vmem:[%s7815_s1 + $0x248] ss:$72 sps:$4 sm:$0xff]   ;;  %v5176_v60 = vld [vmem:[%s7815_s1 + $0x758] ss:$72 sps:$4 sm:$0xff]   ;;  %v5184_v63 = vld [vmem:[%s7815_s1 + $0x6cc] ss:$72 sps:$4 sm:$0xff]  }
  0x20   :  { %3649 = vmatpush1.bf16.msra.mxu1 %v5066_v31  ;;  %3609 = vmatprep.subr.bf16.mxu0 %v5067_v32  ;;  %v5137_v31 = vld [vmem:[%s7815_s1 + $0xb48] ss:$72 sps:$4 sm:$0xff]   ;;  %v5142_v32 = vld [vmem:[%s7815_s1 + $0x1bc] ss:$72 sps:$4 sm:$0xff]  }
  0x21   :  { %3650 = vmatprep.subr.bf16.mxu1 %v5069_v33  ;;  %v5145_v33 = vld [vmem:[%s7815_s1 + $0xabc] ss:$72 sps:$4 sm:$0xff]  }
  0x23   :  { %3610 = vmatpush2.bf16.msra.mxu0 %v5071_v34  ;;  %v5140_v34 = vld [vmem:[%s7815_s1 + $0x1b8] ss:$72 sps:$4 sm:$0xff]  }
  0x24   :  { %3651 = vmatpush2.bf16.msra.mxu1 %v5072_v35  ;;  %3611 = vmatprep.subr.bf16.mxu0 %v5073_v39  ;;  %v5143_v35 = vld [vmem:[%s7815_s1 + $0xab8] ss:$72 sps:$4 sm:$0xff]   ;;  %v5149_v39 = vld [vmem:[%s7815_s1 + $0xa28] ss:$72 sps:$4 sm:$0xff]  }
  0x25   :  { %3652 = vmatprep.subr.bf16.mxu1 %v5075_v40  ;;  %v5154_v40 = vld [vmem:[%s7815_s1 + $0x9c] ss:$72 sps:$4 sm:$0xff]  }
  0x27   :  { %3612 = vmatpush2.bf16.msra.mxu0 %v5077_v41  ;;  %v5157_v41 = vld [vmem:[%s7815_s1 + $0x99c] ss:$72 sps:$4 sm:$0xff]  }
  0x28   :  { %3653 = vmatpush2.bf16.msra.mxu1 %v5078_v44  ;;  %3613 = vmatprep.subr.bf16.mxu0 %v5079_v45  ;;  %v5155_v44 = vld [vmem:[%s7815_s1 + $0x998] ss:$72 sps:$4 sm:$0xff]   ;;  %v5160_v45 = vld [vmem:[%s7815_s1 + $0xc] ss:$72 sps:$4 sm:$0xff]  }
  0x29   :  { %3654 = vmatprep.subr.bf16.mxu1 %v5081_v46  ;;  %v5163_v46 = vld [vmem:[%s7815_s1 + $0x90c] ss:$72 sps:$4 sm:$0xff]  }
  0x2b   :  { %3614 = vmatpush2.bf16.msra.mxu0 %v5083_v47  ;;  %v5158_v47 = vld [vmem:[%s7815_s1 + $0x8] ss:$72 sps:$4 sm:$0xff]  }
  0x2c   :  { %3655 = vmatpush2.bf16.msra.mxu1 %v5084_v48  ;;  %3615 = vmatprep.subr.bf16.mxu0 %v5085_v50  ;;  %v5161_v48 = vld [vmem:[%s7815_s1 + $0x908] ss:$72 sps:$4 sm:$0xff]   ;;  %v5166_v50 = vld [vmem:[%s7815_s1 + $0x87c] ss:$72 sps:$4 sm:$0xff]  }
  0x2d   :  { %3656 = vmatprep.subr.bf16.mxu1 %v5087_v51  ;;  %v5169_v51 = vld [vmem:[%s7815_s1 + $0x117c] ss:$72 sps:$4 sm:$0xff]  }
  0x2f   :  { %3616 = vmatpush2.bf16.msra.mxu0 %v5089_v53  ;;  %v5167_v53 = vld [vmem:[%s7815_s1 + $0x1178] ss:$72 sps:$4 sm:$0xff]  }
  0x30   :  { %3657 = vmatpush2.bf16.msra.mxu1 %v5090_v56  ;;  %3617 = vmatprep.subr.bf16.mxu0 %v5091_v57  ;;  %v5170_v56 = vld [vmem:[%s7815_s1 + $0x7e8] ss:$72 sps:$4 sm:$0xff]  }
  0x31   :  { %3658 = vmatprep.subr.bf16.mxu1 %v5093_v58  ;;  %v5173_v57 = vld [vmem:[%s7815_s1 + $0x10e8] ss:$72 sps:$4 sm:$0xff]   ;;  %v5178_v58 = vld [vmem:[%s7815_s1 + $0x75c] ss:$72 sps:$4 sm:$0xff]  }
  0x33   :  { %3618 = vmatpush2.bf16.msra.mxu0 %v5095_v61  ;;  %v5179_v61 = vld [vmem:[%s7815_s1 + $0x1058] ss:$72 sps:$4 sm:$0xff]  }
  0x34   :  { %3659 = vmatpush2.bf16.msra.mxu1 %v5096_v0  ;;  %3619 = vmatprep.subr.bf16.mxu0 %v5097_v1  ;;  %v5187_v0 = vld [vmem:[%s7815_s1 + $0xfcc] ss:$72 sps:$4 sm:$0xff]   ;;  %v5182_v1 = vld [vmem:[%s7815_s1 + $0x6c8] ss:$72 sps:$4 sm:$0xff]  }
  0x35   :  { %3660 = vmatprep.subr.bf16.mxu1 %v5099_v2  ;;  %v5185_v2 = vld [vmem:[%s7815_s1 + $0xfc8] ss:$72 sps:$4 sm:$0xff]  }
  0x37   :  { %3620 = vmatpush2.bf16.msra.mxu0 %v5101_v4  ;;  %v5190_v4 = vld [vmem:[%s7815_s1 + $0x63c] ss:$72 sps:$4 sm:$0xff]  }
  0x38   :  { %3661 = vmatpush2.bf16.msra.mxu1 %v5102_v5  ;;  %3621 = vmatprep.subr.bf16.mxu0 %v5103_v6  ;;  %v5193_v5 = vld [vmem:[%s7815_s1 + $0xf3c] ss:$72 sps:$4 sm:$0xff]   ;;  %v5188_v6 = vld [vmem:[%s7815_s1 + $0x638] ss:$72 sps:$4 sm:$0xff]  }
  0x39   :  { %3662 = vmatprep.subr.bf16.mxu1 %v5105_v7  ;;  %v5191_v7 = vld [vmem:[%s7815_s1 + $0xf38] ss:$72 sps:$4 sm:$0xff]  }
  0x3b   :  { %3622 = vmatpush2.bf16.msra.mxu0 %v5107_v8  ;;  %v5196_v8 = vld [vmem:[%s7815_s1 + $0x5ac] ss:$72 sps:$4 sm:$0xff]  }
  0x3c   :  { %3663 = vmatpush2.bf16.msra.mxu1 %v5108_v9  ;;  %3623 = vmatprep.subr.bf16.mxu0 %v5109_v10  ;;  %v5199_v9 = vld [vmem:[%s7815_s1 + $0xeac] ss:$72 sps:$4 sm:$0xff]   ;;  %v5194_v10 = vld [vmem:[%s7815_s1 + $0x5a8] ss:$72 sps:$4 sm:$0xff]  }
  0x3d   :  { %3664 = vmatprep.subr.bf16.mxu1 %v5111_v11  ;;  %v5197_v11 = vld [vmem:[%s7815_s1 + $0xea8] ss:$72 sps:$4 sm:$0xff]  }
  0x3f   :  { %3624 = vmatpush2.bf16.msra.mxu0 %v5113_v12  ;;  %v5202_v12 = vld [vmem:[%s7815_s1 + $0x51c] ss:$72 sps:$4 sm:$0xff]  }
  0x40   :  { %3665 = vmatpush2.bf16.msra.mxu1 %v5114_v13  ;;  %3675 = vmatprep.subr.bf16.mxu0 %v5118_v14  ;;  %v5205_v13 = vld [vmem:[%s7815_s1 + $0xe1c] ss:$72 sps:$4 sm:$0xff]   ;;  %v5200_v14 = vld [vmem:[%s7815_s1 + $0x518] ss:$72 sps:$4 sm:$0xff]  }
  0x41   :  { %3716 = vmatprep.subr.bf16.mxu1 %v5121_v15  ;;  %v5203_v15 = vld [vmem:[%s7815_s1 + $0xe18] ss:$72 sps:$4 sm:$0xff]  }
  0x42   :  { %3626 = vmatmul.mubr.bf16.vlgmr.msra.gmra.mxu0 %v6120_v16 }
  0x43   :  { %3667 = vmatmul.mubr.bf16.vlgmr.msra.gmra.mxu1 %v6122_v17  ;;  %3676 = vmatpush1.bf16.msra.mxu0 %v5116_v18  ;;  %v5208_v18 = vld [vmem:[%s7815_s1 + $0x48c] ss:$72 sps:$4 sm:$0xff]  }
  0x44   :  { %3717 = vmatpush1.bf16.msra.mxu1 %v5119_v19  ;;  %3677 = vmatprep.subr.bf16.mxu0 %v5124_v20  ;;  %v5211_v19 = vld [vmem:[%s7815_s1 + $0xd8c] ss:$72 sps:$4 sm:$0xff]   ;;  %v5206_v20 = vld [vmem:[%s7815_s1 + $0x488] ss:$72 sps:$4 sm:$0xff]  }
  0x45   :  { %3718 = vmatprep.subr.bf16.mxu1 %v5127_v21  ;;  %3707 = vmatprep.mubr.bf16.mxu0 %v6069_v62  ;;  %v5209_v21 = vld [vmem:[%s7815_s1 + $0xd88] ss:$72 sps:$4 sm:$0xff]  }
  0x46   :  { %3748 = vmatprep.mubr.bf16.mxu1 %v6080_v3 }
  0x47   :  { %3678 = vmatpush1.bf16.msra.mxu0 %v5122_v22  ;;  %v5214_v22 = vld [vmem:[%s7815_s1 + $0x404] ss:$72 sps:$4 sm:$0xff]  }
  0x48   :  { %3719 = vmatpush1.bf16.msra.mxu1 %v5125_v23  ;;  %3679 = vmatprep.subr.bf16.mxu0 %v5130_v24  ;;  %v5217_v23 = vld [vmem:[%s7815_s1 + $0xd04] ss:$72 sps:$4 sm:$0xff]   ;;  %v5212_v24 = vld [vmem:[%s7815_s1 + $0x400] ss:$72 sps:$4 sm:$0xff]  }
  0x49   :  { %3720 = vmatprep.subr.bf16.mxu1 %v5133_v25  ;;  %v5215_v25 = vld [vmem:[%s7815_s1 + $0xd00] ss:$72 sps:$4 sm:$0xff]  }
  0x4b   :  { %3680 = vmatpush1.bf16.msra.mxu0 %v5128_v26  ;;  %v5220_v26 = vld [vmem:[%s7815_s1 + $0x374] ss:$72 sps:$4 sm:$0xff]  }
  0x4c   :  { %3721 = vmatpush1.bf16.msra.mxu1 %v5131_v27  ;;  %3681 = vmatprep.subr.bf16.mxu0 %v5136_v28  ;;  %v5223_v27 = vld [vmem:[%s7815_s1 + $0xc74] ss:$72 sps:$4 sm:$0xff]   ;;  %v5218_v28 = vld [vmem:[%s7815_s1 + $0x370] ss:$72 sps:$4 sm:$0xff]  }
  0x4d   :  { %3722 = vmatprep.subr.bf16.mxu1 %v5139_v29  ;;  %v5221_v29 = vld [vmem:[%s7815_s1 + $0xc70] ss:$72 sps:$4 sm:$0xff]  }
  0x4f   :  { %3682 = vmatpush1.bf16.msra.mxu0 %v5134_v30  ;;  %v5226_v30 = vld [vmem:[%s7815_s1 + $0x2e4] ss:$72 sps:$4 sm:$0xff]  }
  0x50   :  { %3723 = vmatpush1.bf16.msra.mxu1 %v5137_v31  ;;  %3683 = vmatprep.subr.bf16.mxu0 %v5142_v32  ;;  %v5229_v31 = vld [vmem:[%s7815_s1 + $0xbe4] ss:$72 sps:$4 sm:$0xff]   ;;  %v5224_v32 = vld [vmem:[%s7815_s1 + $0x2e0] ss:$72 sps:$4 sm:$0xff]  }
  0x51   :  { %3724 = vmatprep.subr.bf16.mxu1 %v5145_v33  ;;  %v5227_v33 = vld [vmem:[%s7815_s1 + $0xbe0] ss:$72 sps:$4 sm:$0xff]  }
  0x53   :  { %3684 = vmatpush1.bf16.msra.mxu0 %v5140_v34  ;;  %v5232_v34 = vld [vmem:[%s7815_s1 + $0x254] ss:$72 sps:$4 sm:$0xff]  }
  0x54   :  { %3725 = vmatpush1.bf16.msra.mxu1 %v5143_v35  ;;  %3685 = vmatprep.subr.bf16.mxu0 %v5148_v36  ;;  %v5235_v35 = vld [vmem:[%s7815_s1 + $0xb54] ss:$72 sps:$4 sm:$0xff]   ;;  %v5230_v36 = vld [vmem:[%s7815_s1 + $0x250] ss:$72 sps:$4 sm:$0xff]  }
  0x55   :  { %3726 = vmatprep.subr.bf16.mxu1 %v5151_v37  ;;  %v5233_v37 = vld [vmem:[%s7815_s1 + $0xb50] ss:$72 sps:$4 sm:$0xff]  }
  0x57   :  { %3686 = vmatpush1.bf16.msra.mxu0 %v5146_v38  ;;  %v5238_v38 = vld [vmem:[%s7815_s1 + $0x1c4] ss:$72 sps:$4 sm:$0xff]  }
  0x58   :  { %3727 = vmatpush1.bf16.msra.mxu1 %v5149_v39  ;;  %3687 = vmatprep.subr.bf16.mxu0 %v5154_v40  ;;  %v5241_v39 = vld [vmem:[%s7815_s1 + $0xac4] ss:$72 sps:$4 sm:$0xff]   ;;  %v5236_v40 = vld [vmem:[%s7815_s1 + $0x1c0] ss:$72 sps:$4 sm:$0xff]  }
  0x59   :  { %3728 = vmatprep.subr.bf16.mxu1 %v5157_v41  ;;  %v5239_v41 = vld [vmem:[%s7815_s1 + $0xac0] ss:$72 sps:$4 sm:$0xff]  }
  0x5b   :  { %3688 = vmatpush1.bf16.msra.mxu0 %v5152_v42  ;;  %v5244_v42 = vld [vmem:[%s7815_s1 + $0x134] ss:$72 sps:$4 sm:$0xff]  }
  0x5c   :  { %3729 = vmatpush1.bf16.msra.mxu1 %v5155_v44  ;;  %3689 = vmatprep.subr.bf16.mxu0 %v5160_v45  ;;  %v5247_v44 = vld [vmem:[%s7815_s1 + $0xa34] ss:$72 sps:$4 sm:$0xff]   ;;  %v5242_v45 = vld [vmem:[%s7815_s1 + $0x130] ss:$72 sps:$4 sm:$0xff]  }
  0x5d   :  { %3730 = vmatprep.subr.bf16.mxu1 %v5163_v46  ;;  %v5245_v46 = vld [vmem:[%s7815_s1 + $0xa30] ss:$72 sps:$4 sm:$0xff]  }
  0x5f   :  { %3690 = vmatpush1.bf16.msra.mxu0 %v5158_v47  ;;  %v5250_v47 = vld [vmem:[%s7815_s1 + $0xa4] ss:$72 sps:$4 sm:$0xff]  }
  0x60   :  { %3731 = vmatpush1.bf16.msra.mxu1 %v5161_v48  ;;  %3691 = vmatprep.subr.bf16.mxu0 %v5166_v50  ;;  %v5253_v48 = vld [vmem:[%s7815_s1 + $0x9a4] ss:$72 sps:$4 sm:$0xff]   ;;  %v5248_v50 = vld [vmem:[%s7815_s1 + $0xa0] ss:$72 sps:$4 sm:$0xff]  }
  0x61   :  { %3732 = vmatprep.subr.bf16.mxu1 %v5169_v51  ;;  %v5251_v51 = vld [vmem:[%s7815_s1 + $0x9a0] ss:$72 sps:$4 sm:$0xff]  }
  0x63   :  { %3692 = vmatpush2.bf16.msra.mxu0 %v5164_v52  ;;  %v5256_v52 = vld [vmem:[%s7815_s1 + $0x14] ss:$72 sps:$4 sm:$0xff]  }
  0x64   :  { %3733 = vmatpush2.bf16.msra.mxu1 %v5167_v53  ;;  %3693 = vmatprep.subr.bf16.mxu0 %v5172_v54  ;;  %v5259_v53 = vld [vmem:[%s7815_s1 + $0x914] ss:$72 sps:$4 sm:$0xff]   ;;  %v5254_v54 = vld [vmem:[%s7815_s1 + $0x10] ss:$72 sps:$4 sm:$0xff]  }
  0x65   :  { %3734 = vmatprep.subr.bf16.mxu1 %v5175_v55  ;;  %v5257_v55 = vld [vmem:[%s7815_s1 + $0x910] ss:$72 sps:$4 sm:$0xff]  }
  0x67   :  { %3694 = vmatpush2.bf16.msra.mxu0 %v5170_v56  ;;  %v5262_v56 = vld [vmem:[%s7815_s1 + $0x884] ss:$72 sps:$4 sm:$0xff]  }
  0x68   :  { %3735 = vmatpush2.bf16.msra.mxu1 %v5173_v57  ;;  %3695 = vmatprep.subr.bf16.mxu0 %v5178_v58  ;;  %v5265_v57 = vld [vmem:[%s7815_s1 + $0x1184] ss:$72 sps:$4 sm:$0xff]   ;;  %v5260_v58 = vld [vmem:[%s7815_s1 + $0x880] ss:$72 sps:$4 sm:$0xff]  }
  0x69   :  { %3736 = vmatprep.subr.bf16.mxu1 %v5181_v59  ;;  %v5263_v59 = vld [vmem:[%s7815_s1 + $0x1180] ss:$72 sps:$4 sm:$0xff]  }
  0x6b   :  { %3696 = vmatpush2.bf16.msra.mxu0 %v5176_v60  ;;  %v5268_v60 = vld [vmem:[%s7815_s1 + $0x7f4] ss:$72 sps:$4 sm:$0xff]  }
  0x6c   :  { %3737 = vmatpush2.bf16.msra.mxu1 %v5179_v61  ;;  %3697 = vmatprep.subr.bf16.mxu0 %v5184_v63  ;;  %v5271_v61 = vld [vmem:[%s7815_s1 + $0x10f4] ss:$72 sps:$4 sm:$0xff]   ;;  %v5266_v63 = vld [vmem:[%s7815_s1 + $0x7f0] ss:$72 sps:$4 sm:$0xff]  }
  0x6d   :  { %3738 = vmatprep.subr.bf16.mxu1 %v5187_v0  ;;  %v5269_v0 = vld [vmem:[%s7815_s1 + $0x10f0] ss:$72 sps:$4 sm:$0xff]  }
  0x6f   :  { %3698 = vmatpush2.bf16.msra.mxu0 %v5182_v1  ;;  %v5274_v1 = vld [vmem:[%s7815_s1 + $0x764] ss:$72 sps:$4 sm:$0xff]  }
  0x70   :  { %3739 = vmatpush2.bf16.msra.mxu1 %v5185_v2  ;;  %3699 = vmatprep.subr.bf16.mxu0 %v5190_v4  ;;  %v5277_v2 = vld [vmem:[%s7815_s1 + $0x1064] ss:$72 sps:$4 sm:$0xff]   ;;  %v5272_v4 = vld [vmem:[%s7815_s1 + $0x760] ss:$72 sps:$4 sm:$0xff]  }
  0x71   :  { %3740 = vmatprep.subr.bf16.mxu1 %v5193_v5  ;;  %v5275_v5 = vld [vmem:[%s7815_s1 + $0x1060] ss:$72 sps:$4 sm:$0xff]  }
  0x73   :  { %3700 = vmatpush2.bf16.msra.mxu0 %v5188_v6  ;;  %v5280_v6 = vld [vmem:[%s7815_s1 + $0x6d4] ss:$72 sps:$4 sm:$0xff]  }
  0x74   :  { %3741 = vmatpush2.bf16.msra.mxu1 %v5191_v7  ;;  %3701 = vmatprep.subr.bf16.mxu0 %v5196_v8  ;;  %v5283_v7 = vld [vmem:[%s7815_s1 + $0xfd4] ss:$72 sps:$4 sm:$0xff]   ;;  %v5278_v8 = vld [vmem:[%s7815_s1 + $0x6d0] ss:$72 sps:$4 sm:$0xff]  }
  0x75   :  { %3742 = vmatprep.subr.bf16.mxu1 %v5199_v9  ;;  %v5281_v9 = vld [vmem:[%s7815_s1 + $0xfd0] ss:$72 sps:$4 sm:$0xff]  }
  0x77   :  { %3702 = vmatpush2.bf16.msra.mxu0 %v5194_v10  ;;  %v5286_v10 = vld [vmem:[%s7815_s1 + $0x644] ss:$72 sps:$4 sm:$0xff]  }
  0x78   :  { %3743 = vmatpush2.bf16.msra.mxu1 %v5197_v11  ;;  %3703 = vmatprep.subr.bf16.mxu0 %v5202_v12  ;;  %v5289_v11 = vld [vmem:[%s7815_s1 + $0xf44] ss:$72 sps:$4 sm:$0xff]   ;;  %v5284_v12 = vld [vmem:[%s7815_s1 + $0x640] ss:$72 sps:$4 sm:$0xff]  }
  0x79   :  { %3744 = vmatprep.subr.bf16.mxu1 %v5205_v13  ;;  %v5287_v13 = vld [vmem:[%s7815_s1 + $0xf40] ss:$72 sps:$4 sm:$0xff]  }
  0x7b   :  { %3704 = vmatpush2.bf16.msra.mxu0 %v5200_v14  ;;  %v5292_v14 = vld [vmem:[%s7815_s1 + $0x5b4] ss:$72 sps:$4 sm:$0xff]  }
  0x7c   :  { %3745 = vmatpush2.bf16.msra.mxu1 %v5203_v15  ;;  %3705 = vmatprep.subr.bf16.mxu0 %v5208_v18  ;;  %v5295_v15 = vld [vmem:[%s7815_s1 + $0xeb4] ss:$72 sps:$4 sm:$0xff]   ;;  %v5290_v18 = vld [vmem:[%s7815_s1 + $0x5b0] ss:$72 sps:$4 sm:$0xff]  }
  0x7d   :  { %3746 = vmatprep.subr.bf16.mxu1 %v5211_v19  ;;  %v5293_v19 = vld [vmem:[%s7815_s1 + $0xeb0] ss:$72 sps:$4 sm:$0xff]  }
  0x7f   :  { %3706 = vmatpush2.bf16.msra.mxu0 %v5206_v20  ;;  %v5298_v20 = vld [vmem:[%s7815_s1 + $0x524] ss:$72 sps:$4 sm:$0xff]  }
  0x80   :  { %3747 = vmatpush2.bf16.msra.mxu1 %v5209_v21  ;;  %3757 = vmatprep.subr.bf16.mxu0 %v5214_v22  ;;  %v5301_v21 = vld [vmem:[%s7815_s1 + $0xe24] ss:$72 sps:$4 sm:$0xff]   ;;  %v5296_v22 = vld [vmem:[%s7815_s1 + $0x520] ss:$72 sps:$4 sm:$0xff]  }
  0x81   :  { %3798 = vmatprep.subr.bf16.mxu1 %v5217_v23  ;;  %v5299_v23 = vld [vmem:[%s7815_s1 + $0xe20] ss:$72 sps:$4 sm:$0xff]  }
  0x82   :  { %3708 = vmatmul.mubr.bf16.vlgmr.msra.gmra.mxu0 %v6120_v16 }
  0x83   :  { %3749 = vmatmul.mubr.bf16.vlgmr.msra.gmra.mxu1 %v6122_v17  ;;  %3758 = vmatpush1.bf16.msra.mxu0 %v5212_v24  ;;  %v5304_v24 = vld [vmem:[%s7815_s1 + $0x494] ss:$72 sps:$4 sm:$0xff]  }
  0x84   :  { %3799 = vmatpush1.bf16.msra.mxu1 %v5215_v25  ;;  %3759 = vmatprep.subr.bf16.mxu0 %v5220_v26  ;;  %v5307_v25 = vld [vmem:[%s7815_s1 + $0xd94] ss:$72 sps:$4 sm:$0xff]   ;;  %v5302_v26 = vld [vmem:[%s7815_s1 + $0x490] ss:$72 sps:$4 sm:$0xff]  }
  0x85   :  { %3800 = vmatprep.subr.bf16.mxu1 %v5223_v27  ;;  %3789 = vmatprep.mubr.bf16.mxu0 %v6069_v62  ;;  %v5305_v27 = vld [vmem:[%s7815_s1 + $0xd90] ss:$72 sps:$4 sm:$0xff]  }
  0x86   :  { %3830 = vmatprep.mubr.bf16.mxu1 %v6080_v3 }
  0x87   :  { %3760 = vmatpush1.bf16.msra.mxu0 %v5218_v28  ;;  %v5310_v28 = vld [vmem:[%s7815_s1 + $0x40c] ss:$72 sps:$4 sm:$0xff]  }
  0x88   :  { %3801 = vmatpush1.bf16.msra.mxu1 %v5221_v29  ;;  %3761 = vmatprep.subr.bf16.mxu0 %v5226_v30  ;;  %v5313_v29 = vld [vmem:[%s7815_s1 + $0xd0c] ss:$72 sps:$4 sm:$0xff]   ;;  %v5308_v30 = vld [vmem:[%s7815_s1 + $0x408] ss:$72 sps:$4 sm:$0xff]  }
  0x89   :  { %3802 = vmatprep.subr.bf16.mxu1 %v5229_v31  ;;  %v5311_v31 = vld [vmem:[%s7815_s1 + $0xd08] ss:$72 sps:$4 sm:$0xff]  }
  0x8b   :  { %3762 = vmatpush1.bf16.msra.mxu0 %v5224_v32  ;;  %v5316_v32 = vld [vmem:[%s7815_s1 + $0x37c] ss:$72 sps:$4 sm:$0xff]  }
  0x8c   :  { %3803 = vmatpush1.bf16.msra.mxu1 %v5227_v33  ;;  %3763 = vmatprep.subr.bf16.mxu0 %v5232_v34  ;;  %v5319_v33 = vld [vmem:[%s7815_s1 + $0xc7c] ss:$72 sps:$4 sm:$0xff]   ;;  %v5314_v34 = vld [vmem:[%s7815_s1 + $0x378] ss:$72 sps:$4 sm:$0xff]  }
  0x8d   :  { %3804 = vmatprep.subr.bf16.mxu1 %v5235_v35  ;;  %v5317_v35 = vld [vmem:[%s7815_s1 + $0xc78] ss:$72 sps:$4 sm:$0xff]  }
  0x8f   :  { %3764 = vmatpush1.bf16.msra.mxu0 %v5230_v36  ;;  %v5322_v36 = vld [vmem:[%s7815_s1 + $0x2ec] ss:$72 sps:$4 sm:$0xff]  }
  0x90   :  { %3805 = vmatpush1.bf16.msra.mxu1 %v5233_v37  ;;  %3765 = vmatprep.subr.bf16.mxu0 %v5238_v38  ;;  %v5325_v37 = vld [vmem:[%s7815_s1 + $0xbec] ss:$72 sps:$4 sm:$0xff]   ;;  %v5320_v38 = vld [vmem:[%s7815_s1 + $0x2e8] ss:$72 sps:$4 sm:$0xff]  }
  0x91   :  { %3806 = vmatprep.subr.bf16.mxu1 %v5241_v39  ;;  %v5323_v39 = vld [vmem:[%s7815_s1 + $0xbe8] ss:$72 sps:$4 sm:$0xff]  }
  0x93   :  { %3766 = vmatpush1.bf16.msra.mxu0 %v5236_v40  ;;  %v5328_v40 = vld [vmem:[%s7815_s1 + $0x25c] ss:$72 sps:$4 sm:$0xff]  }
  0x94   :  { %3807 = vmatpush1.bf16.msra.mxu1 %v5239_v41  ;;  %3767 = vmatprep.subr.bf16.mxu0 %v5244_v42  ;;  %v5331_v41 = vld [vmem:[%s7815_s1 + $0xb5c] ss:$72 sps:$4 sm:$0xff]   ;;  %v5326_v42 = vld [vmem:[%s7815_s1 + $0x258] ss:$72 sps:$4 sm:$0xff]  }
  0x95   :  { %3808 = vmatprep.subr.bf16.mxu1 %v5247_v44  ;;  %v5329_v44 = vld [vmem:[%s7815_s1 + $0xb58] ss:$72 sps:$4 sm:$0xff]  }
  0x97   :  { %3768 = vmatpush1.bf16.msra.mxu0 %v5242_v45  ;;  %v5334_v45 = vld [vmem:[%s7815_s1 + $0x1cc] ss:$72 sps:$4 sm:$0xff]  }
  0x98   :  { %3809 = vmatpush1.bf16.msra.mxu1 %v5245_v46  ;;  %3769 = vmatprep.subr.bf16.mxu0 %v5250_v47  ;;  %v5337_v46 = vld [vmem:[%s7815_s1 + $0xacc] ss:$72 sps:$4 sm:$0xff]   ;;  %v5332_v47 = vld [vmem:[%s7815_s1 + $0x1c8] ss:$72 sps:$4 sm:$0xff]  }
  0x99   :  { %3810 = vmatprep.subr.bf16.mxu1 %v5253_v48  ;;  %v5335_v48 = vld [vmem:[%s7815_s1 + $0xac8] ss:$72 sps:$4 sm:$0xff]  }
  0x9b   :  { %3770 = vmatpush1.bf16.msra.mxu0 %v5248_v50  ;;  %v5340_v50 = vld [vmem:[%s7815_s1 + $0x13c] ss:$72 sps:$4 sm:$0xff]  }
  0x9c   :  { %3811 = vmatpush1.bf16.msra.mxu1 %v5251_v51  ;;  %3771 = vmatprep.subr.bf16.mxu0 %v5256_v52  ;;  %v5343_v51 = vld [vmem:[%s7815_s1 + $0xa3c] ss:$72 sps:$4 sm:$0xff]   ;;  %v5338_v52 = vld [vmem:[%s7815_s1 + $0x138] ss:$72 sps:$4 sm:$0xff]  }
  0x9d   :  { %3812 = vmatprep.subr.bf16.mxu1 %v5259_v53  ;;  %v5341_v53 = vld [vmem:[%s7815_s1 + $0xa38] ss:$72 sps:$4 sm:$0xff]  }
  0x9f   :  { %3772 = vmatpush1.bf16.msra.mxu0 %v5254_v54  ;;  %v5346_v54 = vld [vmem:[%s7815_s1 + $0xac] ss:$72 sps:$4 sm:$0xff]  }
  0xa0   :  { %3813 = vmatpush1.bf16.msra.mxu1 %v5257_v55  ;;  %3773 = vmatprep.subr.bf16.mxu0 %v5262_v56  ;;  %v5349_v55 = vld [vmem:[%s7815_s1 + $0x9ac] ss:$72 sps:$4 sm:$0xff]   ;;  %v5344_v56 = vld [vmem:[%s7815_s1 + $0xa8] ss:$72 sps:$4 sm:$0xff]  }
  0xa1   :  { %3814 = vmatprep.subr.bf16.mxu1 %v5265_v57  ;;  %v5347_v57 = vld [vmem:[%s7815_s1 + $0x9a8] ss:$72 sps:$4 sm:$0xff]  }
  0xa3   :  { %3774 = vmatpush2.bf16.msra.mxu0 %v5260_v58  ;;  %v5352_v58 = vld [vmem:[%s7815_s1 + $0x1c] ss:$72 sps:$4 sm:$0xff]  }
  0xa4   :  { %3815 = vmatpush2.bf16.msra.mxu1 %v5263_v59  ;;  %3775 = vmatprep.subr.bf16.mxu0 %v5268_v60  ;;  %v5355_v59 = vld [vmem:[%s7815_s1 + $0x91c] ss:$72 sps:$4 sm:$0xff]   ;;  %v5350_v60 = vld [vmem:[%s7815_s1 + $0x18] ss:$72 sps:$4 sm:$0xff]  }
  0xa5   :  { %3816 = vmatprep.subr.bf16.mxu1 %v5271_v61  ;;  %v5353_v61 = vld [vmem:[%s7815_s1 + $0x918] ss:$72 sps:$4 sm:$0xff]  }
  0xa7   :  { %3776 = vmatpush2.bf16.msra.mxu0 %v5266_v63  ;;  %v5358_v63 = vld [vmem:[%s7815_s1 + $0x88c] ss:$72 sps:$4 sm:$0xff]  }
  0xa8   :  { %3817 = vmatpush2.bf16.msra.mxu1 %v5269_v0  ;;  %3777 = vmatprep.subr.bf16.mxu0 %v5274_v1  ;;  %v5361_v0 = vld [vmem:[%s7815_s1 + $0x118c] ss:$72 sps:$4 sm:$0xff]   ;;  %v5356_v1 = vld [vmem:[%s7815_s1 + $0x888] ss:$72 sps:$4 sm:$0xff]  }
  0xa9   :  { %3818 = vmatprep.subr.bf16.mxu1 %v5277_v2  ;;  %v5359_v2 = vld [vmem:[%s7815_s1 + $0x1188] ss:$72 sps:$4 sm:$0xff]  }
  0xab   :  { %3778 = vmatpush2.bf16.msra.mxu0 %v5272_v4  ;;  %v5364_v4 = vld [vmem:[%s7815_s1 + $0x7fc] ss:$72 sps:$4 sm:$0xff]  }
  0xac   :  { %3819 = vmatpush2.bf16.msra.mxu1 %v5275_v5  ;;  %3779 = vmatprep.subr.bf16.mxu0 %v5280_v6  ;;  %v5367_v5 = vld [vmem:[%s7815_s1 + $0x10fc] ss:$72 sps:$4 sm:$0xff]   ;;  %v5362_v6 = vld [vmem:[%s7815_s1 + $0x7f8] ss:$72 sps:$4 sm:$0xff]  }
  0xad   :  { %3820 = vmatprep.subr.bf16.mxu1 %v5283_v7  ;;  %v5365_v7 = vld [vmem:[%s7815_s1 + $0x10f8] ss:$72 sps:$4 sm:$0xff]  }
  0xaf   :  { %3780 = vmatpush2.bf16.msra.mxu0 %v5278_v8  ;;  %v5370_v8 = vld [vmem:[%s7815_s1 + $0x76c] ss:$72 sps:$4 sm:$0xff]  }
  0xb0   :  { %3821 = vmatpush2.bf16.msra.mxu1 %v5281_v9  ;;  %3781 = vmatprep.subr.bf16.mxu0 %v5286_v10  ;;  %v5373_v9 = vld [vmem:[%s7815_s1 + $0x106c] ss:$72 sps:$4 sm:$0xff]   ;;  %v5368_v10 = vld [vmem:[%s7815_s1 + $0x768] ss:$72 sps:$4 sm:$0xff]  }
  0xb1   :  { %3822 = vmatprep.subr.bf16.mxu1 %v5289_v11  ;;  %v5371_v11 = vld [vmem:[%s7815_s1 + $0x1068] ss:$72 sps:$4 sm:$0xff]  }
  0xb3   :  { %3782 = vmatpush2.bf16.msra.mxu0 %v5284_v12  ;;  %v5376_v12 = vld [vmem:[%s7815_s1 + $0x6dc] ss:$72 sps:$4 sm:$0xff]  }
  0xb4   :  { %3823 = vmatpush2.bf16.msra.mxu1 %v5287_v13  ;;  %3783 = vmatprep.subr.bf16.mxu0 %v5292_v14  ;;  %v5379_v13 = vld [vmem:[%s7815_s1 + $0xfdc] ss:$72 sps:$4 sm:$0xff]   ;;  %v5374_v14 = vld [vmem:[%s7815_s1 + $0x6d8] ss:$72 sps:$4 sm:$0xff]  }
  0xb5   :  { %3824 = vmatprep.subr.bf16.mxu1 %v5295_v15  ;;  %v5377_v15 = vld [vmem:[%s7815_s1 + $0xfd8] ss:$72 sps:$4 sm:$0xff]  }
  0xb7   :  { %3784 = vmatpush2.bf16.msra.mxu0 %v5290_v18  ;;  %v5382_v18 = vld [vmem:[%s7815_s1 + $0x64c] ss:$72 sps:$4 sm:$0xff]  }
  0xb8   :  { %3825 = vmatpush2.bf16.msra.mxu1 %v5293_v19  ;;  %3785 = vmatprep.subr.bf16.mxu0 %v5298_v20  ;;  %v5385_v19 = vld [vmem:[%s7815_s1 + $0xf4c] ss:$72 sps:$4 sm:$0xff]   ;;  %v5380_v20 = vld [vmem:[%s7815_s1 + $0x648] ss:$72 sps:$4 sm:$0xff]  }
  0xb9   :  { %3826 = vmatprep.subr.bf16.mxu1 %v5301_v21  ;;  %v5383_v21 = vld [vmem:[%s7815_s1 + $0xf48] ss:$72 sps:$4 sm:$0xff]  }
  0xbb   :  { %3786 = vmatpush2.bf16.msra.mxu0 %v5296_v22  ;;  %v5388_v22 = vld [vmem:[%s7815_s1 + $0x5bc] ss:$72 sps:$4 sm:$0xff]  }
  0xbc   :  { %3827 = vmatpush2.bf16.msra.mxu1 %v5299_v23  ;;  %3787 = vmatprep.subr.bf16.mxu0 %v5304_v24  ;;  %v5391_v23 = vld [vmem:[%s7815_s1 + $0xebc] ss:$72 sps:$4 sm:$0xff]   ;;  %v5386_v24 = vld [vmem:[%s7815_s1 + $0x5b8] ss:$72 sps:$4 sm:$0xff]  }
  0xbd   :  { %3828 = vmatprep.subr.bf16.mxu1 %v5307_v25  ;;  %v5389_v25 = vld [vmem:[%s7815_s1 + $0xeb8] ss:$72 sps:$4 sm:$0xff]  }
  0xbf   :  { %3788 = vmatpush2.bf16.msra.mxu0 %v5302_v26  ;;  %v5394_v26 = vld [vmem:[%s7815_s1 + $0x52c] ss:$72 sps:$4 sm:$0xff]  }
  0xc0   :  { %3829 = vmatpush2.bf16.msra.mxu1 %v5305_v27  ;;  %3839 = vmatprep.subr.bf16.mxu0 %v5310_v28  ;;  %v5397_v27 = vld [vmem:[%s7815_s1 + $0xe2c] ss:$72 sps:$4 sm:$0xff]   ;;  %v5392_v28 = vld [vmem:[%s7815_s1 + $0x528] ss:$72 sps:$4 sm:$0xff]  }
  0xc1   :  { %3880 = vmatprep.subr.bf16.mxu1 %v5313_v29  ;;  %v5395_v29 = vld [vmem:[%s7815_s1 + $0xe28] ss:$72 sps:$4 sm:$0xff]  }
  0xc2   :  { %3790 = vmatmul.mubr.bf16.vlgmr.msra.gmra.mxu0 %v6120_v16 }
  0xc3   :  { %3831 = vmatmul.mubr.bf16.vlgmr.msra.gmra.mxu1 %v6122_v17  ;;  %3840 = vmatpush1.bf16.msra.mxu0 %v5308_v30  ;;  %v5400_v30 = vld [vmem:[%s7815_s1 + $0x49c] ss:$72 sps:$4 sm:$0xff]  }
  0xc4   :  { %3881 = vmatpush1.bf16.msra.mxu1 %v5311_v31  ;;  %3841 = vmatprep.subr.bf16.mxu0 %v5316_v32  ;;  %v5403_v31 = vld [vmem:[%s7815_s1 + $0xd9c] ss:$72 sps:$4 sm:$0xff]   ;;  %v5398_v32 = vld [vmem:[%s7815_s1 + $0x498] ss:$72 sps:$4 sm:$0xff]  }
  0xc5   :  { %3882 = vmatprep.subr.bf16.mxu1 %v5319_v33  ;;  %3871 = vmatprep.mubr.bf16.mxu0 %v6069_v62  ;;  %v5401_v33 = vld [vmem:[%s7815_s1 + $0xd98] ss:$72 sps:$4 sm:$0xff]  }
  0xc6   :  { %3912 = vmatprep.mubr.bf16.mxu1 %v6080_v3 }
  0xc7   :  { %3842 = vmatpush1.bf16.msra.mxu0 %v5314_v34  ;;  %v6709_v34 = vld [vmem:[%s7817_s2] sm:$0xff] }
  0xc8   :  { %3883 = vmatpush1.bf16.msra.mxu1 %v5317_v35  ;;  %3843 = vmatprep.subr.bf16.mxu0 %v5322_v36  ;;  %v6712_v35 = vsub.s32 0, %v6023_v43  ;;  %v5406_v36 = vld [vmem:[%s7815_s1 + $0x414] ss:$72 sps:$4 sm:$0xff]  }
  0xc9   :  { %3884 = vmatprep.subr.bf16.mxu1 %v5325_v37  ;;  %v5409_v37 = vld [vmem:[%s7815_s1 + $0xd14] ss:$72 sps:$4 sm:$0xff]  }
  0xcb   :  { %3844 = vmatpush1.bf16.msra.mxu0 %v5320_v38  ;;  %v6721_v38 = vsub.s32 1, %v6023_v43 }
  0xcc   :  { %3885 = vmatpush1.bf16.msra.mxu1 %v5323_v39  ;;  %3845 = vmatprep.subr.bf16.mxu0 %v5328_v40  ;;  %v5404_v39 = vld [vmem:[%s7815_s1 + $0x410] ss:$72 sps:$4 sm:$0xff]   ;;  %v626_v40 = vrot.slane %v6709_v34, %v6712_v35 }
  0xcd   :  { %3886 = vmatprep.subr.bf16.mxu1 %v5331_v41  ;;  %v5407_v41 = vld [vmem:[%s7815_s1 + $0xd10] ss:$72 sps:$4 sm:$0xff]  }
  0xcf   :  { %3846 = vmatpush1.bf16.msra.mxu0 %v5326_v42  ;;  %v5412_v42 = vld [vmem:[%s7815_s1 + $0x384] ss:$72 sps:$4 sm:$0xff]  }
  0xd0   :  { %3887 = vmatpush1.bf16.msra.mxu1 %v5329_v44  ;;  %3847 = vmatprep.subr.bf16.mxu0 %v5334_v45  ;;  %v5415_v44 = vld [vmem:[%s7815_s1 + $0xc84] ss:$72 sps:$4 sm:$0xff]   ;;  %v630_v45 = vrot.slane %v6709_v34, %v6721_v38 }
  0xd1   :  { %3888 = vmatprep.subr.bf16.mxu1 %v5337_v46  ;;  %v5410_v46 = vld [vmem:[%s7815_s1 + $0x380] ss:$72 sps:$4 sm:$0xff]  }
  0xd3   :  { %3848 = vmatpush1.bf16.msra.mxu0 %v5332_v47 }
  0xd4   :  { %3889 = vmatpush1.bf16.msra.mxu1 %v5335_v48  ;;  %3849 = vmatprep.subr.bf16.mxu0 %v5340_v50  ;;  %v5413_v50 = vld [vmem:[%s7815_s1 + $0xc80] ss:$72 sps:$4 sm:$0xff]  }
  0xd5   :  { %3890 = vmatprep.subr.bf16.mxu1 %v5343_v51 }
  0xd7   :  { %3850 = vmatpush1.bf16.msra.mxu0 %v5338_v52 }
  0xd8   :  { %3891 = vmatpush1.bf16.msra.mxu1 %v5341_v53  ;;  %3851 = vmatprep.subr.bf16.mxu0 %v5346_v54  ;;  %v5418_v54 = vld [vmem:[%s7815_s1 + $0x2f4] ss:$72 sps:$4 sm:$0xff]  }
  0xd9   :  { %3892 = vmatprep.subr.bf16.mxu1 %v5349_v55  ;;  %v5421_v55 = vld [vmem:[%s7815_s1 + $0xbf4] ss:$72 sps:$4 sm:$0xff]  }
  0xdb   :  { %3852 = vmatpush1.bf16.msra.mxu0 %v5344_v56 }
  0xdc   :  { %3893 = vmatpush1.bf16.msra.mxu1 %v5347_v57  ;;  %3853 = vmatprep.subr.bf16.mxu0 %v5352_v58  ;;  %v5416_v58 = vld [vmem:[%s7815_s1 + $0x2f0] ss:$72 sps:$4 sm:$0xff]  }
  0xdd   :  { %3894 = vmatprep.subr.bf16.mxu1 %v5355_v59  ;;  %v5419_v59 = vld [vmem:[%s7815_s1 + $0xbf0] ss:$72 sps:$4 sm:$0xff]  }
  0xdf   :  { %3854 = vmatpush1.bf16.msra.mxu0 %v5350_v60 }
  0xe0   :  { %3895 = vmatpush1.bf16.msra.mxu1 %v5353_v61  ;;  %3855 = vmatprep.subr.bf16.mxu0 %v5358_v63 }
  0xe1   :  { %3896 = vmatprep.subr.bf16.mxu1 %v5361_v0 }
  0xe3   :  { %3856 = vmatpush2.bf16.msra.mxu0 %v5356_v1 }
  0xe4   :  { %3897 = vmatpush2.bf16.msra.mxu1 %v5359_v2  ;;  %3857 = vmatprep.subr.bf16.mxu0 %v5364_v4  ;;  %v5424_v2 = vld [vmem:[%s7815_s1 + $0x264] ss:$72 sps:$4 sm:$0xff]  }
  0xe5   :  { %3898 = vmatprep.subr.bf16.mxu1 %v5367_v5  ;;  %v5427_v4 = vld [vmem:[%s7815_s1 + $0xb64] ss:$72 sps:$4 sm:$0xff]  }
  0xe7   :  { %3858 = vmatpush2.bf16.msra.mxu0 %v5362_v6  ;;  %v5422_v6 = vld [vmem:[%s7815_s1 + $0x260] ss:$72 sps:$4 sm:$0xff]  }
  0xe8   :  { %3899 = vmatpush2.bf16.msra.mxu1 %v5365_v7  ;;  %3859 = vmatprep.subr.bf16.mxu0 %v5370_v8  ;;  %v5425_v7 = vld [vmem:[%s7815_s1 + $0xb60] ss:$72 sps:$4 sm:$0xff]   ;;  %v5430_v8 = vld [vmem:[%s7815_s1 + $0x1d4] ss:$72 sps:$4 sm:$0xff]  }
  0xe9   :  { %3900 = vmatprep.subr.bf16.mxu1 %v5373_v9  ;;  %v5433_v9 = vld [vmem:[%s7815_s1 + $0xad4] ss:$72 sps:$4 sm:$0xff]  }
  0xeb   :  { %3860 = vmatpush2.bf16.msra.mxu0 %v5368_v10  ;;  %v5428_v10 = vld [vmem:[%s7815_s1 + $0x1d0] ss:$72 sps:$4 sm:$0xff]  }
  0xec   :  { %3901 = vmatpush2.bf16.msra.mxu1 %v5371_v11  ;;  %3861 = vmatprep.subr.bf16.mxu0 %v5376_v12  ;;  %v5431_v11 = vld [vmem:[%s7815_s1 + $0xad0] ss:$72 sps:$4 sm:$0xff]   ;;  %v5436_v12 = vld [vmem:[%s7815_s1 + $0x144] ss:$72 sps:$4 sm:$0xff]  }
  0xed   :  { %3902 = vmatprep.subr.bf16.mxu1 %v5379_v13  ;;  %v5439_v13 = vld [vmem:[%s7815_s1 + $0xa44] ss:$72 sps:$4 sm:$0xff]  }
  0xef   :  { %3862 = vmatpush2.bf16.msra.mxu0 %v5374_v14  ;;  %v5434_v14 = vld [vmem:[%s7815_s1 + $0x140] ss:$72 sps:$4 sm:$0xff]  }
  0xf0   :  { %3903 = vmatpush2.bf16.msra.mxu1 %v5377_v15  ;;  %3863 = vmatprep.subr.bf16.mxu0 %v5382_v18  ;;  %v5437_v15 = vld [vmem:[%s7815_s1 + $0xa40] ss:$72 sps:$4 sm:$0xff]   ;;  %v5442_v18 = vld [vmem:[%s7815_s1 + $0xb4] ss:$72 sps:$4 sm:$0xff]  }
  0xf1   :  { %3904 = vmatprep.subr.bf16.mxu1 %v5385_v19  ;;  %v5445_v19 = vld [vmem:[%s7815_s1 + $0x9b4] ss:$72 sps:$4 sm:$0xff]  }
  0xf3   :  { %3864 = vmatpush2.bf16.msra.mxu0 %v5380_v20  ;;  %v5440_v20 = vld [vmem:[%s7815_s1 + $0xb0] ss:$72 sps:$4 sm:$0xff]  }
  0xf4   :  { %3905 = vmatpush2.bf16.msra.mxu1 %v5383_v21  ;;  %3865 = vmatprep.subr.bf16.mxu0 %v5388_v22  ;;  %v5443_v21 = vld [vmem:[%s7815_s1 + $0x9b0] ss:$72 sps:$4 sm:$0xff]   ;;  %v5448_v22 = vld [vmem:[%s7815_s1 + $0x24] ss:$72 sps:$4 sm:$0xff]  }
  0xf5   :  { %3906 = vmatprep.subr.bf16.mxu1 %v5391_v23  ;;  %v5451_v23 = vld [vmem:[%s7815_s1 + $0x924] ss:$72 sps:$4 sm:$0xff]  }
  0xf7   :  { %3866 = vmatpush2.bf16.msra.mxu0 %v5386_v24  ;;  %v5446_v24 = vld [vmem:[%s7815_s1 + $0x20] ss:$72 sps:$4 sm:$0xff]  }
  0xf8   :  { %3907 = vmatpush2.bf16.msra.mxu1 %v5389_v25  ;;  %3867 = vmatprep.subr.bf16.mxu0 %v5394_v26  ;;  %v5449_v25 = vld [vmem:[%s7815_s1 + $0x920] ss:$72 sps:$4 sm:$0xff]   ;;  %v5454_v26 = vld [vmem:[%s7815_s1 + $0x894] ss:$72 sps:$4 sm:$0xff]  }
  0xf9   :  { %3908 = vmatprep.subr.bf16.mxu1 %v5397_v27  ;;  %v5457_v27 = vld [vmem:[%s7815_s1 + $0x1194] ss:$72 sps:$4 sm:$0xff]  }
  0xfb   :  { %3868 = vmatpush2.bf16.msra.mxu0 %v5392_v28  ;;  %v5452_v28 = vld [vmem:[%s7815_s1 + $0x890] ss:$72 sps:$4 sm:$0xff]  }
  0xfc   :  { %3909 = vmatpush2.bf16.msra.mxu1 %v5395_v29  ;;  %3869 = vmatprep.subr.bf16.mxu0 %v5400_v30  ;;  %v5455_v29 = vld [vmem:[%s7815_s1 + $0x1190] ss:$72 sps:$4 sm:$0xff]   ;;  %v5460_v30 = vld [vmem:[%s7815_s1 + $0x804] ss:$72 sps:$4 sm:$0xff]  }
  0xfd   :  { %3910 = vmatprep.subr.bf16.mxu1 %v5403_v31  ;;  %v5463_v31 = vld [vmem:[%s7815_s1 + $0x1104] ss:$72 sps:$4 sm:$0xff]  }
  0xff   :  { %3870 = vmatpush2.bf16.msra.mxu0 %v5398_v32  ;;  %v5458_v32 = vld [vmem:[%s7815_s1 + $0x800] ss:$72 sps:$4 sm:$0xff]  }
 0x100   :  { %3911 = vmatpush2.bf16.msra.mxu1 %v5401_v33  ;;  %3921 = vmatprep.subr.bf16.mxu0 %v5406_v36  ;;  %v5461_v33 = vld [vmem:[%s7815_s1 + $0x1100] ss:$72 sps:$4 sm:$0xff]   ;;  %v5466_v36 = vld [vmem:[%s7815_s1 + $0x774] ss:$72 sps:$4 sm:$0xff]  }
 0x101   :  { %3962 = vmatprep.subr.bf16.mxu1 %v5409_v37  ;;  %v5469_v37 = vld [vmem:[%s7815_s1 + $0x1074] ss:$72 sps:$4 sm:$0xff]  }
 0x102   :  { %v3627_v47 = vpop.f32.mrf.mxu0  ;;  %3872 = vmatmul.mubr.bf16.vlgmr.msra.gmra.mxu0 %v6120_v16 }
 0x103   :  { %v3668_v48 = vpop.f32.mrf.mxu1  ;;  %3913 = vmatmul.mubr.bf16.vlgmr.msra.gmra.mxu1 %v6122_v17  ;;  %v3628_v51 = vadd.f32 %v3627_v47, %v626_v40  ;;  %3922 = vmatpush1.bf16.msra.mxu0 %v5404_v39  ;;  %v5464_v39 = vld [vmem:[%s7815_s1 + $0x770] ss:$72 sps:$4 sm:$0xff]   ;;  %v5481_v47 = vld [vmem:[%s7815_s1 + $0xf54] ss:$72 sps:$4 sm:$0xff]  }
 0x104   :  { %3963 = vmatpush1.bf16.msra.mxu1 %v5407_v41  ;;  %v3629_v52 = vpop.f32.mrf.mxu0  ;;  %3923 = vmatprep.subr.bf16.mxu0 %v5412_v42  ;;  %v5467_v40 = vld [vmem:[%s7815_s1 + $0x1070] ss:$72 sps:$4 sm:$0xff]   ;;  %v5472_v41 = vld [vmem:[%s7815_s1 + $0x6e4] ss:$72 sps:$4 sm:$0xff]  }
 0x105   :  { %v3670_v53 = vpop.f32.mrf.mxu1  ;;  %3964 = vmatprep.subr.bf16.mxu1 %v5415_v44  ;;  %v6753_v56 = vadd.f32 %v3668_v48, %v3628_v51  ;;  %v3630_v57 = vadd.f32 %v3629_v52, %v630_v45  ;;  %3953 = vmatprep.mubr.bf16.mxu0 %v6069_v62  ;;  %v5475_v42 = vld [vmem:[%s7815_s1 + $0xfe4] ss:$72 sps:$4 sm:$0xff]   ;;  %v5470_v44 = vld [vmem:[%s7815_s1 + $0x6e0] ss:$72 sps:$4 sm:$0xff]   ;;  %v5476_v48 = vld [vmem:[%s7815_s1 + $0x650] ss:$72 sps:$4 sm:$0xff]  }
 0x106   :  { %3994 = vmatprep.mubr.bf16.mxu1 %v6080_v3  ;;  %v3631_v60 = vpop.f32.mrf.mxu0  ;;  %v5473_v45 = vld [vmem:[%s7815_s1 + $0xfe0] ss:$72 sps:$4 sm:$0xff]   ;;  %v5484_v51 = vld [vmem:[%s7815_s1 + $0x5c4] ss:$72 sps:$4 sm:$0xff]  }
 0x107   :  { %v3672_v61 = vpop.f32.mrf.mxu1  ;;  %v6763_v63 = vadd.f32 %v3670_v53, %v3630_v57  ;;  %3924 = vmatpush1.bf16.msra.mxu0 %v5410_v46  ;;  %v5478_v46 = vld [vmem:[%s7815_s1 + $0x654] ss:$72 sps:$4 sm:$0xff]   ;;  %v5487_v52 = vld [vmem:[%s7815_s1 + $0xec4] ss:$72 sps:$4 sm:$0xff]   ;;  %v5482_v53 = vld [vmem:[%s7815_s1 + $0x5c0] ss:$72 sps:$4 sm:$0xff]  }
 0x108   :  { %3965 = vmatpush1.bf16.msra.mxu1 %v5413_v50  ;;  %v3632_v0 = vpop.f32.mrf.mxu0  ;;  %3925 = vmatprep.subr.bf16.mxu0 %v5418_v54  ;;  %v5479_v50 = vld [vmem:[%s7815_s1 + $0xf50] ss:$72 sps:$4 sm:$0xff]   ;;  %v5485_v54 = vld [vmem:[%s7815_s1 + $0xec0] ss:$72 sps:$4 sm:$0xff]   ;;  %v5493_v57 = vld [vmem:[%s7815_s1 + $0xe34] ss:$72 sps:$4 sm:$0xff]  }
 0x109   :  { %v3673_v1 = vpop.f32.mrf.mxu1  ;;  %3966 = vmatprep.subr.bf16.mxu1 %v5421_v55  ;;  %v4349_v5 = vcombine.low %v6753_v56, %v6763_v63  ;;  %v5490_v55 = vld [vmem:[%s7815_s1 + $0x534] ss:$72 sps:$4 sm:$0xff]   ;;  %v5496_v60 = vld [vmem:[%s7815_s1 + $0x4a4] ss:$72 sps:$4 sm:$0xff]   ;;  %v5494_v0 = vld [vmem:[%s7815_s1 + $0x4a0] ss:$72 sps:$4 sm:$0xff]  }
 0x10a   :  { %v5499_v61 = vld [vmem:[%s7815_s1 + $0xda4] ss:$72 sps:$4 sm:$0xff]   ;;  %v5497_v1 = vld [vmem:[%s7815_s1 + $0xda0] ss:$72 sps:$4 sm:$0xff]  }
 0x10b   :  { %3926 = vmatpush1.bf16.msra.mxu0 %v5416_v58  ;;  %v5488_v58 = vld [vmem:[%s7815_s1 + $0x530] ss:$72 sps:$4 sm:$0xff]  }
 0x10c   :  { %3967 = vmatpush1.bf16.msra.mxu1 %v5419_v59  ;;  %3927 = vmatprep.subr.bf16.mxu0 %v5424_v2  ;;  %v5491_v59 = vld [vmem:[%s7815_s1 + $0xe30] ss:$72 sps:$4 sm:$0xff]   ;;  %v633_v2 = vsub.s32 2, %v6023_v43 }
 0x10d   :  { %3968 = vmatprep.subr.bf16.mxu1 %v5427_v4  ;;  %v5502_v4 = vld [vmem:[%s7815_s1 + $0x41c] ss:$72 sps:$4 sm:$0xff]   ;;  %v5524_v56 = vld [vmem:[%s7815_s1 + $0x1d8] ss:$72 sps:$4 sm:$0xff]  }
 0x10e   :  { %v5527_v63 = vld [vmem:[%s7815_s1 + $0xad8] ss:$72 sps:$4 sm:$0xff]  }
 0x10f   :  { %3928 = vmatpush1.bf16.msra.mxu0 %v5422_v6  ;;  %v5505_v6 = vld [vmem:[%s7815_s1 + $0xd1c] ss:$72 sps:$4 sm:$0xff]  }
 0x110   :  { %3969 = vmatpush1.bf16.msra.mxu1 %v5425_v7  ;;  %3929 = vmatprep.subr.bf16.mxu0 %v5430_v8  ;;  %v5500_v7 = vld [vmem:[%s7815_s1 + $0x418] ss:$72 sps:$4 sm:$0xff]  }
 0x111   :  { %3970 = vmatprep.subr.bf16.mxu1 %v5433_v9  ;;  %v5503_v8 = vld [vmem:[%s7815_s1 + $0xd18] ss:$72 sps:$4 sm:$0xff]   ;;  %v637_v9 = vsub.s32 3, %v6023_v43 }
 0x113   :  { %3930 = vmatpush1.bf16.msra.mxu0 %v5428_v10  ;;  %v634_v10 = vrot.slane %v6709_v34, %v633_v2 }
 0x114   :  { %3971 = vmatpush1.bf16.msra.mxu1 %v5431_v11  ;;  %3931 = vmatprep.subr.bf16.mxu0 %v5436_v12  ;;  %v5508_v11 = vld [vmem:[%s7815_s1 + $0x38c] ss:$72 sps:$4 sm:$0xff]  }
 0x115   :  { %3972 = vmatprep.subr.bf16.mxu1 %v5439_v13  ;;  %v5511_v12 = vld [vmem:[%s7815_s1 + $0xc8c] ss:$72 sps:$4 sm:$0xff]   ;;  %v638_v13 = vrot.slane %v6709_v34, %v637_v9 }
 0x117   :  { %3932 = vmatpush1.bf16.msra.mxu0 %v5434_v14  ;;  %v5506_v14 = vld [vmem:[%s7815_s1 + $0x388] ss:$72 sps:$4 sm:$0xff]  }
 0x118   :  { %3973 = vmatpush1.bf16.msra.mxu1 %v5437_v15  ;;  %3933 = vmatprep.subr.bf16.mxu0 %v5442_v18  ;;  %v5509_v15 = vld [vmem:[%s7815_s1 + $0xc88] ss:$72 sps:$4 sm:$0xff]  }
 0x119   :  { %3974 = vmatprep.subr.bf16.mxu1 %v5445_v19 }
 0x11b   :  { %3934 = vmatpush1.bf16.msra.mxu0 %v5440_v20 }
 0x11c   :  { %3975 = vmatpush1.bf16.msra.mxu1 %v5443_v21  ;;  %3935 = vmatprep.subr.bf16.mxu0 %v5448_v22 }
 0x11d   :  { %3976 = vmatprep.subr.bf16.mxu1 %v5451_v23  ;;  %v5514_v23 = vld [vmem:[%s7815_s1 + $0x2fc] ss:$72 sps:$4 sm:$0xff]  }
 0x11f   :  { %3936 = vmatpush1.bf16.msra.mxu0 %v5446_v24  ;;  %v5517_v24 = vld [vmem:[%s7815_s1 + $0xbfc] ss:$72 sps:$4 sm:$0xff]  }
 0x120   :  { %3977 = vmatpush1.bf16.msra.mxu1 %v5449_v25  ;;  %3937 = vmatprep.subr.bf16.mxu0 %v5454_v26 }
 0x121   :  { %3978 = vmatprep.subr.bf16.mxu1 %v5457_v27  ;;  %v5512_v27 = vld [vmem:[%s7815_s1 + $0x2f8] ss:$72 sps:$4 sm:$0xff]  }
 0x123   :  { %3938 = vmatpush2.bf16.msra.mxu0 %v5452_v28  ;;  %v5515_v28 = vld [vmem:[%s7815_s1 + $0xbf8] ss:$72 sps:$4 sm:$0xff]  }
 0x124   :  { %3979 = vmatpush2.bf16.msra.mxu1 %v5455_v29  ;;  %3939 = vmatprep.subr.bf16.mxu0 %v5460_v30 }
 0x125   :  { %3980 = vmatprep.subr.bf16.mxu1 %v5463_v31 }
 0x127   :  { %3940 = vmatpush2.bf16.msra.mxu0 %v5458_v32 }
 0x128   :  { %3981 = vmatpush2.bf16.msra.mxu1 %v5461_v33  ;;  %3941 = vmatprep.subr.bf16.mxu0 %v5466_v36  ;;  %v5520_v36 = vld [vmem:[%s7815_s1 + $0x26c] ss:$72 sps:$4 sm:$0xff]  }
 0x129   :  { %3982 = vmatprep.subr.bf16.mxu1 %v5469_v37  ;;  %v5523_v37 = vld [vmem:[%s7815_s1 + $0xb6c] ss:$72 sps:$4 sm:$0xff]  }
 0x12b   :  { %3942 = vmatpush2.bf16.msra.mxu0 %v5464_v39 }
 0x12c   :  { %3983 = vmatpush2.bf16.msra.mxu1 %v5467_v40  ;;  %3943 = vmatprep.subr.bf16.mxu0 %v5472_v41  ;;  %v5518_v40 = vld [vmem:[%s7815_s1 + $0x268] ss:$72 sps:$4 sm:$0xff]  }
 0x12d   :  { %3984 = vmatprep.subr.bf16.mxu1 %v5475_v42  ;;  %v5521_v41 = vld [vmem:[%s7815_s1 + $0xb68] ss:$72 sps:$4 sm:$0xff]   ;;  %v4357_v42 = vrot.slane %v4349_v5, %v6041_v49  ;;  %v5532_v5 = vld [vmem:[%s7815_s1 + $0x14c] ss:$72 sps:$4 sm:$0xff]  }
 0x12f   :  { %3944 = vmatpush2.bf16.msra.mxu0 %v5470_v44 }
 0x130   :  { %3985 = vmatpush2.bf16.msra.mxu1 %v5473_v45  ;;  %3945 = vmatprep.subr.bf16.mxu0 %v5478_v46  ;;  %v5526_v45 = vld [vmem:[%s7815_s1 + $0x1dc] ss:$72 sps:$4 sm:$0xff]  }
 0x131   :  { %3986 = vmatprep.subr.bf16.mxu1 %v5481_v47  ;;  %v5529_v46 = vld [vmem:[%s7815_s1 + $0xadc] ss:$72 sps:$4 sm:$0xff]  }
 0x133   :  { %3946 = vmatpush2.bf16.msra.mxu0 %v5476_v48  ;;  %v5535_v48 = vld [vmem:[%s7815_s1 + $0xa4c] ss:$72 sps:$4 sm:$0xff]  }
 0x134   :  { %3987 = vmatpush2.bf16.msra.mxu1 %v5479_v50  ;;  %3947 = vmatprep.subr.bf16.mxu0 %v5484_v51  ;;  %v5530_v50 = vld [vmem:[%s7815_s1 + $0x148] ss:$72 sps:$4 sm:$0xff]  }
 0x135   :  { %3988 = vmatprep.subr.bf16.mxu1 %v5487_v52  ;;  %v5533_v51 = vld [vmem:[%s7815_s1 + $0xa48] ss:$72 sps:$4 sm:$0xff]   ;;  %v5538_v52 = vld [vmem:[%s7815_s1 + $0xbc] ss:$72 sps:$4 sm:$0xff]  }
 0x137   :  { %3948 = vmatpush2.bf16.msra.mxu0 %v5482_v53  ;;  %v5541_v53 = vld [vmem:[%s7815_s1 + $0x9bc] ss:$72 sps:$4 sm:$0xff]  }
 0x138   :  { %3989 = vmatpush2.bf16.msra.mxu1 %v5485_v54  ;;  %3949 = vmatprep.subr.bf16.mxu0 %v5490_v55  ;;  %v5536_v54 = vld [vmem:[%s7815_s1 + $0xb8] ss:$72 sps:$4 sm:$0xff]  }
 0x139   :  { %3990 = vmatprep.subr.bf16.mxu1 %v5493_v57  ;;  %v5539_v55 = vld [vmem:[%s7815_s1 + $0x9b8] ss:$72 sps:$4 sm:$0xff]   ;;  %v5544_v57 = vld [vmem:[%s7815_s1 + $0x2c] ss:$72 sps:$4 sm:$0xff]  }
 0x13b   :  { %3950 = vmatpush2.bf16.msra.mxu0 %v5488_v58  ;;  %v5547_v58 = vld [vmem:[%s7815_s1 + $0x92c] ss:$72 sps:$4 sm:$0xff]  }
 0x13c   :  { %3991 = vmatpush2.bf16.msra.mxu1 %v5491_v59  ;;  %3951 = vmatprep.subr.bf16.mxu0 %v5496_v60  ;;  %v5542_v59 = vld [vmem:[%s7815_s1 + $0x28] ss:$72 sps:$4 sm:$0xff]  }
 0x13d   :  { %3992 = vmatprep.subr.bf16.mxu1 %v5499_v61  ;;  %v5545_v60 = vld [vmem:[%s7815_s1 + $0x928] ss:$72 sps:$4 sm:$0xff]   ;;  %v5550_v61 = vld [vmem:[%s7815_s1 + $0x89c] ss:$72 sps:$4 sm:$0xff]  }
 0x13f   :  { %3952 = vmatpush2.bf16.msra.mxu0 %v5494_v0  ;;  %v5553_v0 = vld [vmem:[%s7815_s1 + $0x119c] ss:$72 sps:$4 sm:$0xff]  }
 0x140   :  { %3993 = vmatpush2.bf16.msra.mxu1 %v5497_v1  ;;  %4003 = vmatprep.subr.bf16.mxu0 %v5502_v4  ;;  %v5548_v1 = vld [vmem:[%s7815_s1 + $0x898] ss:$72 sps:$4 sm:$0xff]  }
 0x141   :  { %4044 = vmatprep.subr.bf16.mxu1 %v5505_v6  ;;  %v5551_v4 = vld [vmem:[%s7815_s1 + $0x1198] ss:$72 sps:$4 sm:$0xff]   ;;  %v5556_v6 = vld [vmem:[%s7815_s1 + $0x80c] ss:$72 sps:$4 sm:$0xff]  }
 0x142   :  { %v3709_v18 = vpop.f32.mrf.mxu0  ;;  %3954 = vmatmul.mubr.bf16.vlgmr.msra.gmra.mxu0 %v6120_v16 }
 0x143   :  { %v3750_v19 = vpop.f32.mrf.mxu1  ;;  %3995 = vmatmul.mubr.bf16.vlgmr.msra.gmra.mxu1 %v6122_v17  ;;  %v3710_v20 = vadd.f32 %v3709_v18, %v634_v10  ;;  %4004 = vmatpush1.bf16.msra.mxu0 %v5500_v7  ;;  %v5559_v7 = vld [vmem:[%s7815_s1 + $0x110c] ss:$72 sps:$4 sm:$0xff]   ;;  %v5557_v10 = vld [vmem:[%s7815_s1 + $0x1108] ss:$72 sps:$4 sm:$0xff]  }
 0x144   :  { %4045 = vmatpush1.bf16.msra.mxu1 %v5503_v8  ;;  %v3711_v21 = vpop.f32.mrf.mxu0  ;;  %4005 = vmatprep.subr.bf16.mxu0 %v5508_v11  ;;  %v5554_v8 = vld [vmem:[%s7815_s1 + $0x808] ss:$72 sps:$4 sm:$0xff]   ;;  %v5562_v11 = vld [vmem:[%s7815_s1 + $0x77c] ss:$72 sps:$4 sm:$0xff]   ;;  %v5571_v18 = vld [vmem:[%s7815_s1 + $0xfec] ss:$72 sps:$4 sm:$0xff]  }
 0x145   :  { %v3752_v22 = vpop.f32.mrf.mxu1  ;;  %4046 = vmatprep.subr.bf16.mxu1 %v5511_v12  ;;  %v3751_v25 = vadd.f32 %v3750_v19, %v3710_v20  ;;  %v3712_v26 = vadd.f32 %v3711_v21, %v638_v13  ;;  %4035 = vmatprep.mubr.bf16.mxu0 %v6069_v62  ;;  %v5565_v12 = vld [vmem:[%s7815_s1 + $0x107c] ss:$72 sps:$4 sm:$0xff]   ;;  %v5560_v13 = vld [vmem:[%s7815_s1 + $0x778] ss:$72 sps:$4 sm:$0xff]   ;;  %v5566_v19 = vld [vmem:[%s7815_s1 + $0x6e8] ss:$72 sps:$4 sm:$0xff]  }
 0x146   :  { %4076 = vmatprep.mubr.bf16.mxu1 %v6080_v3  ;;  %v3713_v29 = vpop.f32.mrf.mxu0  ;;  %v5569_v20 = vld [vmem:[%s7815_s1 + $0xfe8] ss:$72 sps:$4 sm:$0xff]   ;;  %v5574_v21 = vld [vmem:[%s7815_s1 + $0x65c] ss:$72 sps:$4 sm:$0xff]  }
 0x147   :  { %v3754_v30 = vpop.f32.mrf.mxu1  ;;  %v3753_v31 = vadd.f32 %v3752_v22, %v3712_v26  ;;  %4006 = vmatpush1.bf16.msra.mxu0 %v5506_v14  ;;  %v5563_v14 = vld [vmem:[%s7815_s1 + $0x1078] ss:$72 sps:$4 sm:$0xff]   ;;  %v5577_v22 = vld [vmem:[%s7815_s1 + $0xf5c] ss:$72 sps:$4 sm:$0xff]   ;;  %v5583_v26 = vld [vmem:[%s7815_s1 + $0xecc] ss:$72 sps:$4 sm:$0xff]  }
 0x148   :  { %4047 = vmatpush1.bf16.msra.mxu1 %v5509_v15  ;;  %v3714_v32 = vpop.f32.mrf.mxu0  ;;  %4007 = vmatprep.subr.bf16.mxu0 %v5514_v23  ;;  %v5568_v15 = vld [vmem:[%s7815_s1 + $0x6ec] ss:$72 sps:$4 sm:$0xff]   ;;  %v5572_v23 = vld [vmem:[%s7815_s1 + $0x658] ss:$72 sps:$4 sm:$0xff]   ;;  %v5586_v29 = vld [vmem:[%s7815_s1 + $0x53c] ss:$72 sps:$4 sm:$0xff]  }
 0x149   :  { %v3755_v33 = vpop.f32.mrf.mxu1  ;;  %4048 = vmatprep.subr.bf16.mxu1 %v5517_v24  ;;  %v4350_v39 = vcombine.low %v3751_v25, %v3753_v31  ;;  %v5575_v24 = vld [vmem:[%s7815_s1 + $0xf58] ss:$72 sps:$4 sm:$0xff]   ;;  %v5580_v25 = vld [vmem:[%s7815_s1 + $0x5cc] ss:$72 sps:$4 sm:$0xff]   ;;  %v5589_v30 = vld [vmem:[%s7815_s1 + $0xe3c] ss:$72 sps:$4 sm:$0xff]  }
 0x14a   :  { %v5584_v31 = vld [vmem:[%s7815_s1 + $0x538] ss:$72 sps:$4 sm:$0xff]   ;;  %v5592_v33 = vld [vmem:[%s7815_s1 + $0x4ac] ss:$72 sps:$4 sm:$0xff]  }
 0x14b   :  { %v4364_v44 = vrot.slane %v4350_v39, %v6041_v49  ;;  %4008 = vmatpush1.bf16.msra.mxu0 %v5512_v27  ;;  %v5578_v27 = vld [vmem:[%s7815_s1 + $0x5c8] ss:$72 sps:$4 sm:$0xff]   ;;  %v5587_v32 = vld [vmem:[%s7815_s1 + $0xe38] ss:$72 sps:$4 sm:$0xff]  }
 0x14c   :  { %4049 = vmatpush1.bf16.msra.mxu1 %v5515_v28  ;;  %4009 = vmatprep.subr.bf16.mxu0 %v5520_v36  ;;  %v5581_v28 = vld [vmem:[%s7815_s1 + $0xec8] ss:$72 sps:$4 sm:$0xff]   ;;  %v5595_v36 = vld [vmem:[%s7815_s1 + $0xdac] ss:$72 sps:$4 sm:$0xff]  }
 0x14d   :  { %4050 = vmatprep.subr.bf16.mxu1 %v5523_v37  ;;  %v4365_v47 = vcombine.low %v4357_v42, %v4364_v44  ;;  %v5590_v37 = vld [vmem:[%s7815_s1 + $0x4a8] ss:$72 sps:$4 sm:$0xff]   ;;  %v5601_v42 = vld [vmem:[%s7815_s1 + $0xd24] ss:$72 sps:$4 sm:$0xff]   ;;  %v645_v44 = vsub.s32 5, %v6023_v43 }
 0x14e   :  { %v5593_v39 = vld [vmem:[%s7815_s1 + $0xda8] ss:$72 sps:$4 sm:$0xff]  }
 0x14f   :  { %4430 = vst [vmem:[%s7818_s3] sm:$0xff] %v4365_v47  ;;  %4010 = vmatpush1.bf16.msra.mxu0 %v5518_v40  ;;  %v641_v40 = vsub.s32 4, %v6023_v43  ;;  %v5599_v47 = vld [vmem:[%s7815_s1 + $0xd20] ss:$72 sps:$4 sm:$0xff]  }
 0x150   :  { %4051 = vmatpush1.bf16.msra.mxu1 %v5521_v41  ;;  %4011 = vmatprep.subr.bf16.mxu0 %v5526_v45  ;;  %v5598_v41 = vld [vmem:[%s7815_s1 + $0x424] ss:$72 sps:$4 sm:$0xff]  }
 0x151   :  { %4052 = vmatprep.subr.bf16.mxu1 %v5529_v46  ;;  %v642_v45 = vrot.slane %v6709_v34, %v641_v40  ;;  %v5596_v46 = vld [vmem:[%s7815_s1 + $0x420] ss:$72 sps:$4 sm:$0xff]  }
 0x152   :  { %v7161_v34 = vld [vmem:[%s7817_s2] sm:$0xff] }
 0x153   :  { %4012 = vmatpush1.bf16.msra.mxu0 %v5524_v56  ;;  %v5604_v56 = vld [vmem:[%s7815_s1 + $0x394] ss:$72 sps:$4 sm:$0xff]  }
 0x154   :  { %4053 = vmatpush1.bf16.msra.mxu1 %v5527_v63  ;;  %4013 = vmatprep.subr.bf16.mxu0 %v5532_v5  ;;  %v5607_v63 = vld [vmem:[%s7815_s1 + $0xc94] ss:$72 sps:$4 sm:$0xff]   ;;  %v646_v5 = vrot.slane %v7161_v34, %v645_v44 }
 0x155   :  { %4054 = vmatprep.subr.bf16.mxu1 %v5535_v48 }
 0x157   :  { %4014 = vmatpush1.bf16.msra.mxu0 %v5530_v50 }
 0x158   :  { %4055 = vmatpush1.bf16.msra.mxu1 %v5533_v51  ;;  %4015 = vmatprep.subr.bf16.mxu0 %v5538_v52  ;;  %v5602_v52 = vld [vmem:[%s7815_s1 + $0x390] ss:$72 sps:$4 sm:$0xff]  }
 0x159   :  { %4056 = vmatprep.subr.bf16.mxu1 %v5541_v53  ;;  %v5605_v53 = vld [vmem:[%s7815_s1 + $0xc90] ss:$72 sps:$4 sm:$0xff]  }
 0x15b   :  { %4016 = vmatpush1.bf16.msra.mxu0 %v5536_v54 }
 0x15c   :  { %4057 = vmatpush1.bf16.msra.mxu1 %v5539_v55  ;;  %4017 = vmatprep.subr.bf16.mxu0 %v5544_v57  ;;  %v5610_v57 = vld [vmem:[%s7815_s1 + $0x304] ss:$72 sps:$4 sm:$0xff]  }
 0x15d   :  { %4058 = vmatprep.subr.bf16.mxu1 %v5547_v58  ;;  %v5613_v58 = vld [vmem:[%s7815_s1 + $0xc04] ss:$72 sps:$4 sm:$0xff]  }
 0x15f   :  { %4018 = vmatpush1.bf16.msra.mxu0 %v5542_v59 }
 0x160   :  { %4059 = vmatpush1.bf16.msra.mxu1 %v5545_v60  ;;  %4019 = vmatprep.subr.bf16.mxu0 %v5550_v61 }
 0x161   :  { %4060 = vmatprep.subr.bf16.mxu1 %v5553_v0 }
 0x163   :  { %4020 = vmatpush2.bf16.msra.mxu0 %v5548_v1 }
 0x164   :  { %4061 = vmatpush2.bf16.msra.mxu1 %v5551_v4  ;;  %4021 = vmatprep.subr.bf16.mxu0 %v5556_v6  ;;  %v5608_v4 = vld [vmem:[%s7815_s1 + $0x300] ss:$72 sps:$4 sm:$0xff]  }
 0x165   :  { %4062 = vmatprep.subr.bf16.mxu1 %v5559_v7  ;;  %v5611_v6 = vld [vmem:[%s7815_s1 + $0xc00] ss:$72 sps:$4 sm:$0xff]  }
 0x167   :  { %4022 = vmatpush2.bf16.msra.mxu0 %v5554_v8 }
 0x168   :  { %4063 = vmatpush2.bf16.msra.mxu1 %v5557_v10  ;;  %4023 = vmatprep.subr.bf16.mxu0 %v5562_v11  ;;  %v5616_v10 = vld [vmem:[%s7815_s1 + $0x274] ss:$72 sps:$4 sm:$0xff]  }
 0x169   :  { %4064 = vmatprep.subr.bf16.mxu1 %v5565_v12  ;;  %v5619_v11 = vld [vmem:[%s7815_s1 + $0xb74] ss:$72 sps:$4 sm:$0xff]  }
 0x16b   :  { %4024 = vmatpush2.bf16.msra.mxu0 %v5560_v13  ;;  %v5614_v13 = vld [vmem:[%s7815_s1 + $0x270] ss:$72 sps:$4 sm:$0xff]  }
 0x16c   :  { %4065 = vmatpush2.bf16.msra.mxu1 %v5563_v14  ;;  %4025 = vmatprep.subr.bf16.mxu0 %v5568_v15  ;;  %v5617_v14 = vld [vmem:[%s7815_s1 + $0xb70] ss:$72 sps:$4 sm:$0xff]   ;;  %v5622_v15 = vld [vmem:[%s7815_s1 + $0x1e4] ss:$72 sps:$4 sm:$0xff]  }
 0x16d   :  { %4066 = vmatprep.subr.bf16.mxu1 %v5571_v18  ;;  %v5625_v18 = vld [vmem:[%s7815_s1 + $0xae4] ss:$72 sps:$4 sm:$0xff]  }
 0x16f   :  { %4026 = vmatpush2.bf16.msra.mxu0 %v5566_v19  ;;  %v5620_v19 = vld [vmem:[%s7815_s1 + $0x1e0] ss:$72 sps:$4 sm:$0xff]  }
 0x170   :  { %4067 = vmatpush2.bf16.msra.mxu1 %v5569_v20  ;;  %4027 = vmatprep.subr.bf16.mxu0 %v5574_v21  ;;  %v5623_v20 = vld [vmem:[%s7815_s1 + $0xae0] ss:$72 sps:$4 sm:$0xff]   ;;  %v5628_v21 = vld [vmem:[%s7815_s1 + $0x154] ss:$72 sps:$4 sm:$0xff]  }
 0x171   :  { %4068 = vmatprep.subr.bf16.mxu1 %v5577_v22  ;;  %v5631_v22 = vld [vmem:[%s7815_s1 + $0xa54] ss:$72 sps:$4 sm:$0xff]  }
 0x173   :  { %4028 = vmatpush2.bf16.msra.mxu0 %v5572_v23  ;;  %v5626_v23 = vld [vmem:[%s7815_s1 + $0x150] ss:$72 sps:$4 sm:$0xff]  }
 0x174   :  { %4069 = vmatpush2.bf16.msra.mxu1 %v5575_v24  ;;  %4029 = vmatprep.subr.bf16.mxu0 %v5580_v25  ;;  %v5629_v24 = vld [vmem:[%s7815_s1 + $0xa50] ss:$72 sps:$4 sm:$0xff]   ;;  %v5634_v25 = vld [vmem:[%s7815_s1 + $0xc4] ss:$72 sps:$4 sm:$0xff]  }
 0x175   :  { %4070 = vmatprep.subr.bf16.mxu1 %v5583_v26  ;;  %v5637_v26 = vld [vmem:[%s7815_s1 + $0x9c4] ss:$72 sps:$4 sm:$0xff]  }
 0x177   :  { %4030 = vmatpush2.bf16.msra.mxu0 %v5578_v27  ;;  %v5632_v27 = vld [vmem:[%s7815_s1 + $0xc0] ss:$72 sps:$4 sm:$0xff]  }
 0x178   :  { %4071 = vmatpush2.bf16.msra.mxu1 %v5581_v28  ;;  %4031 = vmatprep.subr.bf16.mxu0 %v5586_v29  ;;  %v5635_v28 = vld [vmem:[%s7815_s1 + $0x9c0] ss:$72 sps:$4 sm:$0xff]   ;;  %v5640_v29 = vld [vmem:[%s7815_s1 + $0x34] ss:$72 sps:$4 sm:$0xff]  }
 0x179   :  { %4072 = vmatprep.subr.bf16.mxu1 %v5589_v30  ;;  %v5643_v30 = vld [vmem:[%s7815_s1 + $0x934] ss:$72 sps:$4 sm:$0xff]  }
 0x17b   :  { %4032 = vmatpush2.bf16.msra.mxu0 %v5584_v31  ;;  %v5638_v31 = vld [vmem:[%s7815_s1 + $0x30] ss:$72 sps:$4 sm:$0xff]  }
 0x17c   :  { %4073 = vmatpush2.bf16.msra.mxu1 %v5587_v32  ;;  %4033 = vmatprep.subr.bf16.mxu0 %v5592_v33  ;;  %v5641_v32 = vld [vmem:[%s7815_s1 + $0x930] ss:$72 sps:$4 sm:$0xff]   ;;  %v5646_v33 = vld [vmem:[%s7815_s1 + $0x8a4] ss:$72 sps:$4 sm:$0xff]  }
 0x17d   :  { %4074 = vmatprep.subr.bf16.mxu1 %v5595_v36  ;;  %v5649_v36 = vld [vmem:[%s7815_s1 + $0x11a4] ss:$72 sps:$4 sm:$0xff]  }
 0x17f   :  { %4034 = vmatpush2.bf16.msra.mxu0 %v5590_v37  ;;  %v5644_v37 = vld [vmem:[%s7815_s1 + $0x8a0] ss:$72 sps:$4 sm:$0xff]  }
 0x180   :  { %4075 = vmatpush2.bf16.msra.mxu1 %v5593_v39  ;;  %4085 = vmatprep.subr.bf16.mxu0 %v5598_v41  ;;  %v5647_v39 = vld [vmem:[%s7815_s1 + $0x11a0] ss:$72 sps:$4 sm:$0xff]   ;;  %v5652_v41 = vld [vmem:[%s7815_s1 + $0x814] ss:$72 sps:$4 sm:$0xff]  }
 0x181   :  { %4126 = vmatprep.subr.bf16.mxu1 %v5601_v42  ;;  %v5655_v42 = vld [vmem:[%s7815_s1 + $0x1114] ss:$72 sps:$4 sm:$0xff]  }
 0x182   :  { %v3791_v48 = vpop.f32.mrf.mxu0  ;;  %4036 = vmatmul.mubr.bf16.vlgmr.msra.gmra.mxu0 %v6120_v16 }
 0x183   :  { %v3832_v50 = vpop.f32.mrf.mxu1  ;;  %4077 = vmatmul.mubr.bf16.vlgmr.msra.gmra.mxu1 %v6122_v17  ;;  %v3792_v51 = vadd.f32 %v3791_v48, %v642_v45  ;;  %4086 = vmatpush1.bf16.msra.mxu0 %v5596_v46  ;;  %v5650_v45 = vld [vmem:[%s7815_s1 + $0x810] ss:$72 sps:$4 sm:$0xff]   ;;  %v5664_v48 = vld [vmem:[%s7815_s1 + $0x6f4] ss:$72 sps:$4 sm:$0xff]  }
 0x184   :  { %4127 = vmatpush1.bf16.msra.mxu1 %v5599_v47  ;;  %v3793_v54 = vpop.f32.mrf.mxu0  ;;  %4087 = vmatprep.subr.bf16.mxu0 %v5604_v56  ;;  %v5653_v46 = vld [vmem:[%s7815_s1 + $0x1110] ss:$72 sps:$4 sm:$0xff]   ;;  %v5658_v47 = vld [vmem:[%s7815_s1 + $0x784] ss:$72 sps:$4 sm:$0xff]  }
 0x185   :  { %v3834_v55 = vpop.f32.mrf.mxu1  ;;  %4128 = vmatprep.subr.bf16.mxu1 %v5607_v63  ;;  %v7180_v59 = vadd.f32 %v3832_v50, %v3792_v51  ;;  %v3794_v60 = vadd.f32 %v3793_v54, %v646_v5  ;;  %4117 = vmatprep.mubr.bf16.mxu0 %v6069_v62  ;;  %v5661_v56 = vld [vmem:[%s7815_s1 + $0x1084] ss:$72 sps:$4 sm:$0xff]   ;;  %v5656_v63 = vld [vmem:[%s7815_s1 + $0x780] ss:$72 sps:$4 sm:$0xff]   ;;  %v5667_v50 = vld [vmem:[%s7815_s1 + $0xff4] ss:$72 sps:$4 sm:$0xff]  }
 0x186   :  { %4158 = vmatprep.mubr.bf16.mxu1 %v6080_v3  ;;  %v3795_v61 = vpop.f32.mrf.mxu0  ;;  %v5659_v5 = vld [vmem:[%s7815_s1 + $0x1080] ss:$72 sps:$4 sm:$0xff]   ;;  %v5662_v51 = vld [vmem:[%s7815_s1 + $0x6f0] ss:$72 sps:$4 sm:$0xff]   ;;  %v5673_v54 = vld [vmem:[%s7815_s1 + $0xf64] ss:$72 sps:$4 sm:$0xff]  }
 0x187   :  { %v3836_v0 = vpop.f32.mrf.mxu1  ;;  %v7184_v1 = vadd.f32 %v3834_v55, %v3794_v60  ;;  %4088 = vmatpush1.bf16.msra.mxu0 %v5602_v52  ;;  %v5665_v52 = vld [vmem:[%s7815_s1 + $0xff0] ss:$72 sps:$4 sm:$0xff]   ;;  %v5668_v55 = vld [vmem:[%s7815_s1 + $0x660] ss:$72 sps:$4 sm:$0xff]   ;;  %v5679_v60 = vld [vmem:[%s7815_s1 + $0xed4] ss:$72 sps:$4 sm:$0xff]  }
 0x188   :  { %4129 = vmatpush1.bf16.msra.mxu1 %v5605_v53  ;;  %v3796_v7 = vpop.f32.mrf.mxu0  ;;  %4089 = vmatprep.subr.bf16.mxu0 %v5610_v57  ;;  %v5670_v53 = vld [vmem:[%s7815_s1 + $0x664] ss:$72 sps:$4 sm:$0xff]   ;;  %v5671_v57 = vld [vmem:[%s7815_s1 + $0xf60] ss:$72 sps:$4 sm:$0xff]   ;;  %v5674_v61 = vld [vmem:[%s7815_s1 + $0x5d0] ss:$72 sps:$4 sm:$0xff]  }
 0x189   :  { %v3837_v8 = vpop.f32.mrf.mxu1  ;;  %4130 = vmatprep.subr.bf16.mxu1 %v5613_v58  ;;  %v4366_v12 = vcombine.low %v7180_v59, %v7184_v1  ;;  %v5676_v58 = vld [vmem:[%s7815_s1 + $0x5d4] ss:$72 sps:$4 sm:$0xff]   ;;  %v5677_v0 = vld [vmem:[%s7815_s1 + $0xed0] ss:$72 sps:$4 sm:$0xff]   ;;  %v5680_v7 = vld [vmem:[%s7815_s1 + $0x540] ss:$72 sps:$4 sm:$0xff]  }
 0x18a   :  { %v5683_v8 = vld [vmem:[%s7815_s1 + $0xe40] ss:$72 sps:$4 sm:$0xff]   ;;  %v5721_v59 = vld [vmem:[%s7815_s1 + $0xaec] ss:$72 sps:$4 sm:$0xff]  }
 0x18b   :  { %4090 = vmatpush1.bf16.msra.mxu0 %v5608_v4  ;;  %v5682_v4 = vld [vmem:[%s7815_s1 + $0x544] ss:$72 sps:$4 sm:$0xff]  }
 0x18c   :  { %4131 = vmatpush1.bf16.msra.mxu1 %v5611_v6  ;;  %4091 = vmatprep.subr.bf16.mxu0 %v5616_v10  ;;  %v5685_v6 = vld [vmem:[%s7815_s1 + $0xe44] ss:$72 sps:$4 sm:$0xff]   ;;  %v5688_v10 = vld [vmem:[%s7815_s1 + $0x4b4] ss:$72 sps:$4 sm:$0xff]  }
 0x18d   :  { %4132 = vmatprep.subr.bf16.mxu1 %v5619_v11  ;;  %v5691_v11 = vld [vmem:[%s7815_s1 + $0xdb4] ss:$72 sps:$4 sm:$0xff]  }
 0x18f   :  { %4092 = vmatpush1.bf16.msra.mxu0 %v5614_v13  ;;  %v5686_v13 = vld [vmem:[%s7815_s1 + $0x4b0] ss:$72 sps:$4 sm:$0xff]  }
 0x190   :  { %4133 = vmatpush1.bf16.msra.mxu1 %v5617_v14  ;;  %4093 = vmatprep.subr.bf16.mxu0 %v5622_v15  ;;  %v5689_v14 = vld [vmem:[%s7815_s1 + $0xdb0] ss:$72 sps:$4 sm:$0xff]   ;;  %v649_v15 = vsub.s32 6, %v6023_v43 }
 0x191   :  { %4134 = vmatprep.subr.bf16.mxu1 %v5625_v18  ;;  %v5694_v18 = vld [vmem:[%s7815_s1 + $0x42c] ss:$72 sps:$4 sm:$0xff]  }
 0x193   :  { %4094 = vmatpush1.bf16.msra.mxu0 %v5620_v19  ;;  %v5697_v19 = vld [vmem:[%s7815_s1 + $0xd2c] ss:$72 sps:$4 sm:$0xff]  }
 0x194   :  { %4135 = vmatpush1.bf16.msra.mxu1 %v5623_v20  ;;  %4095 = vmatprep.subr.bf16.mxu0 %v5628_v21  ;;  %v653_v20 = vsub.s32 7, %v6023_v43  ;;  %v650_v21 = vrot.slane %v7161_v34, %v649_v15 }
 0x195   :  { %4136 = vmatprep.subr.bf16.mxu1 %v5631_v22  ;;  %v5692_v22 = vld [vmem:[%s7815_s1 + $0x428] ss:$72 sps:$4 sm:$0xff]  }
 0x197   :  { %4096 = vmatpush1.bf16.msra.mxu0 %v5626_v23  ;;  %v5695_v23 = vld [vmem:[%s7815_s1 + $0xd28] ss:$72 sps:$4 sm:$0xff]  }
 0x198   :  { %4137 = vmatpush1.bf16.msra.mxu1 %v5629_v24  ;;  %4097 = vmatprep.subr.bf16.mxu0 %v5634_v25  ;;  %v5700_v24 = vld [vmem:[%s7815_s1 + $0x39c] ss:$72 sps:$4 sm:$0xff]  }
 0x199   :  { %4138 = vmatprep.subr.bf16.mxu1 %v5637_v26  ;;  %v5703_v25 = vld [vmem:[%s7815_s1 + $0xc9c] ss:$72 sps:$4 sm:$0xff]   ;;  %v654_v26 = vrot.slane %v7161_v34, %v653_v20  ;;  %v5706_v34 = vld [vmem:[%s7815_s1 + $0x30c] ss:$72 sps:$4 sm:$0xff]  }
 0x19b   :  { %4098 = vmatpush1.bf16.msra.mxu0 %v5632_v27 }
 0x19c   :  { %4139 = vmatpush1.bf16.msra.mxu1 %v5635_v28  ;;  %4099 = vmatprep.subr.bf16.mxu0 %v5640_v29 }
 0x19d   :  { %4140 = vmatprep.subr.bf16.mxu1 %v5643_v30  ;;  %v5698_v30 = vld [vmem:[%s7815_s1 + $0x398] ss:$72 sps:$4 sm:$0xff]  }
 0x19f   :  { %4100 = vmatpush1.bf16.msra.mxu0 %v5638_v31  ;;  %v5701_v31 = vld [vmem:[%s7815_s1 + $0xc98] ss:$72 sps:$4 sm:$0xff]  }
 0x1a0   :  { %4141 = vmatpush1.bf16.msra.mxu1 %v5641_v32  ;;  %4101 = vmatprep.subr.bf16.mxu0 %v5646_v33 }
 0x1a1   :  { %4142 = vmatprep.subr.bf16.mxu1 %v5649_v36  ;;  %v5709_v36 = vld [vmem:[%s7815_s1 + $0xc0c] ss:$72 sps:$4 sm:$0xff]  }
 0x1a3   :  { %4102 = vmatpush2.bf16.msra.mxu0 %v5644_v37 }
 0x1a4   :  { %4143 = vmatpush2.bf16.msra.mxu1 %v5647_v39  ;;  %4103 = vmatprep.subr.bf16.mxu0 %v5652_v41 }
 0x1a5   :  { %4144 = vmatprep.subr.bf16.mxu1 %v5655_v42 }
 0x1a7   :  { %4104 = vmatpush2.bf16.msra.mxu0 %v5650_v45 }
 0x1a8   :  { %4145 = vmatpush2.bf16.msra.mxu1 %v5653_v46  ;;  %4105 = vmatprep.subr.bf16.mxu0 %v5658_v47  ;;  %v5704_v46 = vld [vmem:[%s7815_s1 + $0x308] ss:$72 sps:$4 sm:$0xff]  }
 0x1a9   :  { %4146 = vmatprep.subr.bf16.mxu1 %v5661_v56  ;;  %v5707_v47 = vld [vmem:[%s7815_s1 + $0xc08] ss:$72 sps:$4 sm:$0xff]  }
 0x1ab   :  { %4106 = vmatpush2.bf16.msra.mxu0 %v5656_v63 }
 0x1ac   :  { %4147 = vmatpush2.bf16.msra.mxu1 %v5659_v5  ;;  %4107 = vmatprep.subr.bf16.mxu0 %v5664_v48  ;;  %v5712_v5 = vld [vmem:[%s7815_s1 + $0x27c] ss:$72 sps:$4 sm:$0xff]  }
 0x1ad   :  { %4148 = vmatprep.subr.bf16.mxu1 %v5667_v50  ;;  %v5715_v48 = vld [vmem:[%s7815_s1 + $0xb7c] ss:$72 sps:$4 sm:$0xff]  }
 0x1af   :  { %4108 = vmatpush2.bf16.msra.mxu0 %v5662_v51  ;;  %v4374_v51 = vrot.slane %v4366_v12, %v6041_v49  ;;  %v5716_v12 = vld [vmem:[%s7815_s1 + $0x1e8] ss:$72 sps:$4 sm:$0xff]  }
 0x1b0   :  { %4149 = vmatpush2.bf16.msra.mxu1 %v5665_v52  ;;  %4109 = vmatprep.subr.bf16.mxu0 %v5670_v53  ;;  %v5710_v53 = vld [vmem:[%s7815_s1 + $0x278] ss:$72 sps:$4 sm:$0xff]  }
 0x1b1   :  { %4150 = vmatprep.subr.bf16.mxu1 %v5673_v54  ;;  %v5713_v54 = vld [vmem:[%s7815_s1 + $0xb78] ss:$72 sps:$4 sm:$0xff]  }
 0x1b3   :  { %4110 = vmatpush2.bf16.msra.mxu0 %v5668_v55  ;;  %v5718_v55 = vld [vmem:[%s7815_s1 + $0x1ec] ss:$72 sps:$4 sm:$0xff]  }
 0x1b4   :  { %4151 = vmatpush2.bf16.msra.mxu1 %v5671_v57  ;;  %4111 = vmatprep.subr.bf16.mxu0 %v5676_v58  ;;  %v5719_v57 = vld [vmem:[%s7815_s1 + $0xae8] ss:$72 sps:$4 sm:$0xff]   ;;  %v5724_v58 = vld [vmem:[%s7815_s1 + $0x15c] ss:$72 sps:$4 sm:$0xff]  }
 0x1b5   :  { %4152 = vmatprep.subr.bf16.mxu1 %v5679_v60  ;;  %v5727_v60 = vld [vmem:[%s7815_s1 + $0xa5c] ss:$72 sps:$4 sm:$0xff]  }
 0x1b7   :  { %4112 = vmatpush2.bf16.msra.mxu0 %v5674_v61  ;;  %v5722_v61 = vld [vmem:[%s7815_s1 + $0x158] ss:$72 sps:$4 sm:$0xff]  }
 0x1b8   :  { %4153 = vmatpush2.bf16.msra.mxu1 %v5677_v0  ;;  %4113 = vmatprep.subr.bf16.mxu0 %v5682_v4  ;;  %v5725_v0 = vld [vmem:[%s7815_s1 + $0xa58] ss:$72 sps:$4 sm:$0xff]   ;;  %v5730_v4 = vld [vmem:[%s7815_s1 + $0xcc] ss:$72 sps:$4 sm:$0xff]  }
 0x1b9   :  { %4154 = vmatprep.subr.bf16.mxu1 %v5685_v6  ;;  %v5733_v6 = vld [vmem:[%s7815_s1 + $0x9cc] ss:$72 sps:$4 sm:$0xff]  }
 0x1bb   :  { %4114 = vmatpush2.bf16.msra.mxu0 %v5680_v7  ;;  %v5728_v7 = vld [vmem:[%s7815_s1 + $0xc8] ss:$72 sps:$4 sm:$0xff]  }
 0x1bc   :  { %4155 = vmatpush2.bf16.msra.mxu1 %v5683_v8  ;;  %4115 = vmatprep.subr.bf16.mxu0 %v5688_v10  ;;  %v5731_v8 = vld [vmem:[%s7815_s1 + $0x9c8] ss:$72 sps:$4 sm:$0xff]   ;;  %v5736_v10 = vld [vmem:[%s7815_s1 + $0x3c] ss:$72 sps:$4 sm:$0xff]  }
 0x1bd   :  { %4156 = vmatprep.subr.bf16.mxu1 %v5691_v11  ;;  %v5739_v11 = vld [vmem:[%s7815_s1 + $0x93c] ss:$72 sps:$4 sm:$0xff]  }
 0x1bf   :  { %4116 = vmatpush2.bf16.msra.mxu0 %v5686_v13  ;;  %v5734_v13 = vld [vmem:[%s7815_s1 + $0x38] ss:$72 sps:$4 sm:$0xff]  }
 0x1c0   :  { %4157 = vmatpush2.bf16.msra.mxu1 %v5689_v14  ;;  %4167 = vmatprep.subr.bf16.mxu0 %v5694_v18  ;;  %v5737_v14 = vld [vmem:[%s7815_s1 + $0x938] ss:$72 sps:$4 sm:$0xff]   ;;  %v5742_v18 = vld [vmem:[%s7815_s1 + $0x8ac] ss:$72 sps:$4 sm:$0xff]  }
 0x1c1   :  { %4208 = vmatprep.subr.bf16.mxu1 %v5697_v19  ;;  %v5745_v19 = vld [vmem:[%s7815_s1 + $0x11ac] ss:$72 sps:$4 sm:$0xff]  }
 0x1c2   :  { %v3873_v27 = vpop.f32.mrf.mxu0  ;;  %4118 = vmatmul.mubr.bf16.vlgmr.msra.gmra.mxu0 %v6120_v16 }
 0x1c3   :  { %v3914_v28 = vpop.f32.mrf.mxu1  ;;  %4159 = vmatmul.mubr.bf16.vlgmr.msra.gmra.mxu1 %v6122_v17  ;;  %v3874_v29 = vadd.f32 %v3873_v27, %v650_v21  ;;  %4168 = vmatpush1.bf16.msra.mxu0 %v5692_v22  ;;  %v5740_v21 = vld [vmem:[%s7815_s1 + $0x8a8] ss:$72 sps:$4 sm:$0xff]   ;;  %v5754_v27 = vld [vmem:[%s7815_s1 + $0x78c] ss:$72 sps:$4 sm:$0xff]  }
 0x1c4   :  { %4209 = vmatpush1.bf16.msra.mxu1 %v5695_v23  ;;  %v3875_v32 = vpop.f32.mrf.mxu0  ;;  %4169 = vmatprep.subr.bf16.mxu0 %v5700_v24  ;;  %v5743_v22 = vld [vmem:[%s7815_s1 + $0x11a8] ss:$72 sps:$4 sm:$0xff]   ;;  %v5748_v23 = vld [vmem:[%s7815_s1 + $0x81c] ss:$72 sps:$4 sm:$0xff]  }
 0x1c5   :  { %v3916_v33 = vpop.f32.mrf.mxu1  ;;  %4210 = vmatprep.subr.bf16.mxu1 %v5703_v25  ;;  %v3915_v37 = vadd.f32 %v3914_v28, %v3874_v29  ;;  %v3876_v39 = vadd.f32 %v3875_v32, %v654_v26  ;;  %4199 = vmatprep.mubr.bf16.mxu0 %v6069_v62  ;;  %v5751_v24 = vld [vmem:[%s7815_s1 + $0x111c] ss:$72 sps:$4 sm:$0xff]   ;;  %v5746_v25 = vld [vmem:[%s7815_s1 + $0x818] ss:$72 sps:$4 sm:$0xff]   ;;  %v5757_v28 = vld [vmem:[%s7815_s1 + $0x108c] ss:$72 sps:$4 sm:$0xff]  }
 0x1c6   :  { %4240 = vmatprep.mubr.bf16.mxu1 %v6080_v3  ;;  %v3877_v41 = vpop.f32.mrf.mxu0  ;;  %v5749_v26 = vld [vmem:[%s7815_s1 + $0x1118] ss:$72 sps:$4 sm:$0xff]   ;;  %v5752_v29 = vld [vmem:[%s7815_s1 + $0x788] ss:$72 sps:$4 sm:$0xff]   ;;  %v5763_v32 = vld [vmem:[%s7815_s1 + $0xffc] ss:$72 sps:$4 sm:$0xff]  }
 0x1c7   :  { %v3918_v42 = vpop.f32.mrf.mxu1  ;;  %v3917_v45 = vadd.f32 %v3916_v33, %v3876_v39  ;;  %4170 = vmatpush1.bf16.msra.mxu0 %v5698_v30  ;;  %v5755_v30 = vld [vmem:[%s7815_s1 + $0x1088] ss:$72 sps:$4 sm:$0xff]   ;;  %v5758_v33 = vld [vmem:[%s7815_s1 + $0x6f8] ss:$72 sps:$4 sm:$0xff]  }
 0x1c8   :  { %4211 = vmatpush1.bf16.msra.mxu1 %v5701_v31  ;;  %v3878_v56 = vpop.f32.mrf.mxu0  ;;  %4171 = vmatprep.subr.bf16.mxu0 %v5706_v34  ;;  %v5760_v31 = vld [vmem:[%s7815_s1 + $0x6fc] ss:$72 sps:$4 sm:$0xff]   ;;  %v5761_v34 = vld [vmem:[%s7815_s1 + $0xff8] ss:$72 sps:$4 sm:$0xff]   ;;  %v5764_v39 = vld [vmem:[%s7815_s1 + $0x668] ss:$72 sps:$4 sm:$0xff]  }
 0x1c9   :  { %v3919_v63 = vpop.f32.mrf.mxu1  ;;  %4212 = vmatprep.subr.bf16.mxu1 %v5709_v36  ;;  %v4367_v50 = vcombine.low %v3915_v37, %v3917_v45  ;;  %v5766_v36 = vld [vmem:[%s7815_s1 + $0x66c] ss:$72 sps:$4 sm:$0xff]   ;;  %v5767_v41 = vld [vmem:[%s7815_s1 + $0xf68] ss:$72 sps:$4 sm:$0xff]   ;;  %v5772_v42 = vld [vmem:[%s7815_s1 + $0x5dc] ss:$72 sps:$4 sm:$0xff]  }
 0x1ca   :  { %v5769_v37 = vld [vmem:[%s7815_s1 + $0xf6c] ss:$72 sps:$4 sm:$0xff]   ;;  %v5775_v45 = vld [vmem:[%s7815_s1 + $0xedc] ss:$72 sps:$4 sm:$0xff]  }
 0x1cb   :  { %v4381_v52 = vrot.slane %v4367_v50, %v6041_v49  ;;  %4172 = vmatpush1.bf16.msra.mxu0 %v5704_v46  ;;  %v5770_v46 = vld [vmem:[%s7815_s1 + $0x5d8] ss:$72 sps:$4 sm:$0xff]   ;;  %v5778_v56 = vld [vmem:[%s7815_s1 + $0x54c] ss:$72 sps:$4 sm:$0xff]   ;;  %v5784_v50 = vld [vmem:[%s7815_s1 + $0x4bc] ss:$72 sps:$4 sm:$0xff]  }
 0x1cc   :  { %4213 = vmatpush1.bf16.msra.mxu1 %v5707_v47  ;;  %4173 = vmatprep.subr.bf16.mxu0 %v5712_v5  ;;  %v5773_v47 = vld [vmem:[%s7815_s1 + $0xed8] ss:$72 sps:$4 sm:$0xff]   ;;  %v5781_v63 = vld [vmem:[%s7815_s1 + $0xe4c] ss:$72 sps:$4 sm:$0xff]   ;;  %v5776_v5 = vld [vmem:[%s7815_s1 + $0x548] ss:$72 sps:$4 sm:$0xff]  }
 0x1cd   :  { %4214 = vmatprep.subr.bf16.mxu1 %v5715_v48  ;;  %v4382_v1 = vcombine.low %v4374_v51, %v4381_v52  ;;  %v5779_v48 = vld [vmem:[%s7815_s1 + $0xe48] ss:$72 sps:$4 sm:$0xff]   ;;  %v5787_v51 = vld [vmem:[%s7815_s1 + $0xdbc] ss:$72 sps:$4 sm:$0xff]   ;;  %v5782_v52 = vld [vmem:[%s7815_s1 + $0x4b8] ss:$72 sps:$4 sm:$0xff]  }
 0x1cf   :  { %4431 = vst [vmem:[%s7818_s3 + $0x8] sm:$0xff] %v4382_v1  ;;  %4174 = vmatpush1.bf16.msra.mxu0 %v5710_v53  ;;  %v5785_v53 = vld [vmem:[%s7815_s1 + $0xdb8] ss:$72 sps:$4 sm:$0xff]  }
 0x1d0   :  { %4215 = vmatpush1.bf16.msra.mxu1 %v5713_v54  ;;  %4175 = vmatprep.subr.bf16.mxu0 %v5718_v55  ;;  %v7565_v54 = vld [vmem:[%s7817_s2 + $0x8] sm:$0xff]  ;;  %v5790_v55 = vld [vmem:[%s7815_s1 + $0x434] ss:$72 sps:$4 sm:$0xff]  }
 0x1d1   :  { %4216 = vmatprep.subr.bf16.mxu1 %v5721_v59  ;;  %v5793_v59 = vld [vmem:[%s7815_s1 + $0xd34] ss:$72 sps:$4 sm:$0xff]   ;;  %v658_v1 = vrot.slane %v7565_v54, %v6712_v35 }
 0x1d3   :  { %4176 = vmatpush1.bf16.msra.mxu0 %v5716_v12  ;;  %v5788_v12 = vld [vmem:[%s7815_s1 + $0x430] ss:$72 sps:$4 sm:$0xff]  }
 0x1d4   :  { %4217 = vmatpush1.bf16.msra.mxu1 %v5719_v57  ;;  %4177 = vmatprep.subr.bf16.mxu0 %v5724_v58  ;;  %v5791_v57 = vld [vmem:[%s7815_s1 + $0xd30] ss:$72 sps:$4 sm:$0xff]   ;;  %v5796_v58 = vld [vmem:[%s7815_s1 + $0x3a4] ss:$72 sps:$4 sm:$0xff]  }
 0x1d5   :  { %4218 = vmatprep.subr.bf16.mxu1 %v5727_v60  ;;  %v5799_v60 = vld [vmem:[%s7815_s1 + $0xca4] ss:$72 sps:$4 sm:$0xff]  }
 0x1d7   :  { %4178 = vmatpush1.bf16.msra.mxu0 %v5722_v61  ;;  %v662_v61 = vrot.slane %v7565_v54, %v6721_v38 }
 0x1d8   :  { %4219 = vmatpush1.bf16.msra.mxu1 %v5725_v0  ;;  %4179 = vmatprep.subr.bf16.mxu0 %v5730_v4 }
 0x1d9   :  { %4220 = vmatprep.subr.bf16.mxu1 %v5733_v6 }
 0x1db   :  { %4180 = vmatpush1.bf16.msra.mxu0 %v5728_v7  ;;  %v5794_v7 = vld [vmem:[%s7815_s1 + $0x3a0] ss:$72 sps:$4 sm:$0xff]  }
 0x1dc   :  { %4221 = vmatpush1.bf16.msra.mxu1 %v5731_v8  ;;  %4181 = vmatprep.subr.bf16.mxu0 %v5736_v10  ;;  %v5797_v8 = vld [vmem:[%s7815_s1 + $0xca0] ss:$72 sps:$4 sm:$0xff]  }
 0x1dd   :  { %4222 = vmatprep.subr.bf16.mxu1 %v5739_v11 }
 0x1df   :  { %4182 = vmatpush1.bf16.msra.mxu0 %v5734_v13  ;;  %v5802_v13 = vld [vmem:[%s7815_s1 + $0x314] ss:$72 sps:$4 sm:$0xff]  }
 0x1e0   :  { %4223 = vmatpush1.bf16.msra.mxu1 %v5737_v14  ;;  %4183 = vmatprep.subr.bf16.mxu0 %v5742_v18  ;;  %v5805_v14 = vld [vmem:[%s7815_s1 + $0xc14] ss:$72 sps:$4 sm:$0xff]  }
 0x1e1   :  { %4224 = vmatprep.subr.bf16.mxu1 %v5745_v19 }
 0x1e3   :  { %4184 = vmatpush2.bf16.msra.mxu0 %v5740_v21 }
 0x1e4   :  { %4225 = vmatpush2.bf16.msra.mxu1 %v5743_v22  ;;  %4185 = vmatprep.subr.bf16.mxu0 %v5748_v23 }
 0x1e5   :  { %4226 = vmatprep.subr.bf16.mxu1 %v5751_v24  ;;  %v5800_v24 = vld [vmem:[%s7815_s1 + $0x310] ss:$72 sps:$4 sm:$0xff]  }
 0x1e7   :  { %4186 = vmatpush2.bf16.msra.mxu0 %v5746_v25  ;;  %v5803_v25 = vld [vmem:[%s7815_s1 + $0xc10] ss:$72 sps:$4 sm:$0xff]  }
 0x1e8   :  { %4227 = vmatpush2.bf16.msra.mxu1 %v5749_v26  ;;  %4187 = vmatprep.subr.bf16.mxu0 %v5754_v27 }
 0x1e9   :  { %4228 = vmatprep.subr.bf16.mxu1 %v5757_v28 }
 0x1eb   :  { %4188 = vmatpush2.bf16.msra.mxu0 %v5752_v29  ;;  %v5806_v29 = vld [vmem:[%s7815_s1 + $0x280] ss:$72 sps:$4 sm:$0xff]  }
 0x1ec   :  { %4229 = vmatpush2.bf16.msra.mxu1 %v5755_v30  ;;  %4189 = vmatprep.subr.bf16.mxu0 %v5760_v31  ;;  %v5809_v30 = vld [vmem:[%s7815_s1 + $0xb80] ss:$72 sps:$4 sm:$0xff]   ;;  %v5814_v31 = vld [vmem:[%s7815_s1 + $0x1f4] ss:$72 sps:$4 sm:$0xff]  }
 0x1ed   :  { %4230 = vmatprep.subr.bf16.mxu1 %v5763_v32  ;;  %v5817_v32 = vld [vmem:[%s7815_s1 + $0xaf4] ss:$72 sps:$4 sm:$0xff]  }
 0x1ef   :  { %4190 = vmatpush2.bf16.msra.mxu0 %v5758_v33  ;;  %v5812_v33 = vld [vmem:[%s7815_s1 + $0x1f0] ss:$72 sps:$4 sm:$0xff]  }
 0x1f0   :  { %4231 = vmatpush2.bf16.msra.mxu1 %v5761_v34  ;;  %4191 = vmatprep.subr.bf16.mxu0 %v5766_v36  ;;  %v5815_v34 = vld [vmem:[%s7815_s1 + $0xaf0] ss:$72 sps:$4 sm:$0xff]   ;;  %v5820_v36 = vld [vmem:[%s7815_s1 + $0x164] ss:$72 sps:$4 sm:$0xff]  }
 0x1f1   :  { %4232 = vmatprep.subr.bf16.mxu1 %v5769_v37  ;;  %v5823_v37 = vld [vmem:[%s7815_s1 + $0xa64] ss:$72 sps:$4 sm:$0xff]  }
 0x1f3   :  { %4192 = vmatpush2.bf16.msra.mxu0 %v5764_v39  ;;  %v5818_v39 = vld [vmem:[%s7815_s1 + $0x160] ss:$72 sps:$4 sm:$0xff]  }
 0x1f4   :  { %4233 = vmatpush2.bf16.msra.mxu1 %v5767_v41  ;;  %4193 = vmatprep.subr.bf16.mxu0 %v5772_v42  ;;  %v5821_v41 = vld [vmem:[%s7815_s1 + $0xa60] ss:$72 sps:$4 sm:$0xff]   ;;  %v5826_v42 = vld [vmem:[%s7815_s1 + $0xd4] ss:$72 sps:$4 sm:$0xff]  }
 0x1f5   :  { %4234 = vmatprep.subr.bf16.mxu1 %v5775_v45  ;;  %v5829_v45 = vld [vmem:[%s7815_s1 + $0x9d4] ss:$72 sps:$4 sm:$0xff]  }
 0x1f7   :  { %4194 = vmatpush2.bf16.msra.mxu0 %v5770_v46  ;;  %v5824_v46 = vld [vmem:[%s7815_s1 + $0xd0] ss:$72 sps:$4 sm:$0xff]  }
 0x1f8   :  { %4235 = vmatpush2.bf16.msra.mxu1 %v5773_v47  ;;  %4195 = vmatprep.subr.bf16.mxu0 %v5778_v56  ;;  %v5827_v47 = vld [vmem:[%s7815_s1 + $0x9d0] ss:$72 sps:$4 sm:$0xff]   ;;  %v5832_v56 = vld [vmem:[%s7815_s1 + $0x44] ss:$72 sps:$4 sm:$0xff]  }
 0x1f9   :  { %4236 = vmatprep.subr.bf16.mxu1 %v5781_v63  ;;  %v5835_v63 = vld [vmem:[%s7815_s1 + $0x944] ss:$72 sps:$4 sm:$0xff]  }
 0x1fb   :  { %4196 = vmatpush2.bf16.msra.mxu0 %v5776_v5  ;;  %v5830_v5 = vld [vmem:[%s7815_s1 + $0x40] ss:$72 sps:$4 sm:$0xff]  }
 0x1fc   :  { %4237 = vmatpush2.bf16.msra.mxu1 %v5779_v48  ;;  %4197 = vmatprep.subr.bf16.mxu0 %v5784_v50  ;;  %v5833_v48 = vld [vmem:[%s7815_s1 + $0x940] ss:$72 sps:$4 sm:$0xff]   ;;  %v5838_v50 = vld [vmem:[%s7815_s1 + $0x8b4] ss:$72 sps:$4 sm:$0xff]  }
 0x1fd   :  { %4238 = vmatprep.subr.bf16.mxu1 %v5787_v51  ;;  %v5841_v51 = vld [vmem:[%s7815_s1 + $0x11b4] ss:$72 sps:$4 sm:$0xff]  }
 0x1ff   :  { %4198 = vmatpush2.bf16.msra.mxu0 %v5782_v52  ;;  %v5836_v52 = vld [vmem:[%s7815_s1 + $0x8b0] ss:$72 sps:$4 sm:$0xff]  }
 0x200   :  { %4239 = vmatpush2.bf16.msra.mxu1 %v5785_v53  ;;  %4249 = vmatprep.subr.bf16.mxu0 %v5790_v55  ;;  %v5839_v53 = vld [vmem:[%s7815_s1 + $0x11b0] ss:$72 sps:$4 sm:$0xff]   ;;  %v5844_v55 = vld [vmem:[%s7815_s1 + $0x824] ss:$72 sps:$4 sm:$0xff]  }
 0x201   :  { %4290 = vmatprep.subr.bf16.mxu1 %v5793_v59  ;;  %v5847_v59 = vld [vmem:[%s7815_s1 + $0x1124] ss:$72 sps:$4 sm:$0xff]  }
 0x202   :  { %v3955_v0 = vpop.f32.mrf.mxu0  ;;  %4200 = vmatmul.mubr.bf16.vlgmr.msra.gmra.mxu0 %v6120_v16 }
 0x203   :  { %v3996_v4 = vpop.f32.mrf.mxu1  ;;  %4241 = vmatmul.mubr.bf16.vlgmr.msra.gmra.mxu1 %v6122_v17  ;;  %v3956_v6 = vadd.f32 %v3955_v0, %v658_v1  ;;  %4250 = vmatpush1.bf16.msra.mxu0 %v5788_v12  ;;  %v5842_v1 = vld [vmem:[%s7815_s1 + $0x820] ss:$72 sps:$4 sm:$0xff]   ;;  %v5856_v0 = vld [vmem:[%s7815_s1 + $0x704] ss:$72 sps:$4 sm:$0xff]  }
 0x204   :  { %4291 = vmatpush1.bf16.msra.mxu1 %v5791_v57  ;;  %v3957_v10 = vpop.f32.mrf.mxu0  ;;  %4251 = vmatprep.subr.bf16.mxu0 %v5796_v58  ;;  %v5845_v12 = vld [vmem:[%s7815_s1 + $0x1120] ss:$72 sps:$4 sm:$0xff]   ;;  %v5850_v57 = vld [vmem:[%s7815_s1 + $0x794] ss:$72 sps:$4 sm:$0xff]  }
 0x205   :  { %v3998_v11 = vpop.f32.mrf.mxu1  ;;  %4292 = vmatprep.subr.bf16.mxu1 %v5799_v60  ;;  %v7603_v18 = vadd.f32 %v3996_v4, %v3956_v6  ;;  %v3958_v19 = vadd.f32 %v3957_v10, %v662_v61  ;;  %4281 = vmatprep.mubr.bf16.mxu0 %v6069_v62  ;;  %v5808_v62 = vld [vmem:[%s7815_s1 + $0x284] ss:$72 sps:$4 sm:$0xff]   ;;  %v5853_v58 = vld [vmem:[%s7815_s1 + $0x1094] ss:$72 sps:$4 sm:$0xff]   ;;  %v5848_v60 = vld [vmem:[%s7815_s1 + $0x790] ss:$72 sps:$4 sm:$0xff]  }
 0x206   :  { %4322 = vmatprep.mubr.bf16.mxu1 %v6080_v3  ;;  %v3959_v21 = vpop.f32.mrf.mxu0  ;;  %v5811_v3 = vld [vmem:[%s7815_s1 + $0xb84] ss:$72 sps:$4 sm:$0xff]   ;;  %v5851_v61 = vld [vmem:[%s7815_s1 + $0x1090] ss:$72 sps:$4 sm:$0xff]   ;;  %v5854_v6 = vld [vmem:[%s7815_s1 + $0x700] ss:$72 sps:$4 sm:$0xff]  }
 0x207   :  { %v4000_v22 = vpop.f32.mrf.mxu1  ;;  %v7607_v23 = vadd.f32 %v3998_v11, %v3958_v19  ;;  %4252 = vmatpush1.bf16.msra.mxu0 %v5794_v7  ;;  %v5859_v4 = vld [vmem:[%s7815_s1 + $0x1004] ss:$72 sps:$4 sm:$0xff]   ;;  %v5857_v7 = vld [vmem:[%s7815_s1 + $0x1000] ss:$72 sps:$4 sm:$0xff]   ;;  %v5865_v10 = vld [vmem:[%s7815_s1 + $0xf74] ss:$72 sps:$4 sm:$0xff]  }
 0x208   :  { %4293 = vmatpush1.bf16.msra.mxu1 %v5797_v8  ;;  %v3960_v26 = vpop.f32.mrf.mxu0  ;;  %4253 = vmatprep.subr.bf16.mxu0 %v5802_v13  ;;  %v5862_v8 = vld [vmem:[%s7815_s1 + $0x674] ss:$72 sps:$4 sm:$0xff]   ;;  %v5860_v11 = vld [vmem:[%s7815_s1 + $0x670] ss:$72 sps:$4 sm:$0xff]   ;;  %v5871_v19 = vld [vmem:[%s7815_s1 + $0xee4] ss:$72 sps:$4 sm:$0xff]  }
 0x209   :  { %v4001_v27 = vpop.f32.mrf.mxu1  ;;  %4294 = vmatprep.subr.bf16.mxu1 %v5805_v14  ;;  %v4383_v28 = vcombine.low %v7603_v18, %v7607_v23  ;;  %v5863_v13 = vld [vmem:[%s7815_s1 + $0xf70] ss:$72 sps:$4 sm:$0xff]   ;;  %v5868_v14 = vld [vmem:[%s7815_s1 + $0x5e4] ss:$72 sps:$4 sm:$0xff]   ;;  %v5866_v21 = vld [vmem:[%s7815_s1 + $0x5e0] ss:$72 sps:$4 sm:$0xff]  }
 0x20a   :  { %v5869_v22 = vld [vmem:[%s7815_s1 + $0xee0] ss:$72 sps:$4 sm:$0xff]   ;;  %v5872_v26 = vld [vmem:[%s7815_s1 + $0x550] ss:$72 sps:$4 sm:$0xff]  }
 0x20b   :  { %4254 = vmatpush1.bf16.msra.mxu0 %v5800_v24  ;;  %v5874_v24 = vld [vmem:[%s7815_s1 + $0x554] ss:$72 sps:$4 sm:$0xff]   ;;  %v5875_v27 = vld [vmem:[%s7815_s1 + $0xe50] ss:$72 sps:$4 sm:$0xff]  }
 0x20c   :  { %4295 = vmatpush1.bf16.msra.mxu1 %v5803_v25  ;;  %4255 = vmatprep.subr.bf16.mxu0 %v5808_v62  ;;  %v5877_v25 = vld [vmem:[%s7815_s1 + $0xe54] ss:$72 sps:$4 sm:$0xff]   ;;  %v5880_v62 = vld [vmem:[%s7815_s1 + $0x4c4] ss:$72 sps:$4 sm:$0xff]  }
 0x20d   :  { %4296 = vmatprep.subr.bf16.mxu1 %v5811_v3  ;;  %v5883_v3 = vld [vmem:[%s7815_s1 + $0xdc4] ss:$72 sps:$4 sm:$0xff]  }
 0x20f   :  { %4256 = vmatpush1.bf16.msra.mxu0 %v5806_v29  ;;  %v5878_v29 = vld [vmem:[%s7815_s1 + $0x4c0] ss:$72 sps:$4 sm:$0xff]  }
 0x210   :  { %4297 = vmatpush1.bf16.msra.mxu1 %v5809_v30  ;;  %4257 = vmatprep.subr.bf16.mxu0 %v5814_v31  ;;  %v5881_v30 = vld [vmem:[%s7815_s1 + $0xdc0] ss:$72 sps:$4 sm:$0xff]   ;;  %v666_v31 = vrot.slane %v7565_v54, %v633_v2 }
 0x211   :  { %4298 = vmatprep.subr.bf16.mxu1 %v5817_v32  ;;  %v670_v32 = vrot.slane %v7565_v54, %v637_v9  ;;  %v4391_v9 = vrot.slane %v4383_v28, %v6041_v49 }
 0x213   :  { %4258 = vmatpush1.bf16.msra.mxu0 %v5812_v33 }
 0x214   :  { %4299 = vmatpush1.bf16.msra.mxu1 %v5815_v34  ;;  %4259 = vmatprep.subr.bf16.mxu0 %v5820_v36 }
 0x215   :  { %4300 = vmatprep.subr.bf16.mxu1 %v5823_v37 }
 0x217   :  { %4260 = vmatpush1.bf16.msra.mxu0 %v5818_v39 }
 0x218   :  { %4301 = vmatpush1.bf16.msra.mxu1 %v5821_v41  ;;  %4261 = vmatprep.subr.bf16.mxu0 %v5826_v42 }
 0x219   :  { %4302 = vmatprep.subr.bf16.mxu1 %v5829_v45 }
 0x21b   :  { %4262 = vmatpush1.bf16.msra.mxu0 %v5824_v46 }
 0x21c   :  { %4303 = vmatpush1.bf16.msra.mxu1 %v5827_v47  ;;  %4263 = vmatprep.subr.bf16.mxu0 %v5832_v56 }
 0x21d   :  { %4304 = vmatprep.subr.bf16.mxu1 %v5835_v63 }
 0x21f   :  { %4264 = vmatpush1.bf16.msra.mxu0 %v5830_v5 }
 0x220   :  { %4305 = vmatpush1.bf16.msra.mxu1 %v5833_v48  ;;  %4265 = vmatprep.subr.bf16.mxu0 %v5838_v50  ;;  %v678_v48 = vrot.slane %v7565_v54, %v645_v44  ;;  %v686_v44 = vrot.slane %v7565_v54, %v653_v20  ;;  %v619_v20 = vld [vmem:[%s7817_s2 + $0x10] sm:$0x3] }
 0x221   :  { %4306 = vmatprep.subr.bf16.mxu1 %v5841_v51 }
 0x223   :  { %4266 = vmatpush2.bf16.msra.mxu0 %v5836_v52 }
 0x224   :  { %4307 = vmatpush2.bf16.msra.mxu1 %v5839_v53  ;;  %4267 = vmatprep.subr.bf16.mxu0 %v5844_v55 }
 0x225   :  { %4308 = vmatprep.subr.bf16.mxu1 %v5847_v59 }
 0x227   :  { %4268 = vmatpush2.bf16.msra.mxu0 %v5842_v1 }
 0x228   :  { %4309 = vmatpush2.bf16.msra.mxu1 %v5845_v12  ;;  %4269 = vmatprep.subr.bf16.mxu0 %v5850_v57 }
 0x229   :  { %4310 = vmatprep.subr.bf16.mxu1 %v5853_v58 }
 0x22b   :  { %4270 = vmatpush2.bf16.msra.mxu0 %v5848_v60 }
 0x22c   :  { %4311 = vmatpush2.bf16.msra.mxu1 %v5851_v61  ;;  %4271 = vmatprep.subr.bf16.mxu0 %v5856_v0 }
 0x22d   :  { %4312 = vmatprep.subr.bf16.mxu1 %v5859_v4 }
 0x22f   :  { %4272 = vmatpush2.bf16.msra.mxu0 %v5854_v6 }
 0x230   :  { %4313 = vmatpush2.bf16.msra.mxu1 %v5857_v7  ;;  %4273 = vmatprep.subr.bf16.mxu0 %v5862_v8 }
 0x231   :  { %4314 = vmatprep.subr.bf16.mxu1 %v5865_v10 }
 0x233   :  { %4274 = vmatpush2.bf16.msra.mxu0 %v5860_v11 }
 0x234   :  { %4315 = vmatpush2.bf16.msra.mxu1 %v5863_v13  ;;  %4275 = vmatprep.subr.bf16.mxu0 %v5868_v14 }
 0x235   :  { %4316 = vmatprep.subr.bf16.mxu1 %v5871_v19 }
 0x237   :  { %4276 = vmatpush2.bf16.msra.mxu0 %v5866_v21 }
 0x238   :  { %4317 = vmatpush2.bf16.msra.mxu1 %v5869_v22  ;;  %4277 = vmatprep.subr.bf16.mxu0 %v5874_v24  ;;  %v694_v24 = vrot.slane %v619_v20, %v6721_v38 }
 0x239   :  { %4318 = vmatprep.subr.bf16.mxu1 %v5877_v25 }
 0x23b   :  { %4278 = vmatpush2.bf16.msra.mxu0 %v5872_v26 }
 0x23c   :  { %4319 = vmatpush2.bf16.msra.mxu1 %v5875_v27  ;;  %4279 = vmatprep.subr.bf16.mxu0 %v5880_v62 }
 0x23d   :  { %4320 = vmatprep.subr.bf16.mxu1 %v5883_v3 }
 0x23f   :  { %4280 = vmatpush2.bf16.msra.mxu0 %v5878_v29 }
 0x240   :  { %4321 = vmatpush2.bf16.msra.mxu1 %v5881_v30 }
 0x242   :  { %v4037_v33 = vpop.f32.mrf.mxu0  ;;  %4282 = vmatmul.mubr.bf16.vlgmr.msra.gmra.mxu0 %v6120_v16 }
 0x243   :  { %v4078_v34 = vpop.f32.mrf.mxu1  ;;  %4323 = vmatmul.mubr.bf16.vlgmr.msra.gmra.mxu1 %v6122_v17  ;;  %v4038_v36 = vadd.f32 %v4037_v33, %v666_v31  ;;  %v674_v17 = vrot.slane %v7565_v54, %v641_v40  ;;  %v682_v40 = vrot.slane %v7565_v54, %v649_v15  ;;  %v690_v54 = vrot.slane %v619_v20, %v6712_v35 }
 0x244   :  { %v4039_v37 = vpop.f32.mrf.mxu0 }
 0x245   :  { %v4080_v39 = vpop.f32.mrf.mxu1  ;;  %v4079_v41 = vadd.f32 %v4078_v34, %v4038_v36  ;;  %v4040_v42 = vadd.f32 %v4039_v37, %v670_v32 }
 0x246   :  { %v4041_v45 = vpop.f32.mrf.mxu0 }
 0x247   :  { %v4082_v46 = vpop.f32.mrf.mxu1  ;;  %v4081_v47 = vadd.f32 %v4080_v39, %v4040_v42 }
 0x248   :  { %v4042_v56 = vpop.f32.mrf.mxu0 }
 0x249   :  { %v4083_v2 = vpop.f32.mrf.mxu1  ;;  %v4384_v63 = vcombine.low %v4079_v41, %v4081_v47 }
 0x24b   :  { %v4398_v16 = vrot.slane %v4384_v63, %v6041_v49 }
 0x24d   :  { %v4399_v5 = vcombine.low %v4391_v9, %v4398_v16 }
 0x24f   :  { %4432 = vst [vmem:[%s7818_s3 + $0x10] sm:$0xff] %v4399_v5 }
 0x282   :  { %v4119_v50 = vpop.f32.mrf.mxu0 }
 0x283   :  { %v4160_v51 = vpop.f32.mrf.mxu1  ;;  %v4120_v52 = vadd.f32 %v4119_v50, %v674_v17 }
 0x284   :  { %v4121_v18 = vpop.f32.mrf.mxu0 }
 0x285   :  { %v4162_v23 = vpop.f32.mrf.mxu1  ;;  %v4161_v28 = vadd.f32 %v4160_v51, %v4120_v52  ;;  %v4122_v53 = vadd.f32 %v4121_v18, %v678_v48 }
 0x286   :  { %v4123_v55 = vpop.f32.mrf.mxu0 }
 0x287   :  { %v4164_v59 = vpop.f32.mrf.mxu1  ;;  %v4163_v1 = vadd.f32 %v4162_v23, %v4122_v53 }
 0x288   :  { %v4124_v12 = vpop.f32.mrf.mxu0 }
 0x289   :  { %v4165_v57 = vpop.f32.mrf.mxu1  ;;  %v4400_v58 = vcombine.low %v4161_v28, %v4163_v1 }
 0x28b   :  { %v4408_v22 = vrot.slane %v4400_v58, %v6041_v49 }
 0x2c2   :  { %v4201_v60 = vpop.f32.mrf.mxu0 }
 0x2c3   :  { %v4242_v61 = vpop.f32.mrf.mxu1  ;;  %v4202_v0 = vadd.f32 %v4201_v60, %v682_v40 }
 0x2c4   :  { %v4203_v4 = vpop.f32.mrf.mxu0 }
 0x2c5   :  { %v4244_v6 = vpop.f32.mrf.mxu1  ;;  %v4243_v7 = vadd.f32 %v4242_v61, %v4202_v0  ;;  %v4204_v8 = vadd.f32 %v4203_v4, %v686_v44 }
 0x2c6   :  { %v4205_v10 = vpop.f32.mrf.mxu0 }
 0x2c7   :  { %v4246_v11 = vpop.f32.mrf.mxu1  ;;  %v4245_v13 = vadd.f32 %v4244_v6, %v4204_v8 }
 0x2c8   :  { %v4206_v14 = vpop.f32.mrf.mxu0 }
 0x2c9   :  { %v4247_v19 = vpop.f32.mrf.mxu1  ;;  %v4401_v21 = vcombine.low %v4243_v7, %v4245_v13 }
 0x2cb   :  { %v4415_v15 = vrot.slane %v4401_v21, %v6041_v49 }
 0x2cd   :  { %v4416_v43 = vcombine.low %v4408_v22, %v4415_v15 }
 0x2cf   :  { %4433 = vst [vmem:[%s7818_s3 + $0x18] sm:$0xff] %v4416_v43 }
 0x302   :  { %v4283_v25 = vpop.f32.mrf.mxu0 }
 0x303   :  { %v4324_v26 = vpop.f32.mrf.mxu1  ;;  %v4284_v27 = vadd.f32 %v4283_v25, %v690_v54 }
 0x304   :  { %v4285_v62 = vpop.f32.mrf.mxu0 }
 0x305   :  { %v4326_v3 = vpop.f32.mrf.mxu1  ;;  %v4286_v29 = vadd.f32 %v4285_v62, %v694_v24  ;;  %v4325_v32 = vadd.f32 %v4324_v26, %v4284_v27 }
 0x306   :  { %v4287_v30 = vpop.f32.mrf.mxu0 }
 0x307   :  { %v4328_v31 = vpop.f32.mrf.mxu1  ;;  %v4327_v33 = vadd.f32 %v4326_v3, %v4286_v29 }
 0x308   :  { %v4288_v34 = vpop.f32.mrf.mxu0 }
 0x309   :  { %v4329_v36 = vpop.f32.mrf.mxu1  ;;  %v4417_v37 = vcombine.low %v4325_v32, %v4327_v33 }
 0x30b   :  { %v4424_v35 = vrot.slane %v4417_v37, %v6041_v49 }
 0x30d   :  { %4437 = vst.msk [vmem:[%s7818_s3 + $0x20] sm:$0xf] %vm4436_vm2, %v4424_v35 }

// kernel: decoder_forward.3
= control target key start
LH: loop header
LB: loop body
LE: loop exit
PB: predicated region body
PF: predicated region fallthrough
CT: control target
= control target key end

     0   :  { %s20478_s13 = smov 0   ;;  %s26080_s0 = inlined_call_operand.vmem [shape: f32[2,20,112], index: 0, kind: input, shape index: {}]   ;;  %s26081_s1 = inlined_call_operand.vmem [shape: f32[5,112,108], index: 1, kind: input, shape index: {}]   ;;  %s26082_s2 = inlined_call_operand.vmem [shape: f32[6,48,108], index: 2, kind: input, shape index: {}]   ;;  %s26083_s3 = inlined_call_operand.vmem [shape: f32[6,48,96], index: 3, kind: input, shape index: {}]   ;;  %s26084_s4 = inlined_call_operand.vmem [shape: f32[104,48], index: 4, kind: input, shape index: {}]   ;;  %s26085_s5 = inlined_call_operand.vmem [shape: f32[12,24], index: 5, kind: input, shape index: {}]   ;;  %s26086_s6 = inlined_call_operand.vmem [shape: f32[2,24,12], index: 6, kind: input, shape index: {}]   ;;  %s26087_s7 = inlined_call_operand.vmem [shape: f32[1,108], index: 7, kind: input, shape index: {}]   ;;  %s26088_s8 = inlined_call_operand.vmem [shape: f32[1,108], index: 8, kind: input, shape index: {}]   ;;  %s26089_s9 = inlined_call_operand.vmem [shape: f32[1,96], index: 9, kind: input, shape index: {}]   ;;  %s26090_s10 = inlined_call_operand.vmem [shape: f32[2,24,96], index: 10, kind: output, shape index: {}]  }
   0x1 LB: > { %s15844_s14 = sadd.s32 4294967295, %s20415_s13   ;;  %p15848_p0 = scmp.ge.s32.totalorder %s20415_s13, 1  ;;  %s20415_s13 = sphi %s20478_s13, %s20_s13  }
   0x2   : > { %p312_p1 = scmp.lt.s32.totalorder %s20415_s13, 3 }
   0x4   : > { %p313_p2 = pnand %p15848_p0, %p312_p1 }
   0x5   : > { %p20497_p3 = scmp.lt.s32.totalorder (!%p313_p2), %s15844_s14, 1  ;;  %s20419_s25 = smov (!%p313_p2), 127  }
   0x6   : > { %316 = sbr.rel (%p313_p2) target bundleno = 3545 (0xdd9), region = 60  ;;  %s20420_s26 = smov (!%p313_p2), 126  }
   0x7   : > { %s20421_s27 = smov (!%p313_p2), 125   ;;  %s20422_s28 = smov (!%p313_p2), 124  }
   0xb   : > { %v392_v0 = vld [vmem:[%s26081_s1 + $0x68] sm:$0xff]  ;;  %v391_v1 = vld [vmem:[%s26081_s1 + $0x60] sm:$0xff]  ;;  %v390_v2 = vld [vmem:[%s26081_s1 + $0x58] sm:$0xff]  ;;  %v20417_v3 = vmov 0.0   ;;  %vm20418_vm0 = vmmov 0   ;;  %s26093_s14 = smov (!%p20497_p3, %s15844_s14), 1 }
   0xc   : > { %17424 = vmatprep.subr.mxu0 %v20417_v3  ;;  %v20502_v4 = vand.u32 4294901760, %v392_v0  ;;  %v20504_v5 = vand.u32 4294901760, %v391_v1  ;;  %v20506_v6 = vand.u32 4294901760, %v390_v2  ;;  %v389_v7 = vld [vmem:[%s26081_s1 + $0x50] sm:$0xff]  ;;  %17461 = vmatprep.subr.mxu1 %v20417_v3  ;;  %v388_v8 = vld [vmem:[%s26081_s1 + $0x48] sm:$0xff]  ;;  %v387_v9 = vld [vmem:[%s26081_s1 + $0x40] sm:$0xff] }
   0xd   : > { %v20518_v10 = vand.u32 4294901760, %v389_v7  ;;  %v20520_v11 = vand.u32 4294901760, %v388_v8  ;;  %v20522_v12 = vand.u32 4294901760, %v387_v9  ;;  %v386_v13 = vld [vmem:[%s26081_s1 + $0x38] sm:$0xff]  ;;  %v385_v14 = vld [vmem:[%s26081_s1 + $0x30] sm:$0xff]  ;;  %17452 = vmatprep.mubr.msk.f32.mxu0 %vm20418_vm0, %v20417_v3  ;;  %17489 = vmatprep.mubr.msk.f32.mxu1 %vm20418_vm0, %v20417_v3  ;;  %v384_v19 = vld [vmem:[%s26081_s1 + $0x28] sm:$0xff] }
   0xe   : > { %17425 = vmatpush3.msra.mxu0 %v20502_v4  ;;  %v20536_v15 = vsub.f32 %v392_v0, %v20502_v4  ;;  %v20539_v16 = vsub.f32 %v391_v1, %v20504_v5  ;;  %v20541_v17 = vand.u32 4294901760, %v386_v13  ;;  %v20544_v18 = vsub.f32 %v390_v2, %v20506_v6  ;;  %s20382_s16 = smul.u32 24, %s26093_s14  ;;  %v383_v29 = vld [vmem:[%s26081_s1 + $0x20] sm:$0xff]  ;;  %v382_v36 = vld [vmem:[%s26081_s1 + $0x18] sm:$0xff]  ;;  %v381_v41 = vld [vmem:[%s26081_s1 + $0x10] sm:$0xff] }
   0xf   : > { %17426 = vmatprep.subr.mxu0 %v20417_v3  ;;  %v20557_v20 = vsub.f32 %v389_v7, %v20518_v10  ;;  %v20560_v21 = vsub.f32 %v388_v8, %v20520_v11  ;;  %v20566_v25 = vand.u32 4294901760, %v385_v14  ;;  %v20571_v27 = vand.u32 4294901760, %v384_v19  ;;  %v380_v53 = vld [vmem:[%s26081_s1 + $0x8] sm:$0xff]  ;;  %v379_v56 = vld [vmem:[%s26081_s1] sm:$0xff] }
  0x10   : > { %17427 = vmatpush3.msra.mxu0 %v20504_v5  ;;  %v525_v22 = vand.u32 4294901760, %v20536_v15  ;;  %v532_v23 = vand.u32 4294901760, %v20539_v16  ;;  %v539_v24 = vand.u32 4294901760, %v20544_v18  ;;  %v20578_v30 = vsub.f32 %v387_v9, %v20522_v12  ;;  %s354_s23 = scalar_lea.vmem %s26080_s0, %s20382_s16 }
  0x11   : > { %17428 = vmatprep.subr.mxu0 %v20417_v3  ;;  %v546_v26 = vand.u32 4294901760, %v20557_v20  ;;  %v553_v28 = vand.u32 4294901760, %v20560_v21  ;;  %v20591_v34 = vsub.f32 %v386_v13, %v20541_v17  ;;  %v20606_v39 = vand.u32 4294901760, %v383_v29  ;;  %v371_v44 = vld [vmem:[%s354_s23 + $0x10] sm:$0xf]  ;;  %v369_v49 = vld [vmem:[%s354_s23] sm:$0xff] }
  0x12   : > { %17429 = vmatpush3.msra.mxu0 %v20506_v6  ;;  %v526_v31 = vsub.f32 %v20536_v15, %v525_v22  ;;  %v533_v32 = vsub.f32 %v20539_v16, %v532_v23  ;;  %v540_v33 = vsub.f32 %v20544_v18, %v539_v24  ;;  %v560_v40 = vand.u32 4294901760, %v20578_v30  ;;  %v370_v50 = vld [vmem:[%s354_s23 + $0x8] sm:$0xff]  ;;  %s359_s23 = scalar_lea.vmem %s26090_s10, %s20382_s16 }
  0x13   : > { %17430 = vmatprep.subr.mxu0 %v20417_v3  ;;  %v547_v35 = vsub.f32 %v20557_v20, %v546_v26  ;;  %v554_v42 = vsub.f32 %v20560_v21, %v553_v28  ;;  %v20617_v43 = vsub.f32 %v385_v14, %v20566_v25  ;;  %v20620_v46 = vand.u32 4294901760, %v382_v36 }
  0x14   : > { %17431 = vmatpush3.msra.mxu0 %v20518_v10  ;;  %v527_v37 = vand.u32 4294901760, %v526_v31  ;;  %v534_v38 = vand.u32 4294901760, %v533_v32  ;;  %v541_v45 = vand.u32 4294901760, %v540_v33  ;;  %v567_v47 = vand.u32 4294901760, %v20591_v34 }
  0x15   : > { %17432 = vmatprep.subr.mxu0 %v20417_v3  ;;  %v20624_v48 = vsub.f32 %v384_v19, %v20571_v27  ;;  %v548_v51 = vand.u32 4294901760, %v547_v35  ;;  %v20628_v52 = vand.u32 4294901760, %v381_v41  ;;  %vm360_vm1 = vcmask 912384  }
  0x16   : > { %17433 = vmatpush3.msra.mxu0 %v20520_v11  ;;  %17462 = vmatpush3.msra.mxu1 %v527_v37  ;;  %v561_v54 = vsub.f32 %v20578_v30, %v560_v40  ;;  %v574_v55 = vand.u32 4294901760, %v20617_v43  ;;  %v20642_v57 = vsub.f32 %v383_v29, %v20606_v39  ;;  %361 = vst.msk [vmem:[#allocation2] sm:$0xf] %vm360_vm1, %v20417_v3  ;;  %vm372_vm2 = vcmask 916480   ;;  %362 = vst.msk [vmem:[#allocation2 + $0x18] sm:$0xf] %vm360_vm1, %v20417_v3 }
  0x17   : > { %17434 = vmatprep.subr.mxu0 %v20417_v3  ;;  %17463 = vmatprep.subr.mxu1 %v20417_v3  ;;  %375 = vst.msk [vmem:[#allocation2 + $0x14] sm:$0xf] %vm360_vm1, %v371_v44  ;;  %v555_v58 = vand.u32 4294901760, %v554_v42  ;;  %v568_v59 = vsub.f32 %v20591_v34, %v567_v47  ;;  %v20654_v60 = vand.u32 4294901760, %v380_v53  ;;  %v581_v61 = vand.u32 4294901760, %v20624_v48 }
  0x18   : > { %17435 = vmatpush3.msra.mxu0 %v20522_v12  ;;  %17464 = vmatpush3.msra.mxu1 %v534_v38  ;;  %373 = vst.msk [vmem:[#allocation2 + $0x4] sm:$0xff] %vm372_vm2, %v369_v49  ;;  %374 = vst.msk [vmem:[#allocation2 + $0xc] sm:$0xff] %vm372_vm2, %v370_v50  ;;  %v20658_v62 = vsub.f32 %v382_v36, %v20620_v46  ;;  %v20662_v63 = vand.u32 4294901760, %v379_v56  ;;  %v562_v0 = vand.u32 4294901760, %v561_v54  ;;  %v588_v2 = vand.u32 4294901760, %v20642_v57 }
  0x19   : > { %17436 = vmatprep.subr.mxu0 %v20417_v3  ;;  %17465 = vmatprep.subr.mxu1 %v20417_v3  ;;  %v575_v1 = vsub.f32 %v20617_v43, %v574_v55  ;;  %v20670_v7 = vsub.f32 %v381_v41, %v20628_v52  ;;  %v569_v8 = vand.u32 4294901760, %v568_v59  ;;  %v582_v9 = vsub.f32 %v20624_v48, %v581_v61 }
  0x1a   : > { %17437 = vmatpush3.msra.mxu0 %v20541_v17  ;;  %17466 = vmatpush3.msra.mxu1 %v541_v45  ;;  %v595_v13 = vand.u32 4294901760, %v20658_v62  ;;  %v20680_v14 = vsub.f32 %v380_v53, %v20654_v60  ;;  %v589_v29 = vsub.f32 %v20642_v57, %v588_v2  ;;  %v20690_v33 = vsub.f32 %v379_v56, %v20662_v63 }
  0x1b   : > { %17438 = vmatprep.subr.mxu0 %v20417_v3  ;;  %17467 = vmatprep.subr.mxu1 %v20417_v3  ;;  %v576_v19 = vand.u32 4294901760, %v575_v1  ;;  %v602_v32 = vand.u32 4294901760, %v20670_v7  ;;  %v583_v36 = vand.u32 4294901760, %v582_v9  ;;  %vm1110_vm3 = vcmask 883712  }
  0x1c   : > { %17439 = vmatpush3.msra.mxu0 %v20566_v25  ;;  %17468 = vmatpush3.msra.mxu1 %v548_v51  ;;  %v596_v38 = vsub.f32 %v20658_v62, %v595_v13  ;;  %v609_v41 = vand.u32 4294901760, %v20680_v14  ;;  %v590_v42 = vand.u32 4294901760, %v589_v29  ;;  %v616_v49 = vand.u32 4294901760, %v20690_v33 }
  0x1d   : > { %17440 = vmatprep.subr.mxu0 %v20417_v3  ;;  %17469 = vmatprep.subr.mxu1 %v20417_v3  ;;  %v603_v45 = vsub.f32 %v20670_v7, %v602_v32  ;;  %vm363_vm4 = vcmask 877568   ;;  %vm4205_vm5 = vcmask 195584   ;;  %vm4147_vm6 = vcmask 1046528  }
  0x1e   : > { %17441 = vmatpush3.msra.mxu0 %v20571_v27  ;;  %17470 = vmatpush3.msra.mxu1 %v555_v58  ;;  %v597_v51 = vand.u32 4294901760, %v596_v38  ;;  %v610_v53 = vsub.f32 %v20680_v14, %v609_v41  ;;  %v617_v59 = vsub.f32 %v20690_v33, %v616_v49  ;;  %364 = vst.msk [vmem:[#allocation3] sm:$0x3] %vm363_vm4, %v20417_v3  ;;  %365 = vst.msk [vmem:[#allocation3 + $0x1a] sm:$0x3] %vm363_vm4, %v20417_v3  ;;  %vm4161_vm7 = vcmask 1045504  }
  0x1f   : > { %17442 = vmatprep.subr.mxu0 %v20417_v3  ;;  %17471 = vmatprep.subr.mxu1 %v20417_v3  ;;  %v376_v31 = vld [vmem:[#allocation2] sm:$0xff]  ;;  %v377_v54 = vld [vmem:[#allocation2 + $0x8] sm:$0xff]  ;;  %v604_v58 = vand.u32 4294901760, %v603_v45  ;;  %v378_v9 = vld [vmem:[#allocation2 + $0x10] sm:$0xff]  ;;  %vm4175_vm8 = vcmask 1044480   ;;  %vm4189_vm9 = vcmask 1043456  }
  0x20   : > { %17443 = vmatpush3.msra.mxu0 %v20606_v39  ;;  %17472 = vmatpush3.msra.mxu1 %v562_v0  ;;  %v401_v35 = vsel %vm372_vm2, %v376_v31, 0  ;;  %v404_v0 = vsel %vm372_vm2, %v377_v54, 0  ;;  %v407_v31 = vsel %vm372_vm2, %v378_v9, 0  ;;  %vm4740_vm10 = vcmask 850944  }
  0x21   : > { %17444 = vmatprep.subr.mxu0 %v20417_v3  ;;  %17473 = vmatprep.subr.mxu1 %v20417_v3  ;;  %v20696_v37 = vand.u32 4294901760, %v401_v35  ;;  %v20732_v29 = vand.u32 4294901760, %v404_v0  ;;  %vm366_vm11 = vcmask 385024   ;;  %vm5394_vm12 = vcmask 388096  }
  0x22   : > { %17445 = vmatpush3.msra.mxu0 %v20620_v46  ;;  %17474 = vmatpush3.msra.mxu1 %v569_v8  ;;  %v611_v8 = vand.u32 4294901760, %v610_v53  ;;  %368 = vst.msk [vmem:[#allocation4 + $0xd] sm:$0x1] %vm366_vm11, %v20417_v3  ;;  %367 = vst.msk [vmem:[#allocation4] sm:$0x1] %vm366_vm11, %v20417_v3  ;;  %vm5392_vm13 = vcmask 392192  }
  0x23   : > { %17446 = vmatprep.subr.mxu0 %v20417_v3  ;;  %17475 = vmatprep.subr.mxu1 %v20417_v3  ;;  %v20706_v44 = vsub.f32 %v401_v35, %v20696_v37  ;;  %v20742_v35 = vsub.f32 %v404_v0, %v20732_v29  ;;  %v15854_v0 = vld [vmem:[%s26081_s1 + $0x80] sm:$0xff]  ;;  %vm8796_vm14 = vcmask 97280   ;;  %vm15785_vm15 = vcmask 785408  }
  0x24   : > { %17447 = vmatpush3.msra.mxu0 %v20628_v52  ;;  %17476 = vmatpush3.msra.mxu1 %v576_v19  ;;  %v618_v19 = vand.u32 4294901760, %v617_v59 }
  0x25   : > { %17448 = vmatprep.subr.mxu0 %v20417_v3  ;;  %17477 = vmatprep.subr.mxu1 %v20417_v3  ;;  %v490_v50 = vand.u32 4294901760, %v20706_v44  ;;  %v500_v38 = vand.u32 4294901760, %v20742_v35 }
  0x26   : > { %17449 = vmatpush3.msra.mxu0 %v20654_v60  ;;  %17478 = vmatpush3.msra.mxu1 %v583_v36  ;;  %v20744_v36 = vand.u32 4294901760, %v407_v31 }
  0x27   : > { %17450 = vmatprep.subr.mxu0 %v20417_v3  ;;  %17479 = vmatprep.subr.mxu1 %v20417_v3  ;;  %v491_v56 = vsub.f32 %v20706_v44, %v490_v50  ;;  %v501_v45 = vsub.f32 %v20742_v35, %v500_v38 }
  0x28   : > { %17451 = vmatpush3.msra.mxu0 %v20662_v63  ;;  %17480 = vmatpush3.msra.mxu1 %v590_v42  ;;  %v20756_v42 = vsub.f32 %v407_v31, %v20744_v36 }
  0x29   : > { %17481 = vmatprep.subr.mxu1 %v20417_v3  ;;  %17498 = vmatprep.subr.mxu0 %v20417_v3  ;;  %v492_v1 = vand.u32 4294901760, %v491_v56  ;;  %v502_v53 = vand.u32 4294901760, %v501_v45 }
  0x2a   : > { %17482 = vmatpush3.msra.mxu1 %v597_v51  ;;  %v510_v51 = vand.u32 4294901760, %v20756_v42 }
  0x2b   : > { %17483 = vmatprep.subr.mxu1 %v20417_v3  ;;  %17453 = vmatmul.mubr.f32.vlgmr.msra.gmra.mxu0 %v492_v1 }
  0x2c   : > { %17484 = vmatpush3.msra.mxu1 %v604_v58  ;;  %17499 = vmatpush3.msra.mxu0 %v20536_v15  ;;  %v511_v54 = vsub.f32 %v20756_v42, %v510_v51 }
  0x2d   : > { %17485 = vmatprep.subr.mxu1 %v20417_v3  ;;  %17500 = vmatprep.subr.mxu0 %v20417_v3 }
  0x2e   : > { %17486 = vmatpush3.msra.mxu1 %v611_v8  ;;  %17501 = vmatpush3.msra.mxu0 %v20539_v16  ;;  %v512_v56 = vand.u32 4294901760, %v511_v54  ;;  %v15862_v16 = vld [vmem:[%s26081_s1 + $0xc0] sm:$0xff] }
  0x2f   : > { %17487 = vmatprep.subr.mxu1 %v20417_v3  ;;  %17502 = vmatprep.subr.mxu0 %v20417_v3 }
  0x30   : > { %17488 = vmatpush3.msra.mxu1 %v618_v19  ;;  %17503 = vmatpush3.msra.mxu0 %v20544_v18  ;;  %v15861_v18 = vld [vmem:[%s26081_s1 + $0xb8] sm:$0xff] }
  0x31   : > { %17490 = vmatmul.mubr.f32.vlgmr.msra.gmra.mxu1 %v20696_v37  ;;  %17504 = vmatprep.subr.mxu0 %v20417_v3 }
  0x32   : > { %17535 = vmatprep.subr.mxu1 %v20417_v3  ;;  %17505 = vmatpush3.msra.mxu0 %v20557_v20  ;;  %v20934_v20 = vand.u32 4294901760, %v15862_v16 }
  0x33   : > { %17536 = vmatpush3.msra.mxu1 %v20502_v4  ;;  %17506 = vmatprep.subr.mxu0 %v20417_v3 }
  0x34   : > { %17537 = vmatprep.subr.mxu1 %v20417_v3  ;;  %17507 = vmatpush3.msra.mxu0 %v20560_v21 }
  0x35   : > { %17538 = vmatpush3.msra.mxu1 %v20504_v5  ;;  %17508 = vmatprep.subr.mxu0 %v20417_v3 }
  0x36   : > { %17539 = vmatprep.subr.mxu1 %v20417_v3  ;;  %17509 = vmatpush3.msra.mxu0 %v20578_v30 }
  0x37   : > { %17540 = vmatpush3.msra.mxu1 %v20506_v6  ;;  %17510 = vmatprep.subr.mxu0 %v20417_v3 }
  0x38   : > { %17541 = vmatprep.subr.mxu1 %v20417_v3  ;;  %17511 = vmatpush3.msra.mxu0 %v20591_v34 }
  0x39   : > { %17542 = vmatpush3.msra.mxu1 %v20518_v10  ;;  %17512 = vmatprep.subr.mxu0 %v20417_v3 }
  0x3a   : > { %17543 = vmatprep.subr.mxu1 %v20417_v3  ;;  %17513 = vmatpush3.msra.mxu0 %v20617_v43 }
  0x3b   : > { %17544 = vmatpush3.msra.mxu1 %v20520_v11  ;;  %17514 = vmatprep.subr.mxu0 %v20417_v3 }
  0x3c   : > { %17545 = vmatprep.subr.mxu1 %v20417_v3  ;;  %17515 = vmatpush3.msra.mxu0 %v20624_v48 }
  0x3d   : > { %17455 = vmatprep.mubr.msk.f32.mxu0 %vm20418_vm0, %v20417_v3  ;;  %17516 = vmatprep.subr.mxu0 %v20417_v3 }
  0x3e   : > { %17546 = vmatpush3.msra.mxu1 %v20522_v12  ;;  %17517 = vmatpush3.msra.mxu0 %v20642_v57 }
  0x3f   : > { %17547 = vmatprep.subr.mxu1 %v20417_v3  ;;  %17456 = vmatmul.mubr.f32.gmra.mxu0 %v502_v53  ;;  %v15852_v53 = vld [vmem:[%s26081_s1 + $0x70] sm:$0xff] }
  0x40   : > { %17518 = vmatprep.subr.mxu0 %v20417_v3  ;;  %17548 = vmatpush3.msra.mxu1 %v20541_v17 }
  0x41   : > { %17519 = vmatpush3.msra.mxu0 %v20658_v62  ;;  %17549 = vmatprep.subr.mxu1 %v20417_v3  ;;  %v15856_v62 = vld [vmem:[%s26081_s1 + $0x90] sm:$0xff] }
  0x42   : > { %17520 = vmatprep.subr.mxu0 %v20417_v3  ;;  %17458 = vmatprep.mubr.msk.f32.mxu0 %vm20418_vm0, %v20417_v3 }
  0x43   : > { %17521 = vmatpush3.msra.mxu0 %v20670_v7  ;;  %17550 = vmatpush3.msra.mxu1 %v20566_v25 }
  0x44   : > { %17459 = vmatmul.mubr.f32.gmra.mxu0 %v512_v56  ;;  %17522 = vmatprep.subr.mxu0 %v20417_v3 }
  0x45   : > { %17551 = vmatprep.subr.mxu1 %v20417_v3  ;;  %17523 = vmatpush3.msra.mxu0 %v20680_v14 }
  0x46   : > { %17552 = vmatpush3.msra.mxu1 %v20571_v27  ;;  %17492 = vmatprep.mubr.msk.f32.mxu1 %vm20418_vm0, %v20417_v3 }
  0x47   : > { %17524 = vmatprep.subr.mxu0 %v20417_v3  ;;  %17553 = vmatprep.subr.mxu1 %v20417_v3 }
  0x48   : > { %17493 = vmatmul.mubr.f32.gmra.mxu1 %v20732_v29  ;;  %17525 = vmatpush3.msra.mxu0 %v20690_v33 }
  0x49   : > { %17526 = vmatprep.mubr.msk.f32.mxu0 %vm20418_vm0, %v20417_v3  ;;  %17554 = vmatpush3.msra.mxu1 %v20606_v39 }
  0x4a   : > { %17527 = vmatmul.mubr.f32.vlgmr.msra.gmra.mxu0 %v20706_v44  ;;  %17555 = vmatprep.subr.mxu1 %v20417_v3  ;;  %v15855_v44 = vld [vmem:[%s26081_s1 + $0x88] sm:$0xff] }
  0x4b   : > { %17572 = vmatprep.subr.mxu0 %v20417_v3  ;;  %17556 = vmatpush3.msra.mxu1 %v20620_v46  ;;  %v21047_v8 = vand.u32 4294901760, %v15855_v44 }
  0x4c   : > { %17573 = vmatpush3.msra.mxu0 %v525_v22  ;;  %17495 = vmatprep.mubr.msk.f32.mxu1 %vm20418_vm0, %v20417_v3 }
  0x4d   : > { %17557 = vmatprep.subr.mxu1 %v20417_v3  ;;  %17574 = vmatprep.subr.mxu0 %v20417_v3  ;;  %v21080_v56 = vsub.f32 %v15855_v44, %v21047_v8 }
  0x4e   : > { %17496 = vmatmul.mubr.f32.gmra.mxu1 %v20744_v36  ;;  %17529 = vmatprep.mubr.msk.f32.mxu0 %vm20418_vm0, %v20417_v3 }
  0x4f   : > { %17558 = vmatpush3.msra.mxu1 %v20628_v52  ;;  %17575 = vmatpush3.msra.mxu0 %v532_v23  ;;  %v15860_v23 = vld [vmem:[%s26081_s1 + $0xb0] sm:$0xff] }
  0x50   : > { %17559 = vmatprep.subr.mxu1 %v20417_v3  ;;  %17530 = vmatmul.mubr.f32.gmra.mxu0 %v20742_v35  ;;  %v20964_v30 = vand.u32 4294901760, %v15860_v23 }
  0x51   : > { %17576 = vmatprep.subr.mxu0 %v20417_v3  ;;  %17560 = vmatpush3.msra.mxu1 %v20654_v60 }
  0x52   : > { %17577 = vmatpush3.msra.mxu0 %v539_v24  ;;  %17561 = vmatprep.subr.mxu1 %v20417_v3  ;;  %v20947_v24 = vand.u32 4294901760, %v15861_v18 }
  0x53   : > { %17578 = vmatprep.subr.mxu0 %v20417_v3  ;;  %17532 = vmatprep.mubr.msk.f32.mxu0 %vm20418_vm0, %v20417_v3 }
  0x54   : > { %17562 = vmatpush3.msra.mxu1 %v20662_v63  ;;  %17563 = vmatprep.mubr.msk.f32.mxu1 %vm20418_vm0, %v20417_v3 }
  0x55   : > { %17579 = vmatpush3.msra.mxu0 %v546_v26  ;;  %17564 = vmatmul.mubr.f32.vlgmr.msra.gmra.mxu1 %v490_v50  ;;  %v15859_v26 = vld [vmem:[%s26081_s1 + $0xa8] sm:$0xff] }
  0x56   : > { %17533 = vmatmul.mubr.f32.gmra.mxu0 %v20756_v42  ;;  %17580 = vmatprep.subr.mxu0 %v20417_v3  ;;  %v20977_v43 = vand.u32 4294901760, %v15859_v26 }
  0x57   : > { %17609 = vmatprep.subr.mxu1 %v20417_v3  ;;  %17581 = vmatpush3.msra.mxu0 %v553_v28 }
  0x58   : > { %17610 = vmatpush3.msra.mxu1 %v20502_v4  ;;  %17582 = vmatprep.subr.mxu0 %v20417_v3  ;;  %v15865_v4 = vld [vmem:[%s26081_s1 + $0xd8] sm:$0xff] }
  0x59   : > { %17611 = vmatprep.subr.mxu1 %v20417_v3  ;;  %17566 = vmatprep.mubr.msk.f32.mxu1 %vm20418_vm0, %v20417_v3 }
  0x5a   : > { %17583 = vmatpush3.msra.mxu0 %v560_v40  ;;  %17612 = vmatpush3.msra.mxu1 %v20504_v5  ;;  %v20890_v5 = vand.u32 4294901760, %v15865_v4  ;;  %v20975_v40 = vsub.f32 %v15861_v18, %v20947_v24 }
  0x5b   : > { %17584 = vmatprep.subr.mxu0 %v20417_v3  ;;  %17567 = vmatmul.mubr.f32.gmra.mxu1 %v500_v38  ;;  %v15853_v38 = vld [vmem:[%s26081_s1 + $0x78] sm:$0xff] }
  0x5c   : > { %17613 = vmatprep.subr.mxu1 %v20417_v3  ;;  %17585 = vmatpush3.msra.mxu0 %v567_v47  ;;  %v15857_v47 = vld [vmem:[%s26081_s1 + $0x98] sm:$0xff]  ;;  %v1288_v7 = vand.u32 4294901760, %v20975_v40 }
  0x5d   : > { %17614 = vmatpush3.msra.mxu1 %v20506_v6  ;;  %17586 = vmatprep.subr.mxu0 %v20417_v3  ;;  %v15864_v6 = vld [vmem:[%s26081_s1 + $0xd0] sm:$0xff] }
  0x5e   : > { %17615 = vmatprep.subr.mxu1 %v20417_v3  ;;  %17569 = vmatprep.mubr.msk.f32.mxu1 %vm20418_vm0, %v20417_v3  ;;  %v1289_v58 = vsub.f32 %v20975_v40, %v1288_v7 }
  0x5f   : > { %17587 = vmatpush3.msra.mxu0 %v574_v55  ;;  %17616 = vmatpush3.msra.mxu1 %v20518_v10  ;;  %v15863_v10 = vld [vmem:[%s26081_s1 + $0xc8] sm:$0xff] }
  0x60   : > { %17588 = vmatprep.subr.mxu0 %v20417_v3  ;;  %17570 = vmatmul.mubr.f32.gmra.mxu1 %v510_v51  ;;  %v20915_v15 = vand.u32 4294901760, %v15863_v10  ;;  %v1290_v42 = vand.u32 4294901760, %v1289_v58 }
  0x61   : > { %17617 = vmatprep.subr.mxu1 %v20417_v3  ;;  %17589 = vmatpush3.msra.mxu0 %v581_v61 }
  0x62   : > { %17618 = vmatpush3.msra.mxu1 %v20520_v11  ;;  %17590 = vmatprep.subr.mxu0 %v20417_v3  ;;  %v20905_v11 = vand.u32 4294901760, %v15864_v6  ;;  %v20940_v22 = vsub.f32 %v15863_v10, %v20915_v15 }
  0x63   : > { %17619 = vmatprep.subr.mxu1 %v20417_v3  ;;  %17591 = vmatpush3.msra.mxu0 %v588_v2  ;;  %v21010_v2 = vand.u32 4294901760, %v15857_v47 }
  0x64   : > { %17620 = vmatpush3.msra.mxu1 %v20522_v12  ;;  %17592 = vmatprep.subr.mxu0 %v20417_v3  ;;  %v20911_v12 = vsub.f32 %v15865_v4, %v20890_v5  ;;  %v1274_v34 = vand.u32 4294901760, %v20940_v22  ;;  %v21082_v4 = vand.u32 4294901760, %v15853_v38 }
  0x65   : > { %17621 = vmatprep.subr.mxu1 %v20417_v3  ;;  %17593 = vmatpush3.msra.mxu0 %v595_v13  ;;  %v21035_v50 = vsub.f32 %v15857_v47, %v21010_v2 }
  0x66   : > { %17622 = vmatpush3.msra.mxu1 %v20541_v17  ;;  %17594 = vmatprep.subr.mxu0 %v20417_v3  ;;  %v20927_v17 = vsub.f32 %v15864_v6, %v20905_v11  ;;  %v1260_v21 = vand.u32 4294901760, %v20911_v12  ;;  %v1275_v61 = vsub.f32 %v20940_v22, %v1274_v34 }
  0x67   : > { %17623 = vmatprep.subr.mxu1 %v20417_v3  ;;  %17595 = vmatpush3.msra.mxu0 %v602_v32  ;;  %v1316_v51 = vand.u32 4294901760, %v21035_v50 }
  0x68   : > { %17624 = vmatpush3.msra.mxu1 %v20566_v25  ;;  %17596 = vmatprep.subr.mxu0 %v20417_v3  ;;  %v1267_v25 = vand.u32 4294901760, %v20927_v17  ;;  %v1261_v28 = vsub.f32 %v20911_v12, %v1260_v21 }
  0x69   : > { %17625 = vmatprep.subr.mxu1 %v20417_v3  ;;  %17597 = vmatpush3.msra.mxu0 %v609_v41 }
  0x6a   : > { %17626 = vmatpush3.msra.mxu1 %v20571_v27  ;;  %17598 = vmatprep.subr.mxu0 %v20417_v3  ;;  %v20959_v27 = vsub.f32 %v15862_v16, %v20934_v20  ;;  %v1262_v48 = vand.u32 4294901760, %v1261_v28  ;;  %v1317_v28 = vsub.f32 %v21035_v50, %v1316_v51 }
  0x6b   : > { %17627 = vmatprep.subr.mxu1 %v20417_v3  ;;  %17599 = vmatpush3.msra.mxu0 %v616_v49  ;;  %v1276_v49 = vand.u32 4294901760, %v1275_v61 }
  0x6c   : > { %17600 = vmatprep.mubr.msk.f32.mxu0 %vm20418_vm0, %v20417_v3  ;;  %17628 = vmatpush3.msra.mxu1 %v20606_v39  ;;  %v15858_v39 = vld [vmem:[%s26081_s1 + $0xa0] sm:$0xff]  ;;  %v1281_v57 = vand.u32 4294901760, %v20959_v27 }
  0x6d   : > { %17601 = vmatmul.mubr.f32.vlgmr.msra.gmra.mxu0 %v20696_v37  ;;  %17629 = vmatprep.subr.mxu1 %v20417_v3  ;;  %v20993_v55 = vand.u32 4294901760, %v15858_v39 }
  0x6e   : > { %17646 = vmatprep.subr.mxu0 %v20417_v3  ;;  %17630 = vmatpush3.msra.mxu1 %v20620_v46  ;;  %v1268_v46 = vsub.f32 %v20927_v17, %v1267_v25  ;;  %v1282_v33 = vsub.f32 %v20959_v27, %v1281_v57 }
  0x6f   : > { %17647 = vmatpush3.msra.mxu0 %v20890_v5  ;;  %17631 = vmatprep.subr.mxu1 %v20417_v3  ;;  %v21018_v32 = vsub.f32 %v15858_v39, %v20993_v55 }
  0x70   : > { %17648 = vmatprep.subr.mxu0 %v20417_v3  ;;  %17603 = vmatprep.mubr.msk.f32.mxu0 %vm20418_vm0, %v20417_v3  ;;  %v1269_v13 = vand.u32 4294901760, %v1268_v46  ;;  %v1283_v9 = vand.u32 4294901760, %v1282_v33  ;;  %v1330_v46 = vand.u32 4294901760, %v21080_v56 }
  0x71   : > { %17632 = vmatpush3.msra.mxu1 %v20628_v52  ;;  %17649 = vmatpush3.msra.mxu0 %v20905_v11  ;;  %v20991_v52 = vsub.f32 %v15860_v23, %v20964_v30  ;;  %v1309_v35 = vand.u32 4294901760, %v21018_v32  ;;  %v21094_v23 = vand.u32 4294901760, %v15852_v53 }
  0x72   : > { %17633 = vmatprep.subr.mxu1 %v20417_v3  ;;  %17604 = vmatmul.mubr.f32.gmra.mxu0 %v20732_v29 }
  0x73   : > { %17650 = vmatprep.subr.mxu0 %v20417_v3  ;;  %17634 = vmatpush3.msra.mxu1 %v20654_v60  ;;  %v1117_v60 = vld [vmem:[#allocation2 + $0x1] sm:$0xff]  ;;  %v1295_v41 = vand.u32 4294901760, %v20991_v52  ;;  %v1310_v10 = vsub.f32 %v21018_v32, %v1309_v35 }
  0x74   : > { %17651 = vmatpush3.msra.mxu0 %v20915_v15  ;;  %17635 = vmatprep.subr.mxu1 %v20417_v3  ;;  %v1136_v14 = vsel %vm372_vm2, %v1117_v60, 0  ;;  %v21114_v60 = vsub.f32 %v15852_v53, %v21094_v23 }
  0x75   : > { %17652 = vmatprep.subr.mxu0 %v20417_v3  ;;  %17606 = vmatprep.mubr.msk.f32.mxu0 %vm20418_vm0, %v20417_v3  ;;  %v21044_v1 = vand.u32 4294901760, %v1136_v14  ;;  %v1296_v31 = vsub.f32 %v20991_v52, %v1295_v41  ;;  %v1311_v47 = vand.u32 4294901760, %v1310_v10 }
  0x76   : > { %17636 = vmatpush3.msra.mxu1 %v20662_v63  ;;  %17637 = vmatprep.mubr.msk.f32.mxu1 %vm20418_vm0, %v20417_v3  ;;  %v21008_v63 = vsub.f32 %v15859_v26, %v20977_v43  ;;  %v1351_v58 = vand.u32 4294901760, %v21114_v60 }
  0x77   : > { %17653 = vmatpush3.msra.mxu0 %v20934_v20  ;;  %17638 = vmatmul.mubr.f32.vlgmr.msra.gmra.mxu1 %v20696_v37  ;;  %v21023_v37 = vand.u32 4294901760, %v15856_v62  ;;  %v21074_v54 = vsub.f32 %v1136_v14, %v21044_v1  ;;  %v1297_v6 = vand.u32 4294901760, %v1296_v31  ;;  %v1331_v14 = vsub.f32 %v21080_v56, %v1330_v46 }
  0x78   : > { %17607 = vmatmul.mubr.f32.gmra.mxu0 %v20744_v36  ;;  %17654 = vmatprep.subr.mxu0 %v20417_v3  ;;  %v1302_v59 = vand.u32 4294901760, %v21008_v63  ;;  %v1352_v53 = vsub.f32 %v21114_v60, %v1351_v58 }
  0x79   : > { %17683 = vmatprep.subr.mxu1 %v20417_v3  ;;  %17655 = vmatpush3.msra.mxu0 %v20947_v24  ;;  %v21052_v19 = vsub.f32 %v15856_v62, %v21023_v37  ;;  %v1225_v39 = vand.u32 4294901760, %v21074_v54  ;;  %v1318_v62 = vand.u32 4294901760, %v1317_v28  ;;  %v1332_v31 = vand.u32 4294901760, %v1331_v14 }
  0x7a   : > { %17684 = vmatpush3.msra.mxu1 %v1262_v48  ;;  %17656 = vmatprep.subr.mxu0 %v20417_v3  ;;  %v1303_v45 = vsub.f32 %v21008_v63, %v1302_v59  ;;  %v1353_v28 = vand.u32 4294901760, %v1352_v53 }
  0x7b   : > { %17685 = vmatprep.subr.mxu1 %v20417_v3  ;;  %17640 = vmatprep.mubr.msk.f32.mxu1 %vm20418_vm0, %v20417_v3  ;;  %v1323_v16 = vand.u32 4294901760, %v21052_v19 }
  0x7c   : > { %17657 = vmatpush3.msra.mxu0 %v20964_v30  ;;  %17686 = vmatpush3.msra.mxu1 %v1269_v13  ;;  %v1304_v26 = vand.u32 4294901760, %v1303_v45  ;;  %v1226_v13 = vsub.f32 %v21074_v54, %v1225_v39 }
  0x7d   : > { %17658 = vmatprep.subr.mxu0 %v20417_v3  ;;  %17641 = vmatmul.mubr.f32.gmra.mxu1 %v20732_v29  ;;  %v21062_v29 = vand.u32 4294901760, %v15854_v0  ;;  %v1324_v48 = vsub.f32 %v21052_v19, %v1323_v16 }
  0x7e   : > { %17687 = vmatprep.subr.mxu1 %v20417_v3  ;;  %17659 = vmatpush3.msra.mxu0 %v20977_v43 }
  0x7f   : > { %17688 = vmatpush3.msra.mxu1 %v1276_v49  ;;  %17660 = vmatprep.subr.mxu0 %v20417_v3  ;;  %v21092_v18 = vsub.f32 %v15854_v0, %v21062_v29  ;;  %v1325_v44 = vand.u32 4294901760, %v1324_v48  ;;  %v1118_v0 = vld [vmem:[#allocation2 + $0x9] sm:$0xff] }
  0x80   : > { %17689 = vmatprep.subr.mxu1 %v20417_v3  ;;  %17643 = vmatprep.mubr.msk.f32.mxu1 %vm20418_vm0, %v20417_v3 }
  0x81   : > { %17661 = vmatpush3.msra.mxu0 %v20993_v55  ;;  %17690 = vmatpush3.msra.mxu1 %v1283_v9  ;;  %v1337_v61 = vand.u32 4294901760, %v21092_v18  ;;  %v1227_v9 = vand.u32 4294901760, %v1226_v13 }
  0x82   : > { %17662 = vmatprep.subr.mxu0 %v20417_v3  ;;  %17644 = vmatmul.mubr.f32.gmra.mxu1 %v20744_v36  ;;  %v21104_v36 = vsub.f32 %v15853_v38, %v21082_v4 }
  0x83   : > { %17691 = vmatprep.subr.mxu1 %v20417_v3  ;;  %17663 = vmatpush3.msra.mxu0 %v21010_v2  ;;  %v1338_v49 = vsub.f32 %v21092_v18, %v1337_v61 }
  0x84   : > { %17692 = vmatpush3.msra.mxu1 %v1290_v42  ;;  %17664 = vmatprep.subr.mxu0 %v20417_v3  ;;  %v1344_v33 = vand.u32 4294901760, %v21104_v36  ;;  %v1139_v42 = vsel %vm372_vm2, %v1118_v0, 0 }
  0x85   : > { %17693 = vmatprep.subr.mxu1 %v20417_v3  ;;  %17665 = vmatpush3.msra.mxu0 %v21023_v37  ;;  %v1339_v45 = vand.u32 4294901760, %v1338_v49 }
  0x86   : > { %17694 = vmatpush3.msra.mxu1 %v1297_v6  ;;  %17666 = vmatprep.subr.mxu0 %v20417_v3  ;;  %v1345_v38 = vsub.f32 %v21104_v36, %v1344_v33  ;;  %v1119_v6 = vld [vmem:[#allocation2 + $0x11] sm:$0xff] }
  0x87   : > { %17695 = vmatprep.subr.mxu1 %v20417_v3  ;;  %17667 = vmatpush3.msra.mxu0 %v21047_v8 }
  0x88   : > { %17696 = vmatpush3.msra.mxu1 %v1304_v26  ;;  %17668 = vmatprep.subr.mxu0 %v20417_v3  ;;  %v1346_v10 = vand.u32 4294901760, %v1345_v38  ;;  %v21150_v26 = vand.u32 4294901760, %v1139_v42 }
  0x89   : > { %17697 = vmatprep.subr.mxu1 %v20417_v3  ;;  %17669 = vmatpush3.msra.mxu0 %v21062_v29 }
  0x8a   : > { %17698 = vmatpush3.msra.mxu1 %v1311_v47  ;;  %17670 = vmatprep.subr.mxu0 %v20417_v3  ;;  %v1142_v47 = vsel %vm372_vm2, %v1119_v6, 0  ;;  %v21160_v48 = vsub.f32 %v1139_v42, %v21150_v26 }
  0x8b   : > { %17699 = vmatprep.subr.mxu1 %v20417_v3  ;;  %17671 = vmatpush3.msra.mxu0 %v21082_v4 }
  0x8c   : > { %17700 = vmatpush3.msra.mxu1 %v1318_v62  ;;  %17672 = vmatprep.subr.mxu0 %v20417_v3  ;;  %v21164_v62 = vand.u32 4294901760, %v1142_v47  ;;  %v1235_v13 = vand.u32 4294901760, %v21160_v48 }
  0x8d   : > { %17701 = vmatprep.subr.mxu1 %v20417_v3  ;;  %17673 = vmatpush3.msra.mxu0 %v21094_v23 }
  0x8e   : > { %17702 = vmatpush3.msra.mxu1 %v1325_v44  ;;  %17674 = vmatprep.mubr.msk.f32.mxu0 %vm20418_vm0, %v20417_v3  ;;  %v21176_v14 = vsub.f32 %v1142_v47, %v21164_v62  ;;  %v1236_v44 = vsub.f32 %v21160_v48, %v1235_v13 }
  0x8f   : > { %17703 = vmatprep.subr.mxu1 %v20417_v3  ;;  %17720 = vmatprep.subr.mxu0 %v20417_v3 }
  0x90   : > { %17675 = vmatmul.mubr.f32.vlgmr.msra.gmra.mxu0 %v1227_v9  ;;  %17704 = vmatpush3.msra.mxu1 %v1332_v31  ;;  %v1245_v49 = vand.u32 4294901760, %v21176_v14  ;;  %v1237_v0 = vand.u32 4294901760, %v1236_v44 }
  0x91   : > { %17721 = vmatpush3.msra.mxu0 %v20911_v12  ;;  %17705 = vmatprep.subr.mxu1 %v20417_v3  ;;  %v15878_v12 = vld [vmem:[%s26081_s1 + $0x140] sm:$0xff] }
  0x92   : > { %17722 = vmatprep.subr.mxu0 %v20417_v3  ;;  %17706 = vmatpush3.msra.mxu1 %v1339_v45  ;;  %v1246_v9 = vsub.f32 %v21176_v14, %v1245_v49  ;;  %v15868_v45 = vld [vmem:[%s26081_s1 + $0xf0] sm:$0xff] }
  0x93   : > { %17723 = vmatpush3.msra.mxu0 %v20927_v17  ;;  %17707 = vmatprep.subr.mxu1 %v20417_v3  ;;  %v21325_v17 = vand.u32 4294901760, %v15878_v12 }
  0x94   : > { %17724 = vmatprep.subr.mxu0 %v20417_v3  ;;  %17708 = vmatpush3.msra.mxu1 %v1346_v10  ;;  %v1247_v31 = vand.u32 4294901760, %v1246_v9 }
  0x95   : > { %17725 = vmatpush3.msra.mxu0 %v20940_v22  ;;  %17709 = vmatprep.subr.mxu1 %v20417_v3  ;;  %v15876_v22 = vld [vmem:[%s26081_s1 + $0x130] sm:$0xff] }
  0x96   : > { %17726 = vmatprep.subr.mxu0 %v20417_v3  ;;  %17710 = vmatpush3.msra.mxu1 %v1353_v28 }
  0x97   : > { %17711 = vmatprep.mubr.msk.f32.mxu1 %vm20418_vm0, %v20417_v3  ;;  %17727 = vmatpush3.msra.mxu0 %v20959_v27  ;;  %v21354_v27 = vand.u32 4294901760, %v15876_v22 }
  0x98   : > { %17712 = vmatmul.mubr.f32.vlgmr.msra.gmra.mxu1 %v21044_v1  ;;  %17728 = vmatprep.subr.mxu0 %v20417_v3 }
  0x99   : > { %17757 = vmatprep.subr.mxu1 %v20417_v3  ;;  %17729 = vmatpush3.msra.mxu0 %v20975_v40  ;;  %v15874_v40 = vld [vmem:[%s26081_s1 + $0x120] sm:$0xff] }
  0x9a   : > { %17758 = vmatpush3.msra.mxu1 %v20890_v5  ;;  %17730 = vmatprep.subr.mxu0 %v20417_v3 }
  0x9b   : > { %17759 = vmatprep.subr.mxu1 %v20417_v3  ;;  %17731 = vmatpush3.msra.mxu0 %v20991_v52 }
  0x9c   : > { %17760 = vmatpush3.msra.mxu1 %v20905_v11  ;;  %17732 = vmatprep.subr.mxu0 %v20417_v3 }
  0x9d   : > { %17761 = vmatprep.subr.mxu1 %v20417_v3  ;;  %17733 = vmatpush3.msra.mxu0 %v21008_v63 }
  0x9e   : > { %17762 = vmatpush3.msra.mxu1 %v20915_v15  ;;  %17734 = vmatprep.subr.mxu0 %v20417_v3 }
  0x9f   : > { %17763 = vmatprep.subr.mxu1 %v20417_v3  ;;  %17735 = vmatpush3.msra.mxu0 %v21018_v32  ;;  %v15872_v32 = vld [vmem:[%s26081_s1 + $0x110] sm:$0xff] }
  0xa0   : > { %17764 = vmatpush3.msra.mxu1 %v20934_v20  ;;  %17736 = vmatprep.subr.mxu0 %v20417_v3 }
  0xa1   : > { %17765 = vmatprep.subr.mxu1 %v20417_v3  ;;  %17737 = vmatpush3.msra.mxu0 %v21035_v50 }
  0xa2   : > { %17766 = vmatpush3.msra.mxu1 %v20947_v24  ;;  %17738 = vmatprep.subr.mxu0 %v20417_v3 }
  0xa3   : > { %17767 = vmatprep.subr.mxu1 %v20417_v3  ;;  %17677 = vmatprep.mubr.msk.f32.mxu0 %vm20418_vm0, %v20417_v3 }
  0xa4   : > { %17739 = vmatpush3.msra.mxu0 %v21052_v19  ;;  %17768 = vmatpush3.msra.mxu1 %v20964_v30 }
  0xa5   : > { %17678 = vmatmul.mubr.f32.gmra.mxu0 %v1237_v0  ;;  %17740 = vmatprep.subr.mxu0 %v20417_v3  ;;  %v15866_v0 = vld [vmem:[%s26081_s1 + $0xe0] sm:$0xff] }
  0xa6   : > { %17769 = vmatprep.subr.mxu1 %v20417_v3  ;;  %17741 = vmatpush3.msra.mxu0 %v21080_v56  ;;  %v15870_v56 = vld [vmem:[%s26081_s1 + $0x100] sm:$0xff] }
  0xa7   : > { %17770 = vmatpush3.msra.mxu1 %v20977_v43  ;;  %17742 = vmatprep.subr.mxu0 %v20417_v3 }
  0xa8   : > { %17771 = vmatprep.subr.mxu1 %v20417_v3  ;;  %17680 = vmatprep.mubr.msk.f32.mxu0 %vm20418_vm0, %v20417_v3 }
  0xa9   : > { %17743 = vmatpush3.msra.mxu0 %v21092_v18  ;;  %17772 = vmatpush3.msra.mxu1 %v20993_v55 }
  0xaa   : > { %17681 = vmatmul.mubr.f32.gmra.mxu0 %v1247_v31  ;;  %17744 = vmatprep.subr.mxu0 %v20417_v3 }
  0xab   : > { %17773 = vmatprep.subr.mxu1 %v20417_v3  ;;  %17745 = vmatpush3.msra.mxu0 %v21104_v36 }
  0xac   : > { %17774 = vmatpush3.msra.mxu1 %v21010_v2  ;;  %17714 = vmatprep.mubr.msk.f32.mxu1 %vm20418_vm0, %v20417_v3 }
  0xad   : > { %17746 = vmatprep.subr.mxu0 %v20417_v3  ;;  %17775 = vmatprep.subr.mxu1 %v20417_v3 }
  0xae   : > { %17715 = vmatmul.mubr.f32.gmra.mxu1 %v21150_v26  ;;  %17747 = vmatpush3.msra.mxu0 %v21114_v60 }
  0xaf   : > { %17748 = vmatprep.mubr.msk.f32.mxu0 %vm20418_vm0, %v20417_v3  ;;  %17776 = vmatpush3.msra.mxu1 %v21023_v37 }
  0xb0   : > { %17749 = vmatmul.mubr.f32.vlgmr.msra.gmra.mxu0 %v21074_v54  ;;  %17777 = vmatprep.subr.mxu1 %v20417_v3 }
  0xb1   : > { %17794 = vmatprep.subr.mxu0 %v20417_v3  ;;  %17778 = vmatpush3.msra.mxu1 %v21047_v8 }
  0xb2   : > { %17795 = vmatpush3.msra.mxu0 %v1260_v21  ;;  %17717 = vmatprep.mubr.msk.f32.mxu1 %vm20418_vm0, %v20417_v3 }
  0xb3   : > { %17779 = vmatprep.subr.mxu1 %v20417_v3  ;;  %17796 = vmatprep.subr.mxu0 %v20417_v3 }
  0xb4   : > { %17718 = vmatmul.mubr.f32.gmra.mxu1 %v21164_v62  ;;  %17751 = vmatprep.mubr.msk.f32.mxu0 %vm20418_vm0, %v20417_v3 }
  0xb5   : > { %17780 = vmatpush3.msra.mxu1 %v21062_v29  ;;  %17797 = vmatpush3.msra.mxu0 %v1267_v25  ;;  %v15875_v25 = vld [vmem:[%s26081_s1 + $0x128] sm:$0xff] }
  0xb6   : > { %17781 = vmatprep.subr.mxu1 %v20417_v3  ;;  %17752 = vmatmul.mubr.f32.gmra.mxu0 %v21160_v48 }
  0xb7   : > { %17798 = vmatprep.subr.mxu0 %v20417_v3  ;;  %17782 = vmatpush3.msra.mxu1 %v21082_v4 }
  0xb8   : > { %17799 = vmatpush3.msra.mxu0 %v1274_v34  ;;  %17783 = vmatprep.subr.mxu1 %v20417_v3 }
  0xb9   : > { %17800 = vmatprep.subr.mxu0 %v20417_v3  ;;  %17754 = vmatprep.mubr.msk.f32.mxu0 %vm20418_vm0, %v20417_v3 }
  0xba   : > { %17784 = vmatpush3.msra.mxu1 %v21094_v23  ;;  %17785 = vmatprep.mubr.msk.f32.mxu1 %vm20418_vm0, %v20417_v3 }
  0xbb   : > { %17801 = vmatpush3.msra.mxu0 %v1281_v57  ;;  %17786 = vmatmul.mubr.f32.vlgmr.msra.gmra.mxu1 %v1225_v39  ;;  %v21379_v57 = vsub.f32 %v15876_v22, %v21354_v27 }
  0xbc   : > { %17755 = vmatmul.mubr.f32.gmra.mxu0 %v21176_v14  ;;  %17802 = vmatprep.subr.mxu0 %v20417_v3 }
  0xbd   : > { %17831 = vmatprep.subr.mxu1 %v20417_v3  ;;  %17803 = vmatpush3.msra.mxu0 %v1288_v7 }
  0xbe   : > { %17832 = vmatpush3.msra.mxu1 %v20890_v5  ;;  %17804 = vmatprep.subr.mxu0 %v20417_v3  ;;  %v15879_v5 = vld [vmem:[%s26081_s1 + $0x148] sm:$0xff] }
  0xbf   : > { %17833 = vmatprep.subr.mxu1 %v20417_v3  ;;  %17788 = vmatprep.mubr.msk.f32.mxu1 %vm20418_vm0, %v20417_v3 }
  0xc0   : > { %17805 = vmatpush3.msra.mxu0 %v1295_v41  ;;  %17834 = vmatpush3.msra.mxu1 %v20905_v11  ;;  %v21310_v11 = vand.u32 4294901760, %v15879_v5 }
  0xc1   : > { %17806 = vmatprep.subr.mxu0 %v20417_v3  ;;  %17789 = vmatmul.mubr.f32.gmra.mxu1 %v1235_v13  ;;  %v15867_v13 = vld [vmem:[%s26081_s1 + $0xe8] sm:$0xff] }
  0xc2   : > { %17835 = vmatprep.subr.mxu1 %v20417_v3  ;;  %17807 = vmatpush3.msra.mxu0 %v1302_v59  ;;  %v15871_v59 = vld [vmem:[%s26081_s1 + $0x108] sm:$0xff] }
  0xc3   : > { %17836 = vmatpush3.msra.mxu1 %v20915_v15  ;;  %17808 = vmatprep.subr.mxu0 %v20417_v3  ;;  %v15877_v15 = vld [vmem:[%s26081_s1 + $0x138] sm:$0xff] }
  0xc4   : > { %17837 = vmatprep.subr.mxu1 %v20417_v3  ;;  %17791 = vmatprep.mubr.msk.f32.mxu1 %vm20418_vm0, %v20417_v3  ;;  %v21335_v21 = vand.u32 4294901760, %v15877_v15 }
  0xc5   : > { %17809 = vmatpush3.msra.mxu0 %v1309_v35  ;;  %17838 = vmatpush3.msra.mxu1 %v20934_v20  ;;  %v21331_v20 = vsub.f32 %v15879_v5, %v21310_v11  ;;  %v21413_v35 = vand.u32 4294901760, %v15872_v32  ;;  %v21502_v5 = vand.u32 4294901760, %v15867_v13 }
  0xc6   : > { %17810 = vmatprep.subr.mxu0 %v20417_v3  ;;  %17792 = vmatmul.mubr.f32.gmra.mxu1 %v1245_v49  ;;  %v21360_v34 = vsub.f32 %v15877_v15, %v21335_v21 }
  0xc7   : > { %17839 = vmatprep.subr.mxu1 %v20417_v3  ;;  %17811 = vmatpush3.msra.mxu0 %v1316_v51  ;;  %v1854_v51 = vld [vmem:[#allocation2 + $0x2] sm:$0xff]  ;;  %v21438_v36 = vsub.f32 %v15872_v32, %v21413_v35 }
  0xc8   : > { %17840 = vmatpush3.msra.mxu1 %v20947_v24  ;;  %17812 = vmatprep.subr.mxu0 %v20417_v3  ;;  %v21347_v24 = vsub.f32 %v15878_v12, %v21325_v17  ;;  %v2011_v7 = vand.u32 4294901760, %v21360_v34  ;;  %v1873_v39 = vsel %vm372_vm2, %v1854_v51, 0 }
  0xc9   : > { %17841 = vmatprep.subr.mxu1 %v20417_v3  ;;  %17813 = vmatpush3.msra.mxu0 %v1323_v16  ;;  %v21430_v16 = vand.u32 4294901760, %v15871_v59  ;;  %v21464_v53 = vand.u32 4294901760, %v1873_v39  ;;  %v2046_v48 = vand.u32 4294901760, %v21438_v36 }
  0xca   : > { %17842 = vmatpush3.msra.mxu1 %v20964_v30  ;;  %17814 = vmatprep.subr.mxu0 %v20417_v3  ;;  %v1997_v30 = vand.u32 4294901760, %v21331_v20  ;;  %v2004_v52 = vand.u32 4294901760, %v21347_v24  ;;  %v2012_v54 = vsub.f32 %v21360_v34, %v2011_v7 }
  0xcb   : > { %17843 = vmatprep.subr.mxu1 %v20417_v3  ;;  %17815 = vmatpush3.msra.mxu0 %v1330_v46  ;;  %v21443_v46 = vand.u32 4294901760, %v15870_v56  ;;  %v21494_v9 = vsub.f32 %v1873_v39, %v21464_v53  ;;  %v2047_v15 = vsub.f32 %v21438_v36, %v2046_v48 }
  0xcc   : > { %17844 = vmatpush3.msra.mxu1 %v20977_v43  ;;  %17816 = vmatprep.subr.mxu0 %v20417_v3  ;;  %v21367_v43 = vand.u32 4294901760, %v15875_v25  ;;  %v1998_v63 = vsub.f32 %v21331_v20, %v1997_v30  ;;  %v2005_v50 = vsub.f32 %v21347_v24, %v2004_v52 }
  0xcd   : > { %17845 = vmatprep.subr.mxu1 %v20417_v3  ;;  %17817 = vmatpush3.msra.mxu0 %v1337_v61  ;;  %v15869_v61 = vld [vmem:[%s26081_s1 + $0xf8] sm:$0xff]  ;;  %v21472_v28 = vsub.f32 %v15870_v56, %v21443_v46  ;;  %v1962_v32 = vand.u32 4294901760, %v21494_v9 }
  0xce   : > { %17846 = vmatpush3.msra.mxu1 %v20993_v55  ;;  %17818 = vmatprep.subr.mxu0 %v20417_v3  ;;  %v15873_v55 = vld [vmem:[%s26081_s1 + $0x118] sm:$0xff]  ;;  %v21467_v6 = vand.u32 4294901760, %v15869_v61 }
  0xcf   : > { %17847 = vmatprep.subr.mxu1 %v20417_v3  ;;  %17819 = vmatpush3.msra.mxu0 %v1344_v33  ;;  %v21397_v41 = vand.u32 4294901760, %v15873_v55  ;;  %v2013_v33 = vand.u32 4294901760, %v2012_v54  ;;  %v2060_v22 = vand.u32 4294901760, %v21472_v28  ;;  %v1963_v39 = vsub.f32 %v21494_v9, %v1962_v32 }
  0xd0   : > { %17848 = vmatpush3.msra.mxu1 %v21010_v2  ;;  %17820 = vmatprep.subr.mxu0 %v20417_v3  ;;  %v21384_v2 = vand.u32 4294901760, %v15874_v40  ;;  %v21500_v31 = vsub.f32 %v15869_v61, %v21467_v6 }
  0xd1   : > { %17849 = vmatprep.subr.mxu1 %v20417_v3  ;;  %17821 = vmatpush3.msra.mxu0 %v1351_v58  ;;  %v21455_v58 = vsub.f32 %v15871_v59, %v21430_v16  ;;  %v2048_v59 = vand.u32 4294901760, %v2047_v15 }
  0xd2   : > { %17822 = vmatprep.mubr.msk.f32.mxu0 %vm20418_vm0, %v20417_v3  ;;  %17850 = vmatpush3.msra.mxu1 %v21023_v37  ;;  %v21395_v37 = vsub.f32 %v15875_v25, %v21367_v43  ;;  %v21411_v19 = vsub.f32 %v15874_v40, %v21384_v2  ;;  %v21514_v40 = vand.u32 4294901760, %v15866_v0 }
  0xd3   : > { %17823 = vmatmul.mubr.f32.vlgmr.msra.gmra.mxu0 %v21044_v1  ;;  %17851 = vmatprep.subr.mxu1 %v20417_v3  ;;  %v2053_v49 = vand.u32 4294901760, %v21455_v58 }
  0xd4   : > { %17868 = vmatprep.subr.mxu0 %v20417_v3  ;;  %17852 = vmatpush3.msra.mxu1 %v21047_v8  ;;  %v1999_v8 = vand.u32 4294901760, %v1998_v63  ;;  %v2025_v18 = vand.u32 4294901760, %v21395_v37  ;;  %v2032_v60 = vand.u32 4294901760, %v21411_v19  ;;  %v21536_v54 = vsub.f32 %v15866_v0, %v21514_v40 }
  0xd5   : > { %17869 = vmatpush3.msra.mxu0 %v21310_v11  ;;  %17853 = vmatprep.subr.mxu1 %v20417_v3  ;;  %v2054_v63 = vsub.f32 %v21455_v58, %v2053_v49 }
  0xd6   : > { %17870 = vmatprep.subr.mxu0 %v20417_v3  ;;  %17825 = vmatprep.mubr.msk.f32.mxu0 %vm20418_vm0, %v20417_v3  ;;  %v2026_v38 = vsub.f32 %v21395_v37, %v2025_v18  ;;  %v2033_v47 = vsub.f32 %v21411_v19, %v2032_v60 }
  0xd7   : > { %17854 = vmatpush3.msra.mxu1 %v21062_v29  ;;  %17871 = vmatpush3.msra.mxu0 %v21325_v17  ;;  %v2018_v29 = vand.u32 4294901760, %v21379_v57 }
  0xd8   : > { %17855 = vmatprep.subr.mxu1 %v20417_v3  ;;  %17826 = vmatmul.mubr.f32.gmra.mxu0 %v21150_v26  ;;  %v2027_v14 = vand.u32 4294901760, %v2026_v38  ;;  %v2034_v12 = vand.u32 4294901760, %v2033_v47  ;;  %v1855_v47 = vld [vmem:[#allocation2 + $0xa] sm:$0xff] }
  0xd9   : > { %17872 = vmatprep.subr.mxu0 %v20417_v3  ;;  %17856 = vmatpush3.msra.mxu1 %v21082_v4  ;;  %v21428_v4 = vsub.f32 %v15873_v55, %v21397_v41  ;;  %v1876_v15 = vsel %vm372_vm2, %v1855_v47, 0 }
  0xda   : > { %17873 = vmatpush3.msra.mxu0 %v21335_v21  ;;  %17857 = vmatprep.subr.mxu1 %v20417_v3 }
  0xdb   : > { %17874 = vmatprep.subr.mxu0 %v20417_v3  ;;  %17828 = vmatprep.mubr.msk.f32.mxu0 %vm20418_vm0, %v20417_v3  ;;  %v2039_v42 = vand.u32 4294901760, %v21428_v4 }
  0xdc   : > { %17858 = vmatpush3.msra.mxu1 %v21094_v23  ;;  %17859 = vmatprep.mubr.msk.f32.mxu1 %vm20418_vm0, %v20417_v3  ;;  %v2006_v23 = vand.u32 4294901760, %v2005_v50  ;;  %v2067_v50 = vand.u32 4294901760, %v21500_v31 }
  0xdd   : > { %17875 = vmatpush3.msra.mxu0 %v21354_v27  ;;  %17860 = vmatmul.mubr.f32.vlgmr.msra.gmra.mxu1 %v21044_v1  ;;  %v2019_v1 = vsub.f32 %v21379_v57, %v2018_v29  ;;  %v2040_v44 = vsub.f32 %v21428_v4, %v2039_v42 }
  0xde   : > { %17829 = vmatmul.mubr.f32.gmra.mxu0 %v21164_v62  ;;  %17876 = vmatprep.subr.mxu0 %v20417_v3  ;;  %v2068_v61 = vsub.f32 %v21500_v31, %v2067_v50 }
  0xdf   : > { %17905 = vmatprep.subr.mxu1 %v20417_v3  ;;  %17877 = vmatpush3.msra.mxu0 %v21367_v43  ;;  %v2020_v10 = vand.u32 4294901760, %v2019_v1  ;;  %v2041_v55 = vand.u32 4294901760, %v2040_v44 }
  0xe0   : > { %17906 = vmatpush3.msra.mxu1 %v1999_v8  ;;  %17878 = vmatprep.subr.mxu0 %v20417_v3  ;;  %v2061_v8 = vsub.f32 %v21472_v28, %v2060_v22  ;;  %v2069_v44 = vand.u32 4294901760, %v2068_v61 }
  0xe1   : > { %17907 = vmatprep.subr.mxu1 %v20417_v3  ;;  %17862 = vmatprep.mubr.msk.f32.mxu1 %vm20418_vm0, %v20417_v3 }
  0xe2   : > { %17879 = vmatpush3.msra.mxu0 %v21384_v2  ;;  %17908 = vmatpush3.msra.mxu1 %v2006_v23  ;;  %v2055_v23 = vand.u32 4294901760, %v2054_v63  ;;  %v2062_v38 = vand.u32 4294901760, %v2061_v8 }
  0xe3   : > { %17880 = vmatprep.subr.mxu0 %v20417_v3  ;;  %17863 = vmatmul.mubr.f32.gmra.mxu1 %v21150_v26  ;;  %v21482_v26 = vand.u32 4294901760, %v15868_v45 }
  0xe4   : > { %17909 = vmatprep.subr.mxu1 %v20417_v3  ;;  %17881 = vmatpush3.msra.mxu0 %v21397_v41 }
  0xe5   : > { %17910 = vmatpush3.msra.mxu1 %v2013_v33  ;;  %17882 = vmatprep.subr.mxu0 %v20417_v3  ;;  %v21512_v25 = vsub.f32 %v15868_v45, %v21482_v26 }
  0xe6   : > { %17911 = vmatprep.subr.mxu1 %v20417_v3  ;;  %17865 = vmatprep.mubr.msk.f32.mxu1 %vm20418_vm0, %v20417_v3 }
  0xe7   : > { %17883 = vmatpush3.msra.mxu0 %v21413_v35  ;;  %17912 = vmatpush3.msra.mxu1 %v2020_v10  ;;  %v2074_v56 = vand.u32 4294901760, %v21512_v25  ;;  %v2088_v10 = vand.u32 4294901760, %v21536_v54 }
  0xe8   : > { %17884 = vmatprep.subr.mxu0 %v20417_v3  ;;  %17866 = vmatmul.mubr.f32.gmra.mxu1 %v21164_v62  ;;  %v21524_v62 = vsub.f32 %v15867_v13, %v21502_v5 }
  0xe9   : > { %17913 = vmatprep.subr.mxu1 %v20417_v3  ;;  %17885 = vmatpush3.msra.mxu0 %v21430_v16  ;;  %v2075_v45 = vsub.f32 %v21512_v25, %v2074_v56  ;;  %v2089_v63 = vsub.f32 %v21536_v54, %v2088_v10 }
  0xea   : > { %17914 = vmatpush3.msra.mxu1 %v2027_v14  ;;  %17886 = vmatprep.subr.mxu0 %v20417_v3  ;;  %v2081_v33 = vand.u32 4294901760, %v21524_v62  ;;  %v1964_v14 = vand.u32 4294901760, %v1963_v39 }
  0xeb   : > { %17915 = vmatprep.subr.mxu1 %v20417_v3  ;;  %17887 = vmatpush3.msra.mxu0 %v21443_v46  ;;  %v21531_v51 = vpop.f32.mrf.mxu0  ;;  %v2090_v39 = vand.u32 4294901760, %v2089_v63 }
  0xec   : > { %17916 = vmatpush3.msra.mxu1 %v2034_v12  ;;  %17888 = vmatprep.subr.mxu0 %v20417_v3  ;;  %v2082_v0 = vsub.f32 %v21524_v62, %v2081_v33 }
  0xed   : > { %17917 = vmatprep.subr.mxu1 %v20417_v3  ;;  %17889 = vmatpush3.msra.mxu0 %v21467_v6  ;;  %v17454_v1 = vpop.f32.mrf.mxu0 }
  0xee   : > { %17918 = vmatpush3.msra.mxu1 %v2041_v55  ;;  %17890 = vmatprep.subr.mxu0 %v20417_v3  ;;  %v2076_v55 = vand.u32 4294901760, %v2075_v45  ;;  %v2083_v8 = vand.u32 4294901760, %v2082_v0 }
  0xef   : > { %17919 = vmatprep.subr.mxu1 %v20417_v3  ;;  %17891 = vmatpush3.msra.mxu0 %v21482_v26 }
  0xf0   : > { %17920 = vmatpush3.msra.mxu1 %v2048_v59  ;;  %17892 = vmatprep.subr.mxu0 %v20417_v3  ;;  %v1856_v59 = vld [vmem:[#allocation2 + $0x12] sm:$0xff] }
  0xf1   : > { %17921 = vmatprep.subr.mxu1 %v20417_v3  ;;  %v21556_v13 = vpop.f32.mrf.mxu1  ;;  %17893 = vmatpush3.msra.mxu0 %v21502_v5  ;;  %v1879_v1 = vsel %vm372_vm2, %v1856_v59, 0 }
  0xf2   : > { %17922 = vmatpush3.msra.mxu1 %v2055_v23  ;;  %17894 = vmatprep.subr.mxu0 %v20417_v3  ;;  %v21574_v23 = vand.u32 4294901760, %v1876_v15 }
  0xf3   : > { %17923 = vmatprep.subr.mxu1 %v20417_v3  ;;  %v17491_v12 = vpop.f32.mrf.mxu1  ;;  %17895 = vmatpush3.msra.mxu0 %v21514_v40 }
  0xf4   : > { %17924 = vmatpush3.msra.mxu1 %v2062_v38  ;;  %17896 = vmatprep.mubr.msk.f32.mxu0 %vm20418_vm0, %v20417_v3  ;;  %v21584_v61 = vsub.f32 %v1876_v15, %v21574_v23  ;;  %v21588_v38 = vand.u32 4294901760, %v1879_v1 }
  0xf5   : > { %17925 = vmatprep.subr.mxu1 %v20417_v3  ;;  %17942 = vmatprep.subr.mxu0 %v20417_v3 }
  0xf6   : > { %17897 = vmatmul.mubr.f32.vlgmr.msra.gmra.mxu0 %v1964_v14  ;;  %17926 = vmatpush3.msra.mxu1 %v2069_v44  ;;  %v1972_v45 = vand.u32 4294901760, %v21584_v61  ;;  %v21600_v47 = vsub.f32 %v1879_v1, %v21588_v38 }
  0xf7   : > { %17943 = vmatpush3.msra.mxu0 %v21331_v20  ;;  %17927 = vmatprep.subr.mxu1 %v20417_v3 }
  0xf8   : > { %17944 = vmatprep.subr.mxu0 %v20417_v3  ;;  %17928 = vmatpush3.msra.mxu1 %v2076_v55  ;;  %v1973_v0 = vsub.f32 %v21584_v61, %v1972_v45  ;;  %v1982_v12 = vand.u32 4294901760, %v21600_v47 }
  0xf9   : > { %17945 = vmatpush3.msra.mxu0 %v21347_v24  ;;  %17929 = vmatprep.subr.mxu1 %v20417_v3 }
  0xfa   : > { %17946 = vmatprep.subr.mxu0 %v20417_v3  ;;  %17930 = vmatpush3.msra.mxu1 %v2083_v8  ;;  %v1974_v63 = vand.u32 4294901760, %v1973_v0  ;;  %v1983_v59 = vsub.f32 %v21600_v47, %v1982_v12 }
  0xfb   : > { %17947 = vmatpush3.msra.mxu0 %v21360_v34  ;;  %17931 = vmatprep.subr.mxu1 %v20417_v3 }
  0xfc   : > { %17948 = vmatprep.subr.mxu0 %v20417_v3  ;;  %17932 = vmatpush3.msra.mxu1 %v2090_v39 }
  0xfd   : > { %17933 = vmatprep.mubr.msk.f32.mxu1 %vm20418_vm0, %v20417_v3  ;;  %17949 = vmatpush3.msra.mxu0 %v21379_v57 }
  0xfe   : > { %17934 = vmatmul.mubr.f32.vlgmr.msra.gmra.mxu1 %v21464_v53  ;;  %17950 = vmatprep.subr.mxu0 %v20417_v3 }
  0xff   : > { %17979 = vmatprep.subr.mxu1 %v20417_v3  ;;  %17951 = vmatpush3.msra.mxu0 %v21395_v37  ;;  %v21602_v14 = vpop.f32.mrf.mxu0  ;;  %v15892_v37 = vld [vmem:[%s26081_s1 + $0x1b0] sm:$0xff] }
 0x100   : > { %17980 = vmatpush3.msra.mxu1 %v21310_v11  ;;  %17952 = vmatprep.subr.mxu0 %v20417_v3 }
 0x101   : > { %17981 = vmatprep.subr.mxu1 %v20417_v3  ;;  %17953 = vmatpush3.msra.mxu0 %v21411_v19  ;;  %v17457_v44 = vpop.f32.mrf.mxu0 }
 0x102   : > { %17982 = vmatpush3.msra.mxu1 %v21325_v17  ;;  %17954 = vmatprep.subr.mxu0 %v20417_v3  ;;  %v1984_v44 = vand.u32 4294901760, %v1983_v59 }
 0x103   : > { %17983 = vmatprep.subr.mxu1 %v20417_v3  ;;  %17955 = vmatpush3.msra.mxu0 %v21428_v4 }
 0x104   : > { %17984 = vmatpush3.msra.mxu1 %v21335_v21  ;;  %v21616_v15 = vpop.f32.mrf.mxu0  ;;  %17956 = vmatprep.subr.mxu0 %v20417_v3 }
 0x105   : > { %17985 = vmatprep.subr.mxu1 %v20417_v3  ;;  %17957 = vmatpush3.msra.mxu0 %v21438_v36 }
 0x106   : > { %17986 = vmatpush3.msra.mxu1 %v21354_v27  ;;  %v17460_v55 = vpop.f32.mrf.mxu0  ;;  %17958 = vmatprep.subr.mxu0 %v20417_v3 }
 0x107   : > { %17987 = vmatprep.subr.mxu1 %v20417_v3  ;;  %17959 = vmatpush3.msra.mxu0 %v21455_v58 }
 0x108   : > { %17988 = vmatpush3.msra.mxu1 %v21367_v43  ;;  %v21629_v8 = vpop.f32.mrf.mxu1  ;;  %17960 = vmatprep.subr.mxu0 %v20417_v3 }
 0x109   : > { %17989 = vmatprep.subr.mxu1 %v20417_v3  ;;  %17899 = vmatprep.mubr.msk.f32.mxu0 %vm20418_vm0, %v20417_v3 }
 0x10a   : > { %17961 = vmatpush3.msra.mxu0 %v21472_v28  ;;  %v21636_v39 = vpop.f32.mrf.mxu0  ;;  %v17494_v1 = vpop.f32.mrf.mxu1  ;;  %17990 = vmatpush3.msra.mxu1 %v21384_v2 }
 0x10b   : > { %17900 = vmatmul.mubr.f32.gmra.mxu0 %v1974_v63  ;;  %17962 = vmatprep.subr.mxu0 %v20417_v3 }
 0x10c   : > { %17991 = vmatprep.subr.mxu1 %v20417_v3  ;;  %v17528_v0 = vpop.f32.mrf.mxu0  ;;  %17963 = vmatpush3.msra.mxu0 %v21500_v31  ;;  %v15889_v31 = vld [vmem:[%s26081_s1 + $0x198] sm:$0xff] }
 0x10d   : > { %17992 = vmatpush3.msra.mxu1 %v21397_v41  ;;  %17964 = vmatprep.subr.mxu0 %v20417_v3 }
 0x10e   : > { %17993 = vmatprep.subr.mxu1 %v20417_v3  ;;  %v21645_v55 = vpop.f32.mrf.mxu1  ;;  %17902 = vmatprep.mubr.msk.f32.mxu0 %vm20418_vm0, %v20417_v3 }
 0x10f   : > { %17965 = vmatpush3.msra.mxu0 %v21512_v25  ;;  %17994 = vmatpush3.msra.mxu1 %v21413_v35 }
 0x110   : > { %17903 = vmatmul.mubr.f32.gmra.mxu0 %v1984_v44  ;;  %v17497_v63 = vpop.f32.mrf.mxu1  ;;  %17966 = vmatprep.subr.mxu0 %v20417_v3  ;;  %v21653_v59 = vpop.f32.mrf.mxu0 }
 0x111   : > { %17995 = vmatprep.subr.mxu1 %v20417_v3  ;;  %17967 = vmatpush3.msra.mxu0 %v21524_v62 }
 0x112   : > { %17996 = vmatpush3.msra.mxu1 %v21430_v16  ;;  %17936 = vmatprep.mubr.msk.f32.mxu1 %vm20418_vm0, %v20417_v3  ;;  %v17531_v1 = vpop.f32.mrf.mxu0 }
 0x113   : > { %17968 = vmatprep.subr.mxu0 %v20417_v3  ;;  %17997 = vmatprep.subr.mxu1 %v20417_v3 }
 0x114   : > { %17937 = vmatmul.mubr.f32.gmra.mxu1 %v21574_v23  ;;  %17969 = vmatpush3.msra.mxu0 %v21536_v54 }
 0x115   : > { %17970 = vmatprep.mubr.msk.f32.mxu0 %vm20418_vm0, %v20417_v3  ;;  %17998 = vmatpush3.msra.mxu1 %v21443_v46  ;;  %v21669_v0 = vpop.f32.mrf.mxu1 }
 0x116   : > { %17971 = vmatmul.mubr.f32.vlgmr.msra.gmra.mxu0 %v21494_v9  ;;  %v21667_v44 = vpop.f32.mrf.mxu0  ;;  %17999 = vmatprep.subr.mxu1 %v20417_v3 }
 0x117   : > { %18016 = vmatprep.subr.mxu0 %v20417_v3  ;;  %18000 = vmatpush3.msra.mxu1 %v21467_v6  ;;  %v17565_v63 = vpop.f32.mrf.mxu1 }
 0x118   : > { %18017 = vmatpush3.msra.mxu0 %v1997_v30  ;;  %v17534_v1 = vpop.f32.mrf.mxu0  ;;  %17939 = vmatprep.mubr.msk.f32.mxu1 %vm20418_vm0, %v20417_v3 }
 0x119   : > { %18001 = vmatprep.subr.mxu1 %v20417_v3  ;;  %18018 = vmatprep.subr.mxu0 %v20417_v3 }
 0x11a   : > { %17940 = vmatmul.mubr.f32.gmra.mxu1 %v21588_v38  ;;  %17973 = vmatprep.mubr.msk.f32.mxu0 %vm20418_vm0, %v20417_v3 }
 0x11b   : > { %18002 = vmatpush3.msra.mxu1 %v21482_v26  ;;  %18019 = vmatpush3.msra.mxu0 %v2004_v52  ;;  %v21687_v20 = vpop.f32.mrf.mxu1  ;;  %v15893_v52 = vld [vmem:[%s26081_s1 + $0x1b8] sm:$0xff] }
 0x11c   : > { %18003 = vmatprep.subr.mxu1 %v20417_v3  ;;  %17974 = vmatmul.mubr.f32.gmra.mxu0 %v21584_v61 }
 0x11d   : > { %18020 = vmatprep.subr.mxu0 %v20417_v3  ;;  %18004 = vmatpush3.msra.mxu1 %v21502_v5  ;;  %v17568_v30 = vpop.f32.mrf.mxu1 }
 0x11e   : > { %18021 = vmatpush3.msra.mxu0 %v2011_v7  ;;  %18005 = vmatprep.subr.mxu1 %v20417_v3 }
 0x11f   : > { %18022 = vmatprep.subr.mxu0 %v20417_v3  ;;  %17976 = vmatprep.mubr.msk.f32.mxu0 %vm20418_vm0, %v20417_v3 }
 0x120   : > { %18006 = vmatpush3.msra.mxu1 %v21514_v40  ;;  %18007 = vmatprep.mubr.msk.f32.mxu1 %vm20418_vm0, %v20417_v3  ;;  %v21703_v24 = vpop.f32.mrf.mxu1 }
 0x121   : > { %18023 = vmatpush3.msra.mxu0 %v2018_v29  ;;  %18008 = vmatmul.mubr.f32.vlgmr.msra.gmra.mxu1 %v1962_v32 }
 0x122   : > { %17977 = vmatmul.mubr.f32.gmra.mxu0 %v21600_v47  ;;  %18024 = vmatprep.subr.mxu0 %v20417_v3  ;;  %v17571_v34 = vpop.f32.mrf.mxu1 }
 0x123   : > { %18053 = vmatprep.subr.mxu1 %v20417_v3  ;;  %18025 = vmatpush3.msra.mxu0 %v2025_v18  ;;  %v21780_v18 = vand.u32 4294901760, %v15892_v37 }
 0x124   : > { %18054 = vmatpush3.msra.mxu1 %v21310_v11  ;;  %18026 = vmatprep.subr.mxu0 %v20417_v3  ;;  %v15851_v11 = vld [vmem:[%s26087_s7] ss:$0 sm:$0xff] }
 0x125   : > { %18055 = vmatprep.subr.mxu1 %v20417_v3  ;;  %18010 = vmatprep.mubr.msk.f32.mxu1 %vm20418_vm0, %v20417_v3  ;;  %v505_v7 = vadd.f32 %v15851_v11, %v21602_v14  ;;  %v21802_v9 = vsub.f32 %v15892_v37, %v21780_v18 }
 0x126   : > { %18027 = vmatpush3.msra.mxu0 %v2032_v60  ;;  %18056 = vmatpush3.msra.mxu1 %v21325_v17  ;;  %v495_v17 = vadd.f32 %v15851_v11, %v21531_v51 }
 0x127   : > { %18028 = vmatprep.subr.mxu0 %v20417_v3  ;;  %18011 = vmatmul.mubr.f32.gmra.mxu1 %v1972_v45  ;;  %v662_v29 = vadd.f32 %v21629_v8, %v505_v7 }
 0x128   : > { %18057 = vmatprep.subr.mxu1 %v20417_v3  ;;  %18029 = vmatpush3.msra.mxu0 %v2039_v42  ;;  %v656_v57 = vadd.f32 %v21556_v13, %v495_v17  ;;  %v15890_v42 = vld [vmem:[%s26081_s1 + $0x1a0] sm:$0xff]  ;;  %v15887_v13 = vld [vmem:[%s26081_s1 + $0x188] sm:$0xff] }
 0x129   : > { %18058 = vmatpush3.msra.mxu1 %v21335_v21  ;;  %18030 = vmatprep.subr.mxu0 %v20417_v3 }
 0x12a   : > { %18059 = vmatprep.subr.mxu1 %v20417_v3  ;;  %18013 = vmatprep.mubr.msk.f32.mxu1 %vm20418_vm0, %v20417_v3 }
 0x12b   : > { %18031 = vmatpush3.msra.mxu0 %v2046_v48  ;;  %18060 = vmatpush3.msra.mxu1 %v21354_v27 }
 0x12c   : > { %18032 = vmatprep.subr.mxu0 %v20417_v3  ;;  %18014 = vmatmul.mubr.f32.gmra.mxu1 %v1982_v12 }
 0x12d   : > { %18061 = vmatprep.subr.mxu1 %v20417_v3  ;;  %v997_v21 = vpop.f32.mrf.mxu0  ;;  %18033 = vmatpush3.msra.mxu0 %v2053_v49 }
 0x12e   : > { %18062 = vmatpush3.msra.mxu1 %v21367_v43  ;;  %18034 = vmatprep.subr.mxu0 %v20417_v3  ;;  %v21757_v43 = vand.u32 4294901760, %v15893_v52 }
 0x12f   : > { %18063 = vmatprep.subr.mxu1 %v20417_v3  ;;  %v17602_v27 = vpop.f32.mrf.mxu0  ;;  %18035 = vmatpush3.msra.mxu0 %v2060_v22 }
 0x130   : > { %18064 = vmatpush3.msra.mxu1 %v21384_v2  ;;  %18036 = vmatprep.subr.mxu0 %v20417_v3  ;;  %v768_v2 = vadd.f32 %v21636_v39, %v656_v57  ;;  %v21778_v4 = vsub.f32 %v15893_v52, %v21757_v43 }
 0x131   : > { %18065 = vmatprep.subr.mxu1 %v20417_v3  ;;  %18037 = vmatpush3.msra.mxu0 %v2067_v50 }
 0x132   : > { %18066 = vmatpush3.msra.mxu1 %v21397_v41  ;;  %18038 = vmatprep.subr.mxu0 %v20417_v3  ;;  %v1003_v19 = vpop.f32.mrf.mxu0  ;;  %v15891_v41 = vld [vmem:[%s26081_s1 + $0x1a8] sm:$0xff]  ;;  %v869_v36 = vadd.f32 %v21669_v0, %v768_v2  ;;  %v2734_v22 = vand.u32 4294901760, %v21778_v4 }
 0x133   : > { %18067 = vmatprep.subr.mxu1 %v20417_v3  ;;  %18039 = vmatpush3.msra.mxu0 %v2074_v56  ;;  %v21789_v58 = vand.u32 4294901760, %v15891_v41  ;;  %v15888_v56 = vld [vmem:[%s26081_s1 + $0x190] sm:$0xff] }
 0x134   : > { %18068 = vmatpush3.msra.mxu1 %v21413_v35  ;;  %18040 = vmatprep.subr.mxu0 %v20417_v3  ;;  %v17605_v60 = vpop.f32.mrf.mxu0  ;;  %v515_v35 = vadd.f32 %v15851_v11, %v21616_v15  ;;  %v998_v28 = vadd.f32 %v997_v21, %v869_v36  ;;  %v15886_v15 = vld [vmem:[%s26081_s1 + $0x180] sm:$0xff]  ;;  %v15883_v36 = vld [vmem:[%s26081_s1 + $0x168] sm:$0xff] }
 0x135   : > { %18069 = vmatprep.subr.mxu1 %v20417_v3  ;;  %18041 = vmatpush3.msra.mxu0 %v2081_v33  ;;  %v21816_v51 = vsub.f32 %v15891_v41, %v21789_v58  ;;  %v21825_v33 = vand.u32 4294901760, %v15889_v31 }
 0x136   : > { %18070 = vmatpush3.msra.mxu1 %v21430_v16  ;;  %18042 = vmatprep.subr.mxu0 %v20417_v3  ;;  %v775_v16 = vadd.f32 %v21653_v59, %v662_v29  ;;  %v668_v32 = vadd.f32 %v21645_v55, %v515_v35  ;;  %v21857_v59 = vand.u32 4294901760, %v15887_v13 }
 0x137   : > { %18071 = vmatprep.subr.mxu1 %v20417_v3  ;;  %18043 = vmatpush3.msra.mxu0 %v2088_v10  ;;  %v1094_v49 = vpop.f32.mrf.mxu1  ;;  %v2741_v10 = vand.u32 4294901760, %v21802_v9  ;;  %v2748_v12 = vand.u32 4294901760, %v21816_v51  ;;  %v21854_v39 = vsub.f32 %v15889_v31, %v21825_v33 }
 0x138   : > { %18044 = vmatprep.mubr.msk.f32.mxu0 %vm20418_vm0, %v20417_v3  ;;  %v1009_v48 = vpop.f32.mrf.mxu0  ;;  %18072 = vmatpush3.msra.mxu1 %v21443_v46  ;;  %v1095_v25 = vadd.f32 %v1094_v49, %v998_v28  ;;  %v21811_v46 = vand.u32 4294901760, %v15890_v42  ;;  %v877_v54 = vadd.f32 %v21687_v20, %v775_v16  ;;  %v782_v45 = vadd.f32 %v21667_v44, %v668_v32 }
 0x139   : > { %18045 = vmatmul.mubr.f32.vlgmr.msra.gmra.mxu0 %v21464_v53  ;;  %18073 = vmatprep.subr.mxu1 %v20417_v3  ;;  %v17639_v62 = vpop.f32.mrf.mxu1  ;;  %v2742_v63 = vsub.f32 %v21802_v9, %v2741_v10  ;;  %v21874_v20 = vand.u32 4294901760, %v15886_v15  ;;  %v2749_v11 = vsub.f32 %v21816_v51, %v2748_v12  ;;  %v21889_v21 = vsub.f32 %v15887_v13, %v21857_v59  ;;  %v15880_v13 = vld [vmem:[%s26081_s1 + $0x150] sm:$0xff] }
 0x13a   : > { %18090 = vmatprep.subr.mxu0 %v20417_v3  ;;  %v17608_v50 = vpop.f32.mrf.mxu0  ;;  %18074 = vmatpush3.msra.mxu1 %v21467_v6  ;;  %1111 = vst.msk [vmem:[#allocation3 + $0x2] sm:$0xff] %vm1110_vm3, %v1095_v25  ;;  %v2735_v6 = vsub.f32 %v21778_v4, %v2734_v22  ;;  %v1004_v61 = vadd.f32 %v1003_v19, %v877_v54  ;;  %v2762_v27 = vand.u32 4294901760, %v21854_v39  ;;  %v21929_v16 = vand.u32 4294901760, %v15883_v36 }
 0x13b   : > { %18091 = vmatpush3.msra.mxu0 %v21757_v43  ;;  %18075 = vmatprep.subr.mxu1 %v20417_v3  ;;  %v21841_v47 = vsub.f32 %v15890_v42, %v21811_v46  ;;  %v885_v55 = vadd.f32 %v21703_v24, %v782_v45  ;;  %v2591_v24 = vld [vmem:[#allocation2 + $0x3] sm:$0xff]  ;;  %v2743_v7 = vand.u32 4294901760, %v2742_v63  ;;  %v2750_v60 = vand.u32 4294901760, %v2749_v11  ;;  %v15881_v50 = vld [vmem:[%s26081_s1 + $0x158] sm:$0xff] }
 0x13c   : > { %18092 = vmatprep.subr.mxu0 %v20417_v3  ;;  %18047 = vmatprep.mubr.msk.f32.mxu0 %vm20418_vm0, %v20417_v3  ;;  %v2736_v0 = vand.u32 4294901760, %v2735_v6  ;;  %v2610_v37 = vsel %vm372_vm2, %v2591_v24, 0  ;;  %v2763_v42 = vsub.f32 %v21854_v39, %v2762_v27  ;;  %v2776_v28 = vand.u32 4294901760, %v21889_v21 }
 0x13d   : > { %18076 = vmatpush3.msra.mxu1 %v21482_v26  ;;  %18093 = vmatpush3.msra.mxu0 %v21780_v18  ;;  %v21843_v26 = vand.u32 4294901760, %v15888_v56  ;;  %v1100_v14 = vpop.f32.mrf.mxu1  ;;  %v2755_v30 = vand.u32 4294901760, %v21841_v47  ;;  %v1010_v34 = vadd.f32 %v1009_v48, %v885_v55  ;;  %v15882_v48 = vld [vmem:[%s26081_s1 + $0x160] sm:$0xff]  ;;  %v21926_v49 = vand.u32 4294901760, %v2610_v37 }
 0x13e   : > { %18077 = vmatprep.subr.mxu1 %v20417_v3  ;;  %18048 = vmatmul.mubr.f32.gmra.mxu0 %v21574_v23  ;;  %v1101_v8 = vadd.f32 %v1100_v14, %v1004_v61  ;;  %v2764_v54 = vand.u32 4294901760, %v2763_v42  ;;  %v21962_v45 = vsub.f32 %v15883_v36, %v21929_v16  ;;  %v21964_v14 = vand.u32 4294901760, %v15881_v50 }
 0x13f   : > { %18094 = vmatprep.subr.mxu0 %v20417_v3  ;;  %18078 = vmatpush3.msra.mxu1 %v21502_v5  ;;  %v17642_v44 = vpop.f32.mrf.mxu1  ;;  %v15885_v5 = vld [vmem:[%s26081_s1 + $0x178] sm:$0xff]  ;;  %v21872_v1 = vsub.f32 %v15888_v56, %v21843_v26  ;;  %v2756_v19 = vsub.f32 %v21841_v47, %v2755_v30  ;;  %v2777_v56 = vsub.f32 %v21889_v21, %v2776_v28 }
 0x140   : > { %18095 = vmatpush3.msra.mxu0 %v21789_v58  ;;  %18079 = vmatprep.subr.mxu1 %v20417_v3  ;;  %1112 = vst.msk [vmem:[#allocation3 + $0xa] sm:$0xff] %vm1110_vm3, %v1101_v8  ;;  %v21891_v52 = vand.u32 4294901760, %v15885_v5  ;;  %v21956_v61 = vsub.f32 %v2610_v37, %v21926_v49  ;;  %v2804_v11 = vand.u32 4294901760, %v21962_v45 }
 0x141   : > { %18096 = vmatprep.subr.mxu0 %v20417_v3  ;;  %18050 = vmatprep.mubr.msk.f32.mxu0 %vm20418_vm0, %v20417_v3  ;;  %v2769_v29 = vand.u32 4294901760, %v21872_v1  ;;  %v2757_v31 = vand.u32 4294901760, %v2756_v19  ;;  %v2778_v63 = vand.u32 4294901760, %v2777_v56 }
 0x142   : > { %18080 = vmatpush3.msra.mxu1 %v21514_v40  ;;  %18081 = vmatprep.mubr.msk.f32.mxu1 %vm20418_vm0, %v20417_v3  ;;  %v15884_v40 = vld [vmem:[%s26081_s1 + $0x170] sm:$0xff]  ;;  %v1106_v17 = vpop.f32.mrf.mxu1  ;;  %v21917_v35 = vsub.f32 %v15885_v5, %v21891_v52  ;;  %v2699_v24 = vand.u32 4294901760, %v21956_v61  ;;  %v2805_v36 = vsub.f32 %v21962_v45, %v2804_v11 }
 0x143   : > { %18097 = vmatpush3.msra.mxu0 %v21811_v46  ;;  %18082 = vmatmul.mubr.f32.vlgmr.msra.gmra.mxu1 %v21464_v53  ;;  %v1107_v57 = vadd.f32 %v1106_v17, %v1010_v34  ;;  %v21899_v53 = vsub.f32 %v15886_v15, %v21874_v20  ;;  %v21904_v41 = vand.u32 4294901760, %v15884_v40  ;;  %v2770_v32 = vsub.f32 %v21872_v1, %v2769_v29 }
 0x144   : > { %18051 = vmatmul.mubr.f32.gmra.mxu0 %v21588_v38  ;;  %18098 = vmatprep.subr.mxu0 %v20417_v3  ;;  %v17645_v2 = vpop.f32.mrf.mxu1  ;;  %v2790_v6 = vand.u32 4294901760, %v21917_v35  ;;  %v2700_v19 = vsub.f32 %v21956_v61, %v2699_v24  ;;  %v2806_v56 = vand.u32 4294901760, %v2805_v36 }
 0x145   : > { %18127 = vmatprep.subr.mxu1 %v20417_v3  ;;  %18099 = vmatpush3.msra.mxu0 %v21825_v33  ;;  %1113 = vst.msk [vmem:[#allocation3 + $0x12] sm:$0xff] %vm1110_vm3, %v1107_v57  ;;  %v21934_v25 = vsub.f32 %v15884_v40, %v21904_v41  ;;  %v2783_v62 = vand.u32 4294901760, %v21899_v53  ;;  %v2771_v15 = vand.u32 4294901760, %v2770_v32  ;;  %v2592_v32 = vld [vmem:[#allocation2 + $0xb] sm:$0xff] }
 0x146   : > { %18128 = vmatpush3.msra.mxu1 %v2736_v0  ;;  %18100 = vmatprep.subr.mxu0 %v20417_v3  ;;  %v21976_v0 = vand.u32 4294901760, %v15880_v13  ;;  %v2791_v5 = vsub.f32 %v21917_v35, %v2790_v6 }
 0x147   : > { %18129 = vmatprep.subr.mxu1 %v20417_v3  ;;  %18084 = vmatprep.mubr.msk.f32.mxu1 %vm20418_vm0, %v20417_v3  ;;  %v2784_v8 = vsub.f32 %v21899_v53, %v2783_v62  ;;  %v2797_v55 = vand.u32 4294901760, %v21934_v25 }
 0x148   : > { %18101 = vmatpush3.msra.mxu0 %v21843_v26  ;;  %18130 = vmatpush3.msra.mxu1 %v2743_v7  ;;  %v21998_v7 = vsub.f32 %v15880_v13, %v21976_v0  ;;  %v2792_v2 = vand.u32 4294901760, %v2791_v5 }
 0x149   : > { %18102 = vmatprep.subr.mxu0 %v20417_v3  ;;  %18085 = vmatmul.mubr.f32.gmra.mxu1 %v21574_v23  ;;  %v21944_v23 = vand.u32 4294901760, %v15882_v48  ;;  %v2785_v40 = vand.u32 4294901760, %v2784_v8  ;;  %v2798_v17 = vsub.f32 %v21934_v25, %v2797_v55 }
 0x14a   : > { %18131 = vmatprep.subr.mxu1 %v20417_v3  ;;  %18103 = vmatpush3.msra.mxu0 %v21857_v59 }
 0x14b   : > { %18132 = vmatpush3.msra.mxu1 %v2750_v60  ;;  %18104 = vmatprep.subr.mxu0 %v20417_v3  ;;  %v21974_v44 = vsub.f32 %v15882_v48, %v21944_v23  ;;  %v2799_v42 = vand.u32 4294901760, %v2798_v17 }
 0x14c   : > { %18133 = vmatprep.subr.mxu1 %v20417_v3  ;;  %18087 = vmatprep.mubr.msk.f32.mxu1 %vm20418_vm0, %v20417_v3 }
 0x14d   : > { %18105 = vmatpush3.msra.mxu0 %v21874_v20  ;;  %18134 = vmatpush3.msra.mxu1 %v2757_v31  ;;  %v2811_v37 = vand.u32 4294901760, %v21974_v44  ;;  %v2825_v31 = vand.u32 4294901760, %v21998_v7 }
 0x14e   : > { %18106 = vmatprep.subr.mxu0 %v20417_v3  ;;  %18088 = vmatmul.mubr.f32.gmra.mxu1 %v21588_v38  ;;  %v21988_v38 = vsub.f32 %v15881_v50, %v21964_v14  ;;  %v2701_v50 = vand.u32 4294901760, %v2700_v19 }
 0x14f   : > { %18135 = vmatprep.subr.mxu1 %v20417_v3  ;;  %18107 = vmatpush3.msra.mxu0 %v21891_v52  ;;  %v2812_v48 = vsub.f32 %v21974_v44, %v2811_v37  ;;  %v2826_v5 = vsub.f32 %v21998_v7, %v2825_v31 }
 0x150   : > { %18136 = vmatpush3.msra.mxu1 %v2764_v54  ;;  %v21983_v34 = vpop.f32.mrf.mxu0  ;;  %18108 = vmatprep.subr.mxu0 %v20417_v3  ;;  %v2818_v60 = vand.u32 4294901760, %v21988_v38 }
 0x151   : > { %18137 = vmatprep.subr.mxu1 %v20417_v3  ;;  %18109 = vmatpush3.msra.mxu0 %v21904_v41 }
 0x152   : > { %18138 = vmatpush3.msra.mxu1 %v2771_v15  ;;  %v17676_v57 = vpop.f32.mrf.mxu0  ;;  %18110 = vmatprep.subr.mxu0 %v20417_v3  ;;  %v2819_v13 = vsub.f32 %v21988_v38, %v2818_v60  ;;  %v2613_v15 = vsel %vm372_vm2, %v2592_v32, 0 }
 0x153   : > { %18139 = vmatprep.subr.mxu1 %v20417_v3  ;;  %18111 = vmatpush3.msra.mxu0 %v21929_v16  ;;  %v22036_v57 = vand.u32 4294901760, %v2613_v15 }
 0x154   : > { %18140 = vmatpush3.msra.mxu1 %v2778_v63  ;;  %18112 = vmatprep.subr.mxu0 %v20417_v3  ;;  %v2813_v63 = vand.u32 4294901760, %v2812_v48  ;;  %v2820_v17 = vand.u32 4294901760, %v2819_v13 }
 0x155   : > { %18141 = vmatprep.subr.mxu1 %v20417_v3  ;;  %18113 = vmatpush3.msra.mxu0 %v21944_v23  ;;  %v22046_v36 = vsub.f32 %v2613_v15, %v22036_v57 }
 0x156   : > { %18142 = vmatpush3.msra.mxu1 %v2785_v40  ;;  %18114 = vmatprep.subr.mxu0 %v20417_v3  ;;  %v2593_v40 = vld [vmem:[#allocation2 + $0x13] sm:$0xff] }
 0x157   : > { %18143 = vmatprep.subr.mxu1 %v20417_v3  ;;  %18115 = vmatpush3.msra.mxu0 %v21964_v14  ;;  %v2616_v19 = vsel %vm372_vm2, %v2593_v40, 0  ;;  %v2709_v48 = vand.u32 4294901760, %v22046_v36 }
 0x158   : > { %18144 = vmatpush3.msra.mxu1 %v2792_v2  ;;  %v22019_v54 = vpop.f32.mrf.mxu1  ;;  %18116 = vmatprep.subr.mxu0 %v20417_v3  ;;  %v2827_v2 = vand.u32 4294901760, %v2826_v5 }
 0x159   : > { %18145 = vmatprep.subr.mxu1 %v20417_v3  ;;  %18117 = vmatpush3.msra.mxu0 %v21976_v0  ;;  %v2710_v13 = vsub.f32 %v22046_v36, %v2709_v48 }
 0x15a   : > { %18146 = vmatpush3.msra.mxu1 %v2799_v42  ;;  %v17713_v8 = vpop.f32.mrf.mxu1  ;;  %18118 = vmatprep.mubr.msk.f32.mxu0 %vm20418_vm0, %v20417_v3  ;;  %v22050_v42 = vand.u32 4294901760, %v2616_v19 }
 0x15b   : > { %18147 = vmatprep.subr.mxu1 %v20417_v3  ;;  %18164 = vmatprep.subr.mxu0 %v20417_v3  ;;  %v2711_v5 = vand.u32 4294901760, %v2710_v13 }
 0x15c   : > { %18119 = vmatmul.mubr.f32.vlgmr.msra.gmra.mxu0 %v2701_v50  ;;  %18148 = vmatpush3.msra.mxu1 %v2806_v56  ;;  %v22064_v50 = vsub.f32 %v2616_v19, %v22050_v42 }
 0x15d   : > { %18165 = vmatpush3.msra.mxu0 %v21778_v4  ;;  %18149 = vmatprep.subr.mxu1 %v20417_v3 }
 0x15e   : > { %18166 = vmatprep.subr.mxu0 %v20417_v3  ;;  %18150 = vmatpush3.msra.mxu1 %v2813_v63  ;;  %v2719_v15 = vand.u32 4294901760, %v22064_v50 }
 0x15f   : > { %18167 = vmatpush3.msra.mxu0 %v21802_v9  ;;  %18151 = vmatprep.subr.mxu1 %v20417_v3 }
 0x160   : > { %18168 = vmatprep.subr.mxu0 %v20417_v3  ;;  %18152 = vmatpush3.msra.mxu1 %v2820_v17  ;;  %v2720_v40 = vsub.f32 %v22064_v50, %v2719_v15 }
 0x161   : > { %18169 = vmatpush3.msra.mxu0 %v21816_v51  ;;  %18153 = vmatprep.subr.mxu1 %v20417_v3 }
 0x162   : > { %18170 = vmatprep.subr.mxu0 %v20417_v3  ;;  %18154 = vmatpush3.msra.mxu1 %v2827_v2 }
 0x163   : > { %18155 = vmatprep.mubr.msk.f32.mxu1 %vm20418_vm0, %v20417_v3  ;;  %18171 = vmatpush3.msra.mxu0 %v21841_v47 }
 0x164   : > { %18156 = vmatmul.mubr.f32.vlgmr.msra.gmra.mxu1 %v21926_v49  ;;  %18172 = vmatprep.subr.mxu0 %v20417_v3 }
 0x165   : > { %18201 = vmatprep.subr.mxu1 %v20417_v3  ;;  %v22059_v32 = vpop.f32.mrf.mxu0  ;;  %18173 = vmatpush3.msra.mxu0 %v21854_v39 }
 0x166   : > { %18202 = vmatpush3.msra.mxu1 %v21757_v43  ;;  %18174 = vmatprep.subr.mxu0 %v20417_v3 }
 0x167   : > { %18203 = vmatprep.subr.mxu1 %v20417_v3  ;;  %v17679_v56 = vpop.f32.mrf.mxu0  ;;  %18175 = vmatpush3.msra.mxu0 %v21872_v1 }
 0x168   : > { %18204 = vmatpush3.msra.mxu1 %v21780_v18  ;;  %18176 = vmatprep.subr.mxu0 %v20417_v3  ;;  %v2721_v56 = vand.u32 4294901760, %v2720_v40 }
 0x169   : > { %18205 = vmatprep.subr.mxu1 %v20417_v3  ;;  %18177 = vmatpush3.msra.mxu0 %v21889_v21 }
 0x16a   : > { %18206 = vmatpush3.msra.mxu1 %v21789_v58  ;;  %v22078_v8 = vpop.f32.mrf.mxu0  ;;  %18178 = vmatprep.subr.mxu0 %v20417_v3 }
 0x16b   : > { %18207 = vmatprep.subr.mxu1 %v20417_v3  ;;  %18179 = vmatpush3.msra.mxu0 %v21899_v53 }
 0x16c   : > { %18208 = vmatpush3.msra.mxu1 %v21811_v46  ;;  %v17682_v63 = vpop.f32.mrf.mxu0  ;;  %18180 = vmatprep.subr.mxu0 %v20417_v3 }
 0x16d   : > { %18209 = vmatprep.subr.mxu1 %v20417_v3  ;;  %18181 = vmatpush3.msra.mxu0 %v21917_v35 }
 0x16e   : > { %18210 = vmatpush3.msra.mxu1 %v21825_v33  ;;  %v22091_v17 = vpop.f32.mrf.mxu1  ;;  %18182 = vmatprep.subr.mxu0 %v20417_v3 }
 0x16f   : > { %18211 = vmatprep.subr.mxu1 %v20417_v3  ;;  %18121 = vmatprep.mubr.msk.f32.mxu0 %vm20418_vm0, %v20417_v3  ;;  %v1397_v21 = vadd.f32 %v22091_v17, %v22059_v32 }
 0x170   : > { %18183 = vmatpush3.msra.mxu0 %v21934_v25  ;;  %v22098_v2 = vpop.f32.mrf.mxu0  ;;  %v17716_v19 = vpop.f32.mrf.mxu1  ;;  %18212 = vmatpush3.msra.mxu1 %v21843_v26 }
 0x171   : > { %18122 = vmatmul.mubr.f32.gmra.mxu0 %v2711_v5  ;;  %18184 = vmatprep.subr.mxu0 %v20417_v3 }
 0x172   : > { %18213 = vmatprep.subr.mxu1 %v20417_v3  ;;  %v17750_v13 = vpop.f32.mrf.mxu0  ;;  %18185 = vmatpush3.msra.mxu0 %v21962_v45 }
 0x173   : > { %18214 = vmatpush3.msra.mxu1 %v21857_v59  ;;  %18186 = vmatprep.subr.mxu0 %v20417_v3 }
 0x174   : > { %18215 = vmatprep.subr.mxu1 %v20417_v3  ;;  %v22107_v63 = vpop.f32.mrf.mxu1  ;;  %18124 = vmatprep.mubr.msk.f32.mxu0 %vm20418_vm0, %v20417_v3 }
 0x175   : > { %18187 = vmatpush3.msra.mxu0 %v21974_v44  ;;  %18216 = vmatpush3.msra.mxu1 %v21874_v20 }
 0x176   : > { %18125 = vmatmul.mubr.f32.gmra.mxu0 %v2721_v56  ;;  %v17719_v5 = vpop.f32.mrf.mxu1  ;;  %18188 = vmatprep.subr.mxu0 %v20417_v3  ;;  %v22115_v40 = vpop.f32.mrf.mxu0 }
 0x177   : > { %18217 = vmatprep.subr.mxu1 %v20417_v3  ;;  %18189 = vmatpush3.msra.mxu0 %v21988_v38  ;;  %v1510_v35 = vadd.f32 %v22115_v40, %v1397_v21 }
 0x178   : > { %18218 = vmatpush3.msra.mxu1 %v21891_v52  ;;  %18158 = vmatprep.mubr.msk.f32.mxu1 %vm20418_vm0, %v20417_v3  ;;  %v17753_v19 = vpop.f32.mrf.mxu0 }
 0x179   : > { %18190 = vmatprep.subr.mxu0 %v20417_v3  ;;  %18219 = vmatprep.subr.mxu1 %v20417_v3 }
 0x17a   : > { %18159 = vmatmul.mubr.f32.gmra.mxu1 %v22036_v57  ;;  %18191 = vmatpush3.msra.mxu0 %v21998_v7 }
 0x17b   : > { %18192 = vmatprep.mubr.msk.f32.mxu0 %vm20418_vm0, %v20417_v3  ;;  %18220 = vmatpush3.msra.mxu1 %v21904_v41  ;;  %v22131_v13 = vpop.f32.mrf.mxu1 }
 0x17c   : > { %18193 = vmatmul.mubr.f32.vlgmr.msra.gmra.mxu0 %v21956_v61  ;;  %v22129_v56 = vpop.f32.mrf.mxu0  ;;  %18221 = vmatprep.subr.mxu1 %v20417_v3  ;;  %v1114_v61 = vld [vmem:[#allocation3 + $0x2] sm:$0xff] }
 0x17d   : > { %18238 = vmatprep.subr.mxu0 %v20417_v3  ;;  %18222 = vmatpush3.msra.mxu1 %v21929_v16  ;;  %v17787_v5 = vpop.f32.mrf.mxu1 }
 0x17e   : > { %18239 = vmatpush3.msra.mxu0 %v2734_v22  ;;  %v17756_v19 = vpop.f32.mrf.mxu0  ;;  %18161 = vmatprep.mubr.msk.f32.mxu1 %vm20418_vm0, %v20417_v3 }
 0x17f   : > { %18223 = vmatprep.subr.mxu1 %v20417_v3  ;;  %18240 = vmatprep.subr.mxu0 %v20417_v3 }
 0x180   : > { %18162 = vmatmul.mubr.f32.gmra.mxu1 %v22050_v42  ;;  %18195 = vmatprep.mubr.msk.f32.mxu0 %vm20418_vm0, %v20417_v3 }
 0x181   : > { %18224 = vmatpush3.msra.mxu1 %v21944_v23  ;;  %18241 = vmatpush3.msra.mxu0 %v2741_v10  ;;  %v22149_v4 = vpop.f32.mrf.mxu1  ;;  %v15906_v10 = vld [vmem:[%s26081_s1 + $0x220] sm:$0xff] }
 0x182   : > { %18225 = vmatprep.subr.mxu1 %v20417_v3  ;;  %18196 = vmatmul.mubr.f32.gmra.mxu0 %v22046_v36  ;;  %v22234_v39 = vand.u32 4294901760, %v15906_v10 }
 0x183   : > { %18242 = vmatprep.subr.mxu0 %v20417_v3  ;;  %18226 = vmatpush3.msra.mxu1 %v21964_v14  ;;  %v17790_v22 = vpop.f32.mrf.mxu1 }
 0x184   : > { %18243 = vmatpush3.msra.mxu0 %v2748_v12  ;;  %18227 = vmatprep.subr.mxu1 %v20417_v3  ;;  %v15905_v12 = vld [vmem:[%s26081_s1 + $0x218] sm:$0xff] }
 0x185   : > { %18244 = vmatprep.subr.mxu0 %v20417_v3  ;;  %18198 = vmatprep.mubr.msk.f32.mxu0 %vm20418_vm0, %v20417_v3 }
 0x186   : > { %18228 = vmatpush3.msra.mxu1 %v21976_v0  ;;  %18229 = vmatprep.mubr.msk.f32.mxu1 %vm20418_vm0, %v20417_v3  ;;  %v22165_v9 = vpop.f32.mrf.mxu1 }
 0x187   : > { %18245 = vmatpush3.msra.mxu0 %v2755_v30  ;;  %18230 = vmatmul.mubr.f32.vlgmr.msra.gmra.mxu1 %v2699_v24  ;;  %v15904_v30 = vld [vmem:[%s26081_s1 + $0x210] sm:$0xff]  ;;  %v1612_v24 = vadd.f32 %v22149_v4, %v1510_v35 }
 0x188   : > { %18199 = vmatmul.mubr.f32.gmra.mxu0 %v22064_v50  ;;  %18246 = vmatprep.subr.mxu0 %v20417_v3  ;;  %v17793_v51 = vpop.f32.mrf.mxu1  ;;  %v22262_v25 = vand.u32 4294901760, %v15904_v30  ;;  %v15900_v50 = vld [vmem:[%s26081_s1 + $0x1f0] sm:$0xff] }
 0x189   : > { %18275 = vmatprep.subr.mxu1 %v20417_v3  ;;  %18247 = vmatpush3.msra.mxu0 %v2762_v27  ;;  %v22250_v27 = vand.u32 4294901760, %v15905_v12  ;;  %v22333_v22 = vand.u32 4294901760, %v15900_v50 }
 0x18a   : > { %18276 = vmatpush3.msra.mxu1 %v21757_v43  ;;  %18248 = vmatprep.subr.mxu0 %v20417_v3  ;;  %v22289_v7 = vsub.f32 %v15904_v30, %v22262_v25 }
 0x18b   : > { %18277 = vmatprep.subr.mxu1 %v20417_v3  ;;  %18232 = vmatprep.mubr.msk.f32.mxu1 %vm20418_vm0, %v20417_v3  ;;  %v22273_v44 = vsub.f32 %v15905_v12, %v22250_v27  ;;  %v22361_v30 = vsub.f32 %v15900_v50, %v22333_v22  ;;  %v15894_v50 = vld [vmem:[%s26081_s1 + $0x1c0] sm:$0xff] }
 0x18c   : > { %18249 = vmatpush3.msra.mxu0 %v2769_v29  ;;  %18278 = vmatpush3.msra.mxu1 %v21780_v18  ;;  %v15907_v18 = vld [vmem:[%s26081_s1 + $0x228] sm:$0xff] }
 0x18d   : > { %18250 = vmatprep.subr.mxu0 %v20417_v3  ;;  %18233 = vmatmul.mubr.f32.gmra.mxu1 %v2709_v48  ;;  %v3485_v32 = vand.u32 4294901760, %v22273_v44 }
 0x18e   : > { %18279 = vmatprep.subr.mxu1 %v20417_v3  ;;  %18251 = vmatpush3.msra.mxu0 %v2776_v28  ;;  %v22260_v28 = vsub.f32 %v15906_v10, %v22234_v39 }
 0x18f   : > { %18280 = vmatpush3.msra.mxu1 %v21789_v58  ;;  %18252 = vmatprep.subr.mxu0 %v20417_v3 }
 0x190   : > { %18281 = vmatprep.subr.mxu1 %v20417_v3  ;;  %18235 = vmatprep.mubr.msk.f32.mxu1 %vm20418_vm0, %v20417_v3 }
 0x191   : > { %18253 = vmatpush3.msra.mxu0 %v2783_v62  ;;  %18282 = vmatpush3.msra.mxu1 %v21811_v46  ;;  %v1391_v46 = vadd.f32 %v22019_v54, %v21983_v34  ;;  %v15903_v62 = vld [vmem:[%s26081_s1 + $0x208] sm:$0xff]  ;;  %v15902_v34 = vld [vmem:[%s26081_s1 + $0x200] sm:$0xff] }
 0x192   : > { %18254 = vmatprep.subr.mxu0 %v20417_v3  ;;  %18236 = vmatmul.mubr.f32.gmra.mxu1 %v2719_v15  ;;  %v22302_v36 = vand.u32 4294901760, %v15902_v34 }
 0x193   : > { %18283 = vmatprep.subr.mxu1 %v20417_v3  ;;  %v1732_v43 = vpop.f32.mrf.mxu0  ;;  %18255 = vmatpush3.msra.mxu0 %v2790_v6  ;;  %v1503_v47 = vadd.f32 %v22098_v2, %v1391_v46 }
 0x194   : > { %18284 = vmatpush3.msra.mxu1 %v21825_v33  ;;  %18256 = vmatprep.subr.mxu0 %v20417_v3  ;;  %v22218_v33 = vand.u32 4294901760, %v15907_v18  ;;  %v22331_v4 = vsub.f32 %v15902_v34, %v22302_v36 }
 0x195   : > { %18285 = vmatprep.subr.mxu1 %v20417_v3  ;;  %v17824_v58 = vpop.f32.mrf.mxu0  ;;  %18257 = vmatpush3.msra.mxu0 %v2797_v55 }
 0x196   : > { %18286 = vmatpush3.msra.mxu1 %v21843_v26  ;;  %18258 = vmatprep.subr.mxu0 %v20417_v3 }
 0x197   : > { %18287 = vmatprep.subr.mxu1 %v20417_v3  ;;  %18259 = vmatpush3.msra.mxu0 %v2804_v11  ;;  %v1403_v11 = vadd.f32 %v22107_v63, %v22078_v8  ;;  %v1115_v63 = vld [vmem:[#allocation3 + $0xa] sm:$0xff] }
 0x198   : > { %18288 = vmatpush3.msra.mxu1 %v21857_v59  ;;  %18260 = vmatprep.subr.mxu0 %v20417_v3  ;;  %v1738_v26 = vpop.f32.mrf.mxu0  ;;  %v1604_v59 = vadd.f32 %v22131_v13, %v1503_v47  ;;  %v15899_v13 = vld [vmem:[%s26081_s1 + $0x1e8] sm:$0xff] }
 0x199   : > { %18289 = vmatprep.subr.mxu1 %v20417_v3  ;;  %18261 = vmatpush3.msra.mxu0 %v2811_v37  ;;  %v3478_v37 = vand.u32 4294901760, %v22260_v28  ;;  %v1517_v54 = vadd.f32 %v22129_v56, %v1403_v11  ;;  %v22350_v46 = vand.u32 4294901760, %v15899_v13 }
 0x19a   : > { %18290 = vmatpush3.msra.mxu1 %v21874_v20  ;;  %18262 = vmatprep.subr.mxu0 %v20417_v3  ;;  %v17827_v1 = vpop.f32.mrf.mxu0  ;;  %v22241_v20 = vsub.f32 %v15907_v18, %v22218_v33  ;;  %v1733_v53 = vadd.f32 %v1732_v43, %v1604_v59  ;;  %v3486_v43 = vsub.f32 %v22273_v44, %v3485_v32 }
 0x19b   : > { %18291 = vmatprep.subr.mxu1 %v20417_v3  ;;  %18263 = vmatpush3.msra.mxu0 %v2818_v60  ;;  %v15901_v60 = vld [vmem:[%s26081_s1 + $0x1f8] sm:$0xff]  ;;  %v1620_v17 = vadd.f32 %v22165_v9, %v1517_v54  ;;  %v3479_v56 = vsub.f32 %v22260_v28, %v3478_v37  ;;  %v3328_v9 = vld [vmem:[#allocation2 + $0x4] sm:$0xff] }
 0x19c   : > { %18292 = vmatpush3.msra.mxu1 %v21891_v52  ;;  %18264 = vmatprep.subr.mxu0 %v20417_v3  ;;  %v22316_v2 = vand.u32 4294901760, %v15901_v60  ;;  %v3347_v59 = vsel %vm372_vm2, %v3328_v9, 0  ;;  %v3487_v35 = vand.u32 4294901760, %v3486_v43 }
 0x19d   : > { %18293 = vmatprep.subr.mxu1 %v20417_v3  ;;  %18265 = vmatpush3.msra.mxu0 %v2825_v31  ;;  %v1829_v29 = vpop.f32.mrf.mxu1  ;;  %v1739_v31 = vadd.f32 %v1738_v26, %v1612_v24  ;;  %v3480_v26 = vand.u32 4294901760, %v3479_v56 }
 0x19e   : > { %18266 = vmatprep.mubr.msk.f32.mxu0 %vm20418_vm0, %v20417_v3  ;;  %v1744_v52 = vpop.f32.mrf.mxu0  ;;  %18294 = vmatpush3.msra.mxu1 %v21904_v41  ;;  %v1830_v6 = vadd.f32 %v1829_v29, %v1733_v53  ;;  %v3471_v41 = vand.u32 4294901760, %v22241_v20  ;;  %v22348_v58 = vsub.f32 %v15901_v60, %v22316_v2  ;;  %v3506_v53 = vand.u32 4294901760, %v22331_v4 }
 0x19f   : > { %18267 = vmatmul.mubr.f32.vlgmr.msra.gmra.mxu0 %v21926_v49  ;;  %18295 = vmatprep.subr.mxu1 %v20417_v3  ;;  %v17861_v45 = vpop.f32.mrf.mxu1  ;;  %v1745_v51 = vadd.f32 %v1744_v52, %v1620_v17  ;;  %v15897_v52 = vld [vmem:[%s26081_s1 + $0x1d8] sm:$0xff]  ;;  %v3520_v60 = vand.u32 4294901760, %v22361_v30 }
 0x1a0   : > { %18312 = vmatprep.subr.mxu0 %v20417_v3  ;;  %v17830_v55 = vpop.f32.mrf.mxu0  ;;  %18296 = vmatpush3.msra.mxu1 %v21929_v16  ;;  %v1845_v38 = vadd.f32 %v1830_v6, %v1114_v61  ;;  %v22283_v16 = vand.u32 4294901760, %v15903_v62  ;;  %v3513_v61 = vand.u32 4294901760, %v22348_v58  ;;  %v15896_v45 = vld [vmem:[%s26081_s1 + $0x1d0] sm:$0xff]  ;;  %v22388_v24 = vand.u32 4294901760, %v15897_v52 }
 0x1a1   : > { %18313 = vmatpush3.msra.mxu0 %v22218_v33  ;;  %18297 = vmatprep.subr.mxu1 %v20417_v3  ;;  %v22384_v55 = vand.u32 4294901760, %v3347_v59  ;;  %v3507_v11 = vsub.f32 %v22331_v4, %v3506_v53  ;;  %v3521_v56 = vsub.f32 %v22361_v30, %v3520_v60 }
 0x1a2   : > { %18314 = vmatprep.subr.mxu0 %v20417_v3  ;;  %18269 = vmatprep.mubr.msk.f32.mxu0 %vm20418_vm0, %v20417_v3  ;;  %1848 = vst.msk [vmem:[#allocation3 + $0x2] sm:$0xff] %vm1110_vm3, %v1845_v38  ;;  %v22313_v8 = vsub.f32 %v15903_v62, %v22283_v16  ;;  %v22375_v62 = vsub.f32 %v15899_v13, %v22350_v46 }
 0x1a3   : > { %18298 = vmatpush3.msra.mxu1 %v21944_v23  ;;  %18315 = vmatpush3.msra.mxu0 %v22234_v39  ;;  %v3472_v23 = vsub.f32 %v22241_v20, %v3471_v41  ;;  %v1835_v48 = vpop.f32.mrf.mxu1  ;;  %v22421_v17 = vsub.f32 %v15897_v52, %v22388_v24 }
 0x1a4   : > { %18299 = vmatprep.subr.mxu1 %v20417_v3  ;;  %18270 = vmatmul.mubr.f32.gmra.mxu0 %v22036_v57  ;;  %v1836_v15 = vadd.f32 %v1835_v48, %v1739_v31  ;;  %v3499_v10 = vand.u32 4294901760, %v22313_v8  ;;  %v15895_v31 = vld [vmem:[%s26081_s1 + $0x1c8] sm:$0xff]  ;;  %v3527_v48 = vand.u32 4294901760, %v22375_v62 }
 0x1a5   : > { %18316 = vmatprep.subr.mxu0 %v20417_v3  ;;  %18300 = vmatpush3.msra.mxu1 %v21964_v14  ;;  %v17864_v40 = vpop.f32.mrf.mxu1  ;;  %v3492_v14 = vand.u32 4294901760, %v22289_v7  ;;  %v3473_v19 = vand.u32 4294901760, %v3472_v23  ;;  %v3514_v23 = vsub.f32 %v22348_v58, %v3513_v61 }
 0x1a6   : > { %18317 = vmatpush3.msra.mxu0 %v22250_v27  ;;  %18301 = vmatprep.subr.mxu1 %v20417_v3  ;;  %v1846_v5 = vadd.f32 %v1836_v15, %v1115_v63  ;;  %v3500_v6 = vsub.f32 %v22313_v8, %v3499_v10  ;;  %v22415_v15 = vsub.f32 %v3347_v59, %v22384_v55  ;;  %v22423_v63 = vand.u32 4294901760, %v15895_v31 }
 0x1a7   : > { %18318 = vmatprep.subr.mxu0 %v20417_v3  ;;  %18272 = vmatprep.mubr.msk.f32.mxu0 %vm20418_vm0, %v20417_v3  ;;  %v3493_v12 = vsub.f32 %v22289_v7, %v3492_v14  ;;  %v3508_v40 = vand.u32 4294901760, %v3507_v11  ;;  %v3515_v9 = vand.u32 4294901760, %v3514_v23  ;;  %v3329_v11 = vld [vmem:[#allocation2 + $0xc] sm:$0xff] }
 0x1a8   : > { %18302 = vmatpush3.msra.mxu1 %v21976_v0  ;;  %18303 = vmatprep.mubr.msk.f32.mxu1 %vm20418_vm0, %v20417_v3  ;;  %v15898_v0 = vld [vmem:[%s26081_s1 + $0x1e0] sm:$0xff]  ;;  %1849 = vst.msk [vmem:[#allocation3 + $0xa] sm:$0xff] %vm1110_vm3, %v1846_v5  ;;  %v1841_v18 = vpop.f32.mrf.mxu1  ;;  %v3501_v54 = vand.u32 4294901760, %v3500_v6  ;;  %v3436_v43 = vand.u32 4294901760, %v22415_v15 }
 0x1a9   : > { %18319 = vmatpush3.msra.mxu0 %v22262_v25  ;;  %18304 = vmatmul.mubr.f32.vlgmr.msra.gmra.mxu1 %v21926_v49  ;;  %v1842_v47 = vadd.f32 %v1841_v18, %v1745_v51  ;;  %v1116_v49 = vld [vmem:[#allocation3 + $0x12] sm:$0xff]  ;;  %v22363_v21 = vand.u32 4294901760, %v15898_v0  ;;  %v3494_v34 = vand.u32 4294901760, %v3493_v12  ;;  %v3528_v51 = vsub.f32 %v22375_v62, %v3527_v48 }
 0x1aa   : > { %18273 = vmatmul.mubr.f32.gmra.mxu0 %v22050_v42  ;;  %18320 = vmatprep.subr.mxu0 %v20417_v3  ;;  %v17867_v1 = vpop.f32.mrf.mxu1  ;;  %v3541_v18 = vand.u32 4294901760, %v22421_v17  ;;  %v3437_v52 = vsub.f32 %v22415_v15, %v3436_v43 }
 0x1ab   : > { %18349 = vmatprep.subr.mxu1 %v20417_v3  ;;  %18321 = vmatpush3.msra.mxu0 %v22283_v16  ;;  %v1847_v29 = vadd.f32 %v1842_v47, %v1116_v49  ;;  %v22393_v38 = vsub.f32 %v15898_v0, %v22363_v21  ;;  %v3522_v47 = vand.u32 4294901760, %v3521_v56  ;;  %v3529_v1 = vand.u32 4294901760, %v3528_v51 }
 0x1ac   : > { %18350 = vmatpush3.msra.mxu1 %v3473_v19  ;;  %18322 = vmatprep.subr.mxu0 %v20417_v3  ;;  %v22435_v19 = vand.u32 4294901760, %v15894_v50 }
 0x1ad   : > { %18351 = vmatprep.subr.mxu1 %v20417_v3  ;;  %18306 = vmatprep.mubr.msk.f32.mxu1 %vm20418_vm0, %v20417_v3  ;;  %1850 = vst.msk [vmem:[#allocation3 + $0x12] sm:$0xff] %vm1110_vm3, %v1847_v29  ;;  %v3534_v13 = vand.u32 4294901760, %v22393_v38  ;;  %v3542_v29 = vsub.f32 %v22421_v17, %v3541_v18 }
 0x1ae   : > { %18323 = vmatpush3.msra.mxu0 %v22302_v36  ;;  %18352 = vmatpush3.msra.mxu1 %v3480_v26  ;;  %v22457_v59 = vsub.f32 %v15894_v50, %v22435_v19 }
 0x1af   : > { %18324 = vmatprep.subr.mxu0 %v20417_v3  ;;  %18307 = vmatmul.mubr.f32.gmra.mxu1 %v22036_v57  ;;  %v22403_v57 = vand.u32 4294901760, %v15896_v45  ;;  %v3535_v26 = vsub.f32 %v22393_v38, %v3534_v13  ;;  %v3543_v23 = vand.u32 4294901760, %v3542_v29 }
 0x1b0   : > { %18353 = vmatprep.subr.mxu1 %v20417_v3  ;;  %18325 = vmatpush3.msra.mxu0 %v22316_v2 }
 0x1b1   : > { %18354 = vmatpush3.msra.mxu1 %v3487_v35  ;;  %18326 = vmatprep.subr.mxu0 %v20417_v3  ;;  %v22433_v5 = vsub.f32 %v15896_v45, %v22403_v57  ;;  %v3536_v6 = vand.u32 4294901760, %v3535_v26 }
 0x1b2   : > { %18355 = vmatprep.subr.mxu1 %v20417_v3  ;;  %18309 = vmatprep.mubr.msk.f32.mxu1 %vm20418_vm0, %v20417_v3 }
 0x1b3   : > { %18327 = vmatpush3.msra.mxu0 %v22333_v22  ;;  %18356 = vmatpush3.msra.mxu1 %v3494_v34  ;;  %v3548_v49 = vand.u32 4294901760, %v22433_v5  ;;  %v3562_v34 = vand.u32 4294901760, %v22457_v59 }
 0x1b4   : > { %18328 = vmatprep.subr.mxu0 %v20417_v3  ;;  %18310 = vmatmul.mubr.f32.gmra.mxu1 %v22050_v42  ;;  %v22447_v42 = vsub.f32 %v15895_v31, %v22423_v63  ;;  %v3438_v31 = vand.u32 4294901760, %v3437_v52 }
 0x1b5   : > { %18357 = vmatprep.subr.mxu1 %v20417_v3  ;;  %18329 = vmatpush3.msra.mxu0 %v22350_v46  ;;  %v3549_v45 = vsub.f32 %v22433_v5, %v3548_v49  ;;  %v3563_v51 = vsub.f32 %v22457_v59, %v3562_v34 }
 0x1b6   : > { %18358 = vmatpush3.msra.mxu1 %v3501_v54  ;;  %v22442_v0 = vpop.f32.mrf.mxu0  ;;  %18330 = vmatprep.subr.mxu0 %v20417_v3  ;;  %v3555_v35 = vand.u32 4294901760, %v22447_v42 }
 0x1b7   : > { %18359 = vmatprep.subr.mxu1 %v20417_v3  ;;  %18331 = vmatpush3.msra.mxu0 %v22363_v21 }
 0x1b8   : > { %18360 = vmatpush3.msra.mxu1 %v3508_v40  ;;  %v17898_v12 = vpop.f32.mrf.mxu0  ;;  %18332 = vmatprep.subr.mxu0 %v20417_v3  ;;  %v3556_v50 = vsub.f32 %v22447_v42, %v3555_v35  ;;  %v3350_v40 = vsel %vm372_vm2, %v3329_v11, 0 }
 0x1b9   : > { %18361 = vmatprep.subr.mxu1 %v20417_v3  ;;  %18333 = vmatpush3.msra.mxu0 %v22388_v24  ;;  %v22495_v12 = vand.u32 4294901760, %v3350_v40 }
 0x1ba   : > { %18362 = vmatpush3.msra.mxu1 %v3515_v9  ;;  %18334 = vmatprep.subr.mxu0 %v20417_v3  ;;  %v3550_v9 = vand.u32 4294901760, %v3549_v45  ;;  %v3557_v26 = vand.u32 4294901760, %v3556_v50 }
 0x1bb   : > { %18363 = vmatprep.subr.mxu1 %v20417_v3  ;;  %18335 = vmatpush3.msra.mxu0 %v22403_v57  ;;  %v22505_v29 = vsub.f32 %v3350_v40, %v22495_v12 }
 0x1bc   : > { %18364 = vmatpush3.msra.mxu1 %v3522_v47  ;;  %18336 = vmatprep.subr.mxu0 %v20417_v3  ;;  %v3330_v47 = vld [vmem:[#allocation2 + $0x14] sm:$0xff] }
 0x1bd   : > { %18365 = vmatprep.subr.mxu1 %v20417_v3  ;;  %18337 = vmatpush3.msra.mxu0 %v22423_v63  ;;  %v3353_v52 = vsel %vm372_vm2, %v3330_v47, 0  ;;  %v3446_v45 = vand.u32 4294901760, %v22505_v29 }
 0x1be   : > { %18366 = vmatpush3.msra.mxu1 %v3529_v1  ;;  %v22478_v54 = vpop.f32.mrf.mxu1  ;;  %18338 = vmatprep.subr.mxu0 %v20417_v3  ;;  %v3564_v1 = vand.u32 4294901760, %v3563_v51 }
 0x1bf   : > { %18367 = vmatprep.subr.mxu1 %v20417_v3  ;;  %18339 = vmatpush3.msra.mxu0 %v22435_v19  ;;  %v3447_v50 = vsub.f32 %v22505_v29, %v3446_v45 }
 0x1c0   : > { %18368 = vmatpush3.msra.mxu1 %v3536_v6  ;;  %v17935_v56 = vpop.f32.mrf.mxu1  ;;  %18340 = vmatprep.mubr.msk.f32.mxu0 %vm20418_vm0, %v20417_v3  ;;  %v22509_v6 = vand.u32 4294901760, %v3353_v52 }
 0x1c1   : > { %18369 = vmatprep.subr.mxu1 %v20417_v3  ;;  %18386 = vmatprep.subr.mxu0 %v20417_v3  ;;  %v3448_v51 = vand.u32 4294901760, %v3447_v50 }
 0x1c2   : > { %18341 = vmatmul.mubr.f32.vlgmr.msra.gmra.mxu0 %v3438_v31  ;;  %18370 = vmatpush3.msra.mxu1 %v3543_v23  ;;  %v22523_v31 = vsub.f32 %v3353_v52, %v22509_v6 }
 0x1c3   : > { %18387 = vmatpush3.msra.mxu0 %v22241_v20  ;;  %18371 = vmatprep.subr.mxu1 %v20417_v3 }
 0x1c4   : > { %18388 = vmatprep.subr.mxu0 %v20417_v3  ;;  %18372 = vmatpush3.msra.mxu1 %v3550_v9  ;;  %v3456_v40 = vand.u32 4294901760, %v22523_v31 }
 0x1c5   : > { %18389 = vmatpush3.msra.mxu0 %v22260_v28  ;;  %18373 = vmatprep.subr.mxu1 %v20417_v3 }
 0x1c6   : > { %18390 = vmatprep.subr.mxu0 %v20417_v3  ;;  %18374 = vmatpush3.msra.mxu1 %v3557_v26  ;;  %v3457_v47 = vsub.f32 %v22523_v31, %v3456_v40 }
 0x1c7   : > { %18391 = vmatpush3.msra.mxu0 %v22273_v44  ;;  %18375 = vmatprep.subr.mxu1 %v20417_v3 }
 0x1c8   : > { %18392 = vmatprep.subr.mxu0 %v20417_v3  ;;  %18376 = vmatpush3.msra.mxu1 %v3564_v1 }
 0x1c9   : > { %18377 = vmatprep.mubr.msk.f32.mxu1 %vm20418_vm0, %v20417_v3  ;;  %18393 = vmatpush3.msra.mxu0 %v22289_v7 }
 0x1ca   : > { %18378 = vmatmul.mubr.f32.vlgmr.msra.gmra.mxu1 %v22384_v55  ;;  %18394 = vmatprep.subr.mxu0 %v20417_v3 }
 0x1cb   : > { %18423 = vmatprep.subr.mxu1 %v20417_v3  ;;  %v22518_v11 = vpop.f32.mrf.mxu0  ;;  %18395 = vmatpush3.msra.mxu0 %v22313_v8 }
 0x1cc   : > { %18424 = vmatpush3.msra.mxu1 %v22218_v33  ;;  %18396 = vmatprep.subr.mxu0 %v20417_v3 }
 0x1cd   : > { %18425 = vmatprep.subr.mxu1 %v20417_v3  ;;  %v17901_v23 = vpop.f32.mrf.mxu0  ;;  %18397 = vmatpush3.msra.mxu0 %v22331_v4 }
 0x1ce   : > { %18426 = vmatpush3.msra.mxu1 %v22234_v39  ;;  %18398 = vmatprep.subr.mxu0 %v20417_v3  ;;  %v3458_v23 = vand.u32 4294901760, %v3457_v47 }
 0x1cf   : > { %18427 = vmatprep.subr.mxu1 %v20417_v3  ;;  %18399 = vmatpush3.msra.mxu0 %v22348_v58 }
 0x1d0   : > { %18428 = vmatpush3.msra.mxu1 %v22250_v27  ;;  %v22537_v56 = vpop.f32.mrf.mxu0  ;;  %18400 = vmatprep.subr.mxu0 %v20417_v3 }
 0x1d1   : > { %18429 = vmatprep.subr.mxu1 %v20417_v3  ;;  %18401 = vmatpush3.msra.mxu0 %v22361_v30 }
 0x1d2   : > { %18430 = vmatpush3.msra.mxu1 %v22262_v25  ;;  %v17904_v9 = vpop.f32.mrf.mxu0  ;;  %18402 = vmatprep.subr.mxu0 %v20417_v3 }
 0x1d3   : > { %18431 = vmatprep.subr.mxu1 %v20417_v3  ;;  %18403 = vmatpush3.msra.mxu0 %v22375_v62 }
 0x1d4   : > { %18432 = vmatpush3.msra.mxu1 %v22283_v16  ;;  %v22550_v26 = vpop.f32.mrf.mxu1  ;;  %18404 = vmatprep.subr.mxu0 %v20417_v3 }
 0x1d5   : > { %18433 = vmatprep.subr.mxu1 %v20417_v3  ;;  %18343 = vmatprep.mubr.msk.f32.mxu0 %vm20418_vm0, %v20417_v3 }
 0x1d6   : > { %18405 = vmatpush3.msra.mxu0 %v22393_v38  ;;  %v22557_v1 = vpop.f32.mrf.mxu0  ;;  %v17938_v52 = vpop.f32.mrf.mxu1  ;;  %18434 = vmatpush3.msra.mxu1 %v22302_v36 }
 0x1d7   : > { %18344 = vmatmul.mubr.f32.gmra.mxu0 %v3448_v51  ;;  %18406 = vmatprep.subr.mxu0 %v20417_v3 }
 0x1d8   : > { %18435 = vmatprep.subr.mxu1 %v20417_v3  ;;  %v17972_v50 = vpop.f32.mrf.mxu0  ;;  %18407 = vmatpush3.msra.mxu0 %v22421_v17 }
 0x1d9   : > { %18436 = vmatpush3.msra.mxu1 %v22316_v2  ;;  %18408 = vmatprep.subr.mxu0 %v20417_v3 }
 0x1da   : > { %18437 = vmatprep.subr.mxu1 %v20417_v3  ;;  %v22566_v9 = vpop.f32.mrf.mxu1  ;;  %18346 = vmatprep.mubr.msk.f32.mxu0 %vm20418_vm0, %v20417_v3 }
 0x1db   : > { %18409 = vmatpush3.msra.mxu0 %v22433_v5  ;;  %18438 = vmatpush3.msra.mxu1 %v22333_v22 }
 0x1dc   : > { %18347 = vmatmul.mubr.f32.gmra.mxu0 %v3458_v23  ;;  %v17941_v51 = vpop.f32.mrf.mxu1  ;;  %18410 = vmatprep.subr.mxu0 %v20417_v3  ;;  %v22574_v47 = vpop.f32.mrf.mxu0 }
 0x1dd   : > { %18439 = vmatprep.subr.mxu1 %v20417_v3  ;;  %18411 = vmatpush3.msra.mxu0 %v22447_v42 }
 0x1de   : > { %18440 = vmatpush3.msra.mxu1 %v22350_v46  ;;  %18380 = vmatprep.mubr.msk.f32.mxu1 %vm20418_vm0, %v20417_v3  ;;  %v17975_v52 = vpop.f32.mrf.mxu0 }
 0x1df   : > { %18412 = vmatprep.subr.mxu0 %v20417_v3  ;;  %18441 = vmatprep.subr.mxu1 %v20417_v3 }
 0x1e0   : > { %18381 = vmatmul.mubr.f32.gmra.mxu1 %v22495_v12  ;;  %18413 = vmatpush3.msra.mxu0 %v22457_v59 }
 0x1e1   : > { %18414 = vmatprep.mubr.msk.f32.mxu0 %vm20418_vm0, %v20417_v3  ;;  %18442 = vmatpush3.msra.mxu1 %v22363_v21  ;;  %v22590_v50 = vpop.f32.mrf.mxu1 }
 0x1e2   : > { %18415 = vmatmul.mubr.f32.vlgmr.msra.gmra.mxu0 %v22415_v15  ;;  %v22588_v23 = vpop.f32.mrf.mxu0  ;;  %18443 = vmatprep.subr.mxu1 %v20417_v3 }
 0x1e3   : > { %18460 = vmatprep.subr.mxu0 %v20417_v3  ;;  %18444 = vmatpush3.msra.mxu1 %v22388_v24  ;;  %v18009_v51 = vpop.f32.mrf.mxu1 }
 0x1e4   : > { %18461 = vmatpush3.msra.mxu0 %v3471_v41  ;;  %v17978_v52 = vpop.f32.mrf.mxu0  ;;  %18383 = vmatprep.mubr.msk.f32.mxu1 %vm20418_vm0, %v20417_v3 }
 0x1e5   : > { %18445 = vmatprep.subr.mxu1 %v20417_v3  ;;  %18462 = vmatprep.subr.mxu0 %v20417_v3 }
 0x1e6   : > { %18384 = vmatmul.mubr.f32.gmra.mxu1 %v22509_v6  ;;  %18417 = vmatprep.mubr.msk.f32.mxu0 %vm20418_vm0, %v20417_v3 }
 0x1e7   : > { %18446 = vmatpush3.msra.mxu1 %v22403_v57  ;;  %18463 = vmatpush3.msra.mxu0 %v3478_v37  ;;  %v22608_v20 = vpop.f32.mrf.mxu1 }
 0x1e8   : > { %18447 = vmatprep.subr.mxu1 %v20417_v3  ;;  %18418 = vmatmul.mubr.f32.gmra.mxu0 %v22505_v29 }
 0x1e9   : > { %18464 = vmatprep.subr.mxu0 %v20417_v3  ;;  %18448 = vmatpush3.msra.mxu1 %v22423_v63  ;;  %v18012_v41 = vpop.f32.mrf.mxu1 }
 0x1ea   : > { %18465 = vmatpush3.msra.mxu0 %v3485_v32  ;;  %18449 = vmatprep.subr.mxu1 %v20417_v3 }
 0x1eb   : > { %18466 = vmatprep.subr.mxu0 %v20417_v3  ;;  %18420 = vmatprep.mubr.msk.f32.mxu0 %vm20418_vm0, %v20417_v3 }
 0x1ec   : > { %18450 = vmatpush3.msra.mxu1 %v22435_v19  ;;  %18451 = vmatprep.mubr.msk.f32.mxu1 %vm20418_vm0, %v20417_v3  ;;  %v22624_v28 = vpop.f32.mrf.mxu1 }
 0x1ed   : > { %18467 = vmatpush3.msra.mxu0 %v3492_v14  ;;  %18452 = vmatmul.mubr.f32.vlgmr.msra.gmra.mxu1 %v3436_v43 }
 0x1ee   : > { %18421 = vmatmul.mubr.f32.gmra.mxu0 %v22523_v31  ;;  %18468 = vmatprep.subr.mxu0 %v20417_v3  ;;  %v18015_v44 = vpop.f32.mrf.mxu1 }
 0x1ef   : > { %18497 = vmatprep.subr.mxu1 %v20417_v3  ;;  %18469 = vmatpush3.msra.mxu0 %v3499_v10 }
 0x1f0   : > { %18498 = vmatpush3.msra.mxu1 %v22218_v33  ;;  %18470 = vmatprep.subr.mxu0 %v20417_v3 }
 0x1f1   : > { %18499 = vmatprep.subr.mxu1 %v20417_v3  ;;  %18454 = vmatprep.mubr.msk.f32.mxu1 %vm20418_vm0, %v20417_v3 }
 0x1f2   : > { %18471 = vmatpush3.msra.mxu0 %v3506_v53  ;;  %18500 = vmatpush3.msra.mxu1 %v22234_v39 }
 0x1f3   : > { %18472 = vmatprep.subr.mxu0 %v20417_v3  ;;  %18455 = vmatmul.mubr.f32.gmra.mxu1 %v3446_v45 }
 0x1f4   : > { %18501 = vmatprep.subr.mxu1 %v20417_v3  ;;  %18473 = vmatpush3.msra.mxu0 %v3513_v61 }
 0x1f5   : > { %18502 = vmatpush3.msra.mxu1 %v22250_v27  ;;  %18474 = vmatprep.subr.mxu0 %v20417_v3  ;;  %v2128_v27 = vadd.f32 %v22478_v54, %v22442_v0 }
 0x1f6   : > { %18503 = vmatprep.subr.mxu1 %v20417_v3  ;;  %18457 = vmatprep.mubr.msk.f32.mxu1 %vm20418_vm0, %v20417_v3 }
 0x1f7   : > { %18475 = vmatpush3.msra.mxu0 %v3520_v60  ;;  %18504 = vmatpush3.msra.mxu1 %v22262_v25  ;;  %v2240_v25 = vadd.f32 %v22557_v1, %v2128_v27  ;;  %v1852_v60 = vld [vmem:[#allocation3 + $0xa] sm:$0xff] }
 0x1f8   : > { %18476 = vmatprep.subr.mxu0 %v20417_v3  ;;  %18458 = vmatmul.mubr.f32.gmra.mxu1 %v3456_v40 }
 0x1f9   : > { %18505 = vmatprep.subr.mxu1 %v20417_v3  ;;  %v2469_v33 = vpop.f32.mrf.mxu0  ;;  %18477 = vmatpush3.msra.mxu0 %v3527_v48  ;;  %v2341_v7 = vadd.f32 %v22590_v50, %v2240_v25 }
 0x1fa   : > { %18506 = vmatpush3.msra.mxu1 %v22283_v16  ;;  %18478 = vmatprep.subr.mxu0 %v20417_v3 }
 0x1fb   : > { %18507 = vmatprep.subr.mxu1 %v20417_v3  ;;  %v18046_v39 = vpop.f32.mrf.mxu0  ;;  %18479 = vmatpush3.msra.mxu0 %v3534_v13  ;;  %v2470_v32 = vadd.f32 %v2469_v33, %v2341_v7  ;;  %v1853_v13 = vld [vmem:[#allocation3 + $0x12] sm:$0xff] }
 0x1fc   : > { %18508 = vmatpush3.msra.mxu1 %v22302_v36  ;;  %18480 = vmatprep.subr.mxu0 %v20417_v3  ;;  %v2134_v36 = vadd.f32 %v22550_v26, %v22518_v11 }
 0x1fd   : > { %18509 = vmatprep.subr.mxu1 %v20417_v3  ;;  %18481 = vmatpush3.msra.mxu0 %v3541_v18 }
 0x1fe   : > { %18510 = vmatpush3.msra.mxu1 %v22316_v2  ;;  %18482 = vmatprep.subr.mxu0 %v20417_v3  ;;  %v2475_v16 = vpop.f32.mrf.mxu0  ;;  %v2247_v14 = vadd.f32 %v22574_v47, %v2134_v36 }
 0x1ff   : > { %18511 = vmatprep.subr.mxu1 %v20417_v3  ;;  %18483 = vmatpush3.msra.mxu0 %v3548_v49 }
 0x200   : > { %18512 = vmatpush3.msra.mxu1 %v22333_v22  ;;  %18484 = vmatprep.subr.mxu0 %v20417_v3  ;;  %v18049_v37 = vpop.f32.mrf.mxu0  ;;  %v1851_v22 = vld [vmem:[#allocation3 + $0x2] sm:$0xff]  ;;  %v2349_v10 = vadd.f32 %v22608_v20, %v2247_v14 }
 0x201   : > { %18513 = vmatprep.subr.mxu1 %v20417_v3  ;;  %18485 = vmatpush3.msra.mxu0 %v3555_v35 }
 0x202   : > { %18514 = vmatpush3.msra.mxu1 %v22350_v46  ;;  %18486 = vmatprep.subr.mxu0 %v20417_v3  ;;  %v2476_v53 = vadd.f32 %v2475_v16, %v2349_v10 }
 0x203   : > { %18515 = vmatprep.subr.mxu1 %v20417_v3  ;;  %18487 = vmatpush3.msra.mxu0 %v3562_v34  ;;  %v2566_v2 = vpop.f32.mrf.mxu1 }
 0x204   : > { %18488 = vmatprep.mubr.msk.f32.mxu0 %vm20418_vm0, %v20417_v3  ;;  %v2481_v8 = vpop.f32.mrf.mxu0  ;;  %18516 = vmatpush3.msra.mxu1 %v22363_v21  ;;  %v2567_v4 = vadd.f32 %v2566_v2, %v2470_v32  ;;  %v2140_v21 = vadd.f32 %v22566_v9, %v22537_v56 }
 0x205   : > { %18489 = vmatmul.mubr.f32.vlgmr.msra.gmra.mxu0 %v22384_v55  ;;  %18517 = vmatprep.subr.mxu1 %v20417_v3  ;;  %v18083_v58 = vpop.f32.mrf.mxu1 }
 0x206   : > { %18491 = vmatprep.mubr.msk.f32.mxu0 %vm20418_vm0, %v20417_v3  ;;  %v18052_v46 = vpop.f32.mrf.mxu0  ;;  %18518 = vmatpush3.msra.mxu1 %v22388_v24  ;;  %v2582_v30 = vadd.f32 %v2567_v4, %v1851_v22  ;;  %v2254_v62 = vadd.f32 %v22588_v23, %v2140_v21 }
 0x207   : > { %18525 = vmatprep.mubr.msk.f32.mxu1 %vm20418_vm0, %v20417_v3  ;;  %18519 = vmatprep.subr.mxu1 %v20417_v3 }
 0x208   : > { %18520 = vmatpush3.msra.mxu1 %v22403_v57  ;;  %2585 = vst.msk [vmem:[#allocation3 + $0x2] sm:$0xff] %vm1110_vm3, %v2582_v30  ;;  %v2357_v38 = vadd.f32 %v22624_v28, %v2254_v62 }
 0x209   : > { %18492 = vmatmul.mubr.f32.gmra.mxu0 %v22495_v12  ;;  %18521 = vmatprep.subr.mxu1 %v20417_v3  ;;  %v2572_v61 = vpop.f32.mrf.mxu1 }
 0x20a   : > { %18494 = vmatprep.mubr.msk.f32.mxu0 %vm20418_vm0, %v20417_v3  ;;  %18522 = vmatpush3.msra.mxu1 %v22423_v63  ;;  %v2573_v24 = vadd.f32 %v2572_v61, %v2476_v53  ;;  %v2482_v15 = vadd.f32 %v2481_v8, %v2357_v38 }
 0x20b   : > { %18523 = vmatprep.subr.mxu1 %v20417_v3  ;;  %v18086_v57 = vpop.f32.mrf.mxu1 }
 0x20c   : > { %18524 = vmatpush3.msra.mxu1 %v22435_v19  ;;  %v2583_v48 = vadd.f32 %v2573_v24, %v1852_v60 }
 0x20d   : > { %18495 = vmatmul.mubr.f32.gmra.mxu0 %v22509_v6  ;;  %18526 = vmatmul.mubr.f32.vlgmr.msra.gmra.mxu1 %v22384_v55 }
 0x20e   : > { %18528 = vmatprep.mubr.msk.f32.mxu1 %vm20418_vm0, %v20417_v3  ;;  %2586 = vst.msk [vmem:[#allocation3 + $0xa] sm:$0xff] %vm1110_vm3, %v2583_v48  ;;  %v2578_v17 = vpop.f32.mrf.mxu1 }
 0x20f   : > { %v2579_v63 = vadd.f32 %v2578_v17, %v2482_v15  ;;  %v2588_v36 = vld [vmem:[#allocation3 + $0x2] sm:$0xff] }
 0x210   : > { %v18089_v5 = vpop.f32.mrf.mxu1 }
 0x211   : > { %18529 = vmatmul.mubr.f32.gmra.mxu1 %v22495_v12  ;;  %v2584_v43 = vadd.f32 %v2579_v63, %v1853_v13 }
 0x212   : > { %18531 = vmatprep.mubr.msk.f32.mxu1 %vm20418_vm0, %v20417_v3 }
 0x213   : > { %2587 = vst.msk [vmem:[#allocation3 + $0x12] sm:$0xff] %vm1110_vm3, %v2584_v43 }
 0x215   : > { %18532 = vmatmul.mubr.f32.gmra.mxu1 %v22509_v6  ;;  %v2589_v21 = vld [vmem:[#allocation3 + $0xa] sm:$0xff] }
 0x21a   : > { %v2590_v60 = vld [vmem:[#allocation3 + $0x12] sm:$0xff] }
 0x21c   : > { %v2703_v55 = vpop.f32.mrf.mxu0 }
 0x21e   : > { %v18120_v19 = vpop.f32.mrf.mxu0 }
 0x224   : > { %v2864_v0 = vpop.f32.mrf.mxu1 }
 0x225   : > { %v2865_v20 = vadd.f32 %v2864_v0, %v2703_v55 }
 0x226   : > { %v18157_v42 = vpop.f32.mrf.mxu1 }
 0x231   : > { %v2713_v18 = vpop.f32.mrf.mxu0 }
 0x233   : > { %v18123_v59 = vpop.f32.mrf.mxu0 }
 0x236   : > { %v2723_v49 = vpop.f32.mrf.mxu0 }
 0x238   : > { %v18126_v35 = vpop.f32.mrf.mxu0 }
 0x23a   : > { %v2870_v34 = vpop.f32.mrf.mxu1 }
 0x23b   : > { %v2871_v39 = vadd.f32 %v2870_v34, %v2713_v18 }
 0x23c   : > { %v2976_v54 = vpop.f32.mrf.mxu0  ;;  %v18160_v29 = vpop.f32.mrf.mxu1 }
 0x23d   : > { %v2977_v41 = vadd.f32 %v2976_v54, %v2865_v20 }
 0x23e   : > { %v18194_v12 = vpop.f32.mrf.mxu0 }
 0x240   : > { %v2876_v45 = vpop.f32.mrf.mxu1 }
 0x241   : > { %v2877_v4 = vadd.f32 %v2876_v45, %v2723_v49 }
 0x242   : > { %v18163_v11 = vpop.f32.mrf.mxu1  ;;  %v2983_v31 = vpop.f32.mrf.mxu0 }
 0x243   : > { %v2984_v7 = vadd.f32 %v2983_v31, %v2871_v39 }
 0x244   : > { %v18197_v40 = vpop.f32.mrf.mxu0 }
 0x247   : > { %v3077_v26 = vpop.f32.mrf.mxu1 }
 0x248   : > { %v2990_v56 = vpop.f32.mrf.mxu0  ;;  %v3078_v44 = vadd.f32 %v3077_v26, %v2977_v41 }
 0x249   : > { %v18231_v1 = vpop.f32.mrf.mxu1  ;;  %v2991_v58 = vadd.f32 %v2990_v56, %v2877_v4 }
 0x24a   : > { %v18200_v6 = vpop.f32.mrf.mxu0 }
 0x24d   : > { %v3085_v9 = vpop.f32.mrf.mxu1 }
 0x24e   : > { %v3086_v2 = vadd.f32 %v3085_v9, %v2984_v7 }
 0x24f   : > { %v18234_v47 = vpop.f32.mrf.mxu1 }
 0x252   : > { %v3093_v23 = vpop.f32.mrf.mxu1 }
 0x253   : > { %v3094_v30 = vadd.f32 %v3093_v23, %v2991_v58 }
 0x254   : > { %v18237_v50 = vpop.f32.mrf.mxu1 }
 0x25f   : > { %v3206_v51 = vpop.f32.mrf.mxu0 }
 0x260   : > { %v3207_v27 = vadd.f32 %v3206_v51, %v3078_v44 }
 0x261   : > { %v18268_v52 = vpop.f32.mrf.mxu0 }
 0x264   : > { %v3212_v28 = vpop.f32.mrf.mxu0 }
 0x265   : > { %v3213_v22 = vadd.f32 %v3212_v28, %v3086_v2 }
 0x266   : > { %v18271_v33 = vpop.f32.mrf.mxu0 }
 0x269   : > { %v3303_v16 = vpop.f32.mrf.mxu1 }
 0x26a   : > { %v3218_v25 = vpop.f32.mrf.mxu0  ;;  %v3304_v37 = vadd.f32 %v3303_v16, %v3207_v27 }
 0x26b   : > { %v18305_v32 = vpop.f32.mrf.mxu1  ;;  %v3219_v61 = vadd.f32 %v3218_v25, %v3094_v30 }
 0x26c   : > { %v18274_v8 = vpop.f32.mrf.mxu0  ;;  %v3319_v14 = vadd.f32 %v3304_v37, %v2588_v36 }
 0x26e   : > { %3322 = vst.msk [vmem:[#allocation3 + $0x2] sm:$0xff] %vm1110_vm3, %v3319_v14 }
 0x26f   : > { %v3309_v46 = vpop.f32.mrf.mxu1 }
 0x270   : > { %v3310_v10 = vadd.f32 %v3309_v46, %v3213_v22 }
 0x271   : > { %v18308_v53 = vpop.f32.mrf.mxu1 }
 0x272   : > { %v3320_v62 = vadd.f32 %v3310_v10, %v2589_v21 }
 0x274   : > { %3323 = vst.msk [vmem:[#allocation3 + $0xa] sm:$0xff] %vm1110_vm3, %v3320_v62  ;;  %v3315_v24 = vpop.f32.mrf.mxu1 }
 0x275   : > { %v3316_v38 = vadd.f32 %v3315_v24, %v3219_v61  ;;  %v3325_v16 = vld [vmem:[#allocation3 + $0x2] sm:$0xff] }
 0x276   : > { %v18311_v57 = vpop.f32.mrf.mxu1 }
 0x277   : > { %v3321_v48 = vadd.f32 %v3316_v38, %v2590_v60 }
 0x279   : > { %3324 = vst.msk [vmem:[#allocation3 + $0x12] sm:$0xff] %vm1110_vm3, %v3321_v48 }
 0x27b   : > { %v3326_v4 = vld [vmem:[#allocation3 + $0xa] sm:$0xff] }
 0x280   : > { %v3327_v21 = vld [vmem:[#allocation3 + $0x12] sm:$0xff] }
 0x282   : > { %v3440_v15 = vpop.f32.mrf.mxu0 }
 0x284   : > { %v18342_v17 = vpop.f32.mrf.mxu0 }
 0x28a   : > { %v3601_v63 = vpop.f32.mrf.mxu1 }
 0x28b   : > { %v3602_v6 = vadd.f32 %v3601_v63, %v3440_v15 }
 0x28c   : > { %v18379_v13 = vpop.f32.mrf.mxu1 }
 0x297   : > { %v3450_v5 = vpop.f32.mrf.mxu0 }
 0x299   : > { %v18345_v43 = vpop.f32.mrf.mxu0 }
 0x29c   : > { %v3460_v55 = vpop.f32.mrf.mxu0 }
 0x29e   : > { %v18348_v19 = vpop.f32.mrf.mxu0 }
 0x2a0   : > { %v3607_v0 = vpop.f32.mrf.mxu1 }
 0x2a1   : > { %v3608_v50 = vadd.f32 %v3607_v0, %v3450_v5  ;;  %v4203_v5 = vld [vmem:[%s26085_s5] sm:$0xff] }
 0x2a2   : > { %v3713_v42 = vpop.f32.mrf.mxu0  ;;  %v18382_v18 = vpop.f32.mrf.mxu1  ;;  %v4207_v43 = vsel %vm4205_vm5, %v4203_v5, 0 }
 0x2a3   : > { %v3714_v47 = vadd.f32 %v3713_v42, %v3602_v6  ;;  %v4204_v6 = vld [vmem:[%s26085_s5 + $0x8] sm:$0xf] }
 0x2a4   : > { %v18416_v59 = vpop.f32.mrf.mxu0 }
 0x2a6   : > { %v3613_v49 = vpop.f32.mrf.mxu1 }
 0x2a7   : > { %v3614_v33 = vadd.f32 %v3613_v49, %v3460_v55  ;;  %v22758_v55 = vand.u32 4294901760, %v4207_v43 }
 0x2a8   : > { %v18385_v35 = vpop.f32.mrf.mxu1  ;;  %v3720_v34 = vpop.f32.mrf.mxu0 }
 0x2a9   : > { %v3721_v20 = vadd.f32 %v3720_v34, %v3608_v50  ;;  %v22762_v19 = vsub.f32 %v4207_v43, %v22758_v55  ;;  %18549 = vmatprep.mubr.f32.mxu1 %v22758_v55 }
 0x2aa   : > { %v18419_v54 = vpop.f32.mrf.mxu0 }
 0x2ab   : > { %v4282_v0 = vand.u32 4294901760, %v22762_v19 }
 0x2ad   : > { %v3814_v12 = vpop.f32.mrf.mxu1  ;;  %v4283_v42 = vsub.f32 %v22762_v19, %v4282_v0 }
 0x2ae   : > { %v3727_v29 = vpop.f32.mrf.mxu0  ;;  %v3815_v51 = vadd.f32 %v3814_v12, %v3714_v47 }
 0x2af   : > { %v18453_v45 = vpop.f32.mrf.mxu1  ;;  %v3728_v37 = vadd.f32 %v3727_v29, %v3614_v33  ;;  %v4284_v18 = vand.u32 4294901760, %v4283_v42 }
 0x2b0   : > { %v18422_v11 = vpop.f32.mrf.mxu0 }
 0x2b1   : > { %18540 = vmatprep.mubr.f32.mxu0 %v4284_v18 }
 0x2b3   : > { %v3822_v31 = vpop.f32.mrf.mxu1 }
 0x2b4   : > { %v3823_v39 = vadd.f32 %v3822_v31, %v3721_v20  ;;  %v4210_v20 = vsel %vm4205_vm5, %v4204_v6, 0 }
 0x2b5   : > { %v18456_v40 = vpop.f32.mrf.mxu1 }
 0x2b8   : > { %v3830_v56 = vpop.f32.mrf.mxu1 }
 0x2b9   : > { %v3831_v2 = vadd.f32 %v3830_v56, %v3728_v37 }
 0x2ba   : > { %v18459_v26 = vpop.f32.mrf.mxu1 }
 0x2c5   : > { %v3943_v1 = vpop.f32.mrf.mxu0 }
 0x2c6   : > { %v3944_v41 = vadd.f32 %v3943_v1, %v3815_v51 }
 0x2c7   : > { %v18490_v9 = vpop.f32.mrf.mxu0 }
 0x2c9   : > { %v3949_v23 = vpop.f32.mrf.mxu0 }
 0x2ca   : > { %v3950_v36 = vadd.f32 %v3949_v23, %v3823_v39 }
 0x2cb   : > { %v18493_v52 = vpop.f32.mrf.mxu0 }
 0x2cd   : > { %v3955_v28 = vpop.f32.mrf.mxu0  ;;  %v4040_v44 = vpop.f32.mrf.mxu1 }
 0x2ce   : > { %v4041_v27 = vadd.f32 %v4040_v44, %v3944_v41  ;;  %v3956_v58 = vadd.f32 %v3955_v28, %v3831_v2 }
 0x2cf   : > { %v18496_v25 = vpop.f32.mrf.mxu0  ;;  %v18527_v7 = vpop.f32.mrf.mxu1 }
 0x2d0   : > { %v4056_v32 = vadd.f32 %v4041_v27, %v3325_v16  ;;  %v22773_v7 = vand.u32 4294901760, %v4210_v20 }
 0x2d1   : > { %v4046_v8 = vpop.f32.mrf.mxu1 }
 0x2d2   : > { %4059 = vst.msk [vmem:[#allocation3 + $0x2] sm:$0xff] %vm1110_vm3, %v4056_v32  ;;  %v4047_v14 = vadd.f32 %v4046_v8, %v3950_v36 }
 0x2d3   : > { %v18530_v22 = vpop.f32.mrf.mxu1 }
 0x2d4   : > { %v4057_v46 = vadd.f32 %v4047_v14, %v3326_v4  ;;  %v22776_v22 = vsub.f32 %v4210_v20, %v22773_v7 }
 0x2d5   : > { %v4052_v10 = vpop.f32.mrf.mxu1 }
 0x2d6   : > { %4060 = vst.msk [vmem:[#allocation3 + $0xa] sm:$0xff] %vm1110_vm3, %v4057_v46  ;;  %v4053_v30 = vadd.f32 %v4052_v10, %v3956_v58 }
 0x2d7   : > { %v18533_v53 = vpop.f32.mrf.mxu1 }
 0x2d8   : > { %v4058_v62 = vadd.f32 %v4053_v30, %v3327_v21 }
 0x2d9   : > { %v4062_v61 = vld [vmem:[#allocation3 + $0x2] sm:$0xff] }
 0x2da   : > { %v4065_v24 = vmax.f32 %v4062_v61, 0.0  ;;  %4061 = vst.msk [vmem:[#allocation3 + $0x12] sm:$0xff] %vm1110_vm3, %v4058_v62 }
 0x2dc   : > { %4068 = vst.msk [vmem:[#allocation3 + $0x2] sm:$0xff] %vm1110_vm3, %v4065_v24 }
 0x2dd   : > { %v4063_v38 = vld [vmem:[#allocation3 + $0xa] sm:$0xff] }
 0x2de   : > { %v4066_v60 = vmax.f32 %v4063_v38, 0.0 }
 0x2e0   : > { %4069 = vst.msk [vmem:[#allocation3 + $0xa] sm:$0xff] %vm1110_vm3, %v4066_v60 }
 0x2e1   : > { %v4064_v57 = vld [vmem:[#allocation3 + $0x12] sm:$0xff] }
 0x2e2   : > { %v4067_v48 = vmax.f32 %v4064_v57, 0.0 }
 0x2e3   : > { %v4071_v15 = vld [vmem:[#allocation3] sm:$0xff] }
 0x2e4   : > { %4070 = vst.msk [vmem:[#allocation3 + $0x12] sm:$0xff] %vm1110_vm3, %v4067_v48  ;;  %4079 = vrot.lane.b32.xlu1 %v4071_v15, %s20419_s25 }
 0x2e7   : > { %v4072_v17 = vld [vmem:[#allocation3 + $0x8] sm:$0xff] }
 0x2e8   : > { %4095 = vrot.lane.b32.xlu1 %v4071_v15, %s20420_s26  ;;  %4097 = vrot.lane.b32.xlu0 %v4072_v17, %s20420_s26 }
 0x2eb   : > { %v4073_v63 = vld [vmem:[#allocation3 + $0x10] sm:$0xff]  ;;  %v4074_v13 = vld [vmem:[#allocation3 + $0x18] sm:$0xf] }
 0x2ec   : > { %4111 = vrot.lane.b32.xlu1 %v4071_v15, %s20421_s27  ;;  %4113 = vrot.lane.b32.xlu0 %v4072_v17, %s20421_s27 }
 0x2f0   : > { %4081 = vrot.lane.b32.xlu1 %v4072_v17, %s20419_s25  ;;  %4083 = vrot.lane.b32.xlu0 %v4073_v63, %s20419_s25 }
 0x2f4   : > { %4099 = vrot.lane.b32.xlu1 %v4073_v63, %s20420_s26  ;;  %4085 = vrot.lane.b32.xlu0 %v4074_v13, %s20419_s25 }
 0x2f8   : > { %4115 = vrot.lane.b32.xlu1 %v4073_v63, %s20421_s27  ;;  %4101 = vrot.lane.b32.xlu0 %v4074_v13, %s20420_s26 }
 0x2fc   : > { %4131 = vrot.lane.b32.xlu1 %v4073_v63, %s20422_s28  ;;  %4117 = vrot.lane.b32.xlu0 %v4074_v13, %s20421_s27 }
 0x300   : > { %4127 = vrot.lane.b32.xlu1 %v4071_v15, %s20422_s28  ;;  %4133 = vrot.lane.b32.xlu0 %v4074_v13, %s20422_s28 }
 0x304   : > { %4129 = vrot.lane.b32.xlu0 %v4072_v17, %s20422_s28 }
 0x356   : > { %v4080_v59 = vpop.permute.xlu1 %4079 }
 0x357   : > { %v4091_v50 = vmax.f32 %v4071_v15, %v4080_v59 }
 0x35a   : > { %v4096_v49 = vpop.permute.xlu1 %4095  ;;  %v4098_v35 = vpop.permute.xlu0 %4097 }
 0x35b   : > { %v4107_v41 = vmax.f32 %v4091_v50, %v4096_v49 }
 0x35e   : > { %v4112_v34 = vpop.permute.xlu1 %4111  ;;  %v4114_v54 = vpop.permute.xlu0 %4113 }
 0x35f   : > { %v4123_v25 = vmax.f32 %v4107_v41, %v4112_v34 }
 0x362   : > { %v4082_v29 = vpop.permute.xlu1 %4081  ;;  %v4084_v12 = vpop.permute.xlu0 %4083 }
 0x363   : > { %v4093_v56 = vmax.f32 %v4073_v63, %v4084_v12  ;;  %v4092_v26 = vmax.f32 %v4072_v17, %v4082_v29  ;;  %v4292_v12 = vand.u32 4294901760, %v22776_v22 }
 0x365   : > { %v4108_v28 = vmax.f32 %v4092_v26, %v4098_v35  ;;  %v4293_v50 = vsub.f32 %v22776_v22, %v4292_v12 }
 0x366   : > { %v4100_v45 = vpop.permute.xlu1 %4099  ;;  %v4086_v11 = vpop.permute.xlu0 %4085 }
 0x367   : > { %v4094_v1 = vmax.f32 %v4074_v13, %v4086_v11  ;;  %v4109_v9 = vmax.f32 %v4093_v56, %v4100_v45  ;;  %v4124_v36 = vmax.f32 %v4108_v28, %v4114_v54  ;;  %v4294_v28 = vand.u32 4294901760, %v4293_v50 }
 0x36a   : > { %v4116_v31 = vpop.permute.xlu1 %4115  ;;  %v4102_v40 = vpop.permute.xlu0 %4101 }
 0x36b   : > { %v4110_v51 = vmax.f32 %v4094_v1, %v4102_v40  ;;  %v4125_v52 = vmax.f32 %v4109_v9, %v4116_v31 }
 0x36e   : > { %v4132_v47 = vpop.permute.xlu1 %4131  ;;  %v4118_v23 = vpop.permute.xlu0 %4117 }
 0x36f   : > { %v4126_v44 = vmax.f32 %v4110_v51, %v4118_v23  ;;  %v4141_v33 = vmax.f32 %v4125_v52, %v4132_v47 }
 0x371   : > { %v4151_v32 = vrot.slane %v4141_v33, 1  ;;  %v4165_v58 = vrot.slane %v4141_v33, 2  ;;  %v4179_v46 = vrot.slane %v4141_v33, 3  ;;  %v4193_v24 = vrot.slane %v4141_v33, 4 }
 0x372   : > { %v4128_v39 = vpop.permute.xlu1 %4127  ;;  %v4134_v27 = vpop.permute.xlu0 %4133 }
 0x373   : > { %v4142_v16 = vmax.f32 %v4126_v44, %v4134_v27  ;;  %v4139_v37 = vmax.f32 %v4123_v25, %v4128_v39 }
 0x375   : > { %v4153_v8 = vrot.slane %v4142_v16, 1  ;;  %v4167_v2 = vrot.slane %v4142_v16, 2  ;;  %v4181_v30 = vrot.slane %v4142_v16, 3  ;;  %v4148_v21 = vrot.slane %v4139_v37, 1 }
 0x376   : > { %v4130_v14 = vpop.permute.xlu0 %4129  ;;  %v4162_v38 = vrot.slane %v4139_v37, 2  ;;  %v4195_v57 = vrot.slane %v4142_v16, 4  ;;  %v4176_v13 = vrot.slane %v4139_v37, 3  ;;  %v4190_v45 = vrot.slane %v4139_v37, 4  ;;  %v4739_v16 = vld [vmem:[%s26084_s4 + $0x60] sm:$0xff] }
 0x377   : > { %v4140_v4 = vmax.f32 %v4124_v36, %v4130_v14  ;;  %v4154_v10 = vsel %vm4147_vm6, %v4151_v32, %v4153_v8  ;;  %v4168_v60 = vsel %vm4161_vm7, %v4165_v58, %v4167_v2  ;;  %v4182_v5 = vsel %vm4175_vm8, %v4179_v46, %v4181_v30  ;;  %v4738_v8 = vld [vmem:[%s26084_s4 + $0x58] sm:$0xff] }
 0x378   : > { %v4160_v53 = vmax.f32 %v4141_v33, %v4154_v10  ;;  %v4196_v34 = vsel %vm4189_vm9, %v4193_v24, %v4195_v57  ;;  %v22815_v2 = vand.u32 4294901760, %v4739_v16 }
 0x379   : > { %v4149_v62 = vrot.slane %v4140_v4, 1  ;;  %v4163_v61 = vrot.slane %v4140_v4, 2  ;;  %v4177_v63 = vrot.slane %v4140_v4, 3  ;;  %v4191_v35 = vrot.slane %v4140_v4, 4 }
 0x37a   : > { %v4174_v48 = vmax.f32 %v4160_v53, %v4168_v60 }
 0x37b   : > { %v4150_v15 = vsel %vm4147_vm6, %v4148_v21, %v4149_v62  ;;  %v4152_v17 = vsel %vm4147_vm6, %v4149_v62, %v4151_v32  ;;  %v4164_v59 = vsel %vm4161_vm7, %v4162_v38, %v4163_v61  ;;  %v4166_v49 = vsel %vm4161_vm7, %v4163_v61, %v4165_v58  ;;  %v4736_v61 = vld [vmem:[%s26084_s4 + $0x48] sm:$0xff]  ;;  %v4735_v38 = vld [vmem:[%s26084_s4 + $0x40] sm:$0xff] }
 0x37c   : > { %v4158_v43 = vmax.f32 %v4139_v37, %v4150_v15  ;;  %v4159_v42 = vmax.f32 %v4140_v4, %v4152_v17  ;;  %v4188_v18 = vmax.f32 %v4174_v48, %v4182_v5  ;;  %v4178_v31 = vsel %vm4175_vm8, %v4176_v13, %v4177_v63  ;;  %v4734_v15 = vld [vmem:[%s26084_s4 + $0x38] sm:$0xff] }
 0x37d   : > { %v4180_v40 = vsel %vm4175_vm8, %v4177_v63, %v4179_v46  ;;  %v4192_v6 = vsel %vm4189_vm9, %v4190_v45, %v4191_v35  ;;  %v4194_v9 = vsel %vm4189_vm9, %v4191_v35, %v4193_v24  ;;  %v22818_v4 = vand.u32 4294901760, %v4738_v8 }
 0x37e   : > { %v4172_v54 = vmax.f32 %v4158_v43, %v4164_v59  ;;  %v4173_v29 = vmax.f32 %v4159_v42, %v4166_v49  ;;  %v4202_v11 = vmax.f32 %v4188_v18, %v4196_v34  ;;  %v22821_v46 = vsub.f32 %v4739_v16, %v22815_v2  ;;  %v4733_v43 = vld [vmem:[%s26084_s4 + $0x30] sm:$0xff]  ;;  %v4732_v34 = vld [vmem:[%s26084_s4 + $0x28] sm:$0xff] }
 0x37f   : > { %v22825_v10 = vsub.f32 %v4738_v8, %v22818_v4  ;;  %v22886_v48 = vand.u32 4294901760, %v4735_v38  ;;  %v22901_v5 = vand.u32 4294901760, %v4734_v15  ;;  %v22917_v35 = vand.u32 4294901760, %v4733_v43  ;;  %v4727_v8 = vld [vmem:[%s26084_s4] sm:$0xff] }
 0x380   : > { %v4186_v56 = vmax.f32 %v4172_v54, %v4178_v31  ;;  %v4187_v26 = vmax.f32 %v4173_v29, %v4180_v40  ;;  %v22789_v1 = vand.u32 4294901760, %v4202_v11  ;;  %v22830_v30 = vand.u32 4294901760, %v22821_v46  ;;  %v4731_v31 = vld [vmem:[%s26084_s4 + $0x20] sm:$0xff] }
 0x381   : > { %v22835_v21 = vand.u32 4294901760, %v22825_v10  ;;  %v22899_v13 = vsub.f32 %v4735_v38, %v22886_v48  ;;  %v22914_v49 = vsub.f32 %v4734_v15, %v22901_v5  ;;  %v22928_v45 = vand.u32 4294901760, %v4732_v34 }
 0x382   : > { %v4200_v47 = vmax.f32 %v4186_v56, %v4192_v6  ;;  %v4201_v23 = vmax.f32 %v4187_v26, %v4194_v9  ;;  %18534 = vmatprep.subr.mxu0 %v22789_v1  ;;  %v4328_v51 = vsub.f32 %v4202_v11, %v22789_v1  ;;  %v4855_v53 = vsub.f32 %v22821_v46, %v22830_v30  ;;  %v4730_v9 = vld [vmem:[%s26084_s4 + $0x18] sm:$0xff] }
 0x383   : > { %18535 = vmatpush3.msra.mxu0 %v22789_v1  ;;  %v4862_v62 = vsub.f32 %v22825_v10, %v22835_v21  ;;  %v22911_v59 = vand.u32 4294901760, %v22899_v13  ;;  %v22931_v11 = vsub.f32 %v4733_v43, %v22917_v35  ;;  %v22940_v26 = vsub.f32 %v4732_v34, %v22928_v45 }
 0x384   : > { %v22798_v52 = vand.u32 4294901760, %v4201_v23  ;;  %v22800_v20 = vand.u32 4294901760, %v4200_v47  ;;  %v4329_v41 = vand.u32 4294901760, %v4328_v51 }
 0x385   : > { %v4883_v29 = vsub.f32 %v22899_v13, %v22911_v59  ;;  %v22946_v6 = vand.u32 4294901760, %v22931_v11 }
 0x386   : > { %18536 = vmatprep.subr.mxu0 %v22798_v52  ;;  %v4335_v44 = vsub.f32 %v4201_v23, %v22798_v52  ;;  %v4342_v33 = vsub.f32 %v4200_v47, %v22800_v20  ;;  %v4330_v39 = vsub.f32 %v4328_v51, %v4329_v41  ;;  %v22953_v23 = vand.u32 4294901760, %v22940_v26 }
 0x387   : > { %18537 = vmatpush3.msra.mxu0 %v22798_v52  ;;  %v4884_v40 = vand.u32 4294901760, %v4883_v29 }
 0x388   : > { %18538 = vmatprep.subr.mxu0 %v22800_v20  ;;  %v4336_v27 = vand.u32 4294901760, %v4335_v44  ;;  %v4343_v25 = vand.u32 4294901760, %v4342_v33  ;;  %v4331_v37 = vand.u32 4294901760, %v4330_v39 }
 0x389   : > { %18539 = vmatpush3.msra.mxu0 %v22800_v20 }
 0x38a   : > { %18552 = vmatprep.subr.mxu0 %v4328_v51  ;;  %18541 = vmatmul.mubr.f32.vlgmr.msra.gmra.mxu0 %v4294_v28  ;;  %v4337_v36 = vsub.f32 %v4335_v44, %v4336_v27  ;;  %v4344_v32 = vsub.f32 %v4342_v33, %v4343_v25 }
 0x38b   : > { %18543 = vmatprep.subr.mxu1 %v4331_v37  ;;  %18553 = vmatpush3.msra.mxu0 %v4328_v51  ;;  %v22958_v51 = vand.u32 4294901760, %v4730_v9 }
 0x38c   : > { %18544 = vmatpush3.msra.mxu1 %v4331_v37  ;;  %18554 = vmatprep.subr.mxu0 %v4335_v44  ;;  %v4338_v14 = vand.u32 4294901760, %v4337_v36  ;;  %v4345_v58 = vand.u32 4294901760, %v4344_v32 }
 0x38d   : > { %18555 = vmatpush3.msra.mxu0 %v4335_v44  ;;  %18558 = vmatprep.mubr.f32.mxu0 %v22762_v19  ;;  %v4856_v19 = vand.u32 4294901760, %v4855_v53  ;;  %v22973_v44 = vsub.f32 %v4730_v9, %v22958_v51 }
 0x38e   : > { %18545 = vmatprep.subr.mxu1 %v4338_v14  ;;  %18556 = vmatprep.subr.mxu0 %v4342_v33 }
 0x38f   : > { %18546 = vmatpush3.msra.mxu1 %v4338_v14  ;;  %18557 = vmatpush3.msra.mxu0 %v4342_v33  ;;  %v22985_v37 = vand.u32 4294901760, %v22973_v44 }
 0x390   : > { %18547 = vmatprep.subr.mxu1 %v4345_v58  ;;  %18570 = vmatprep.subr.mxu0 %v4329_v41 }
 0x391   : > { %18548 = vmatpush3.msra.mxu1 %v4345_v58  ;;  %18559 = vmatmul.mubr.f32.vlgmr.msra.gmra.mxu0 %v22776_v22  ;;  %v4918_v58 = vsub.f32 %v22973_v44, %v22985_v37 }
 0x392   : > { %18571 = vmatpush3.msra.mxu0 %v4329_v41  ;;  %18550 = vmatmul.mubr.f32.vlgmr.msra.gmra.mxu1 %v22773_v7  ;;  %v4904_v41 = vsub.f32 %v22940_v26, %v22953_v23 }
 0x393   : > { %18561 = vmatprep.subr.mxu1 %v22789_v1  ;;  %18572 = vmatprep.subr.mxu0 %v4336_v27 }
 0x394   : > { %18562 = vmatpush3.msra.mxu1 %v22789_v1  ;;  %18573 = vmatpush3.msra.mxu0 %v4336_v27  ;;  %v4728_v27 = vld [vmem:[%s26084_s4 + $0x8] sm:$0xff] }
 0x395   : > { %18563 = vmatprep.subr.mxu1 %v22798_v52  ;;  %18574 = vmatprep.subr.mxu0 %v4343_v25  ;;  %v22991_v32 = vand.u32 4294901760, %v4728_v27 }
 0x396   : > { %18564 = vmatpush3.msra.mxu1 %v22798_v52  ;;  %18575 = vmatpush3.msra.mxu0 %v4343_v25  ;;  %v4905_v25 = vand.u32 4294901760, %v4904_v41 }
 0x397   : > { %18565 = vmatprep.subr.mxu1 %v22800_v20  ;;  %18567 = vmatprep.mubr.f32.mxu1 %v4282_v0  ;;  %v4863_v0 = vand.u32 4294901760, %v4862_v62  ;;  %v23002_v62 = vand.u32 4294901760, %v4727_v8 }
 0x398   : > { %18566 = vmatpush3.msra.mxu1 %v22800_v20  ;;  %18576 = vmatprep.mubr.f32.mxu0 %v22758_v55 }
 0x399   : > { %18568 = vmatmul.mubr.f32.vlgmr.msra.gmra.mxu1 %v4292_v12  ;;  %18579 = vmatprep.subr.mxu1 %v22789_v1  ;;  %v22926_v12 = vand.u32 4294901760, %v22914_v49 }
 0x39a   : > { %18580 = vmatpush3.msra.mxu1 %v22789_v1  ;;  %18577 = vmatmul.mubr.f32.vlgmr.msra.gmra.mxu0 %v22773_v7  ;;  %v22942_v1 = vand.u32 4294901760, %v4731_v31 }
 0x39b   : > { %18581 = vmatprep.subr.mxu1 %v22798_v52  ;;  %18585 = vmatprep.mubr.f32.mxu1 %v22758_v55  ;;  %v4737_v55 = vld [vmem:[%s26084_s4 + $0x50] sm:$0xff]  ;;  %v4890_v56 = vsub.f32 %v22914_v49, %v22926_v12 }
 0x39c   : > { %18582 = vmatpush3.msra.mxu1 %v22798_v52  ;;  %18588 = vmatprep.subr.mxu0 %v22815_v2  ;;  %v22865_v22 = vand.u32 4294901760, %v4737_v55  ;;  %v22956_v50 = vsub.f32 %v4731_v31, %v22942_v1  ;;  %v4897_v52 = vsub.f32 %v22931_v11, %v22946_v6 }
 0x39d   : > { %18583 = vmatprep.subr.mxu1 %v22800_v20  ;;  %18589 = vmatpush3.msra.mxu0 %v22815_v2  ;;  %v4891_v47 = vand.u32 4294901760, %v4890_v56 }
 0x39e   : > { %18584 = vmatpush3.msra.mxu1 %v22800_v20  ;;  %18590 = vmatprep.subr.mxu0 %v22818_v4  ;;  %v22871_v24 = vsub.f32 %v4737_v55, %v22865_v22  ;;  %v4729_v20 = vld [vmem:[%s26084_s4 + $0x10] sm:$0xff]  ;;  %v22970_v28 = vand.u32 4294901760, %v22956_v50  ;;  %v4898_v39 = vand.u32 4294901760, %v4897_v52 }
 0x39f   : > { %18586 = vmatmul.mubr.f32.vlgmr.msra.gmra.mxu1 %v22773_v7  ;;  %18617 = vmatprep.subr.mxu1 %v4856_v19  ;;  %v22873_v7 = vand.u32 4294901760, %v4736_v61  ;;  %v22975_v33 = vand.u32 4294901760, %v4729_v20 }
 0x3a0   : > { %18618 = vmatpush3.msra.mxu1 %v4856_v19  ;;  %18591 = vmatpush3.msra.mxu0 %v22818_v4  ;;  %v22881_v60 = vand.u32 4294901760, %v22871_v24  ;;  %v4911_v16 = vsub.f32 %v22956_v50, %v22970_v28  ;;  %v23006_v19 = vsub.f32 %v4728_v27, %v22991_v32 }
 0x3a1   : > { %18619 = vmatprep.subr.mxu1 %v4863_v0  ;;  %18592 = vmatprep.subr.mxu0 %v22865_v22  ;;  %v22884_v57 = vsub.f32 %v4736_v61, %v22873_v7  ;;  %v22988_v36 = vsub.f32 %v4729_v20, %v22975_v33  ;;  %v23012_v61 = vsub.f32 %v4727_v8, %v23002_v62 }
 0x3a2   : > { %18620 = vmatpush3.msra.mxu1 %v4863_v0  ;;  %18593 = vmatpush3.msra.mxu0 %v22865_v22  ;;  %v4869_v17 = vsub.f32 %v22871_v24, %v22881_v60  ;;  %v4912_v14 = vand.u32 4294901760, %v4911_v16  ;;  %v4919_v0 = vand.u32 4294901760, %v4918_v58  ;;  %v23016_v38 = vand.u32 4294901760, %v23006_v19 }
 0x3a3   : > { %18594 = vmatprep.subr.mxu0 %v22873_v7  ;;  %v22896_v63 = vand.u32 4294901760, %v22884_v57  ;;  %v23000_v53 = vand.u32 4294901760, %v22988_v36 }
 0x3a4   : > { %18595 = vmatpush3.msra.mxu0 %v22873_v7  ;;  %v4870_v42 = vand.u32 4294901760, %v4869_v17  ;;  %v23020_v17 = vand.u32 4294901760, %v23012_v61  ;;  %v4932_v43 = vsub.f32 %v23006_v19, %v23016_v38 }
 0x3a5   : > { %18596 = vmatprep.subr.mxu0 %v22886_v48  ;;  %v4876_v18 = vsub.f32 %v22884_v57, %v22896_v63  ;;  %v4925_v55 = vsub.f32 %v22988_v36, %v23000_v53 }
 0x3a6   : > { %18597 = vmatpush3.msra.mxu0 %v22886_v48  ;;  %18621 = vmatprep.subr.mxu1 %v4870_v42 }
 0x3a7   : > { %18598 = vmatprep.subr.mxu0 %v22901_v5  ;;  %v4877_v54 = vand.u32 4294901760, %v4876_v18  ;;  %18622 = vmatpush3.msra.mxu1 %v4870_v42  ;;  %v4926_v15 = vand.u32 4294901760, %v4925_v55  ;;  %v4939_v42 = vsub.f32 %v23012_v61, %v23020_v17  ;;  %v4933_v18 = vand.u32 4294901760, %v4932_v43 }
 0x3a8   : > { %18599 = vmatpush3.msra.mxu0 %v22901_v5 }
 0x3a9   : > { %18600 = vmatprep.subr.mxu0 %v22917_v35  ;;  %18623 = vmatprep.subr.mxu1 %v4877_v54  ;;  %v4940_v34 = vand.u32 4294901760, %v4939_v42 }
 0x3aa   : > { %18601 = vmatpush3.msra.mxu0 %v22917_v35  ;;  %18624 = vmatpush3.msra.mxu1 %v4877_v54 }
 0x3ab   : > { %18602 = vmatprep.subr.mxu0 %v22928_v45  ;;  %18625 = vmatprep.subr.mxu1 %v4884_v40 }
 0x3ac   : > { %18603 = vmatpush3.msra.mxu0 %v22928_v45  ;;  %18626 = vmatpush3.msra.mxu1 %v4884_v40 }
 0x3ad   : > { %18604 = vmatprep.subr.mxu0 %v22942_v1  ;;  %18627 = vmatprep.subr.mxu1 %v4891_v47 }
 0x3ae   : > { %18605 = vmatpush3.msra.mxu0 %v22942_v1  ;;  %18628 = vmatpush3.msra.mxu1 %v4891_v47 }
 0x3af   : > { %18606 = vmatprep.subr.mxu0 %v22958_v51  ;;  %18629 = vmatprep.subr.mxu1 %v4898_v39 }
 0x3b0   : > { %18607 = vmatpush3.msra.mxu0 %v22958_v51  ;;  %18630 = vmatpush3.msra.mxu1 %v4898_v39 }
 0x3b1   : > { %18608 = vmatprep.subr.mxu0 %v22975_v33  ;;  %18631 = vmatprep.subr.mxu1 %v4905_v25 }
 0x3b2   : > { %18609 = vmatpush3.msra.mxu0 %v22975_v33  ;;  %18632 = vmatpush3.msra.mxu1 %v4905_v25 }
 0x3b3   : > { %18610 = vmatprep.subr.mxu0 %v22991_v32  ;;  %18633 = vmatprep.subr.mxu1 %v4912_v14 }
 0x3b4   : > { %18611 = vmatpush3.msra.mxu0 %v22991_v32  ;;  %18634 = vmatpush3.msra.mxu1 %v4912_v14 }
 0x3b5   : > { %18612 = vmatprep.subr.mxu0 %v23002_v62  ;;  %18635 = vmatprep.subr.mxu1 %v4919_v0 }
 0x3b6   : > { %18613 = vmatpush3.msra.mxu0 %v23002_v62  ;;  %18636 = vmatpush3.msra.mxu1 %v4919_v0 }
 0x3b7   : > { %18646 = vmatprep.subr.mxu0 %v22821_v46  ;;  %18637 = vmatprep.subr.mxu1 %v4926_v15 }
 0x3b8   : > { %18638 = vmatpush3.msra.mxu1 %v4926_v15 }
 0x3b9   : > { %18639 = vmatprep.subr.mxu1 %v4933_v18 }
 0x3ba   : > { %18640 = vmatpush3.msra.mxu1 %v4933_v18 }
 0x3bb   : > { %18641 = vmatprep.subr.mxu1 %v4940_v34 }
 0x3bc   : > { %18642 = vmatpush3.msra.mxu1 %v4940_v34 }
 0x3bd   : > { %18675 = vmatprep.subr.mxu1 %v22815_v2 }
 0x44a   : > { %v18542_v54 = vpop.f32.mrf.mxu0 }
 0x44c   : > { %v4286_v29 = vpop.f32.mrf.mxu0 }
 0x451   : > { %v18560_v40 = vpop.f32.mrf.mxu0 }
 0x452   : > { %v18551_v31 = vpop.f32.mrf.mxu1 }
 0x453   : > { %v4389_v56 = vadd.f32 %v18551_v31, %v18542_v54  ;;  %v4466_v52 = vpop.f32.mrf.mxu0 }
 0x454   : > { %v4382_v9 = vpop.f32.mrf.mxu1 }
 0x455   : > { %v4383_v47 = vadd.f32 %v4382_v9, %v4286_v29  ;;  %v4474_v20 = vadd.f32 %v18560_v40, %v4389_v56 }
 0x457   : > { %v4467_v39 = vadd.f32 %v4466_v52, %v4383_v47 }
 0x459   : > { %v18569_v41 = vpop.f32.mrf.mxu1 }
 0x45a   : > { %v4558_v27 = vadd.f32 %v18569_v41, %v4474_v20  ;;  %v18578_v25 = vpop.f32.mrf.mxu0 }
 0x45b   : > { %v4549_v16 = vpop.f32.mrf.mxu1 }
 0x45c   : > { %v4550_v8 = vadd.f32 %v4549_v16, %v4467_v39  ;;  %v4637_v14 = vpop.f32.mrf.mxu0  ;;  %v4644_v58 = vadd.f32 %v18578_v25, %v4558_v27 }
 0x45e   : > { %v4638_v55 = vadd.f32 %v4637_v14, %v4550_v8 }
 0x45f   : > { %v18587_v0 = vpop.f32.mrf.mxu1 }
 0x460   : > { %v4724_v15 = vadd.f32 %v18587_v0, %v4644_v58 }
 0x461   : > { %v4717_v43 = vpop.f32.mrf.mxu1 }
 0x462   : > { %v4745_v42 = vsel %vm4740_vm10, %v4724_v15, 0  ;;  %v4718_v18 = vadd.f32 %v4717_v43, %v4638_v55 }
 0x463   : > { %v23030_v34 = vand.u32 4294901760, %v4745_v42 }
 0x464   : > { %v4742_v54 = vsel %vm4740_vm10, %v4718_v18, 0 }
 0x465   : > { %v23034_v29 = vsub.f32 %v4745_v42, %v23030_v34  ;;  %v23036_v31 = vand.u32 4294901760, %v4742_v54 }
 0x467   : > { %v4837_v40 = vand.u32 4294901760, %v23034_v29  ;;  %v4826_v56 = vsub.f32 %v4742_v54, %v23036_v31  ;;  %18643 = vmatprep.mubr.f32.mxu1 %v23036_v31 }
 0x468   : > { %18644 = vmatmul.mubr.f32.vlgmr.msra.gmra.mxu1 %v23030_v34 }
 0x469   : > { %18676 = vmatpush3.msra.mxu1 %v22815_v2  ;;  %v4827_v9 = vand.u32 4294901760, %v4826_v56  ;;  %v4838_v47 = vsub.f32 %v23034_v29, %v4837_v40 }
 0x46a   : > { %18677 = vmatprep.subr.mxu1 %v22818_v4 }
 0x46b   : > { %18678 = vmatpush3.msra.mxu1 %v22818_v4  ;;  %18701 = vmatprep.mubr.f32.mxu1 %v4827_v9  ;;  %v4828_v52 = vsub.f32 %v4826_v56, %v4827_v9  ;;  %v4839_v41 = vand.u32 4294901760, %v4838_v47 }
 0x46c   : > { %18679 = vmatprep.subr.mxu1 %v22865_v22 }
 0x46d   : > { %18680 = vmatpush3.msra.mxu1 %v22865_v22  ;;  %v4829_v20 = vand.u32 4294901760, %v4828_v52 }
 0x46e   : > { %18681 = vmatprep.subr.mxu1 %v22873_v7 }
 0x46f   : > { %18682 = vmatpush3.msra.mxu1 %v22873_v7  ;;  %18614 = vmatprep.mubr.f32.mxu0 %v4829_v20 }
 0x470   : > { %18683 = vmatprep.subr.mxu1 %v22886_v48  ;;  %18615 = vmatmul.mubr.f32.vlgmr.msra.gmra.mxu0 %v4839_v41 }
 0x471   : > { %18647 = vmatpush3.msra.mxu0 %v22821_v46  ;;  %18684 = vmatpush3.msra.mxu1 %v22886_v48  ;;  %v15912_v46 = vld [vmem:[%s26082_s2 + $0x50] sm:$0xff] }
 0x472   : > { %18648 = vmatprep.subr.mxu0 %v22825_v10  ;;  %18672 = vmatprep.mubr.f32.mxu0 %v4826_v56 }
 0x473   : > { %18685 = vmatprep.subr.mxu1 %v22901_v5  ;;  %18649 = vmatpush3.msra.mxu0 %v22825_v10 }
 0x474   : > { %18686 = vmatpush3.msra.mxu1 %v22901_v5  ;;  %18650 = vmatprep.subr.mxu0 %v22871_v24 }
 0x475   : > { %18687 = vmatprep.subr.mxu1 %v22917_v35  ;;  %18651 = vmatpush3.msra.mxu0 %v22871_v24 }
 0x476   : > { %18688 = vmatpush3.msra.mxu1 %v22917_v35  ;;  %18652 = vmatprep.subr.mxu0 %v22884_v57 }
 0x477   : > { %18689 = vmatprep.subr.mxu1 %v22928_v45  ;;  %18653 = vmatpush3.msra.mxu0 %v22884_v57 }
 0x478   : > { %18690 = vmatpush3.msra.mxu1 %v22928_v45  ;;  %18654 = vmatprep.subr.mxu0 %v22899_v13 }
 0x479   : > { %18691 = vmatprep.subr.mxu1 %v22942_v1  ;;  %18655 = vmatpush3.msra.mxu0 %v22899_v13 }
 0x47a   : > { %18692 = vmatpush3.msra.mxu1 %v22942_v1  ;;  %18656 = vmatprep.subr.mxu0 %v22914_v49 }
 0x47b   : > { %18693 = vmatprep.subr.mxu1 %v22958_v51  ;;  %18657 = vmatpush3.msra.mxu0 %v22914_v49 }
 0x47c   : > { %18694 = vmatpush3.msra.mxu1 %v22958_v51  ;;  %18658 = vmatprep.subr.mxu0 %v22931_v11 }
 0x47d   : > { %18695 = vmatprep.subr.mxu1 %v22975_v33  ;;  %18659 = vmatpush3.msra.mxu0 %v22931_v11  ;;  %v15908_v11 = vld [vmem:[%s26082_s2 + $0x30] sm:$0xff] }
 0x47e   : > { %18696 = vmatpush3.msra.mxu1 %v22975_v33  ;;  %18660 = vmatprep.subr.mxu0 %v22940_v26 }
 0x47f   : > { %18697 = vmatprep.subr.mxu1 %v22991_v32  ;;  %18661 = vmatpush3.msra.mxu0 %v22940_v26 }
 0x480   : > { %18698 = vmatpush3.msra.mxu1 %v22991_v32  ;;  %18662 = vmatprep.subr.mxu0 %v22956_v50 }
 0x481   : > { %18699 = vmatprep.subr.mxu1 %v23002_v62  ;;  %18663 = vmatpush3.msra.mxu0 %v22956_v50 }
 0x482   : > { %18700 = vmatpush3.msra.mxu1 %v23002_v62  ;;  %18664 = vmatprep.subr.mxu0 %v22973_v44 }
 0x483   : > { %18702 = vmatmul.mubr.f32.vlgmr.msra.gmra.mxu1 %v4837_v40  ;;  %18733 = vmatprep.subr.mxu1 %v22815_v2 }
 0x484   : > { %18665 = vmatpush3.msra.mxu0 %v22973_v44  ;;  %18734 = vmatpush3.msra.mxu1 %v22815_v2  ;;  %v15913_v2 = vld [vmem:[%s26082_s2 + $0x58] sm:$0xff] }
 0x485   : > { %18759 = vmatprep.mubr.f32.mxu1 %v23036_v31  ;;  %18666 = vmatprep.subr.mxu0 %v22988_v36 }
 0x486   : > { %18735 = vmatprep.subr.mxu1 %v22818_v4  ;;  %18667 = vmatpush3.msra.mxu0 %v22988_v36 }
 0x487   : > { %18736 = vmatpush3.msra.mxu1 %v22818_v4  ;;  %18668 = vmatprep.subr.mxu0 %v23006_v19  ;;  %v23153_v4 = vand.u32 4294901760, %v15913_v2 }
 0x488   : > { %18737 = vmatprep.subr.mxu1 %v22865_v22  ;;  %18669 = vmatpush3.msra.mxu0 %v23006_v19 }
 0x489   : > { %18738 = vmatpush3.msra.mxu1 %v22865_v22  ;;  %18670 = vmatprep.subr.mxu0 %v23012_v61  ;;  %v23159_v10 = vsub.f32 %v15913_v2, %v23153_v4 }
 0x48a   : > { %18739 = vmatprep.subr.mxu1 %v22873_v7  ;;  %18671 = vmatpush3.msra.mxu0 %v23012_v61 }
 0x48b   : > { %18740 = vmatpush3.msra.mxu1 %v22873_v7  ;;  %18673 = vmatmul.mubr.f32.vlgmr.msra.gmra.mxu0 %v23034_v29  ;;  %v23169_v22 = vand.u32 4294901760, %v23159_v10 }
 0x48c   : > { %18704 = vmatprep.subr.mxu0 %v22830_v30  ;;  %18741 = vmatprep.subr.mxu1 %v22886_v48 }
 0x48d   : > { %18705 = vmatpush3.msra.mxu0 %v22830_v30  ;;  %18730 = vmatprep.mubr.f32.mxu0 %v23036_v31  ;;  %v23161_v30 = vand.u32 4294901760, %v15912_v46  ;;  %v5534_v57 = vsub.f32 %v23159_v10, %v23169_v22 }
 0x48e   : > { %18742 = vmatpush3.msra.mxu1 %v22886_v48  ;;  %18706 = vmatprep.subr.mxu0 %v22835_v21 }
 0x48f   : > { %18743 = vmatprep.subr.mxu1 %v22901_v5  ;;  %18707 = vmatpush3.msra.mxu0 %v22835_v21  ;;  %v15911_v21 = vld [vmem:[%s26082_s2 + $0x48] sm:$0xff]  ;;  %v23172_v24 = vsub.f32 %v15912_v46, %v23161_v30 }
 0x490   : > { %18744 = vmatpush3.msra.mxu1 %v22901_v5  ;;  %18708 = vmatprep.subr.mxu0 %v22881_v60  ;;  %v23174_v7 = vand.u32 4294901760, %v15911_v21  ;;  %v15909_v5 = vld [vmem:[%s26082_s2 + $0x38] sm:$0xff] }
 0x491   : > { %18745 = vmatprep.subr.mxu1 %v22917_v35  ;;  %18709 = vmatpush3.msra.mxu0 %v22881_v60  ;;  %v15910_v60 = vld [vmem:[%s26082_s2 + $0x40] sm:$0xff]  ;;  %v23184_v48 = vand.u32 4294901760, %v23172_v24 }
 0x492   : > { %18746 = vmatpush3.msra.mxu1 %v22917_v35  ;;  %18710 = vmatprep.subr.mxu0 %v22896_v63  ;;  %v23190_v13 = vand.u32 4294901760, %v15910_v60 }
 0x493   : > { %18747 = vmatprep.subr.mxu1 %v22928_v45  ;;  %18711 = vmatpush3.msra.mxu0 %v22896_v63  ;;  %v23187_v63 = vsub.f32 %v15911_v21, %v23174_v7  ;;  %v5541_v49 = vsub.f32 %v23172_v24, %v23184_v48 }
 0x494   : > { %18748 = vmatpush3.msra.mxu1 %v22928_v45  ;;  %18712 = vmatprep.subr.mxu0 %v22911_v59  ;;  %v23204_v45 = vand.u32 4294901760, %v15909_v5 }
 0x495   : > { %18749 = vmatprep.subr.mxu1 %v22942_v1  ;;  %18713 = vmatpush3.msra.mxu0 %v22911_v59  ;;  %v5535_v59 = vand.u32 4294901760, %v5534_v57  ;;  %v23199_v35 = vand.u32 4294901760, %v23187_v63  ;;  %v5542_v26 = vand.u32 4294901760, %v5541_v49  ;;  %v5403_v49 = vld [vmem:[%s26082_s2 + $0x28] sm:$0xff] }
 0x496   : > { %18750 = vmatpush3.msra.mxu1 %v22942_v1  ;;  %18714 = vmatprep.subr.mxu0 %v22926_v12  ;;  %v23219_v50 = vsub.f32 %v15909_v5, %v23204_v45 }
 0x497   : > { %18751 = vmatprep.subr.mxu1 %v22958_v51  ;;  %18715 = vmatpush3.msra.mxu0 %v22926_v12  ;;  %v23202_v12 = vsub.f32 %v15910_v60, %v23190_v13  ;;  %v5548_v1 = vsub.f32 %v23187_v63, %v23199_v35 }
 0x498   : > { %18752 = vmatpush3.msra.mxu1 %v22958_v51  ;;  %18716 = vmatprep.subr.mxu0 %v22946_v6 }
 0x499   : > { %18753 = vmatprep.subr.mxu1 %v22975_v33  ;;  %18717 = vmatpush3.msra.mxu0 %v22946_v6  ;;  %v23212_v6 = vand.u32 4294901760, %v15908_v11  ;;  %v5549_v51 = vand.u32 4294901760, %v5548_v1  ;;  %v23286_v1 = vand.u32 4294901760, %v5403_v49 }
 0x49a   : > { %18754 = vmatpush3.msra.mxu1 %v22975_v33  ;;  %18718 = vmatprep.subr.mxu0 %v22953_v23  ;;  %v23229_v33 = vand.u32 4294901760, %v23219_v50 }
 0x49b   : > { %18755 = vmatprep.subr.mxu1 %v22991_v32  ;;  %18719 = vmatpush3.msra.mxu0 %v22953_v23  ;;  %v23216_v23 = vand.u32 4294901760, %v23202_v12 }
 0x49c   : > { %18756 = vmatpush3.msra.mxu1 %v22991_v32  ;;  %18720 = vmatprep.subr.mxu0 %v22970_v28  ;;  %v5562_v32 = vsub.f32 %v23219_v50, %v23229_v33 }
 0x49d   : > { %18757 = vmatprep.subr.mxu1 %v23002_v62  ;;  %18721 = vmatpush3.msra.mxu0 %v22970_v28  ;;  %v23223_v28 = vsub.f32 %v15908_v11, %v23212_v6  ;;  %v5555_v44 = vsub.f32 %v23202_v12, %v23216_v23 }
 0x49e   : > { %18758 = vmatpush3.msra.mxu1 %v23002_v62  ;;  %18722 = vmatprep.subr.mxu0 %v22985_v37  ;;  %v5563_v62 = vand.u32 4294901760, %v5562_v32  ;;  %v23305_v32 = vsub.f32 %v5403_v49, %v23286_v1 }
 0x49f   : > { %18760 = vmatmul.mubr.f32.vlgmr.msra.gmra.mxu1 %v23030_v34  ;;  %18723 = vmatpush3.msra.mxu0 %v22985_v37  ;;  %v23233_v37 = vand.u32 4294901760, %v23223_v28  ;;  %v5556_v36 = vand.u32 4294901760, %v5555_v44  ;;  %v5401_v44 = vld [vmem:[%s26082_s2 + $0x18] sm:$0xff] }
 0x4a0   : > { %18724 = vmatprep.subr.mxu0 %v23000_v53  ;;  %18777 = vmatprep.subr.mxu1 %v5535_v59 }
 0x4a1   : > { %18725 = vmatpush3.msra.mxu0 %v23000_v53  ;;  %18778 = vmatpush3.msra.mxu1 %v5535_v59  ;;  %v5569_v53 = vsub.f32 %v23223_v28, %v23233_v37 }
 0x4a2   : > { %18726 = vmatprep.subr.mxu0 %v23016_v38  ;;  %18779 = vmatprep.subr.mxu1 %v5542_v26 }
 0x4a3   : > { %18727 = vmatpush3.msra.mxu0 %v23016_v38  ;;  %18780 = vmatpush3.msra.mxu1 %v5542_v26  ;;  %v5570_v19 = vand.u32 4294901760, %v5569_v53  ;;  %v23312_v53 = vand.u32 4294901760, %v5401_v44 }
 0x4a4   : > { %18728 = vmatprep.subr.mxu0 %v23020_v17  ;;  %18781 = vmatprep.subr.mxu1 %v5549_v51 }
 0x4a5   : > { %18729 = vmatpush3.msra.mxu0 %v23020_v17  ;;  %18782 = vmatpush3.msra.mxu1 %v5549_v51  ;;  %v5402_v51 = vld [vmem:[%s26082_s2 + $0x20] sm:$0xff] }
 0x4a6   : > { %18731 = vmatmul.mubr.f32.vlgmr.msra.gmra.mxu0 %v23030_v34  ;;  %18762 = vmatprep.subr.mxu0 %v23153_v4 }
 0x4a7   : > { %18763 = vmatpush3.msra.mxu0 %v23153_v4  ;;  %18783 = vmatprep.subr.mxu1 %v5556_v36 }
 0x4a8   : > { %18764 = vmatprep.subr.mxu0 %v23161_v30  ;;  %18784 = vmatpush3.msra.mxu1 %v5556_v36  ;;  %v23300_v36 = vand.u32 4294901760, %v5402_v51 }
 0x4a9   : > { %18765 = vmatpush3.msra.mxu0 %v23161_v30  ;;  %18785 = vmatprep.subr.mxu1 %v5563_v62 }
 0x4aa   : > { %18766 = vmatprep.subr.mxu0 %v23174_v7  ;;  %18786 = vmatpush3.msra.mxu1 %v5563_v62 }
 0x4ab   : > { %18767 = vmatpush3.msra.mxu0 %v23174_v7  ;;  %18787 = vmatprep.subr.mxu1 %v5570_v19 }
 0x4ac   : > { %18768 = vmatprep.subr.mxu0 %v23190_v13  ;;  %18788 = vmatpush3.msra.mxu1 %v5570_v19  ;;  %v23322_v19 = vsub.f32 %v5402_v51, %v23300_v36  ;;  %v15916_v51 = vld [vmem:[%s26082_s2 + $0x70] sm:$0xff] }
 0x4ad   : > { %18769 = vmatpush3.msra.mxu0 %v23190_v13  ;;  %18807 = vmatprep.subr.mxu1 %v23153_v4 }
 0x4ae   : > { %18770 = vmatprep.subr.mxu0 %v23204_v45 }
 0x4af   : > { %18771 = vmatpush3.msra.mxu0 %v23204_v45 }
 0x4b0   : > { %18772 = vmatprep.subr.mxu0 %v23212_v6 }
 0x4b1   : > { %18773 = vmatpush3.msra.mxu0 %v23212_v6 }
 0x4b2   : > { %18792 = vmatprep.subr.mxu0 %v23159_v10 }
 0x528   : > { %v18645_v38 = vpop.f32.mrf.mxu1 }
 0x52a   : > { %v4977_v27 = vpop.f32.mrf.mxu1 }
 0x530   : > { %v18616_v61 = vpop.f32.mrf.mxu0 }
 0x531   : > { %v4984_v25 = vadd.f32 %v18645_v38, %v18616_v61  ;;  %v23329_v38 = vand.u32 4294901760, %v23305_v32 }
 0x532   : > { %v4831_v17 = vpop.f32.mrf.mxu0 }
 0x533   : > { %v4978_v14 = vadd.f32 %v4977_v27, %v4831_v17 }
 0x543   : > { %v18703_v16 = vpop.f32.mrf.mxu1 }
 0x545   : > { %v5174_v55 = vpop.f32.mrf.mxu1 }
 0x54b   : > { %v18674_v39 = vpop.f32.mrf.mxu0 }
 0x54c   : > { %v5089_v58 = vadd.f32 %v18674_v39, %v4984_v25  ;;  %v5398_v39 = vld [vmem:[%s26082_s2] sm:$0xff]  ;;  %v6094_v25 = vsub.f32 %v23305_v32, %v23329_v38 }
 0x54d   : > { %v5081_v8 = vpop.f32.mrf.mxu0 }
 0x54e   : > { %v5082_v0 = vadd.f32 %v5081_v8, %v4978_v14  ;;  %v5183_v15 = vadd.f32 %v18703_v16, %v5089_v58  ;;  %v23358_v16 = vand.u32 4294901760, %v5398_v39 }
 0x550   : > { %v5175_v34 = vadd.f32 %v5174_v55, %v5082_v0 }
 0x55f   : > { %v18761_v43 = vpop.f32.mrf.mxu1 }
 0x561   : > { %v5382_v40 = vpop.f32.mrf.mxu1 }
 0x566   : > { %v18732_v42 = vpop.f32.mrf.mxu0 }
 0x567   : > { %v5299_v18 = vadd.f32 %v18732_v42, %v5183_v15 }
 0x568   : > { %v5292_v54 = vpop.f32.mrf.mxu0 }
 0x569   : > { %v5389_v29 = vadd.f32 %v18761_v43, %v5299_v18  ;;  %v5293_v31 = vadd.f32 %v5292_v54, %v5175_v34 }
 0x56b   : > { %5395 = vst.msk [vmem:[#allocation4 + $0x9] sm:$0xf] %vm5394_vm12, %v5389_v29  ;;  %v5383_v56 = vadd.f32 %v5382_v40, %v5293_v31 }
 0x56d   : > { %5393 = vst.msk [vmem:[#allocation4 + $0x1] sm:$0xff] %vm5392_vm13, %v5383_v56 }
 0x572   : > { %v5405_v9 = vld [vmem:[#allocation4 + $0x9] sm:$0xf] }
 0x573   : > { %v5417_v47 = vsel %vm5392_vm13, %v5405_v9, 0  ;;  %v15919_v9 = vld [vmem:[%s26082_s2 + $0x88] sm:$0xff] }
 0x574   : > { %v5404_v52 = vld [vmem:[#allocation4 + $0x1] sm:$0xff]  ;;  %v23247_v20 = vand.u32 4294901760, %v5417_v47 }
 0x575   : > { %v5414_v41 = vsel %vm5392_vm13, %v5404_v52, 0  ;;  %v5396_v62 = vld [vmem:[#allocation4 + $0x2] sm:$0xff]  ;;  %v23462_v52 = vand.u32 4294901760, %v15919_v9 }
 0x576   : > { %v23250_v2 = vand.u32 4294901760, %v5414_v41  ;;  %v23253_v46 = vsub.f32 %v5417_v47, %v23247_v20 }
 0x577   : > { %v23481_v49 = vsub.f32 %v15919_v9, %v23462_v52 }
 0x578   : > { %18789 = vmatprep.mubr.f32.mxu1 %v23250_v2  ;;  %v23257_v21 = vsub.f32 %v5414_v41, %v23250_v2  ;;  %v23260_v60 = vand.u32 4294901760, %v23253_v46  ;;  %v15918_v41 = vld [vmem:[%s26082_s2 + $0x80] sm:$0xff] }
 0x579   : > { %18790 = vmatmul.mubr.f32.vlgmr.msra.gmra.mxu1 %v23247_v20 }
 0x57a   : > { %18808 = vmatpush3.msra.mxu1 %v23153_v4  ;;  %v23265_v57 = vand.u32 4294901760, %v23257_v21  ;;  %v5503_v5 = vsub.f32 %v23253_v46, %v23260_v60 }
 0x57b   : > { %18809 = vmatprep.subr.mxu1 %v23161_v30 }
 0x57c   : > { %18810 = vmatpush3.msra.mxu1 %v23161_v30  ;;  %18819 = vmatprep.mubr.f32.mxu1 %v23265_v57  ;;  %v5493_v59 = vsub.f32 %v23257_v21, %v23265_v57  ;;  %v23282_v26 = vand.u32 4294901760, %v5503_v5  ;;  %v15917_v5 = vld [vmem:[%s26082_s2 + $0x78] sm:$0xff] }
 0x57d   : > { %18811 = vmatprep.subr.mxu1 %v23174_v7 }
 0x57e   : > { %18812 = vmatpush3.msra.mxu1 %v23174_v7  ;;  %v23279_v11 = vand.u32 4294901760, %v5493_v59  ;;  %v23476_v59 = vand.u32 4294901760, %v15918_v41 }
 0x57f   : > { %18813 = vmatprep.subr.mxu1 %v23190_v13 }
 0x580   : > { %18814 = vmatpush3.msra.mxu1 %v23190_v13  ;;  %18774 = vmatprep.mubr.f32.mxu0 %v23279_v11 }
 0x581   : > { %18815 = vmatprep.subr.mxu1 %v23204_v45  ;;  %18775 = vmatmul.mubr.f32.vlgmr.msra.gmra.mxu0 %v23282_v26 }
 0x582   : > { %18793 = vmatpush3.msra.mxu0 %v23159_v10  ;;  %18816 = vmatpush3.msra.mxu1 %v23204_v45  ;;  %v5400_v10 = vld [vmem:[%s26082_s2 + $0x10] sm:$0xff] }
 0x583   : > { %18794 = vmatprep.subr.mxu0 %v23172_v24  ;;  %18804 = vmatprep.mubr.f32.mxu0 %v23257_v21  ;;  %v23324_v61 = vand.u32 4294901760, %v5400_v10 }
 0x584   : > { %18817 = vmatprep.subr.mxu1 %v23212_v6  ;;  %18795 = vmatpush3.msra.mxu0 %v23172_v24  ;;  %v5399_v24 = vld [vmem:[%s26082_s2 + $0x8] sm:$0xff] }
 0x585   : > { %18818 = vmatpush3.msra.mxu1 %v23212_v6  ;;  %18796 = vmatprep.subr.mxu0 %v23187_v63  ;;  %v23337_v17 = vand.u32 4294901760, %v5399_v24  ;;  %v23350_v27 = vsub.f32 %v5400_v10, %v23324_v61  ;;  %v15915_v10 = vld [vmem:[%s26082_s2 + $0x68] sm:$0xff] }
 0x586   : > { %18820 = vmatmul.mubr.f32.vlgmr.msra.gmra.mxu1 %v23260_v60  ;;  %18837 = vmatprep.subr.mxu1 %v23153_v4 }
 0x587   : > { %18797 = vmatpush3.msra.mxu0 %v23187_v63  ;;  %18838 = vmatpush3.msra.mxu1 %v23153_v4  ;;  %v5974_v63 = vsel %vm5392_vm13, %v5396_v62, 0  ;;  %v23335_v4 = vsub.f32 %v5401_v44, %v23312_v53  ;;  %v23366_v8 = vsub.f32 %v5399_v24, %v23337_v17  ;;  %v23375_v14 = vand.u32 4294901760, %v23350_v27 }
 0x588   : > { %18849 = vmatprep.mubr.f32.mxu1 %v23250_v2  ;;  %18798 = vmatprep.subr.mxu0 %v23202_v12  ;;  %v23488_v44 = vand.u32 4294901760, %v15917_v5  ;;  %v23498_v62 = vsub.f32 %v15918_v41, %v23476_v59  ;;  %v23500_v24 = vand.u32 4294901760, %v15916_v51 }
 0x589   : > { %18839 = vmatprep.subr.mxu1 %v23161_v30  ;;  %18799 = vmatpush3.msra.mxu0 %v23202_v12  ;;  %v23347_v12 = vand.u32 4294901760, %v23322_v19  ;;  %v23390_v55 = vand.u32 4294901760, %v23366_v8 }
 0x58a   : > { %18840 = vmatpush3.msra.mxu1 %v23161_v30  ;;  %18800 = vmatprep.subr.mxu0 %v23219_v50  ;;  %v23356_v30 = vand.u32 4294901760, %v5974_v63 }
 0x58b   : > { %18841 = vmatprep.subr.mxu1 %v23174_v7  ;;  %18801 = vmatpush3.msra.mxu0 %v23219_v50  ;;  %v23363_v50 = vand.u32 4294901760, %v23335_v4 }
 0x58c   : > { %18842 = vmatpush3.msra.mxu1 %v23174_v7  ;;  %18802 = vmatprep.subr.mxu0 %v23223_v28  ;;  %v6101_v7 = vsub.f32 %v23322_v19, %v23347_v12  ;;  %v23380_v58 = vsub.f32 %v5974_v63, %v23356_v30 }
 0x58d   : > { %18843 = vmatprep.subr.mxu1 %v23190_v13  ;;  %18803 = vmatpush3.msra.mxu0 %v23223_v28  ;;  %v6095_v28 = vand.u32 4294901760, %v6094_v25  ;;  %v6108_v0 = vsub.f32 %v23335_v4, %v23363_v50  ;;  %v23526_v25 = vsub.f32 %v15916_v51, %v23500_v24 }
 0x58e   : > { %18844 = vmatpush3.msra.mxu1 %v23190_v13  ;;  %18805 = vmatmul.mubr.f32.vlgmr.msra.gmra.mxu0 %v23253_v46  ;;  %v23383_v13 = vsub.f32 %v5398_v39, %v23358_v16  ;;  %v6102_v15 = vand.u32 4294901760, %v6101_v7  ;;  %v23400_v43 = vand.u32 4294901760, %v23380_v58  ;;  %v15914_v39 = vld [vmem:[%s26082_s2 + $0x60] sm:$0xff] }
 0x58f   : > { %18822 = vmatprep.subr.mxu0 %v23169_v22  ;;  %18845 = vmatprep.subr.mxu1 %v23204_v45 }
 0x590   : > { %18823 = vmatpush3.msra.mxu0 %v23169_v22  ;;  %18834 = vmatprep.mubr.f32.mxu0 %v23250_v2  ;;  %v5397_v22 = vld [vmem:[#allocation4 + $0xa] sm:$0xf]  ;;  %v23403_v42 = vand.u32 4294901760, %v23383_v13 }
 0x591   : > { %18846 = vmatpush3.msra.mxu1 %v23204_v45  ;;  %18824 = vmatprep.subr.mxu0 %v23184_v48  ;;  %v6115_v45 = vsub.f32 %v23350_v27, %v23375_v14  ;;  %v5977_v18 = vsel %vm5392_vm13, %v5397_v22, 0  ;;  %v23551_v22 = vand.u32 4294901760, %v23526_v25 }
 0x592   : > { %18847 = vmatprep.subr.mxu1 %v23212_v6  ;;  %18825 = vmatpush3.msra.mxu0 %v23184_v48  ;;  %v6109_v48 = vand.u32 4294901760, %v6108_v0  ;;  %v6129_v54 = vsub.f32 %v23383_v13, %v23403_v42  ;;  %v23417_v29 = vand.u32 4294901760, %v5977_v18 }
 0x593   : > { %18848 = vmatpush3.msra.mxu1 %v23212_v6  ;;  %18826 = vmatprep.subr.mxu0 %v23199_v35  ;;  %v6122_v6 = vsub.f32 %v23366_v8, %v23390_v55  ;;  %v6116_v34 = vand.u32 4294901760, %v6115_v45 }
 0x594   : > { %18850 = vmatmul.mubr.f32.vlgmr.msra.gmra.mxu1 %v23247_v20  ;;  %18867 = vmatprep.subr.mxu1 %v6095_v28  ;;  %v6130_v40 = vand.u32 4294901760, %v6129_v54  ;;  %v23426_v56 = vsub.f32 %v5977_v18, %v23417_v29 }
 0x595   : > { %18827 = vmatpush3.msra.mxu0 %v23199_v35  ;;  %18868 = vmatpush3.msra.mxu1 %v6095_v28  ;;  %v6053_v35 = vsub.f32 %v23380_v58, %v23400_v43  ;;  %v6123_v31 = vand.u32 4294901760, %v6122_v6  ;;  %v23534_v28 = vand.u32 4294901760, %v15914_v39 }
 0x596   : > { %18879 = vmatprep.mubr.f32.mxu1 %v23356_v30  ;;  %18828 = vmatprep.subr.mxu0 %v23216_v23 }
 0x597   : > { %18869 = vmatprep.subr.mxu1 %v6102_v15  ;;  %18829 = vmatpush3.msra.mxu0 %v23216_v23  ;;  %v23423_v23 = vand.u32 4294901760, %v6053_v35 }
 0x598   : > { %18870 = vmatpush3.msra.mxu1 %v6102_v15  ;;  %18830 = vmatprep.subr.mxu0 %v23229_v33 }
 0x599   : > { %18871 = vmatprep.subr.mxu1 %v6109_v48  ;;  %18831 = vmatpush3.msra.mxu0 %v23229_v33  ;;  %v23434_v33 = vand.u32 4294901760, %v23426_v56 }
 0x59a   : > { %18872 = vmatpush3.msra.mxu1 %v6109_v48  ;;  %18832 = vmatprep.subr.mxu0 %v23233_v37 }
 0x59b   : > { %18873 = vmatprep.subr.mxu1 %v6116_v34  ;;  %18833 = vmatpush3.msra.mxu0 %v23233_v37  ;;  %v6063_v37 = vsub.f32 %v23426_v56, %v23434_v33 }
 0x59c   : > { %18874 = vmatpush3.msra.mxu1 %v6116_v34  ;;  %18835 = vmatmul.mubr.f32.vlgmr.msra.gmra.mxu0 %v23247_v20 }
 0x59d   : > { %18852 = vmatprep.subr.mxu0 %v23286_v1  ;;  %18875 = vmatprep.subr.mxu1 %v6123_v31  ;;  %v23456_v47 = vand.u32 4294901760, %v6063_v37 }
 0x59e   : > { %18853 = vmatpush3.msra.mxu0 %v23286_v1  ;;  %18864 = vmatprep.mubr.f32.mxu0 %v23423_v23 }
 0x59f   : > { %18876 = vmatpush3.msra.mxu1 %v6123_v31  ;;  %18854 = vmatprep.subr.mxu0 %v23300_v36 }
 0x5a0   : > { %18877 = vmatprep.subr.mxu1 %v6130_v40  ;;  %18855 = vmatpush3.msra.mxu0 %v23300_v36 }
 0x5a1   : > { %18878 = vmatpush3.msra.mxu1 %v6130_v40  ;;  %18856 = vmatprep.subr.mxu0 %v23312_v53 }
 0x5a2   : > { %18880 = vmatmul.mubr.f32.vlgmr.msra.gmra.mxu1 %v23417_v29  ;;  %18897 = vmatprep.subr.mxu1 %v23286_v1 }
 0x5a3   : > { %18857 = vmatpush3.msra.mxu0 %v23312_v53  ;;  %18898 = vmatpush3.msra.mxu1 %v23286_v1 }
 0x5a4   : > { %18909 = vmatprep.mubr.f32.mxu1 %v23400_v43  ;;  %18858 = vmatprep.subr.mxu0 %v23324_v61 }
 0x5a5   : > { %18899 = vmatprep.subr.mxu1 %v23300_v36  ;;  %18859 = vmatpush3.msra.mxu0 %v23324_v61 }
 0x5a6   : > { %18900 = vmatpush3.msra.mxu1 %v23300_v36  ;;  %18860 = vmatprep.subr.mxu0 %v23337_v17 }
 0x5a7   : > { %18901 = vmatprep.subr.mxu1 %v23312_v53  ;;  %18861 = vmatpush3.msra.mxu0 %v23337_v17 }
 0x5a8   : > { %18902 = vmatpush3.msra.mxu1 %v23312_v53  ;;  %18862 = vmatprep.subr.mxu0 %v23358_v16 }
 0x5a9   : > { %18903 = vmatprep.subr.mxu1 %v23324_v61  ;;  %18863 = vmatpush3.msra.mxu0 %v23358_v16 }
 0x5aa   : > { %18904 = vmatpush3.msra.mxu1 %v23324_v61  ;;  %18865 = vmatmul.mubr.f32.vlgmr.msra.gmra.mxu0 %v23456_v47 }
 0x5ab   : > { %18882 = vmatprep.subr.mxu0 %v23305_v32  ;;  %18905 = vmatprep.subr.mxu1 %v23337_v17 }
 0x5ac   : > { %18883 = vmatpush3.msra.mxu0 %v23305_v32  ;;  %18894 = vmatprep.mubr.f32.mxu0 %v23380_v58  ;;  %v6533_v32 = vld [vmem:[#allocation4] sm:$0xff] }
 0x5ad   : > { %18906 = vmatpush3.msra.mxu1 %v23337_v17  ;;  %18884 = vmatprep.subr.mxu0 %v23322_v19  ;;  %v6543_v63 = vsel %vm5392_vm13, %v6533_v32, 0 }
 0x5ae   : > { %18907 = vmatprep.subr.mxu1 %v23358_v16  ;;  %18885 = vmatpush3.msra.mxu0 %v23322_v19  ;;  %v23505_v19 = vand.u32 4294901760, %v23481_v49 }
 0x5af   : > { %18908 = vmatpush3.msra.mxu1 %v23358_v16  ;;  %18886 = vmatprep.subr.mxu0 %v23335_v4 }
 0x5b0   : > { %18910 = vmatmul.mubr.f32.vlgmr.msra.gmra.mxu1 %v23434_v33  ;;  %18927 = vmatprep.subr.mxu1 %v23286_v1  ;;  %v6663_v7 = vsub.f32 %v23481_v49, %v23505_v19 }
 0x5b1   : > { %18887 = vmatpush3.msra.mxu0 %v23335_v4  ;;  %18928 = vmatpush3.msra.mxu1 %v23286_v1  ;;  %v23511_v1 = vsub.f32 %v15917_v5, %v23488_v44  ;;  %v23513_v4 = vand.u32 4294901760, %v15915_v10  ;;  %v15931_v5 = vld [vmem:[%s26082_s2 + $0xe8] sm:$0xff] }
 0x5b2   : > { %18939 = vmatprep.mubr.f32.mxu1 %v23356_v30  ;;  %18888 = vmatprep.subr.mxu0 %v23350_v27  ;;  %v23638_v32 = vand.u32 4294901760, %v15931_v5 }
 0x5b3   : > { %18929 = vmatprep.subr.mxu1 %v23300_v36  ;;  %18889 = vmatpush3.msra.mxu0 %v23350_v27  ;;  %v23523_v27 = vand.u32 4294901760, %v23498_v62  ;;  %v23542_v0 = vsub.f32 %v15915_v10, %v23513_v4  ;;  %v15930_v10 = vld [vmem:[%s26082_s2 + $0xe0] sm:$0xff] }
 0x5b4   : > { %18930 = vmatpush3.msra.mxu1 %v23300_v36  ;;  %18890 = vmatprep.subr.mxu0 %v23366_v8  ;;  %v23532_v36 = vand.u32 4294901760, %v6543_v63 }
 0x5b5   : > { %18931 = vmatprep.subr.mxu1 %v23312_v53  ;;  %18891 = vmatpush3.msra.mxu0 %v23366_v8  ;;  %v23539_v8 = vand.u32 4294901760, %v23511_v1  ;;  %v23566_v48 = vand.u32 4294901760, %v23542_v0 }
 0x5b6   : > { %18932 = vmatpush3.msra.mxu1 %v23312_v53  ;;  %18892 = vmatprep.subr.mxu0 %v23383_v13  ;;  %v6670_v53 = vsub.f32 %v23498_v62, %v23523_v27  ;;  %v23556_v15 = vsub.f32 %v6543_v63, %v23532_v36  ;;  %v15929_v63 = vld [vmem:[%s26082_s2 + $0xd8] sm:$0xff] }
 0x5b7   : > { %18933 = vmatprep.subr.mxu1 %v23324_v61  ;;  %18893 = vmatpush3.msra.mxu0 %v23383_v13  ;;  %v6664_v13 = vand.u32 4294901760, %v6663_v7  ;;  %v6677_v45 = vsub.f32 %v23511_v1, %v23539_v8  ;;  %v23657_v7 = vsub.f32 %v15931_v5, %v23638_v32 }
 0x5b8   : > { %18934 = vmatpush3.msra.mxu1 %v23324_v61  ;;  %18895 = vmatmul.mubr.f32.vlgmr.msra.gmra.mxu0 %v23426_v56  ;;  %v23559_v61 = vsub.f32 %v15914_v39, %v23534_v28  ;;  %v6671_v6 = vand.u32 4294901760, %v6670_v53  ;;  %v23576_v18 = vand.u32 4294901760, %v23556_v15  ;;  %v23652_v39 = vand.u32 4294901760, %v15930_v10 }
 0x5b9   : > { %18912 = vmatprep.subr.mxu0 %v23329_v38  ;;  %18935 = vmatprep.subr.mxu1 %v23337_v17  ;;  %v23664_v53 = vand.u32 4294901760, %v15929_v63 }
 0x5ba   : > { %18913 = vmatpush3.msra.mxu0 %v23329_v38  ;;  %18924 = vmatprep.mubr.f32.mxu0 %v23356_v30  ;;  %v6534_v38 = vld [vmem:[#allocation4 + $0x8] sm:$0xf]  ;;  %v23579_v34 = vand.u32 4294901760, %v23559_v61 }
 0x5bb   : > { %18936 = vmatpush3.msra.mxu1 %v23337_v17  ;;  %18914 = vmatprep.subr.mxu0 %v23347_v12  ;;  %v6684_v17 = vsub.f32 %v23526_v25, %v23551_v22  ;;  %v6546_v35 = vsel %vm5392_vm13, %v6534_v38, 0  ;;  %v23681_v38 = vand.u32 4294901760, %v23657_v7 }
 0x5bc   : > { %18937 = vmatprep.subr.mxu1 %v23358_v16  ;;  %18915 = vmatpush3.msra.mxu0 %v23347_v12  ;;  %v6678_v12 = vand.u32 4294901760, %v6677_v45  ;;  %v6698_v31 = vsub.f32 %v23559_v61, %v23579_v34  ;;  %v23593_v40 = vand.u32 4294901760, %v6546_v35 }
 0x5bd   : > { %18938 = vmatpush3.msra.mxu1 %v23358_v16  ;;  %18916 = vmatprep.subr.mxu0 %v23363_v50  ;;  %v6691_v16 = vsub.f32 %v23542_v0, %v23566_v48  ;;  %v6685_v54 = vand.u32 4294901760, %v6684_v17 }
 0x5be   : > { %18940 = vmatmul.mubr.f32.vlgmr.msra.gmra.mxu1 %v23417_v29  ;;  %18957 = vmatprep.subr.mxu1 %v6664_v13  ;;  %v6699_v9 = vand.u32 4294901760, %v6698_v31  ;;  %v23602_v41 = vsub.f32 %v6546_v35, %v23593_v40 }
 0x5bf   : > { %18917 = vmatpush3.msra.mxu0 %v23363_v50  ;;  %18958 = vmatpush3.msra.mxu1 %v6664_v13  ;;  %v6622_v50 = vsub.f32 %v23556_v15, %v23576_v18  ;;  %v6692_v37 = vand.u32 4294901760, %v6691_v16  ;;  %v23674_v13 = vsub.f32 %v15930_v10, %v23652_v39  ;;  %v15921_v10 = vld [vmem:[%s26082_s2 + $0x98] sm:$0xff] }
 0x5c0   : > { %18969 = vmatprep.mubr.f32.mxu1 %v23532_v36  ;;  %18918 = vmatprep.subr.mxu0 %v23375_v14 }
 0x5c1   : > { %18959 = vmatprep.subr.mxu1 %v6671_v6  ;;  %18919 = vmatpush3.msra.mxu0 %v23375_v14  ;;  %v23599_v14 = vand.u32 4294901760, %v6622_v50  ;;  %v23698_v17 = vand.u32 4294901760, %v23674_v13 }
 0x5c2   : > { %18960 = vmatpush3.msra.mxu1 %v6671_v6  ;;  %18920 = vmatprep.subr.mxu0 %v23390_v55  ;;  %v15926_v6 = vld [vmem:[%s26082_s2 + $0xc0] sm:$0xff] }
 0x5c3   : > { %18961 = vmatprep.subr.mxu1 %v6678_v12  ;;  %18921 = vmatpush3.msra.mxu0 %v23390_v55  ;;  %v23610_v55 = vand.u32 4294901760, %v23602_v41 }
 0x5c4   : > { %18962 = vmatpush3.msra.mxu1 %v6678_v12  ;;  %18922 = vmatprep.subr.mxu0 %v23403_v42  ;;  %v7236_v12 = vsub.f32 %v23657_v7, %v23681_v38 }
 0x5c5   : > { %18963 = vmatprep.subr.mxu1 %v6685_v54  ;;  %18923 = vmatpush3.msra.mxu0 %v23403_v42  ;;  %v6632_v42 = vsub.f32 %v23602_v41, %v23610_v55 }
 0x5c6   : > { %18964 = vmatpush3.msra.mxu1 %v6685_v54  ;;  %18925 = vmatmul.mubr.f32.vlgmr.msra.gmra.mxu0 %v23417_v29 }
 0x5c7   : > { %18942 = vmatprep.subr.mxu0 %v23462_v52  ;;  %18965 = vmatprep.subr.mxu1 %v6692_v37  ;;  %v23632_v51 = vand.u32 4294901760, %v6632_v42 }
 0x5c8   : > { %18943 = vmatpush3.msra.mxu0 %v23462_v52  ;;  %18954 = vmatprep.mubr.f32.mxu0 %v23599_v14 }
 0x5c9   : > { %18966 = vmatpush3.msra.mxu1 %v6692_v37  ;;  %18944 = vmatprep.subr.mxu0 %v23476_v59 }
 0x5ca   : > { %18967 = vmatprep.subr.mxu1 %v6699_v9  ;;  %18945 = vmatpush3.msra.mxu0 %v23476_v59 }
 0x5cb   : > { %18968 = vmatpush3.msra.mxu1 %v6699_v9  ;;  %18946 = vmatprep.subr.mxu0 %v23488_v44 }
 0x5cc   : > { %18970 = vmatmul.mubr.f32.vlgmr.msra.gmra.mxu1 %v23593_v40  ;;  %18987 = vmatprep.subr.mxu1 %v23462_v52 }
 0x5cd   : > { %18947 = vmatpush3.msra.mxu0 %v23488_v44  ;;  %18988 = vmatpush3.msra.mxu1 %v23462_v52 }
 0x5ce   : > { %18999 = vmatprep.mubr.f32.mxu1 %v23576_v18  ;;  %18948 = vmatprep.subr.mxu0 %v23500_v24 }
 0x5cf   : > { %18989 = vmatprep.subr.mxu1 %v23476_v59  ;;  %18949 = vmatpush3.msra.mxu0 %v23500_v24 }
 0x5d0   : > { %18990 = vmatpush3.msra.mxu1 %v23476_v59  ;;  %18950 = vmatprep.subr.mxu0 %v23513_v4 }
 0x5d1   : > { %18991 = vmatprep.subr.mxu1 %v23488_v44  ;;  %18951 = vmatpush3.msra.mxu0 %v23513_v4 }
 0x5d2   : > { %18992 = vmatpush3.msra.mxu1 %v23488_v44  ;;  %18952 = vmatprep.subr.mxu0 %v23534_v28 }
 0x5d3   : > { %18993 = vmatprep.subr.mxu1 %v23500_v24  ;;  %18953 = vmatpush3.msra.mxu0 %v23534_v28 }
 0x5d4   : > { %18994 = vmatpush3.msra.mxu1 %v23500_v24  ;;  %18955 = vmatmul.mubr.f32.vlgmr.msra.gmra.mxu0 %v23632_v51 }
 0x5d5   : > { %18972 = vmatprep.subr.mxu0 %v23481_v49  ;;  %18995 = vmatprep.subr.mxu1 %v23513_v4 }
 0x5d6   : > { %18973 = vmatpush3.msra.mxu0 %v23481_v49  ;;  %18984 = vmatprep.mubr.f32.mxu0 %v23556_v15  ;;  %v15928_v49 = vld [vmem:[%s26082_s2 + $0xd0] sm:$0xff] }
 0x5d7   : > { %18996 = vmatpush3.msra.mxu1 %v23513_v4  ;;  %18974 = vmatprep.subr.mxu0 %v23498_v62  ;;  %v23676_v45 = vand.u32 4294901760, %v15928_v49 }
 0x5d8   : > { %18997 = vmatprep.subr.mxu1 %v23534_v28  ;;  %18975 = vmatpush3.msra.mxu0 %v23498_v62  ;;  %v15927_v62 = vld [vmem:[%s26082_s2 + $0xc8] sm:$0xff] }
 0x5d9   : > { %18998 = vmatpush3.msra.mxu1 %v23534_v28  ;;  %18976 = vmatprep.subr.mxu0 %v23511_v1 }
 0x5da   : > { %19000 = vmatmul.mubr.f32.vlgmr.msra.gmra.mxu1 %v23610_v55  ;;  %19017 = vmatprep.subr.mxu1 %v23462_v52 }
 0x5db   : > { %18977 = vmatpush3.msra.mxu0 %v23511_v1  ;;  %19018 = vmatpush3.msra.mxu1 %v23462_v52  ;;  %v23686_v1 = vsub.f32 %v15929_v63, %v23664_v53  ;;  %v23688_v52 = vand.u32 4294901760, %v15927_v62 }
 0x5dc   : > { %19029 = vmatprep.mubr.f32.mxu1 %v23532_v36  ;;  %18978 = vmatprep.subr.mxu0 %v23526_v25 }
 0x5dd   : > { %19019 = vmatprep.subr.mxu1 %v23476_v59  ;;  %18979 = vmatpush3.msra.mxu0 %v23526_v25  ;;  %v23701_v25 = vsub.f32 %v15928_v49, %v23676_v45  ;;  %v23715_v16 = vsub.f32 %v15927_v62, %v23688_v52  ;;  %v15920_v62 = vld [vmem:[%s26082_s2 + $0x90] sm:$0xff] }
 0x5de   : > { %19020 = vmatpush3.msra.mxu1 %v23476_v59  ;;  %18980 = vmatprep.subr.mxu0 %v23542_v0  ;;  %v23707_v59 = vand.u32 4294901760, %v15926_v6 }
 0x5df   : > { %19021 = vmatprep.subr.mxu1 %v23488_v44  ;;  %18981 = vmatpush3.msra.mxu0 %v23542_v0  ;;  %v23712_v0 = vand.u32 4294901760, %v23686_v1  ;;  %v23724_v35 = vand.u32 4294901760, %v23701_v25  ;;  %v23736_v50 = vand.u32 4294901760, %v23715_v16 }
 0x5e0   : > { %19022 = vmatpush3.msra.mxu1 %v23488_v44  ;;  %18982 = vmatprep.subr.mxu0 %v23559_v61  ;;  %v7243_v44 = vsub.f32 %v23674_v13, %v23698_v17  ;;  %v23729_v54 = vsub.f32 %v15926_v6, %v23707_v59 }
 0x5e1   : > { %19023 = vmatprep.subr.mxu1 %v23500_v24  ;;  %18983 = vmatpush3.msra.mxu0 %v23559_v61  ;;  %v7237_v61 = vand.u32 4294901760, %v7236_v12 }
 0x5e2   : > { %19024 = vmatpush3.msra.mxu1 %v23500_v24  ;;  %18985 = vmatmul.mubr.f32.vlgmr.msra.gmra.mxu0 %v23602_v41  ;;  %v7250_v24 = vsub.f32 %v23686_v1, %v23712_v0  ;;  %v23746_v31 = vand.u32 4294901760, %v23729_v54 }
 0x5e3   : > { %19002 = vmatprep.subr.mxu0 %v23505_v19  ;;  %19025 = vmatprep.subr.mxu1 %v23513_v4 }
 0x5e4   : > { %19003 = vmatpush3.msra.mxu0 %v23505_v19  ;;  %19014 = vmatprep.mubr.f32.mxu0 %v23532_v36  ;;  %v7244_v19 = vand.u32 4294901760, %v7243_v44  ;;  %v7251_v37 = vand.u32 4294901760, %v7250_v24  ;;  %v7271_v9 = vsub.f32 %v23729_v54, %v23746_v31 }
 0x5e5   : > { %19026 = vmatpush3.msra.mxu1 %v23513_v4  ;;  %19004 = vmatprep.subr.mxu0 %v23523_v27  ;;  %v7257_v4 = vsub.f32 %v23701_v25, %v23724_v35 }
 0x5e6   : > { %19027 = vmatprep.subr.mxu1 %v23534_v28  ;;  %19005 = vmatpush3.msra.mxu0 %v23523_v27  ;;  %v7264_v27 = vsub.f32 %v23715_v16, %v23736_v50 }
 0x5e7   : > { %19028 = vmatpush3.msra.mxu1 %v23534_v28  ;;  %19006 = vmatprep.subr.mxu0 %v23539_v8  ;;  %v7258_v28 = vand.u32 4294901760, %v7257_v4 }
 0x5e8   : > { %19030 = vmatmul.mubr.f32.vlgmr.msra.gmra.mxu1 %v23593_v40  ;;  %19047 = vmatprep.subr.mxu1 %v7237_v61 }
 0x5e9   : > { %19007 = vmatpush3.msra.mxu0 %v23539_v8  ;;  %19048 = vmatpush3.msra.mxu1 %v7237_v61  ;;  %v7265_v8 = vand.u32 4294901760, %v7264_v27 }
 0x5ea   : > { %19059 = vmatprep.mubr.f32.mxu1 %v23250_v2  ;;  %19008 = vmatprep.subr.mxu0 %v23551_v22 }
 0x5eb   : > { %19049 = vmatprep.subr.mxu1 %v7244_v19  ;;  %19009 = vmatpush3.msra.mxu0 %v23551_v22  ;;  %v7272_v22 = vand.u32 4294901760, %v7271_v9 }
 0x5ec   : > { %19050 = vmatpush3.msra.mxu1 %v7244_v19  ;;  %19010 = vmatprep.subr.mxu0 %v23566_v48 }
 0x5ed   : > { %19051 = vmatprep.subr.mxu1 %v7251_v37  ;;  %19011 = vmatpush3.msra.mxu0 %v23566_v48  ;;  %v15924_v48 = vld [vmem:[%s26082_s2 + $0xb0] sm:$0xff] }
 0x5ee   : > { %19052 = vmatpush3.msra.mxu1 %v7251_v37  ;;  %19012 = vmatprep.subr.mxu0 %v23579_v34 }
 0x5ef   : > { %19053 = vmatprep.subr.mxu1 %v7258_v28  ;;  %19013 = vmatpush3.msra.mxu0 %v23579_v34  ;;  %v15923_v34 = vld [vmem:[%s26082_s2 + $0xa8] sm:$0xff] }
 0x5f0   : > { %19054 = vmatpush3.msra.mxu1 %v7258_v28  ;;  %19015 = vmatmul.mubr.f32.vlgmr.msra.gmra.mxu0 %v23593_v40  ;;  %v23814_v5 = vand.u32 4294901760, %v15923_v34 }
 0x5f1   : > { %19032 = vmatprep.subr.mxu0 %v23638_v32  ;;  %19055 = vmatprep.subr.mxu1 %v7265_v8 }
 0x5f2   : > { %19033 = vmatpush3.msra.mxu0 %v23638_v32  ;;  %19044 = vmatprep.mubr.f32.mxu0 %v23279_v11  ;;  %v15925_v11 = vld [vmem:[%s26082_s2 + $0xb8] sm:$0xff]  ;;  %v23836_v49 = vsub.f32 %v15923_v34, %v23814_v5 }
 0x5f3   : > { %19056 = vmatpush3.msra.mxu1 %v7265_v8  ;;  %19034 = vmatprep.subr.mxu0 %v23652_v39  ;;  %v15932_v8 = vld [vmem:[%s26082_s2 + $0xf0] sm:$0xff] }
 0x5f4   : > { %19057 = vmatprep.subr.mxu1 %v7272_v22  ;;  %19035 = vmatpush3.msra.mxu0 %v23652_v39 }
 0x5f5   : > { %19058 = vmatpush3.msra.mxu1 %v7272_v22  ;;  %19036 = vmatprep.subr.mxu0 %v23664_v53 }
 0x5f6   : > { %19060 = vmatmul.mubr.f32.vlgmr.msra.gmra.mxu1 %v23247_v20  ;;  %19077 = vmatprep.subr.mxu1 %v23638_v32 }
 0x5f7   : > { %19037 = vmatpush3.msra.mxu0 %v23664_v53  ;;  %19078 = vmatpush3.msra.mxu1 %v23638_v32 }
 0x5f8   : > { %19089 = vmatprep.mubr.f32.mxu1 %v23265_v57  ;;  %19038 = vmatprep.subr.mxu0 %v23676_v45  ;;  %v23788_v57 = vand.u32 4294901760, %v15925_v11 }
 0x5f9   : > { %19079 = vmatprep.subr.mxu1 %v23652_v39  ;;  %19039 = vmatpush3.msra.mxu0 %v23676_v45 }
 0x5fa   : > { %19080 = vmatpush3.msra.mxu1 %v23652_v39  ;;  %19040 = vmatprep.subr.mxu0 %v23688_v52  ;;  %v23807_v42 = vsub.f32 %v15925_v11, %v23788_v57 }
 0x5fb   : > { %19081 = vmatprep.subr.mxu1 %v23664_v53  ;;  %19041 = vmatpush3.msra.mxu0 %v23688_v52 }
 0x5fc   : > { %19082 = vmatpush3.msra.mxu1 %v23664_v53  ;;  %19042 = vmatprep.subr.mxu0 %v23707_v59 }
 0x5fd   : > { %19083 = vmatprep.subr.mxu1 %v23676_v45  ;;  %19043 = vmatpush3.msra.mxu0 %v23707_v59 }
 0x5fe   : > { %19084 = vmatpush3.msra.mxu1 %v23676_v45  ;;  %19045 = vmatmul.mubr.f32.vlgmr.msra.gmra.mxu0 %v23282_v26  ;;  %v23802_v26 = vand.u32 4294901760, %v15924_v48 }
 0x5ff   : > { %19062 = vmatprep.subr.mxu0 %v23657_v7  ;;  %19085 = vmatprep.subr.mxu1 %v23688_v52 }
 0x600   : > { %19063 = vmatpush3.msra.mxu0 %v23657_v7  ;;  %19074 = vmatprep.mubr.f32.mxu0 %v23257_v21  ;;  %v15922_v21 = vld [vmem:[%s26082_s2 + $0xa0] sm:$0xff]  ;;  %v23824_v63 = vsub.f32 %v15924_v48, %v23802_v26  ;;  %v24007_v48 = vand.u32 4294901760, %v15932_v8 }
 0x601   : > { %19086 = vmatpush3.msra.mxu1 %v23688_v52  ;;  %19064 = vmatprep.subr.mxu0 %v23674_v13  ;;  %v23826_v7 = vand.u32 4294901760, %v15922_v21 }
 0x602   : > { %19087 = vmatprep.subr.mxu1 %v23707_v59  ;;  %19065 = vmatpush3.msra.mxu0 %v23674_v13  ;;  %v23848_v13 = vand.u32 4294901760, %v23824_v63 }
 0x603   : > { %19088 = vmatpush3.msra.mxu1 %v23707_v59  ;;  %19066 = vmatprep.subr.mxu0 %v23686_v1 }
 0x604   : > { %19090 = vmatmul.mubr.f32.vlgmr.msra.gmra.mxu1 %v23260_v60  ;;  %19107 = vmatprep.subr.mxu1 %v23638_v32  ;;  %v23831_v60 = vand.u32 4294901760, %v23807_v42 }
 0x605   : > { %19067 = vmatpush3.msra.mxu0 %v23686_v1  ;;  %19108 = vmatpush3.msra.mxu1 %v23638_v32  ;;  %v23838_v32 = vand.u32 4294901760, %v15921_v10  ;;  %v23851_v1 = vsub.f32 %v15922_v21, %v23826_v7 }
 0x606   : > { %19119 = vmatprep.mubr.f32.mxu1 %v23250_v2  ;;  %19068 = vmatprep.subr.mxu0 %v23701_v25  ;;  %v7790_v6 = vsub.f32 %v23807_v42, %v23831_v60 }
 0x607   : > { %19109 = vmatprep.subr.mxu1 %v23652_v39  ;;  %19069 = vmatpush3.msra.mxu0 %v23701_v25  ;;  %v23862_v25 = vand.u32 4294901760, %v23836_v49  ;;  %v23865_v12 = vsub.f32 %v15921_v10, %v23838_v32  ;;  %v24029_v10 = vsub.f32 %v15932_v8, %v24007_v48 }
 0x608   : > { %19110 = vmatpush3.msra.mxu1 %v23652_v39  ;;  %19070 = vmatprep.subr.mxu0 %v23715_v16  ;;  %v23857_v39 = vand.u32 4294901760, %v15920_v62  ;;  %v7791_v44 = vand.u32 4294901760, %v7790_v6 }
 0x609   : > { %19111 = vmatprep.subr.mxu1 %v23664_v53  ;;  %19071 = vmatpush3.msra.mxu0 %v23715_v16  ;;  %v23874_v16 = vand.u32 4294901760, %v23851_v1 }
 0x60a   : > { %19112 = vmatpush3.msra.mxu1 %v23664_v53  ;;  %19072 = vmatprep.subr.mxu0 %v23729_v54  ;;  %v7797_v53 = vsub.f32 %v23824_v63, %v23848_v13  ;;  %v23879_v61 = vsub.f32 %v15920_v62, %v23857_v39 }
 0x60b   : > { %19113 = vmatprep.subr.mxu1 %v23676_v45  ;;  %19073 = vmatpush3.msra.mxu0 %v23729_v54 }
 0x60c   : > { %19114 = vmatpush3.msra.mxu1 %v23676_v45  ;;  %19075 = vmatmul.mubr.f32.vlgmr.msra.gmra.mxu0 %v23253_v46  ;;  %v7804_v46 = vsub.f32 %v23836_v49, %v23862_v25  ;;  %v23886_v45 = vand.u32 4294901760, %v23865_v12 }
 0x60d   : > { %19092 = vmatprep.subr.mxu0 %v23681_v38  ;;  %19115 = vmatprep.subr.mxu1 %v23688_v52 }
 0x60e   : > { %19093 = vmatpush3.msra.mxu0 %v23681_v38  ;;  %19104 = vmatprep.mubr.f32.mxu0 %v23250_v2  ;;  %v7798_v2 = vand.u32 4294901760, %v7797_v53  ;;  %v7811_v38 = vsub.f32 %v23851_v1, %v23874_v16  ;;  %v7805_v54 = vand.u32 4294901760, %v7804_v46 }
 0x60f   : > { %19116 = vmatpush3.msra.mxu1 %v23688_v52  ;;  %19094 = vmatprep.subr.mxu0 %v23698_v17  ;;  %v23896_v52 = vand.u32 4294901760, %v23879_v61 }
 0x610   : > { %19117 = vmatprep.subr.mxu1 %v23707_v59  ;;  %19095 = vmatpush3.msra.mxu0 %v23698_v17  ;;  %v7818_v17 = vsub.f32 %v23865_v12, %v23886_v45 }
 0x611   : > { %19118 = vmatpush3.msra.mxu1 %v23707_v59  ;;  %19096 = vmatprep.subr.mxu0 %v23712_v0  ;;  %v7812_v59 = vand.u32 4294901760, %v7811_v38  ;;  %v7825_v24 = vsub.f32 %v23879_v61, %v23896_v52 }
 0x612   : > { %19120 = vmatmul.mubr.f32.vlgmr.msra.gmra.mxu1 %v23247_v20  ;;  %19137 = vmatprep.subr.mxu1 %v7791_v44 }
 0x613   : > { %19097 = vmatpush3.msra.mxu0 %v23712_v0  ;;  %19138 = vmatpush3.msra.mxu1 %v7791_v44  ;;  %v7819_v0 = vand.u32 4294901760, %v7818_v17 }
 0x614   : > { %19149 = vmatprep.mubr.f32.mxu1 %v23356_v30  ;;  %19098 = vmatprep.subr.mxu0 %v23724_v35 }
 0x615   : > { %19139 = vmatprep.subr.mxu1 %v7798_v2  ;;  %19099 = vmatpush3.msra.mxu0 %v23724_v35  ;;  %v7826_v35 = vand.u32 4294901760, %v7825_v24 }
 0x616   : > { %19140 = vmatpush3.msra.mxu1 %v7798_v2  ;;  %19100 = vmatprep.subr.mxu0 %v23736_v50 }
 0x617   : > { %19141 = vmatprep.subr.mxu1 %v7805_v54  ;;  %19101 = vmatpush3.msra.mxu0 %v23736_v50  ;;  %v15935_v50 = vld [vmem:[%s26082_s2 + $0x108] sm:$0xff] }
 0x618   : > { %19142 = vmatpush3.msra.mxu1 %v7805_v54  ;;  %19102 = vmatprep.subr.mxu0 %v23746_v31  ;;  %v23964_v4 = vand.u32 4294901760, %v15935_v50 }
 0x619   : > { %19143 = vmatprep.subr.mxu1 %v7812_v59  ;;  %19103 = vmatpush3.msra.mxu0 %v23746_v31  ;;  %v15933_v31 = vld [vmem:[%s26082_s2 + $0xf8] sm:$0xff] }
 0x61a   : > { %19144 = vmatpush3.msra.mxu1 %v7812_v59  ;;  %19105 = vmatmul.mubr.f32.vlgmr.msra.gmra.mxu0 %v23247_v20  ;;  %v15937_v20 = vld [vmem:[%s26082_s2 + $0x118] sm:$0xff]  ;;  %v23986_v28 = vsub.f32 %v15935_v50, %v23964_v4  ;;  %v23988_v9 = vand.u32 4294901760, %v15933_v31 }
 0x61b   : > { %19122 = vmatprep.subr.mxu0 %v23788_v57  ;;  %19145 = vmatprep.subr.mxu1 %v7819_v0 }
 0x61c   : > { %19123 = vmatpush3.msra.mxu0 %v23788_v57  ;;  %19134 = vmatprep.mubr.f32.mxu0 %v23423_v23  ;;  %v15936_v23 = vld [vmem:[%s26082_s2 + $0x110] sm:$0xff]  ;;  %v24012_v34 = vand.u32 4294901760, %v23986_v28 }
 0x61d   : > { %19146 = vmatpush3.msra.mxu1 %v7819_v0  ;;  %19124 = vmatprep.subr.mxu0 %v23802_v26 }
 0x61e   : > { %19147 = vmatprep.subr.mxu1 %v7826_v35  ;;  %19125 = vmatpush3.msra.mxu0 %v23802_v26 }
 0x61f   : > { %19148 = vmatpush3.msra.mxu1 %v7826_v35  ;;  %19126 = vmatprep.subr.mxu0 %v23814_v5 }
 0x620   : > { %19150 = vmatmul.mubr.f32.vlgmr.msra.gmra.mxu1 %v23417_v29  ;;  %19167 = vmatprep.subr.mxu1 %v23788_v57 }
 0x621   : > { %19127 = vmatpush3.msra.mxu0 %v23814_v5  ;;  %19168 = vmatpush3.msra.mxu1 %v23788_v57 }
 0x622   : > { %19179 = vmatprep.mubr.f32.mxu1 %v23400_v43  ;;  %19128 = vmatprep.subr.mxu0 %v23826_v7  ;;  %v23938_v43 = vand.u32 4294901760, %v15937_v20 }
 0x623   : > { %19169 = vmatprep.subr.mxu1 %v23802_v26  ;;  %19129 = vmatpush3.msra.mxu0 %v23826_v7 }
 0x624   : > { %19170 = vmatpush3.msra.mxu1 %v23802_v26  ;;  %19130 = vmatprep.subr.mxu0 %v23838_v32  ;;  %v23957_v19 = vsub.f32 %v15937_v20, %v23938_v43 }
 0x625   : > { %19171 = vmatprep.subr.mxu1 %v23814_v5  ;;  %19131 = vmatpush3.msra.mxu0 %v23838_v32 }
 0x626   : > { %19172 = vmatpush3.msra.mxu1 %v23814_v5  ;;  %19132 = vmatprep.subr.mxu0 %v23857_v39 }
 0x627   : > { %19173 = vmatprep.subr.mxu1 %v23826_v7  ;;  %19133 = vmatpush3.msra.mxu0 %v23857_v39 }
 0x628   : > { %19174 = vmatpush3.msra.mxu1 %v23826_v7  ;;  %19135 = vmatmul.mubr.f32.vlgmr.msra.gmra.mxu0 %v23456_v47  ;;  %v23952_v47 = vand.u32 4294901760, %v15936_v23 }
 0x629   : > { %19152 = vmatprep.subr.mxu0 %v23807_v42  ;;  %19175 = vmatprep.subr.mxu1 %v23838_v32 }
 0x62a   : > { %19153 = vmatpush3.msra.mxu0 %v23807_v42  ;;  %19164 = vmatprep.mubr.f32.mxu0 %v23380_v58  ;;  %v15934_v58 = vld [vmem:[%s26082_s2 + $0x100] sm:$0xff]  ;;  %v23974_v37 = vsub.f32 %v15936_v23, %v23952_v47 }
 0x62b   : > { %19176 = vmatpush3.msra.mxu1 %v23838_v32  ;;  %19154 = vmatprep.subr.mxu0 %v23824_v63  ;;  %v23976_v27 = vand.u32 4294901760, %v15934_v58 }
 0x62c   : > { %19177 = vmatprep.subr.mxu1 %v23857_v39  ;;  %19155 = vmatpush3.msra.mxu0 %v23824_v63  ;;  %v23998_v22 = vand.u32 4294901760, %v23974_v37 }
 0x62d   : > { %19178 = vmatpush3.msra.mxu1 %v23857_v39  ;;  %19156 = vmatprep.subr.mxu0 %v23836_v49  ;;  %v24001_v11 = vsub.f32 %v15934_v58, %v23976_v27 }
 0x62e   : > { %19180 = vmatmul.mubr.f32.vlgmr.msra.gmra.mxu1 %v23434_v33  ;;  %19197 = vmatprep.subr.mxu1 %v23788_v57  ;;  %v23981_v33 = vand.u32 4294901760, %v23957_v19  ;;  %v8358_v42 = vsub.f32 %v23974_v37, %v23998_v22 }
 0x62f   : > { %19157 = vmatpush3.msra.mxu0 %v23836_v49  ;;  %19198 = vmatpush3.msra.mxu1 %v23788_v57  ;;  %v24024_v21 = vand.u32 4294901760, %v24001_v11 }
 0x630   : > { %19209 = vmatprep.mubr.f32.mxu1 %v23356_v30  ;;  %19158 = vmatprep.subr.mxu0 %v23851_v1  ;;  %v8351_v57 = vsub.f32 %v23957_v19, %v23981_v33 }
 0x631   : > { %19199 = vmatprep.subr.mxu1 %v23802_v26  ;;  %19159 = vmatpush3.msra.mxu0 %v23851_v1 }
 0x632   : > { %19200 = vmatpush3.msra.mxu1 %v23802_v26  ;;  %19160 = vmatprep.subr.mxu0 %v23865_v12  ;;  %v24015_v26 = vsub.f32 %v15933_v31, %v23988_v9 }
 0x633   : > { %19201 = vmatprep.subr.mxu1 %v23814_v5  ;;  %19161 = vmatpush3.msra.mxu0 %v23865_v12 }
 0x634   : > { %19202 = vmatpush3.msra.mxu1 %v23814_v5  ;;  %19162 = vmatprep.subr.mxu0 %v23879_v61  ;;  %v8352_v5 = vand.u32 4294901760, %v8351_v57  ;;  %v24036_v63 = vand.u32 4294901760, %v24015_v26 }
 0x635   : > { %19203 = vmatprep.subr.mxu1 %v23826_v7  ;;  %19163 = vmatpush3.msra.mxu0 %v23879_v61 }
 0x636   : > { %19204 = vmatpush3.msra.mxu1 %v23826_v7  ;;  %19165 = vmatmul.mubr.f32.vlgmr.msra.gmra.mxu0 %v23426_v56  ;;  %v8365_v56 = vsub.f32 %v23986_v28, %v24012_v34  ;;  %v8372_v7 = vsub.f32 %v24001_v11, %v24024_v21 }
 0x637   : > { %19182 = vmatprep.subr.mxu0 %v23831_v60  ;;  %19205 = vmatprep.subr.mxu1 %v23838_v32 }
 0x638   : > { %19183 = vmatpush3.msra.mxu0 %v23831_v60  ;;  %19194 = vmatprep.mubr.f32.mxu0 %v23356_v30  ;;  %v8359_v30 = vand.u32 4294901760, %v8358_v42  ;;  %v24046_v60 = vand.u32 4294901760, %v24029_v10  ;;  %v8366_v49 = vand.u32 4294901760, %v8365_v56  ;;  %v8373_v62 = vand.u32 4294901760, %v8372_v7 }
 0x639   : > { %19206 = vmatpush3.msra.mxu1 %v23838_v32  ;;  %19184 = vmatprep.subr.mxu0 %v23848_v13  ;;  %v8379_v32 = vsub.f32 %v24015_v26, %v24036_v63  ;;  %v18791_v6 = vpop.f32.mrf.mxu1 }
 0x63a   : > { %19207 = vmatprep.subr.mxu1 %v23857_v39  ;;  %19185 = vmatpush3.msra.mxu0 %v23848_v13  ;;  %v8386_v13 = vsub.f32 %v24029_v10, %v24046_v60 }
 0x63b   : > { %19208 = vmatpush3.msra.mxu1 %v23857_v39  ;;  %19186 = vmatprep.subr.mxu0 %v23862_v25  ;;  %v8380_v1 = vand.u32 4294901760, %v8379_v32 }
 0x63c   : > { %19210 = vmatmul.mubr.f32.vlgmr.msra.gmra.mxu1 %v23417_v29  ;;  %19227 = vmatprep.subr.mxu1 %v8352_v5  ;;  %v8387_v12 = vand.u32 4294901760, %v8386_v13 }
 0x63d   : > { %19187 = vmatpush3.msra.mxu0 %v23862_v25  ;;  %19228 = vmatpush3.msra.mxu1 %v8352_v5 }
 0x63e   : > { %19239 = vmatprep.mubr.f32.mxu1 %v23532_v36  ;;  %19188 = vmatprep.subr.mxu0 %v23874_v16 }
 0x63f   : > { %19229 = vmatprep.subr.mxu1 %v8359_v30  ;;  %19189 = vmatpush3.msra.mxu0 %v23874_v16 }
 0x640   : > { %19230 = vmatpush3.msra.mxu1 %v8359_v30  ;;  %19190 = vmatprep.subr.mxu0 %v23886_v45 }
 0x641   : > { %19231 = vmatprep.subr.mxu1 %v8366_v49  ;;  %19191 = vmatpush3.msra.mxu0 %v23886_v45  ;;  %v18776_v39 = vpop.f32.mrf.mxu0 }
 0x642   : > { %19232 = vmatpush3.msra.mxu1 %v8366_v49  ;;  %19192 = vmatprep.subr.mxu0 %v23896_v52  ;;  %v5614_v25 = vadd.f32 %v18791_v6, %v18776_v39 }
 0x643   : > { %19233 = vmatprep.subr.mxu1 %v8373_v62  ;;  %19193 = vmatpush3.msra.mxu0 %v23896_v52 }
 0x644   : > { %19234 = vmatpush3.msra.mxu1 %v8373_v62  ;;  %19195 = vmatmul.mubr.f32.vlgmr.msra.gmra.mxu0 %v23417_v29  ;;  %v24073_v29 = vpop.f32.mrf.mxu0 }
 0x645   : > { %19212 = vmatprep.subr.mxu0 %v23938_v43  ;;  %19235 = vmatprep.subr.mxu1 %v8380_v1 }
 0x646   : > { %19213 = vmatpush3.msra.mxu0 %v23938_v43  ;;  %19224 = vmatprep.mubr.f32.mxu0 %v23599_v14  ;;  %v24079_v14 = vpop.f32.mrf.mxu1 }
 0x647   : > { %19236 = vmatpush3.msra.mxu1 %v8380_v1  ;;  %19214 = vmatprep.subr.mxu0 %v23952_v47 }
 0x648   : > { %19237 = vmatprep.subr.mxu1 %v8387_v12  ;;  %19215 = vmatpush3.msra.mxu0 %v23952_v47  ;;  %v18821_v16 = vpop.f32.mrf.mxu1 }
 0x649   : > { %19238 = vmatpush3.msra.mxu1 %v8387_v12  ;;  %19216 = vmatprep.subr.mxu0 %v23964_v4 }
 0x64a   : > { %19240 = vmatmul.mubr.f32.vlgmr.msra.gmra.mxu1 %v23593_v40  ;;  %19257 = vmatprep.subr.mxu1 %v23938_v43 }
 0x64b   : > { %19217 = vmatpush3.msra.mxu0 %v23964_v4  ;;  %19258 = vmatpush3.msra.mxu1 %v23938_v43 }
 0x64c   : > { %19269 = vmatprep.mubr.f32.mxu1 %v23576_v18  ;;  %19218 = vmatprep.subr.mxu0 %v23976_v27 }
 0x64d   : > { %19259 = vmatprep.subr.mxu1 %v23952_v47  ;;  %19219 = vmatpush3.msra.mxu0 %v23976_v27 }
 0x64e   : > { %19260 = vmatpush3.msra.mxu1 %v23952_v47  ;;  %19220 = vmatprep.subr.mxu0 %v23988_v9  ;;  %v18806_v53 = vpop.f32.mrf.mxu0 }
 0x64f   : > { %19261 = vmatprep.subr.mxu1 %v23964_v4  ;;  %19221 = vmatpush3.msra.mxu0 %v23988_v9  ;;  %v5705_v18 = vadd.f32 %v18806_v53, %v5614_v25 }
 0x650   : > { %19262 = vmatpush3.msra.mxu1 %v23964_v4  ;;  %19222 = vmatprep.subr.mxu0 %v24007_v48 }
 0x651   : > { %19263 = vmatprep.subr.mxu1 %v23976_v27  ;;  %19223 = vmatpush3.msra.mxu0 %v24007_v48  ;;  %v5792_v44 = vadd.f32 %v18821_v16, %v5705_v18 }
 0x652   : > { %19264 = vmatpush3.msra.mxu1 %v23976_v27  ;;  %19225 = vmatmul.mubr.f32.vlgmr.msra.gmra.mxu0 %v23632_v51 }
 0x653   : > { %19242 = vmatprep.subr.mxu0 %v23957_v19  ;;  %19265 = vmatprep.subr.mxu1 %v23988_v9 }
 0x654   : > { %19243 = vmatpush3.msra.mxu0 %v23957_v19  ;;  %19254 = vmatprep.mubr.f32.mxu0 %v23556_v15  ;;  %v24105_v15 = vpop.f32.mrf.mxu0 }
 0x655   : > { %19266 = vmatpush3.msra.mxu1 %v23988_v9  ;;  %19244 = vmatprep.subr.mxu0 %v23974_v37 }
 0x656   : > { %19267 = vmatprep.subr.mxu1 %v24007_v48  ;;  %19245 = vmatpush3.msra.mxu0 %v23974_v37 }
 0x657   : > { %19268 = vmatpush3.msra.mxu1 %v24007_v48  ;;  %19246 = vmatprep.subr.mxu0 %v23986_v28 }
 0x658   : > { %19270 = vmatmul.mubr.f32.vlgmr.msra.gmra.mxu1 %v23610_v55  ;;  %19287 = vmatprep.subr.mxu1 %v23938_v43  ;;  %v24111_v55 = vpop.f32.mrf.mxu1 }
 0x659   : > { %19247 = vmatpush3.msra.mxu0 %v23986_v28  ;;  %19288 = vmatpush3.msra.mxu1 %v23938_v43 }
 0x65a   : > { %19299 = vmatprep.mubr.f32.mxu1 %v23532_v36  ;;  %19248 = vmatprep.subr.mxu0 %v24001_v11  ;;  %v18851_v46 = vpop.f32.mrf.mxu1 }
 0x65b   : > { %19289 = vmatprep.subr.mxu1 %v23952_v47  ;;  %19249 = vmatpush3.msra.mxu0 %v24001_v11 }
 0x65c   : > { %19290 = vmatpush3.msra.mxu1 %v23952_v47  ;;  %19250 = vmatprep.subr.mxu0 %v24015_v26  ;;  %v18836_v51 = vpop.f32.mrf.mxu0 }
 0x65d   : > { %19291 = vmatprep.subr.mxu1 %v23964_v4  ;;  %19251 = vmatpush3.msra.mxu0 %v24015_v26  ;;  %v5887_v61 = vadd.f32 %v18836_v51, %v5792_v44 }
 0x65e   : > { %19292 = vmatpush3.msra.mxu1 %v23964_v4  ;;  %19252 = vmatprep.subr.mxu0 %v24029_v10 }
 0x65f   : > { %19293 = vmatprep.subr.mxu1 %v23976_v27  ;;  %19253 = vmatpush3.msra.mxu0 %v24029_v10  ;;  %v5970_v45 = vadd.f32 %v18851_v46, %v5887_v61 }
 0x660   : > { %19294 = vmatpush3.msra.mxu1 %v23976_v27  ;;  %19255 = vmatmul.mubr.f32.vlgmr.msra.gmra.mxu0 %v23602_v41  ;;  %v24142_v41 = vpop.f32.mrf.mxu1 }
 0x661   : > { %19272 = vmatprep.subr.mxu0 %v23981_v33  ;;  %19295 = vmatprep.subr.mxu1 %v23988_v9 }
 0x662   : > { %19273 = vmatpush3.msra.mxu0 %v23981_v33  ;;  %19284 = vmatprep.mubr.f32.mxu0 %v23532_v36  ;;  %v24136_v36 = vpop.f32.mrf.mxu0  ;;  %v18881_v52 = vpop.f32.mrf.mxu1 }
 0x663   : > { %19296 = vmatpush3.msra.mxu1 %v23988_v9  ;;  %19274 = vmatprep.subr.mxu0 %v23998_v22 }
 0x664   : > { %19297 = vmatprep.subr.mxu1 %v24007_v48  ;;  %19275 = vmatpush3.msra.mxu0 %v23998_v22  ;;  %v24152_v59 = vpop.f32.mrf.mxu1 }
 0x665   : > { %19298 = vmatpush3.msra.mxu1 %v24007_v48  ;;  %19276 = vmatprep.subr.mxu0 %v24012_v34 }
 0x666   : > { %19300 = vmatmul.mubr.f32.vlgmr.msra.gmra.mxu1 %v23593_v40  ;;  %19277 = vmatpush3.msra.mxu0 %v24012_v34 }
 0x667   : > { %19278 = vmatprep.subr.mxu0 %v24024_v21  ;;  %19315 = vmatprep.subr.mxu1 %v20417_v3 }
 0x668   : > { %19279 = vmatpush3.msra.mxu0 %v24024_v21  ;;  %19319 = vmatprep.mubr.msk.f32.mxu1 %vm20418_vm0, %v20417_v3 }
 0x669   : > { %19280 = vmatprep.subr.mxu0 %v24036_v63 }
 0x66a   : > { %19281 = vmatpush3.msra.mxu0 %v24036_v63  ;;  %v18866_v2 = vpop.f32.mrf.mxu0 }
 0x66b   : > { %19282 = vmatprep.subr.mxu0 %v24046_v60  ;;  %v6067_v38 = vadd.f32 %v18866_v2, %v5970_v45 }
 0x66c   : > { %19283 = vmatpush3.msra.mxu0 %v24046_v60  ;;  %v24150_v17 = vpop.f32.mrf.mxu0 }
 0x66d   : > { %19285 = vmatmul.mubr.f32.vlgmr.msra.gmra.mxu0 %v23593_v40  ;;  %v6174_v54 = vadd.f32 %v18881_v52, %v6067_v38  ;;  %19302 = vmatprep.subr.mxu0 %v20417_v3 }
 0x66e   : > { %19306 = vmatprep.mubr.msk.f32.mxu0 %vm20418_vm0, %v20417_v3 }
 0x670   : > { %v18911_v35 = vpop.f32.mrf.mxu1 }
 0x672   : > { %v24156_v23 = vpop.f32.mrf.mxu1 }
 0x678   : > { %v18896_v24 = vpop.f32.mrf.mxu0 }
 0x679   : > { %v6265_v0 = vadd.f32 %v18896_v24, %v6174_v54 }
 0x67a   : > { %v24154_v43 = vpop.f32.mrf.mxu0 }
 0x67b   : > { %v6352_v20 = vadd.f32 %v18911_v35, %v6265_v0 }
 0x67e   : > { %v18941_v47 = vpop.f32.mrf.mxu1 }
 0x680   : > { %v24158_v58 = vpop.f32.mrf.mxu1 }
 0x686   : > { %v18926_v50 = vpop.f32.mrf.mxu0 }
 0x687   : > { %v6447_v40 = vadd.f32 %v18926_v50, %v6352_v20 }
 0x688   : > { %v24160_v4 = vpop.f32.mrf.mxu0 }
 0x689   : > { %v6530_v19 = vadd.f32 %v18941_v47, %v6447_v40 }
 0x68c   : > { %v18971_v31 = vpop.f32.mrf.mxu1 }
 0x68e   : > { %v24164_v28 = vpop.f32.mrf.mxu1 }
 0x694   : > { %v18956_v37 = vpop.f32.mrf.mxu0 }
 0x695   : > { %v6743_v27 = vadd.f32 %v18971_v31, %v18956_v37  ;;  %v15938_v37 = vld [vmem:[%s26086_s6 + $0x18] sm:$0xff] }
 0x696   : > { %v24162_v33 = vpop.f32.mrf.mxu0 }
 0x69a   : > { %v19001_v22 = vpop.f32.mrf.mxu1 }
 0x69c   : > { %v24168_v48 = vpop.f32.mrf.mxu1 }
 0x6a2   : > { %v18986_v9 = vpop.f32.mrf.mxu0 }
 0x6a3   : > { %v6834_v8 = vadd.f32 %v18986_v9, %v6743_v27 }
 0x6a4   : > { %v24166_v57 = vpop.f32.mrf.mxu0 }
 0x6a5   : > { %v6921_v11 = vadd.f32 %v19001_v22, %v6834_v8 }
 0x6a8   : > { %v19031_v42 = vpop.f32.mrf.mxu1 }
 0x6aa   : > { %v24174_v63 = vpop.f32.mrf.mxu1 }
 0x6b0   : > { %v19016_v34 = vpop.f32.mrf.mxu0 }
 0x6b1   : > { %v7016_v26 = vadd.f32 %v19016_v34, %v6921_v11  ;;  %v8798_v34 = vsel %vm8796_vm14, %v15938_v37, 0 }
 0x6b2   : > { %v24172_v10 = vpop.f32.mrf.mxu0 }
 0x6b3   : > { %v7099_v21 = vadd.f32 %v19031_v42, %v7016_v26  ;;  %v15939_v42 = vld [vmem:[%s26086_s6 + $0x20] sm:$0xff] }
 0x6b5   : > { %v24170_v5 = vadd.f32 %v7099_v21, %v6530_v19 }
 0x6b6   : > { %v19061_v30 = vpop.f32.mrf.mxu1 }
 0x6b8   : > { %v7309_v49 = vpop.f32.mrf.mxu1 }
 0x6be   : > { %v19046_v56 = vpop.f32.mrf.mxu0 }
 0x6bf   : > { %v7316_v44 = vadd.f32 %v19061_v30, %v19046_v56  ;;  %v24183_v30 = vand.u32 4294901760, %v8798_v34 }
 0x6c0   : > { %v7198_v7 = vpop.f32.mrf.mxu0 }
 0x6c1   : > { %v7310_v61 = vadd.f32 %v7309_v49, %v7198_v7 }
 0x6c4   : > { %v19091_v32 = vpop.f32.mrf.mxu1 }
 0x6c6   : > { %v7485_v1 = vpop.f32.mrf.mxu1 }
 0x6cc   : > { %v19076_v60 = vpop.f32.mrf.mxu0 }
 0x6cd   : > { %v7407_v46 = vadd.f32 %v19076_v60, %v7316_v44 }
 0x6ce   : > { %v7399_v62 = vpop.f32.mrf.mxu0 }
 0x6cf   : > { %v7400_v38 = vadd.f32 %v7399_v62, %v7310_v61  ;;  %v7494_v54 = vadd.f32 %v19091_v32, %v7407_v46  ;;  %v8801_v32 = vsel %vm8796_vm14, %v15939_v42, 0  ;;  %v5608_v62 = vadd.f32 %v24079_v14, %v24073_v29 }
 0x6d1   : > { %v7486_v35 = vadd.f32 %v7485_v1, %v7400_v38 }
 0x6d2   : > { %v19121_v6 = vpop.f32.mrf.mxu1 }
 0x6d4   : > { %v7665_v12 = vpop.f32.mrf.mxu1 }
 0x6da   : > { %v19106_v13 = vpop.f32.mrf.mxu0 }
 0x6db   : > { %v7589_v0 = vadd.f32 %v19106_v13, %v7494_v54 }
 0x6dc   : > { %v7582_v39 = vpop.f32.mrf.mxu0 }
 0x6dd   : > { %v7583_v40 = vadd.f32 %v7582_v39, %v7486_v35  ;;  %v7672_v19 = vadd.f32 %v19121_v6, %v7589_v0 }
 0x6df   : > { %v7666_v9 = vadd.f32 %v7665_v12, %v7583_v40  ;;  %v15940_v12 = vld [vmem:[%s26086_s6 + $0x28] sm:$0xff] }
 0x6e0   : > { %v19151_v53 = vpop.f32.mrf.mxu1  ;;  %v8804_v29 = vsel %vm8796_vm14, %v15940_v12, 0 }
 0x6e2   : > { %v7863_v51 = vpop.f32.mrf.mxu1 }
 0x6e8   : > { %v19136_v25 = vpop.f32.mrf.mxu0 }
 0x6e9   : > { %v7763_v27 = vadd.f32 %v19136_v25, %v7672_v19 }
 0x6ea   : > { %v7752_v18 = vpop.f32.mrf.mxu0 }
 0x6eb   : > { %v7753_v11 = vadd.f32 %v7752_v18, %v7666_v9  ;;  %v7870_v21 = vadd.f32 %v19151_v53, %v7763_v27  ;;  %v5698_v53 = vadd.f32 %v24105_v15, %v5608_v62  ;;  %v24193_v18 = vsub.f32 %v8798_v34, %v24183_v30 }
 0x6ed   : > { %v7864_v60 = vadd.f32 %v7863_v51, %v7753_v11  ;;  %v5784_v38 = vadd.f32 %v24111_v55, %v5698_v53  ;;  %v8878_v35 = vand.u32 4294901760, %v24193_v18 }
 0x6ee   : > { %v19181_v45 = vpop.f32.mrf.mxu1 }
 0x6ef   : > { %v5881_v37 = vadd.f32 %v24136_v36, %v5784_v38  ;;  %v8879_v55 = vsub.f32 %v24193_v18, %v8878_v35  ;;  %v7106_v38 = vld [vmem:[%s26086_s6 + $0x10] sm:$0xff] }
 0x6f0   : > { %v8039_v24 = vpop.f32.mrf.mxu1 }
 0x6f1   : > { %v5964_v42 = vadd.f32 %v24142_v41, %v5881_v37 }
 0x6f6   : > { %v19166_v16 = vpop.f32.mrf.mxu0 }
 0x6f7   : > { %v7961_v7 = vadd.f32 %v19166_v16, %v7870_v21  ;;  %v24195_v16 = vand.u32 4294901760, %v8801_v32  ;;  %v6057_v21 = vadd.f32 %v24150_v17, %v5964_v42 }
 0x6f8   : > { %v7953_v2 = vpop.f32.mrf.mxu0 }
 0x6f9   : > { %v7954_v6 = vadd.f32 %v7953_v2, %v7864_v60  ;;  %v8048_v44 = vadd.f32 %v19181_v45, %v7961_v7  ;;  %v24201_v15 = vsub.f32 %v8801_v32, %v24195_v16  ;;  %v24203_v45 = vand.u32 4294901760, %v8804_v29 }
 0x6fa   : > { %v8880_v60 = vand.u32 4294901760, %v8879_v55  ;;  %v6737_v32 = vadd.f32 %v24164_v28, %v24162_v33  ;;  %v6168_v62 = vadd.f32 %v24152_v59, %v6057_v21 }
 0x6fb   : > { %v8040_v46 = vadd.f32 %v8039_v24, %v7954_v6 }
 0x6fc   : > { %v19211_v20 = vpop.f32.mrf.mxu1  ;;  %v6258_v59 = vadd.f32 %v24154_v43, %v6168_v62 }
 0x6fe   : > { %v8219_v31 = vpop.f32.mrf.mxu1 }
 0x704   : > { %v19196_v52 = vpop.f32.mrf.mxu0 }
 0x705   : > { %v8143_v14 = vadd.f32 %v19196_v52, %v8048_v44 }
 0x706   : > { %v8136_v50 = vpop.f32.mrf.mxu0 }
 0x707   : > { %v8137_v40 = vadd.f32 %v8136_v50, %v8040_v46  ;;  %v8226_v52 = vadd.f32 %v19211_v20, %v8143_v14 }
 0x709   : > { %v8220_v11 = vadd.f32 %v8219_v31, %v8137_v40 }
 0x70a   : > { %v19241_v8 = vpop.f32.mrf.mxu1 }
 0x70c   : > { %v8424_v56 = vpop.f32.mrf.mxu1 }
 0x712   : > { %v19226_v47 = vpop.f32.mrf.mxu0 }
 0x713   : > { %v8431_v49 = vadd.f32 %v19241_v8, %v19226_v47 }
 0x714   : > { %v8313_v22 = vpop.f32.mrf.mxu0 }
 0x715   : > { %v8425_v39 = vadd.f32 %v8424_v56, %v8313_v22  ;;  %v8888_v22 = vand.u32 4294901760, %v24201_v15 }
 0x717   : > { %v8889_v31 = vsub.f32 %v24201_v15, %v8888_v22 }
 0x718   : > { %v19271_v13 = vpop.f32.mrf.mxu1 }
 0x719   : > { %v8890_v6 = vand.u32 4294901760, %v8889_v31 }
 0x71a   : > { %v8600_v61 = vpop.f32.mrf.mxu1 }
 0x720   : > { %v19256_v26 = vpop.f32.mrf.mxu0 }
 0x721   : > { %v8522_v25 = vadd.f32 %v19256_v26, %v8431_v49  ;;  %v24211_v26 = vsub.f32 %v8804_v29, %v24203_v45 }
 0x722   : > { %v8514_v1 = vpop.f32.mrf.mxu0 }
 0x723   : > { %v8515_v51 = vadd.f32 %v8514_v1, %v8425_v39  ;;  %v8609_v2 = vadd.f32 %v19271_v13, %v8522_v25  ;;  %v8898_v49 = vand.u32 4294901760, %v24211_v26  ;;  %v6827_v1 = vadd.f32 %v24166_v57, %v6737_v32 }
 0x725   : > { %v8601_v19 = vadd.f32 %v8600_v61, %v8515_v51  ;;  %v8899_v33 = vsub.f32 %v24211_v26, %v8898_v49  ;;  %v6913_v12 = vadd.f32 %v24168_v48, %v6827_v1  ;;  %v6344_v51 = vadd.f32 %v24156_v23, %v6258_v59  ;;  %v7104_v23 = vld [vmem:[%s26086_s6] sm:$0xff] }
 0x726   : > { %v19301_v54 = vpop.f32.mrf.mxu1 }
 0x727   : > { %v8900_v44 = vand.u32 4294901760, %v8899_v33  ;;  %v7010_v43 = vadd.f32 %v24172_v10, %v6913_v12  ;;  %v6441_v61 = vadd.f32 %v24160_v4, %v6344_v51  ;;  %v9364_v10 = vsel %vm4189_vm9, %v24170_v5, 0 }
 0x728   : > { %v8780_v8 = vpop.f32.mrf.mxu1  ;;  %v24276_v5 = vand.u32 4294901760, %v9364_v10 }
 0x729   : > { %v7093_v48 = vadd.f32 %v24174_v63, %v7010_v43  ;;  %v6524_v4 = vadd.f32 %v24158_v58, %v6441_v61  ;;  %v9355_v63 = vsel %vm8796_vm14, %v7104_v23, 0  ;;  %v7105_v58 = vld [vmem:[%s26086_s6 + $0x8] sm:$0xff] }
 0x72a   : > { %v24280_v14 = vand.u32 4294901760, %v9355_v63  ;;  %v9358_v46 = vsel %vm8796_vm14, %v7105_v58, 0 }
 0x72b   : > { %v7102_v29 = vadd.f32 %v7093_v48, %v6524_v4  ;;  %v24301_v40 = vand.u32 4294901760, %v9358_v46 }
 0x72d   : > { %v19286_v0 = vpop.f32.mrf.mxu0  ;;  %v24320_v37 = vsub.f32 %v9358_v46, %v24301_v40 }
 0x72e   : > { %v8704_v47 = vadd.f32 %v19286_v0, %v8609_v2  ;;  %v24289_v2 = vand.u32 4294901760, %v7102_v29  ;;  %v24299_v0 = vsub.f32 %v9355_v63, %v24280_v14 }
 0x72f   : > { %v8697_v27 = vpop.f32.mrf.mxu0 }
 0x730   : > { %v8787_v24 = vadd.f32 %v19301_v54, %v8704_v47  ;;  %v8698_v9 = vadd.f32 %v8697_v27, %v8601_v19  ;;  %v24295_v54 = vsub.f32 %v9364_v10, %v24276_v5  ;;  %v9361_v47 = vsel %vm8796_vm14, %v7106_v38, 0 }
 0x731   : > { %v24312_v19 = vsub.f32 %v7102_v29, %v24289_v2  ;;  %v24322_v27 = vand.u32 4294901760, %v9361_v47 }
 0x732   : > { %v8791_v34 = vadd.f32 %v8787_v24, %v8226_v52  ;;  %v8781_v50 = vadd.f32 %v8780_v8, %v8698_v9  ;;  %v9445_v9 = vand.u32 4294901760, %v24320_v37 }
 0x733   : > { %v9501_v52 = vand.u32 4294901760, %v24312_v19  ;;  %v24342_v8 = vsub.f32 %v9361_v47, %v24322_v27 }
 0x734   : > { %v8807_v36 = vsel %vm4189_vm9, %v8791_v34, 0  ;;  %v8790_v20 = vadd.f32 %v8781_v50, %v8220_v11  ;;  %v9446_v34 = vsub.f32 %v24320_v37, %v9445_v9 }
 0x735   : > { %v24216_v56 = vand.u32 4294901760, %v8807_v36  ;;  %v9502_v55 = vsub.f32 %v24312_v19, %v9501_v52  ;;  %v9455_v50 = vand.u32 4294901760, %v24342_v8 }
 0x736   : > { %v24218_v7 = vand.u32 4294901760, %v8790_v20  ;;  %v9447_v42 = vand.u32 4294901760, %v9446_v34 }
 0x737   : > { %19303 = vmatpush3.msra.mxu0 %v24216_v56  ;;  %v8936_v41 = vsub.f32 %v8807_v36, %v24216_v56  ;;  %v9456_v36 = vsub.f32 %v24342_v8, %v9455_v50 }
 0x738   : > { %19304 = vmatprep.subr.mxu0 %v20417_v3  ;;  %v8943_v17 = vsub.f32 %v8790_v20, %v24218_v7 }
 0x739   : > { %19305 = vmatpush3.msra.mxu0 %v24218_v7  ;;  %v8937_v13 = vand.u32 4294901760, %v8936_v41 }
 0x73a   : > { %19307 = vmatmul.mubr.f32.vlgmr.msra.gmra.mxu0 %v8880_v60  ;;  %19328 = vmatprep.subr.mxu0 %v20417_v3  ;;  %v8944_v39 = vand.u32 4294901760, %v8943_v17 }
 0x73b   : > { %19329 = vmatpush3.msra.mxu0 %v8936_v41  ;;  %19309 = vmatprep.mubr.msk.f32.mxu0 %vm20418_vm0, %v20417_v3  ;;  %v8938_v28 = vsub.f32 %v8936_v41, %v8937_v13 }
 0x73c   : > { %19330 = vmatprep.subr.mxu0 %v20417_v3  ;;  %v8945_v25 = vsub.f32 %v8943_v17, %v8944_v39 }
 0x73d   : > { %19331 = vmatpush3.msra.mxu0 %v8943_v17  ;;  %v8939_v57 = vand.u32 4294901760, %v8938_v28 }
 0x73e   : > { %19310 = vmatmul.mubr.f32.gmra.mxu0 %v8890_v6  ;;  %v8946_v53 = vand.u32 4294901760, %v8945_v25  ;;  %19354 = vmatprep.subr.mxu0 %v20417_v3 }
 0x73f   : > { %19316 = vmatpush3.msra.mxu1 %v8939_v57  ;;  %19312 = vmatprep.mubr.msk.f32.mxu0 %vm20418_vm0, %v20417_v3 }
 0x740   : > { %19317 = vmatprep.subr.mxu1 %v20417_v3 }
 0x741   : > { %19318 = vmatpush3.msra.mxu1 %v8946_v53 }
 0x742   : > { %19313 = vmatmul.mubr.f32.gmra.mxu0 %v8900_v44  ;;  %19320 = vmatmul.mubr.f32.vlgmr.msra.gmra.mxu1 %v24183_v30 }
 0x743   : > { %19341 = vmatprep.subr.mxu1 %v20417_v3  ;;  %19322 = vmatprep.mubr.msk.f32.mxu1 %vm20418_vm0, %v20417_v3 }
 0x744   : > { %19342 = vmatpush3.msra.mxu1 %v24216_v56  ;;  %19332 = vmatprep.mubr.msk.f32.mxu0 %vm20418_vm0, %v20417_v3 }
 0x745   : > { %19343 = vmatprep.subr.mxu1 %v20417_v3 }
 0x746   : > { %19344 = vmatpush3.msra.mxu1 %v24218_v7  ;;  %19333 = vmatmul.mubr.f32.vlgmr.msra.gmra.mxu0 %v24193_v18  ;;  %v9494_v18 = vand.u32 4294901760, %v24295_v54 }
 0x747   : > { %19323 = vmatmul.mubr.f32.gmra.mxu1 %v24195_v16  ;;  %19355 = vmatpush3.msra.mxu0 %v8937_v13 }
 0x748   : > { %19356 = vmatprep.subr.mxu0 %v20417_v3  ;;  %19325 = vmatprep.mubr.msk.f32.mxu1 %vm20418_vm0, %v20417_v3 }
 0x749   : > { %19357 = vmatpush3.msra.mxu0 %v8944_v39  ;;  %19335 = vmatprep.mubr.msk.f32.mxu0 %vm20418_vm0, %v20417_v3 }
 0x74a   : > { %19336 = vmatmul.mubr.f32.gmra.mxu0 %v24201_v15  ;;  %19367 = vmatprep.subr.mxu1 %v20417_v3  ;;  %v9495_v15 = vsub.f32 %v24295_v54, %v9494_v18 }
 0x74b   : > { %19326 = vmatmul.mubr.f32.gmra.mxu1 %v24203_v45  ;;  %19338 = vmatprep.mubr.msk.f32.mxu0 %vm20418_vm0, %v20417_v3 }
 0x74c   : > { %19345 = vmatprep.mubr.msk.f32.mxu1 %vm20418_vm0, %v20417_v3  ;;  %19380 = vmatprep.subr.mxu0 %v20417_v3 }
 0x74e   : > { %19339 = vmatmul.mubr.f32.gmra.mxu0 %v24211_v26  ;;  %v9503_v26 = vand.u32 4294901760, %v9502_v55 }
 0x74f   : > { %19346 = vmatmul.mubr.f32.vlgmr.msra.gmra.mxu1 %v8878_v35  ;;  %19358 = vmatprep.mubr.msk.f32.mxu0 %vm20418_vm0, %v20417_v3  ;;  %v9435_v35 = vand.u32 4294901760, %v24299_v0 }
 0x750   : > { %19368 = vmatpush3.msra.mxu1 %v24216_v56  ;;  %19348 = vmatprep.mubr.msk.f32.mxu1 %vm20418_vm0, %v20417_v3 }
 0x751   : > { %19369 = vmatprep.subr.mxu1 %v20417_v3  ;;  %v9436_v24 = vsub.f32 %v24299_v0, %v9435_v35 }
 0x752   : > { %19370 = vmatpush3.msra.mxu1 %v24218_v7  ;;  %19359 = vmatmul.mubr.f32.vlgmr.msra.gmra.mxu0 %v24183_v30 }
 0x753   : > { %19349 = vmatmul.mubr.f32.gmra.mxu1 %v8888_v22  ;;  %19381 = vmatpush3.msra.mxu0 %v24276_v5  ;;  %v9496_v22 = vand.u32 4294901760, %v9495_v15  ;;  %v9437_v11 = vand.u32 4294901760, %v9436_v24 }
 0x754   : > { %19382 = vmatprep.subr.mxu0 %v20417_v3  ;;  %19351 = vmatprep.mubr.msk.f32.mxu1 %vm20418_vm0, %v20417_v3 }
 0x755   : > { %19383 = vmatpush3.msra.mxu0 %v24289_v2  ;;  %19361 = vmatprep.mubr.msk.f32.mxu0 %vm20418_vm0, %v20417_v3 }
 0x756   : > { %19362 = vmatmul.mubr.f32.gmra.mxu0 %v24195_v16  ;;  %19393 = vmatprep.subr.mxu1 %v20417_v3 }
 0x757   : > { %19352 = vmatmul.mubr.f32.gmra.mxu1 %v8898_v49  ;;  %19364 = vmatprep.mubr.msk.f32.mxu0 %vm20418_vm0, %v20417_v3 }
 0x758   : > { %19371 = vmatprep.mubr.msk.f32.mxu1 %vm20418_vm0, %v20417_v3  ;;  %19406 = vmatprep.subr.mxu0 %v20417_v3 }
 0x75a   : > { %19365 = vmatmul.mubr.f32.gmra.mxu0 %v24203_v45 }
 0x75b   : > { %19372 = vmatmul.mubr.f32.vlgmr.msra.gmra.mxu1 %v24183_v30  ;;  %19384 = vmatprep.mubr.msk.f32.mxu0 %vm20418_vm0, %v20417_v3  ;;  %v9457_v30 = vand.u32 4294901760, %v9456_v36 }
 0x75c   : > { %19394 = vmatpush3.msra.mxu1 %v9496_v22  ;;  %19374 = vmatprep.mubr.msk.f32.mxu1 %vm20418_vm0, %v20417_v3 }
 0x75d   : > { %19395 = vmatprep.subr.mxu1 %v20417_v3 }
 0x75e   : > { %19396 = vmatpush3.msra.mxu1 %v9503_v26  ;;  %19385 = vmatmul.mubr.f32.vlgmr.msra.gmra.mxu0 %v9437_v11 }
 0x75f   : > { %19375 = vmatmul.mubr.f32.gmra.mxu1 %v24195_v16  ;;  %19407 = vmatpush3.msra.mxu0 %v24295_v54 }
 0x760   : > { %19408 = vmatprep.subr.mxu0 %v20417_v3  ;;  %19377 = vmatprep.mubr.msk.f32.mxu1 %vm20418_vm0, %v20417_v3 }
 0x761   : > { %19409 = vmatpush3.msra.mxu0 %v24312_v19  ;;  %19387 = vmatprep.mubr.msk.f32.mxu0 %vm20418_vm0, %v20417_v3 }
 0x762   : > { %19388 = vmatmul.mubr.f32.gmra.mxu0 %v9447_v42  ;;  %19419 = vmatprep.subr.mxu1 %v20417_v3 }
 0x763   : > { %19378 = vmatmul.mubr.f32.gmra.mxu1 %v24203_v45  ;;  %19390 = vmatprep.mubr.msk.f32.mxu0 %vm20418_vm0, %v20417_v3 }
 0x764   : > { %19397 = vmatprep.mubr.msk.f32.mxu1 %vm20418_vm0, %v20417_v3  ;;  %19432 = vmatprep.subr.mxu0 %v20417_v3 }
 0x766   : > { %19391 = vmatmul.mubr.f32.gmra.mxu0 %v9457_v30 }
 0x767   : > { %19398 = vmatmul.mubr.f32.vlgmr.msra.gmra.mxu1 %v24280_v14  ;;  %19410 = vmatprep.mubr.msk.f32.mxu0 %vm20418_vm0, %v20417_v3 }
 0x768   : > { %19420 = vmatpush3.msra.mxu1 %v24276_v5  ;;  %19400 = vmatprep.mubr.msk.f32.mxu1 %vm20418_vm0, %v20417_v3 }
 0x769   : > { %19421 = vmatprep.subr.mxu1 %v20417_v3 }
 0x76a   : > { %19422 = vmatpush3.msra.mxu1 %v24289_v2  ;;  %19411 = vmatmul.mubr.f32.vlgmr.msra.gmra.mxu0 %v24299_v0 }
 0x76b   : > { %19401 = vmatmul.mubr.f32.gmra.mxu1 %v24301_v40  ;;  %19433 = vmatpush3.msra.mxu0 %v9494_v18 }
 0x76c   : > { %19434 = vmatprep.subr.mxu0 %v20417_v3  ;;  %19403 = vmatprep.mubr.msk.f32.mxu1 %vm20418_vm0, %v20417_v3 }
 0x76d   : > { %19435 = vmatpush3.msra.mxu0 %v9501_v52  ;;  %19413 = vmatprep.mubr.msk.f32.mxu0 %vm20418_vm0, %v20417_v3 }
 0x76e   : > { %19414 = vmatmul.mubr.f32.gmra.mxu0 %v24320_v37  ;;  %19445 = vmatprep.subr.mxu1 %v20417_v3 }
 0x76f   : > { %19404 = vmatmul.mubr.f32.gmra.mxu1 %v24322_v27  ;;  %19416 = vmatprep.mubr.msk.f32.mxu0 %vm20418_vm0, %v20417_v3 }
 0x770   : > { %19423 = vmatprep.mubr.msk.f32.mxu1 %vm20418_vm0, %v20417_v3 }
 0x772   : > { %19417 = vmatmul.mubr.f32.gmra.mxu0 %v24342_v8 }
 0x773   : > { %19424 = vmatmul.mubr.f32.vlgmr.msra.gmra.mxu1 %v9435_v35  ;;  %19436 = vmatprep.mubr.msk.f32.mxu0 %vm20418_vm0, %v20417_v3 }
 0x774   : > { %19446 = vmatpush3.msra.mxu1 %v24276_v5  ;;  %19426 = vmatprep.mubr.msk.f32.mxu1 %vm20418_vm0, %v20417_v3 }
 0x775   : > { %19447 = vmatprep.subr.mxu1 %v20417_v3 }
 0x776   : > { %19448 = vmatpush3.msra.mxu1 %v24289_v2  ;;  %19437 = vmatmul.mubr.f32.vlgmr.msra.gmra.mxu0 %v24280_v14 }
 0x777   : > { %19427 = vmatmul.mubr.f32.gmra.mxu1 %v9445_v9  ;;  %19439 = vmatprep.mubr.msk.f32.mxu0 %vm20418_vm0, %v20417_v3 }
 0x778   : > { %19429 = vmatprep.mubr.msk.f32.mxu1 %vm20418_vm0, %v20417_v3 }
 0x77a   : > { %19440 = vmatmul.mubr.f32.gmra.mxu0 %v24301_v40 }
 0x77b   : > { %19430 = vmatmul.mubr.f32.gmra.mxu1 %v9455_v50  ;;  %19442 = vmatprep.mubr.msk.f32.mxu0 %vm20418_vm0, %v20417_v3 }
 0x77c   : > { %19449 = vmatprep.mubr.msk.f32.mxu1 %vm20418_vm0, %v20417_v3 }
 0x77e   : > { %19443 = vmatmul.mubr.f32.gmra.mxu0 %v24322_v27 }
 0x77f   : > { %19450 = vmatmul.mubr.f32.vlgmr.msra.gmra.mxu1 %v24280_v14 }
 0x780   : > { %19452 = vmatprep.mubr.msk.f32.mxu1 %vm20418_vm0, %v20417_v3 }
 0x783   : > { %19453 = vmatmul.mubr.f32.gmra.mxu1 %v24301_v40 }
 0x784   : > { %19455 = vmatprep.mubr.msk.f32.mxu1 %vm20418_vm0, %v20417_v3 }
 0x787   : > { %19456 = vmatmul.mubr.f32.gmra.mxu1 %v24322_v27 }
 0x7fa   : > { %v8882_v16 = vpop.f32.mrf.mxu0 }
 0x7fc   : > { %v19308_v45 = vpop.f32.mrf.mxu0 }
 0x7fe   : > { %v8892_v20 = vpop.f32.mrf.mxu0 }
 0x800   : > { %v19311_v21 = vpop.f32.mrf.mxu0 }
 0x802   : > { %v8902_v56 = vpop.f32.mrf.mxu0  ;;  %v8983_v7 = vpop.f32.mrf.mxu1 }
 0x803   : > { %v8984_v35 = vadd.f32 %v8983_v7, %v8882_v16 }
 0x804   : > { %v19314_v60 = vpop.f32.mrf.mxu0  ;;  %v19321_v31 = vpop.f32.mrf.mxu1 }
 0x806   : > { %v9071_v49 = vpop.f32.mrf.mxu0 }
 0x807   : > { %v8989_v41 = vpop.f32.mrf.mxu1  ;;  %v9072_v52 = vadd.f32 %v9071_v49, %v8984_v35 }
 0x808   : > { %v19334_v32 = vpop.f32.mrf.mxu0  ;;  %v8990_v9 = vadd.f32 %v8989_v41, %v8892_v20 }
 0x809   : > { %v19324_v17 = vpop.f32.mrf.mxu1 }
 0x80a   : > { %v9078_v62 = vpop.f32.mrf.mxu0 }
 0x80b   : > { %v8995_v13 = vpop.f32.mrf.mxu1  ;;  %v9079_v11 = vadd.f32 %v9078_v62, %v8990_v9 }
 0x80c   : > { %v19337_v1 = vpop.f32.mrf.mxu0  ;;  %v8996_v42 = vadd.f32 %v8995_v13, %v8902_v56 }
 0x80d   : > { %v19327_v6 = vpop.f32.mrf.mxu1 }
 0x80e   : > { %v9085_v39 = vpop.f32.mrf.mxu0 }
 0x80f   : > { %v9160_v33 = vpop.f32.mrf.mxu1  ;;  %v9086_v60 = vadd.f32 %v9085_v39, %v8996_v42 }
 0x810   : > { %v19340_v28 = vpop.f32.mrf.mxu0  ;;  %v9161_v8 = vadd.f32 %v9160_v33, %v9072_v52 }
 0x811   : > { %v19347_v59 = vpop.f32.mrf.mxu1 }
 0x812   : > { %v9253_v25 = vpop.f32.mrf.mxu0 }
 0x813   : > { %v9168_v57 = vpop.f32.mrf.mxu1  ;;  %v9254_v34 = vadd.f32 %v9253_v25, %v9161_v8  ;;  %v10055_v8 = vld [vmem:[%s26085_s5] sm:$0xff] }
 0x814   : > { %v19360_v12 = vpop.f32.mrf.mxu0  ;;  %v9169_v36 = vadd.f32 %v9168_v57, %v9079_v11 }
 0x815   : > { %v19350_v53 = vpop.f32.mrf.mxu1 }
 0x816   : > { %v9259_v44 = vpop.f32.mrf.mxu0 }
 0x817   : > { %v9176_v51 = vpop.f32.mrf.mxu1  ;;  %v9260_v16 = vadd.f32 %v9259_v44, %v9169_v36 }
 0x818   : > { %v19363_v43 = vpop.f32.mrf.mxu0  ;;  %v9177_v32 = vadd.f32 %v9176_v51, %v9086_v60  ;;  %v15941_v51 = vld [vmem:[%s26088_s8] ss:$0 sm:$0xff] }
 0x819   : > { %v19353_v61 = vpop.f32.mrf.mxu1 }
 0x81a   : > { %v9265_v48 = vpop.f32.mrf.mxu0 }
 0x81b   : > { %v9338_v23 = vpop.f32.mrf.mxu1  ;;  %v9266_v6 = vadd.f32 %v9265_v48, %v9177_v32 }
 0x81c   : > { %v19366_v4 = vpop.f32.mrf.mxu0  ;;  %v9339_v30 = vadd.f32 %v9338_v23, %v9254_v34 }
 0x81d   : > { %v19373_v10 = vpop.f32.mrf.mxu1 }
 0x81e   : > { %v9439_v63 = vpop.f32.mrf.mxu0 }
 0x81f   : > { %v9344_v29 = vpop.f32.mrf.mxu1  ;;  %v9440_v7 = vadd.f32 %v9439_v63, %v9339_v30 }
 0x820   : > { %v19386_v58 = vpop.f32.mrf.mxu0  ;;  %v9345_v17 = vadd.f32 %v9344_v29, %v9260_v16 }
 0x821   : > { %v19376_v5 = vpop.f32.mrf.mxu1 }
 0x822   : > { %v9449_v14 = vpop.f32.mrf.mxu0 }
 0x823   : > { %v9350_v46 = vpop.f32.mrf.mxu1  ;;  %v9450_v62 = vadd.f32 %v9449_v14, %v9345_v17 }
 0x824   : > { %v19389_v2 = vpop.f32.mrf.mxu0  ;;  %v9351_v56 = vadd.f32 %v9350_v46, %v9266_v6 }
 0x825   : > { %v19379_v38 = vpop.f32.mrf.mxu1 }
 0x826   : > { %v9459_v54 = vpop.f32.mrf.mxu0 }
 0x827   : > { %v9540_v0 = vpop.f32.mrf.mxu1  ;;  %v9460_v39 = vadd.f32 %v9459_v54, %v9351_v56 }
 0x828   : > { %v19392_v40 = vpop.f32.mrf.mxu0  ;;  %v9541_v20 = vadd.f32 %v9540_v0, %v9440_v7 }
 0x829   : > { %v19399_v47 = vpop.f32.mrf.mxu1 }
 0x82a   : > { %v9628_v19 = vpop.f32.mrf.mxu0 }
 0x82b   : > { %v9546_v18 = vpop.f32.mrf.mxu1  ;;  %v9629_v33 = vadd.f32 %v9628_v19, %v9541_v20 }
 0x82c   : > { %v19412_v37 = vpop.f32.mrf.mxu0  ;;  %v9547_v13 = vadd.f32 %v9546_v18, %v9450_v62 }
 0x82d   : > { %v19402_v27 = vpop.f32.mrf.mxu1 }
 0x82e   : > { %v9635_v15 = vpop.f32.mrf.mxu0 }
 0x82f   : > { %v9552_v24 = vpop.f32.mrf.mxu1  ;;  %v9636_v53 = vadd.f32 %v9635_v15, %v9547_v13 }
 0x830   : > { %v19415_v55 = vpop.f32.mrf.mxu0  ;;  %v9553_v23 = vadd.f32 %v9552_v24, %v9460_v39 }
 0x831   : > { %v19405_v22 = vpop.f32.mrf.mxu1  ;;  %v10058_v55 = vsel %vm4205_vm5, %v10055_v8, 0 }
 0x832   : > { %v9642_v50 = vpop.f32.mrf.mxu0  ;;  %v24452_v22 = vand.u32 4294901760, %v10058_v55 }
 0x833   : > { %v9717_v26 = vpop.f32.mrf.mxu1  ;;  %v9643_v29 = vadd.f32 %v9642_v50, %v9553_v23 }
 0x834   : > { %v19418_v45 = vpop.f32.mrf.mxu0  ;;  %v9718_v25 = vadd.f32 %v9717_v26, %v9629_v33  ;;  %v24456_v11 = vsub.f32 %v10058_v55, %v24452_v22  ;;  %19473 = vmatprep.mubr.f32.mxu1 %v24452_v22 }
 0x835   : > { %v19425_v21 = vpop.f32.mrf.mxu1 }
 0x836   : > { %v9810_v31 = vpop.f32.mrf.mxu0  ;;  %v10133_v34 = vand.u32 4294901760, %v24456_v11 }
 0x837   : > { %v9725_v49 = vpop.f32.mrf.mxu1  ;;  %v9811_v44 = vadd.f32 %v9810_v31, %v9718_v25 }
 0x838   : > { %v19438_v41 = vpop.f32.mrf.mxu0  ;;  %v9726_v48 = vadd.f32 %v9725_v49, %v9636_v53  ;;  %v10134_v50 = vsub.f32 %v24456_v11, %v10133_v34 }
 0x839   : > { %v19428_v1 = vpop.f32.mrf.mxu1  ;;  %v10056_v41 = vld [vmem:[%s26085_s5 + $0x8] sm:$0xf] }
 0x83a   : > { %v9816_v28 = vpop.f32.mrf.mxu0  ;;  %v10135_v26 = vand.u32 4294901760, %v10134_v50 }
 0x83b   : > { %v9733_v59 = vpop.f32.mrf.mxu1  ;;  %v9817_v58 = vadd.f32 %v9816_v28, %v9726_v48 }
 0x83c   : > { %v19441_v57 = vpop.f32.mrf.mxu0  ;;  %v9734_v46 = vadd.f32 %v9733_v59, %v9643_v29  ;;  %19464 = vmatprep.mubr.f32.mxu0 %v10135_v26  ;;  %v10061_v59 = vsel %vm4205_vm5, %v10056_v41, 0 }
 0x83d   : > { %v19431_v12 = vpop.f32.mrf.mxu1 }
 0x83e   : > { %v9822_v43 = vpop.f32.mrf.mxu0 }
 0x83f   : > { %v9895_v61 = vpop.f32.mrf.mxu1  ;;  %v9823_v0 = vadd.f32 %v9822_v43, %v9734_v46 }
 0x840   : > { %v9896_v4 = vadd.f32 %v9895_v61, %v9811_v44  ;;  %v19444_v10 = vpop.f32.mrf.mxu0  ;;  %v24467_v44 = vand.u32 4294901760, %v10061_v59 }
 0x841   : > { %v19451_v63 = vpop.f32.mrf.mxu1 }
 0x842   : > { %v9918_v5 = vadd.f32 %v15941_v51, %v9896_v4 }
 0x843   : > { %v9901_v14 = vpop.f32.mrf.mxu1 }
 0x844   : > { %v9921_v2 = vmax.f32 %v9918_v5, 0.0  ;;  %v9902_v38 = vadd.f32 %v9901_v14, %v9817_v58  ;;  %v24470_v58 = vsub.f32 %v10061_v59, %v24467_v44 }
 0x845   : > { %v19454_v54 = vpop.f32.mrf.mxu1 }
 0x846   : > { %9924 = vst.msk [vmem:[#allocation3 + $0x2] sm:$0xff] %vm1110_vm3, %v9921_v2  ;;  %v9919_v40 = vadd.f32 %v15941_v51, %v9902_v38 }
 0x847   : > { %v9907_v47 = vpop.f32.mrf.mxu1 }
 0x848   : > { %v9922_v19 = vmax.f32 %v9919_v40, 0.0  ;;  %v9908_v18 = vadd.f32 %v9907_v47, %v9823_v0 }
 0x849   : > { %v19457_v35 = vpop.f32.mrf.mxu1 }
 0x84a   : > { %9925 = vst.msk [vmem:[#allocation3 + $0xa] sm:$0xff] %vm1110_vm3, %v9922_v19  ;;  %v9920_v37 = vadd.f32 %v15941_v51, %v9908_v18 }
 0x84c   : > { %v9923_v27 = vmax.f32 %v9920_v37, 0.0 }
 0x84d   : > { %v9927_v52 = vld [vmem:[#allocation3] sm:$0xff] }
 0x84e   : > { %9926 = vst.msk [vmem:[#allocation3 + $0x12] sm:$0xff] %vm1110_vm3, %v9923_v27  ;;  %9935 = vrot.lane.b32.xlu1 %v9927_v52, %s20419_s25 }
 0x851   : > { %v9928_v15 = vld [vmem:[#allocation3 + $0x8] sm:$0xff] }
 0x852   : > { %9951 = vrot.lane.b32.xlu1 %v9927_v52, %s20420_s26  ;;  %9937 = vrot.lane.b32.xlu0 %v9928_v15, %s20419_s25 }
 0x855   : > { %v9930_v24 = vld [vmem:[#allocation3 + $0x18] sm:$0xf]  ;;  %v9929_v9 = vld [vmem:[#allocation3 + $0x10] sm:$0xff] }
 0x856   : > { %9967 = vrot.lane.b32.xlu1 %v9927_v52, %s20421_s27  ;;  %9953 = vrot.lane.b32.xlu0 %v9928_v15, %s20420_s26 }
 0x85a   : > { %9969 = vrot.lane.b32.xlu0 %v9928_v15, %s20421_s27  ;;  %9941 = vrot.lane.b32.xlu1 %v9930_v24, %s20419_s25 }
 0x85e   : > { %9955 = vrot.lane.b32.xlu1 %v9929_v9, %s20420_s26  ;;  %9939 = vrot.lane.b32.xlu0 %v9929_v9, %s20419_s25 }
 0x862   : > { %9971 = vrot.lane.b32.xlu1 %v9929_v9, %s20421_s27  ;;  %9957 = vrot.lane.b32.xlu0 %v9930_v24, %s20420_s26 }
 0x866   : > { %9987 = vrot.lane.b32.xlu1 %v9929_v9, %s20422_s28  ;;  %9973 = vrot.lane.b32.xlu0 %v9930_v24, %s20421_s27 }
 0x86a   : > { %9983 = vrot.lane.b32.xlu1 %v9927_v52, %s20422_s28  ;;  %9989 = vrot.lane.b32.xlu0 %v9930_v24, %s20422_s28 }
 0x86e   : > { %9985 = vrot.lane.b32.xlu0 %v9928_v15, %s20422_s28 }
 0x8c0   : > { %v9936_v42 = vpop.permute.xlu1 %9935 }
 0x8c1   : > { %v9947_v33 = vmax.f32 %v9927_v52, %v9936_v42 }
 0x8c4   : > { %v9952_v36 = vpop.permute.xlu1 %9951  ;;  %v9938_v30 = vpop.permute.xlu0 %9937 }
 0x8c5   : > { %v9963_v13 = vmax.f32 %v9947_v33, %v9952_v36  ;;  %v9948_v25 = vmax.f32 %v9928_v15, %v9938_v30 }
 0x8c8   : > { %v9968_v45 = vpop.permute.xlu1 %9967  ;;  %v9954_v21 = vpop.permute.xlu0 %9953 }
 0x8c9   : > { %v9979_v43 = vmax.f32 %v9963_v13, %v9968_v45  ;;  %v9964_v61 = vmax.f32 %v9948_v25, %v9954_v21 }
 0x8cc   : > { %v9970_v60 = vpop.permute.xlu0 %9969  ;;  %v9942_v16 = vpop.permute.xlu1 %9941 }
 0x8cd   : > { %v9950_v1 = vmax.f32 %v9930_v24, %v9942_v16  ;;  %v9980_v23 = vmax.f32 %v9964_v61, %v9970_v60  ;;  %v10143_v16 = vand.u32 4294901760, %v24470_v58 }
 0x8d0   : > { %v9956_v7 = vpop.permute.xlu1 %9955  ;;  %v9940_v31 = vpop.permute.xlu0 %9939 }
 0x8d1   : > { %v9949_v49 = vmax.f32 %v9929_v9, %v9940_v31 }
 0x8d3   : > { %v9965_v20 = vmax.f32 %v9949_v49, %v9956_v7 }
 0x8d4   : > { %v9972_v32 = vpop.permute.xlu1 %9971  ;;  %v9958_v17 = vpop.permute.xlu0 %9957 }
 0x8d5   : > { %v9966_v28 = vmax.f32 %v9950_v1, %v9958_v17  ;;  %v9981_v56 = vmax.f32 %v9965_v20, %v9972_v32 }
 0x8d8   : > { %v9988_v6 = vpop.permute.xlu1 %9987  ;;  %v9974_v62 = vpop.permute.xlu0 %9973 }
 0x8d9   : > { %v9982_v57 = vmax.f32 %v9966_v28, %v9974_v62  ;;  %v9997_v12 = vmax.f32 %v9981_v56, %v9988_v6  ;;  %v10144_v28 = vsub.f32 %v24470_v58, %v10143_v16 }
 0x8db   : > { %v10006_v4 = vrot.slane %v9997_v12, 1  ;;  %v10019_v14 = vrot.slane %v9997_v12, 2  ;;  %v10032_v46 = vrot.slane %v9997_v12, 3  ;;  %v10045_v19 = vrot.slane %v9997_v12, 4 }
 0x8dc   : > { %v9984_v39 = vpop.permute.xlu1 %9983  ;;  %v9990_v53 = vpop.permute.xlu0 %9989 }
 0x8dd   : > { %v9998_v51 = vmax.f32 %v9982_v57, %v9990_v53  ;;  %v9995_v48 = vmax.f32 %v9979_v43, %v9984_v39  ;;  %v10145_v57 = vand.u32 4294901760, %v10144_v28 }
 0x8df   : > { %v10008_v10 = vrot.slane %v9998_v51, 1  ;;  %v10021_v63 = vrot.slane %v9998_v51, 2  ;;  %v10034_v38 = vrot.slane %v9998_v51, 3  ;;  %v10003_v54 = vrot.slane %v9995_v48, 1 }
 0x8e0   : > { %v9986_v29 = vpop.permute.xlu0 %9985  ;;  %v10016_v18 = vrot.slane %v9995_v48, 2  ;;  %v10047_v37 = vrot.slane %v9998_v51, 4  ;;  %v10029_v9 = vrot.slane %v9995_v48, 3  ;;  %v10042_v7 = vrot.slane %v9995_v48, 4  ;;  %v10590_v51 = vld [vmem:[%s26084_s4 + $0x60] sm:$0xff] }
 0x8e1   : > { %v9996_v5 = vmax.f32 %v9980_v23, %v9986_v29  ;;  %v10009_v2 = vsel %vm4147_vm6, %v10006_v4, %v10008_v10  ;;  %v10022_v35 = vsel %vm4161_vm7, %v10019_v14, %v10021_v63  ;;  %v10035_v8 = vsel %vm4175_vm8, %v10032_v46, %v10034_v38  ;;  %v10589_v10 = vld [vmem:[%s26084_s4 + $0x58] sm:$0xff] }
 0x8e2   : > { %v10015_v0 = vmax.f32 %v9997_v12, %v10009_v2  ;;  %v10048_v45 = vsel %vm4189_vm9, %v10045_v19, %v10047_v37  ;;  %v24509_v63 = vand.u32 4294901760, %v10590_v51 }
 0x8e3   : > { %v10004_v40 = vrot.slane %v9996_v5, 1  ;;  %v10017_v47 = vrot.slane %v9996_v5, 2  ;;  %v10030_v24 = vrot.slane %v9996_v5, 3  ;;  %v10043_v30 = vrot.slane %v9996_v5, 4 }
 0x8e4   : > { %v10028_v27 = vmax.f32 %v10015_v0, %v10022_v35 }
 0x8e5   : > { %v10005_v52 = vsel %vm4147_vm6, %v10003_v54, %v10004_v40  ;;  %v10007_v15 = vsel %vm4147_vm6, %v10004_v40, %v10006_v4  ;;  %v10018_v42 = vsel %vm4161_vm7, %v10016_v18, %v10017_v47  ;;  %v10020_v36 = vsel %vm4161_vm7, %v10017_v47, %v10019_v14  ;;  %v10587_v47 = vld [vmem:[%s26084_s4 + $0x48] sm:$0xff]  ;;  %v10586_v18 = vld [vmem:[%s26084_s4 + $0x40] sm:$0xff] }
 0x8e6   : > { %v10013_v55 = vmax.f32 %v9995_v48, %v10005_v52  ;;  %v10014_v50 = vmax.f32 %v9996_v5, %v10007_v15  ;;  %v10041_v26 = vmax.f32 %v10028_v27, %v10035_v8  ;;  %v10031_v49 = vsel %vm4175_vm8, %v10029_v9, %v10030_v24  ;;  %v10585_v52 = vld [vmem:[%s26084_s4 + $0x38] sm:$0xff] }
 0x8e7   : > { %v10033_v32 = vsel %vm4175_vm8, %v10030_v24, %v10032_v46  ;;  %v10044_v1 = vsel %vm4189_vm9, %v10042_v7, %v10043_v30  ;;  %v10046_v6 = vsel %vm4189_vm9, %v10043_v30, %v10045_v19  ;;  %v24512_v5 = vand.u32 4294901760, %v10589_v10 }
 0x8e8   : > { %v10026_v21 = vmax.f32 %v10013_v55, %v10018_v42  ;;  %v10027_v60 = vmax.f32 %v10014_v50, %v10020_v36  ;;  %v10054_v31 = vmax.f32 %v10041_v26, %v10048_v45  ;;  %v24515_v46 = vsub.f32 %v10590_v51, %v24509_v63  ;;  %v10584_v55 = vld [vmem:[%s26084_s4 + $0x30] sm:$0xff]  ;;  %v10583_v45 = vld [vmem:[%s26084_s4 + $0x28] sm:$0xff] }
 0x8e9   : > { %v24519_v2 = vsub.f32 %v10589_v10, %v24512_v5  ;;  %v24580_v27 = vand.u32 4294901760, %v10586_v18  ;;  %v24595_v8 = vand.u32 4294901760, %v10585_v52  ;;  %v24611_v30 = vand.u32 4294901760, %v10584_v55  ;;  %v10578_v10 = vld [vmem:[%s26084_s4] sm:$0xff] }
 0x8ea   : > { %v10039_v17 = vmax.f32 %v10026_v21, %v10031_v49  ;;  %v10040_v20 = vmax.f32 %v10027_v60, %v10033_v32  ;;  %v24483_v41 = vand.u32 4294901760, %v10054_v31  ;;  %v24524_v38 = vand.u32 4294901760, %v24515_v46  ;;  %v10582_v49 = vld [vmem:[%s26084_s4 + $0x20] sm:$0xff] }
 0x8eb   : > { %v24529_v54 = vand.u32 4294901760, %v24519_v2  ;;  %v24593_v9 = vsub.f32 %v10586_v18, %v24580_v27  ;;  %v24608_v36 = vsub.f32 %v10585_v52, %v24595_v8  ;;  %v24622_v7 = vand.u32 4294901760, %v10583_v45 }
 0x8ec   : > { %v10052_v62 = vmax.f32 %v10039_v17, %v10044_v1  ;;  %v10053_v33 = vmax.f32 %v10040_v20, %v10046_v6  ;;  %19458 = vmatprep.subr.mxu0 %v24483_v41  ;;  %v10179_v59 = vsub.f32 %v10054_v31, %v24483_v41  ;;  %v10705_v0 = vsub.f32 %v24515_v46, %v24524_v38  ;;  %v10581_v6 = vld [vmem:[%s26084_s4 + $0x18] sm:$0xff] }
 0x8ed   : > { %19459 = vmatpush3.msra.mxu0 %v24483_v41  ;;  %v10712_v40 = vsub.f32 %v24519_v2, %v24529_v54  ;;  %v24605_v42 = vand.u32 4294901760, %v24593_v9  ;;  %v24625_v31 = vsub.f32 %v10584_v55, %v24611_v30  ;;  %v24634_v20 = vsub.f32 %v10583_v45, %v24622_v7 }
 0x8ee   : > { %v24492_v56 = vand.u32 4294901760, %v10053_v33  ;;  %v24494_v13 = vand.u32 4294901760, %v10052_v62  ;;  %v10180_v25 = vand.u32 4294901760, %v10179_v59 }
 0x8ef   : > { %v10733_v60 = vsub.f32 %v24593_v9, %v24605_v42  ;;  %v24640_v1 = vand.u32 4294901760, %v24625_v31 }
 0x8f0   : > { %19460 = vmatprep.subr.mxu0 %v24492_v56  ;;  %v10186_v12 = vsub.f32 %v10053_v33, %v24492_v56  ;;  %v10193_v39 = vsub.f32 %v10052_v62, %v24494_v13  ;;  %v10181_v53 = vsub.f32 %v10179_v59, %v10180_v25  ;;  %v24647_v33 = vand.u32 4294901760, %v24634_v20 }
 0x8f1   : > { %19461 = vmatpush3.msra.mxu0 %v24492_v56  ;;  %v10734_v32 = vand.u32 4294901760, %v10733_v60 }
 0x8f2   : > { %19462 = vmatprep.subr.mxu0 %v24494_v13  ;;  %v10187_v43 = vand.u32 4294901760, %v10186_v12  ;;  %v10194_v61 = vand.u32 4294901760, %v10193_v39  ;;  %v10182_v23 = vand.u32 4294901760, %v10181_v53 }
 0x8f3   : > { %19463 = vmatpush3.msra.mxu0 %v24494_v13 }
 0x8f4   : > { %19476 = vmatprep.subr.mxu0 %v10179_v59  ;;  %19465 = vmatmul.mubr.f32.vlgmr.msra.gmra.mxu0 %v10145_v57  ;;  %v10188_v48 = vsub.f32 %v10186_v12, %v10187_v43  ;;  %v10195_v4 = vsub.f32 %v10193_v39, %v10194_v61 }
 0x8f5   : > { %19467 = vmatprep.subr.mxu1 %v10182_v23  ;;  %19477 = vmatpush3.msra.mxu0 %v10179_v59  ;;  %v24652_v59 = vand.u32 4294901760, %v10581_v6 }
 0x8f6   : > { %19468 = vmatpush3.msra.mxu1 %v10182_v23  ;;  %19478 = vmatprep.subr.mxu0 %v10186_v12  ;;  %v10189_v29 = vand.u32 4294901760, %v10188_v48  ;;  %v10196_v14 = vand.u32 4294901760, %v10195_v4 }
 0x8f7   : > { %19479 = vmatpush3.msra.mxu0 %v10186_v12  ;;  %19482 = vmatprep.mubr.f32.mxu0 %v24456_v11  ;;  %v10706_v11 = vand.u32 4294901760, %v10705_v0  ;;  %v24667_v12 = vsub.f32 %v10581_v6, %v24652_v59 }
 0x8f8   : > { %19469 = vmatprep.subr.mxu1 %v10189_v29  ;;  %19480 = vmatprep.subr.mxu0 %v10193_v39 }
 0x8f9   : > { %19470 = vmatpush3.msra.mxu1 %v10189_v29  ;;  %19481 = vmatpush3.msra.mxu0 %v10193_v39  ;;  %v24679_v23 = vand.u32 4294901760, %v24667_v12 }
 0x8fa   : > { %19471 = vmatprep.subr.mxu1 %v10196_v14  ;;  %19494 = vmatprep.subr.mxu0 %v10180_v25 }
 0x8fb   : > { %19472 = vmatpush3.msra.mxu1 %v10196_v14  ;;  %19483 = vmatmul.mubr.f32.vlgmr.msra.gmra.mxu0 %v24470_v58  ;;  %v10768_v14 = vsub.f32 %v24667_v12, %v24679_v23 }
 0x8fc   : > { %19495 = vmatpush3.msra.mxu0 %v10180_v25  ;;  %19474 = vmatmul.mubr.f32.vlgmr.msra.gmra.mxu1 %v24467_v44  ;;  %v10754_v25 = vsub.f32 %v24634_v20, %v24647_v33 }
 0x8fd   : > { %19485 = vmatprep.subr.mxu1 %v24483_v41  ;;  %19496 = vmatprep.subr.mxu0 %v10187_v43 }
 0x8fe   : > { %19486 = vmatpush3.msra.mxu1 %v24483_v41  ;;  %19497 = vmatpush3.msra.mxu0 %v10187_v43  ;;  %v10579_v43 = vld [vmem:[%s26084_s4 + $0x8] sm:$0xff] }
 0x8ff   : > { %19487 = vmatprep.subr.mxu1 %v24492_v56  ;;  %19498 = vmatprep.subr.mxu0 %v10194_v61  ;;  %v24685_v4 = vand.u32 4294901760, %v10579_v43 }
 0x900   : > { %19488 = vmatpush3.msra.mxu1 %v24492_v56  ;;  %19499 = vmatpush3.msra.mxu0 %v10194_v61  ;;  %v10755_v61 = vand.u32 4294901760, %v10754_v25 }
 0x901   : > { %19489 = vmatprep.subr.mxu1 %v24494_v13  ;;  %19491 = vmatprep.mubr.f32.mxu1 %v10133_v34  ;;  %v10713_v34 = vand.u32 4294901760, %v10712_v40  ;;  %v24696_v40 = vand.u32 4294901760, %v10578_v10 }
 0x902   : > { %19490 = vmatpush3.msra.mxu1 %v24494_v13  ;;  %19500 = vmatprep.mubr.f32.mxu0 %v24452_v22 }
 0x903   : > { %19492 = vmatmul.mubr.f32.vlgmr.msra.gmra.mxu1 %v10143_v16  ;;  %19503 = vmatprep.subr.mxu1 %v24483_v41  ;;  %v24620_v16 = vand.u32 4294901760, %v24608_v36 }
 0x904   : > { %19504 = vmatpush3.msra.mxu1 %v24483_v41  ;;  %19501 = vmatmul.mubr.f32.vlgmr.msra.gmra.mxu0 %v24467_v44  ;;  %v24636_v41 = vand.u32 4294901760, %v10582_v49 }
 0x905   : > { %19505 = vmatprep.subr.mxu1 %v24492_v56  ;;  %19509 = vmatprep.mubr.f32.mxu1 %v24452_v22  ;;  %v10588_v22 = vld [vmem:[%s26084_s4 + $0x50] sm:$0xff]  ;;  %v10740_v17 = vsub.f32 %v24608_v36, %v24620_v16 }
 0x906   : > { %19506 = vmatpush3.msra.mxu1 %v24492_v56  ;;  %19512 = vmatprep.subr.mxu0 %v24509_v63  ;;  %v24559_v58 = vand.u32 4294901760, %v10588_v22  ;;  %v24650_v28 = vsub.f32 %v10582_v49, %v24636_v41  ;;  %v10747_v56 = vsub.f32 %v24625_v31, %v24640_v1 }
 0x907   : > { %19507 = vmatprep.subr.mxu1 %v24494_v13  ;;  %19513 = vmatpush3.msra.mxu0 %v24509_v63  ;;  %v10741_v62 = vand.u32 4294901760, %v10740_v17 }
 0x908   : > { %19508 = vmatpush3.msra.mxu1 %v24494_v13  ;;  %19514 = vmatprep.subr.mxu0 %v24512_v5  ;;  %v24565_v19 = vsub.f32 %v10588_v22, %v24559_v58  ;;  %v10580_v13 = vld [vmem:[%s26084_s4 + $0x10] sm:$0xff]  ;;  %v24664_v57 = vand.u32 4294901760, %v24650_v28  ;;  %v10748_v53 = vand.u32 4294901760, %v10747_v56 }
 0x909   : > { %19510 = vmatmul.mubr.f32.vlgmr.msra.gmra.mxu1 %v24467_v44  ;;  %19541 = vmatprep.subr.mxu1 %v10706_v11  ;;  %v24567_v44 = vand.u32 4294901760, %v10587_v47  ;;  %v24669_v39 = vand.u32 4294901760, %v10580_v13 }
 0x90a   : > { %19542 = vmatpush3.msra.mxu1 %v10706_v11  ;;  %19515 = vmatpush3.msra.mxu0 %v24512_v5  ;;  %v24575_v35 = vand.u32 4294901760, %v24565_v19  ;;  %v10761_v51 = vsub.f32 %v24650_v28, %v24664_v57  ;;  %v24700_v11 = vsub.f32 %v10579_v43, %v24685_v4 }
 0x90b   : > { %19543 = vmatprep.subr.mxu1 %v10713_v34  ;;  %19516 = vmatprep.subr.mxu0 %v24559_v58  ;;  %v24578_v37 = vsub.f32 %v10587_v47, %v24567_v44  ;;  %v24682_v48 = vsub.f32 %v10580_v13, %v24669_v39  ;;  %v24706_v47 = vsub.f32 %v10578_v10, %v24696_v40 }
 0x90c   : > { %19544 = vmatpush3.msra.mxu1 %v10713_v34  ;;  %19517 = vmatpush3.msra.mxu0 %v24559_v58  ;;  %v10719_v15 = vsub.f32 %v24565_v19, %v24575_v35  ;;  %v10762_v29 = vand.u32 4294901760, %v10761_v51  ;;  %v10769_v34 = vand.u32 4294901760, %v10768_v14  ;;  %v24710_v18 = vand.u32 4294901760, %v24700_v11 }
 0x90d   : > { %19518 = vmatprep.subr.mxu0 %v24567_v44  ;;  %v24590_v24 = vand.u32 4294901760, %v24578_v37  ;;  %v24694_v0 = vand.u32 4294901760, %v24682_v48 }
 0x90e   : > { %19519 = vmatpush3.msra.mxu0 %v24567_v44  ;;  %v10720_v50 = vand.u32 4294901760, %v10719_v15  ;;  %v24714_v15 = vand.u32 4294901760, %v24706_v47  ;;  %v10782_v55 = vsub.f32 %v24700_v11, %v24710_v18 }
 0x90f   : > { %19520 = vmatprep.subr.mxu0 %v24580_v27  ;;  %v10726_v26 = vsub.f32 %v24578_v37, %v24590_v24  ;;  %v10775_v22 = vsub.f32 %v24682_v48, %v24694_v0 }
 0x910   : > { %19521 = vmatpush3.msra.mxu0 %v24580_v27  ;;  %19545 = vmatprep.subr.mxu1 %v10720_v50 }
 0x911   : > { %19522 = vmatprep.subr.mxu0 %v24595_v8  ;;  %v10727_v21 = vand.u32 4294901760, %v10726_v26  ;;  %19546 = vmatpush3.msra.mxu1 %v10720_v50  ;;  %v10776_v52 = vand.u32 4294901760, %v10775_v22  ;;  %v10789_v50 = vsub.f32 %v24706_v47, %v24714_v15  ;;  %v10783_v26 = vand.u32 4294901760, %v10782_v55 }
 0x912   : > { %19523 = vmatpush3.msra.mxu0 %v24595_v8 }
 0x913   : > { %19524 = vmatprep.subr.mxu0 %v24611_v30  ;;  %19547 = vmatprep.subr.mxu1 %v10727_v21  ;;  %v10790_v45 = vand.u32 4294901760, %v10789_v50 }
 0x914   : > { %19525 = vmatpush3.msra.mxu0 %v24611_v30  ;;  %19548 = vmatpush3.msra.mxu1 %v10727_v21 }
 0x915   : > { %19526 = vmatprep.subr.mxu0 %v24622_v7  ;;  %19549 = vmatprep.subr.mxu1 %v10734_v32 }
 0x916   : > { %19527 = vmatpush3.msra.mxu0 %v24622_v7  ;;  %19550 = vmatpush3.msra.mxu1 %v10734_v32 }
 0x917   : > { %19528 = vmatprep.subr.mxu0 %v24636_v41  ;;  %19551 = vmatprep.subr.mxu1 %v10741_v62 }
 0x918   : > { %19529 = vmatpush3.msra.mxu0 %v24636_v41  ;;  %19552 = vmatpush3.msra.mxu1 %v10741_v62 }
 0x919   : > { %19530 = vmatprep.subr.mxu0 %v24652_v59  ;;  %19553 = vmatprep.subr.mxu1 %v10748_v53 }
 0x91a   : > { %19531 = vmatpush3.msra.mxu0 %v24652_v59  ;;  %19554 = vmatpush3.msra.mxu1 %v10748_v53 }
 0x91b   : > { %19532 = vmatprep.subr.mxu0 %v24669_v39  ;;  %19555 = vmatprep.subr.mxu1 %v10755_v61 }
 0x91c   : > { %19533 = vmatpush3.msra.mxu0 %v24669_v39  ;;  %19556 = vmatpush3.msra.mxu1 %v10755_v61 }
 0x91d   : > { %19534 = vmatprep.subr.mxu0 %v24685_v4  ;;  %19557 = vmatprep.subr.mxu1 %v10762_v29 }
 0x91e   : > { %19535 = vmatpush3.msra.mxu0 %v24685_v4  ;;  %19558 = vmatpush3.msra.mxu1 %v10762_v29 }
 0x91f   : > { %19536 = vmatprep.subr.mxu0 %v24696_v40  ;;  %19559 = vmatprep.subr.mxu1 %v10769_v34 }
 0x920   : > { %19537 = vmatpush3.msra.mxu0 %v24696_v40  ;;  %19560 = vmatpush3.msra.mxu1 %v10769_v34 }
 0x921   : > { %19570 = vmatprep.subr.mxu0 %v24515_v46  ;;  %19561 = vmatprep.subr.mxu1 %v10776_v52 }
 0x922   : > { %19562 = vmatpush3.msra.mxu1 %v10776_v52 }
 0x923   : > { %19563 = vmatprep.subr.mxu1 %v10783_v26 }
 0x924   : > { %19564 = vmatpush3.msra.mxu1 %v10783_v26 }
 0x925   : > { %19565 = vmatprep.subr.mxu1 %v10790_v45 }
 0x926   : > { %19566 = vmatpush3.msra.mxu1 %v10790_v45 }
 0x927   : > { %19599 = vmatprep.subr.mxu1 %v24509_v63 }
 0x9b4   : > { %v19466_v21 = vpop.f32.mrf.mxu0 }
 0x9b6   : > { %v10137_v60 = vpop.f32.mrf.mxu0 }
 0x9bb   : > { %v19484_v32 = vpop.f32.mrf.mxu0 }
 0x9bc   : > { %v19475_v49 = vpop.f32.mrf.mxu1 }
 0x9bd   : > { %v10240_v17 = vadd.f32 %v19475_v49, %v19466_v21  ;;  %v10317_v56 = vpop.f32.mrf.mxu0 }
 0x9be   : > { %v10233_v6 = vpop.f32.mrf.mxu1 }
 0x9bf   : > { %v10234_v62 = vadd.f32 %v10233_v6, %v10137_v60  ;;  %v10325_v13 = vadd.f32 %v19484_v32, %v10240_v17 }
 0x9c1   : > { %v10318_v53 = vadd.f32 %v10317_v56, %v10234_v62 }
 0x9c3   : > { %v19493_v25 = vpop.f32.mrf.mxu1 }
 0x9c4   : > { %v10409_v43 = vadd.f32 %v19493_v25, %v10325_v13  ;;  %v19502_v61 = vpop.f32.mrf.mxu0 }
 0x9c5   : > { %v10400_v51 = vpop.f32.mrf.mxu1 }
 0x9c6   : > { %v10401_v10 = vadd.f32 %v10400_v51, %v10318_v53  ;;  %v10488_v29 = vpop.f32.mrf.mxu0  ;;  %v10495_v14 = vadd.f32 %v19502_v61, %v10409_v43 }
 0x9c8   : > { %v10489_v22 = vadd.f32 %v10488_v29, %v10401_v10 }
 0x9c9   : > { %v19511_v34 = vpop.f32.mrf.mxu1 }
 0x9ca   : > { %v10575_v52 = vadd.f32 %v19511_v34, %v10495_v14 }
 0x9cb   : > { %v10568_v55 = vpop.f32.mrf.mxu1 }
 0x9cc   : > { %v10595_v50 = vsel %vm4740_vm10, %v10575_v52, 0  ;;  %v10569_v26 = vadd.f32 %v10568_v55, %v10489_v22 }
 0x9cd   : > { %v24724_v45 = vand.u32 4294901760, %v10595_v50 }
 0x9ce   : > { %v10592_v21 = vsel %vm4740_vm10, %v10569_v26, 0 }
 0x9cf   : > { %v24728_v60 = vsub.f32 %v10595_v50, %v24724_v45  ;;  %v24730_v49 = vand.u32 4294901760, %v10592_v21 }
 0x9d1   : > { %v10687_v32 = vand.u32 4294901760, %v24728_v60  ;;  %v10676_v17 = vsub.f32 %v10592_v21, %v24730_v49  ;;  %19567 = vmatprep.mubr.f32.mxu1 %v24730_v49 }
 0x9d2   : > { %19568 = vmatmul.mubr.f32.vlgmr.msra.gmra.mxu1 %v24724_v45 }
 0x9d3   : > { %19600 = vmatpush3.msra.mxu1 %v24509_v63  ;;  %v10677_v6 = vand.u32 4294901760, %v10676_v17  ;;  %v10688_v62 = vsub.f32 %v24728_v60, %v10687_v32 }
 0x9d4   : > { %19601 = vmatprep.subr.mxu1 %v24512_v5 }
 0x9d5   : > { %19602 = vmatpush3.msra.mxu1 %v24512_v5  ;;  %19625 = vmatprep.mubr.f32.mxu1 %v10677_v6  ;;  %v10678_v56 = vsub.f32 %v10676_v17, %v10677_v6  ;;  %v10689_v25 = vand.u32 4294901760, %v10688_v62 }
 0x9d6   : > { %19603 = vmatprep.subr.mxu1 %v24559_v58 }
 0x9d7   : > { %19604 = vmatpush3.msra.mxu1 %v24559_v58  ;;  %v10679_v13 = vand.u32 4294901760, %v10678_v56 }
 0x9d8   : > { %19605 = vmatprep.subr.mxu1 %v24567_v44 }
 0x9d9   : > { %19606 = vmatpush3.msra.mxu1 %v24567_v44  ;;  %19538 = vmatprep.mubr.f32.mxu0 %v10679_v13 }
 0x9da   : > { %19607 = vmatprep.subr.mxu1 %v24580_v27  ;;  %19539 = vmatmul.mubr.f32.vlgmr.msra.gmra.mxu0 %v10689_v25 }
 0x9db   : > { %19571 = vmatpush3.msra.mxu0 %v24515_v46  ;;  %19608 = vmatpush3.msra.mxu1 %v24580_v27  ;;  %v15946_v46 = vld [vmem:[%s26083_s3 + $0x50] sm:$0xff] }
 0x9dc   : > { %19572 = vmatprep.subr.mxu0 %v24519_v2  ;;  %19596 = vmatprep.mubr.f32.mxu0 %v10676_v17 }
 0x9dd   : > { %19609 = vmatprep.subr.mxu1 %v24595_v8  ;;  %19573 = vmatpush3.msra.mxu0 %v24519_v2 }
 0x9de   : > { %19610 = vmatpush3.msra.mxu1 %v24595_v8  ;;  %19574 = vmatprep.subr.mxu0 %v24565_v19 }
 0x9df   : > { %19611 = vmatprep.subr.mxu1 %v24611_v30  ;;  %19575 = vmatpush3.msra.mxu0 %v24565_v19 }
 0x9e0   : > { %19612 = vmatpush3.msra.mxu1 %v24611_v30  ;;  %19576 = vmatprep.subr.mxu0 %v24578_v37 }
 0x9e1   : > { %19613 = vmatprep.subr.mxu1 %v24622_v7  ;;  %19577 = vmatpush3.msra.mxu0 %v24578_v37 }
 0x9e2   : > { %19614 = vmatpush3.msra.mxu1 %v24622_v7  ;;  %19578 = vmatprep.subr.mxu0 %v24593_v9 }
 0x9e3   : > { %19615 = vmatprep.subr.mxu1 %v24636_v41  ;;  %19579 = vmatpush3.msra.mxu0 %v24593_v9 }
 0x9e4   : > { %19616 = vmatpush3.msra.mxu1 %v24636_v41  ;;  %19580 = vmatprep.subr.mxu0 %v24608_v36 }
 0x9e5   : > { %19617 = vmatprep.subr.mxu1 %v24652_v59  ;;  %19581 = vmatpush3.msra.mxu0 %v24608_v36 }
 0x9e6   : > { %19618 = vmatpush3.msra.mxu1 %v24652_v59  ;;  %19582 = vmatprep.subr.mxu0 %v24625_v31 }
 0x9e7   : > { %19619 = vmatprep.subr.mxu1 %v24669_v39  ;;  %19583 = vmatpush3.msra.mxu0 %v24625_v31  ;;  %v15942_v31 = vld [vmem:[%s26083_s3 + $0x30] sm:$0xff] }
 0x9e8   : > { %19620 = vmatpush3.msra.mxu1 %v24669_v39  ;;  %19584 = vmatprep.subr.mxu0 %v24634_v20 }
 0x9e9   : > { %19621 = vmatprep.subr.mxu1 %v24685_v4  ;;  %19585 = vmatpush3.msra.mxu0 %v24634_v20 }
 0x9ea   : > { %19622 = vmatpush3.msra.mxu1 %v24685_v4  ;;  %19586 = vmatprep.subr.mxu0 %v24650_v28 }
 0x9eb   : > { %19623 = vmatprep.subr.mxu1 %v24696_v40  ;;  %19587 = vmatpush3.msra.mxu0 %v24650_v28 }
 0x9ec   : > { %19624 = vmatpush3.msra.mxu1 %v24696_v40  ;;  %19588 = vmatprep.subr.mxu0 %v24667_v12 }
 0x9ed   : > { %19626 = vmatmul.mubr.f32.vlgmr.msra.gmra.mxu1 %v10687_v32  ;;  %19657 = vmatprep.subr.mxu1 %v24509_v63 }
 0x9ee   : > { %19589 = vmatpush3.msra.mxu0 %v24667_v12  ;;  %19658 = vmatpush3.msra.mxu1 %v24509_v63  ;;  %v15947_v63 = vld [vmem:[%s26083_s3 + $0x58] sm:$0xff] }
 0x9ef   : > { %19683 = vmatprep.mubr.f32.mxu1 %v24730_v49  ;;  %19590 = vmatprep.subr.mxu0 %v24682_v48 }
 0x9f0   : > { %19659 = vmatprep.subr.mxu1 %v24512_v5  ;;  %19591 = vmatpush3.msra.mxu0 %v24682_v48 }
 0x9f1   : > { %19660 = vmatpush3.msra.mxu1 %v24512_v5  ;;  %19592 = vmatprep.subr.mxu0 %v24700_v11  ;;  %v24847_v5 = vand.u32 4294901760, %v15947_v63 }
 0x9f2   : > { %19661 = vmatprep.subr.mxu1 %v24559_v58  ;;  %19593 = vmatpush3.msra.mxu0 %v24700_v11 }
 0x9f3   : > { %19662 = vmatpush3.msra.mxu1 %v24559_v58  ;;  %19594 = vmatprep.subr.mxu0 %v24706_v47  ;;  %v24853_v2 = vsub.f32 %v15947_v63, %v24847_v5 }
 0x9f4   : > { %19663 = vmatprep.subr.mxu1 %v24567_v44  ;;  %19595 = vmatpush3.msra.mxu0 %v24706_v47 }
 0x9f5   : > { %19664 = vmatpush3.msra.mxu1 %v24567_v44  ;;  %19597 = vmatmul.mubr.f32.vlgmr.msra.gmra.mxu0 %v24728_v60  ;;  %v24863_v58 = vand.u32 4294901760, %v24853_v2 }
 0x9f6   : > { %19628 = vmatprep.subr.mxu0 %v24524_v38  ;;  %19665 = vmatprep.subr.mxu1 %v24580_v27 }
 0x9f7   : > { %19629 = vmatpush3.msra.mxu0 %v24524_v38  ;;  %19654 = vmatprep.mubr.f32.mxu0 %v24730_v49  ;;  %v24855_v38 = vand.u32 4294901760, %v15946_v46  ;;  %v11382_v37 = vsub.f32 %v24853_v2, %v24863_v58 }
 0x9f8   : > { %19666 = vmatpush3.msra.mxu1 %v24580_v27  ;;  %19630 = vmatprep.subr.mxu0 %v24529_v54 }
 0x9f9   : > { %19667 = vmatprep.subr.mxu1 %v24595_v8  ;;  %19631 = vmatpush3.msra.mxu0 %v24529_v54  ;;  %v15945_v54 = vld [vmem:[%s26083_s3 + $0x48] sm:$0xff]  ;;  %v24866_v19 = vsub.f32 %v15946_v46, %v24855_v38 }
 0x9fa   : > { %19668 = vmatpush3.msra.mxu1 %v24595_v8  ;;  %19632 = vmatprep.subr.mxu0 %v24575_v35  ;;  %v24868_v44 = vand.u32 4294901760, %v15945_v54  ;;  %v15943_v8 = vld [vmem:[%s26083_s3 + $0x38] sm:$0xff] }
 0x9fb   : > { %19669 = vmatprep.subr.mxu1 %v24611_v30  ;;  %19633 = vmatpush3.msra.mxu0 %v24575_v35  ;;  %v15944_v35 = vld [vmem:[%s26083_s3 + $0x40] sm:$0xff]  ;;  %v24878_v27 = vand.u32 4294901760, %v24866_v19 }
 0x9fc   : > { %19670 = vmatpush3.msra.mxu1 %v24611_v30  ;;  %19634 = vmatprep.subr.mxu0 %v24590_v24  ;;  %v24883_v9 = vand.u32 4294901760, %v15944_v35 }
 0x9fd   : > { %19671 = vmatprep.subr.mxu1 %v24622_v7  ;;  %19635 = vmatpush3.msra.mxu0 %v24590_v24  ;;  %v24881_v24 = vsub.f32 %v15945_v54, %v24868_v44  ;;  %v11389_v36 = vsub.f32 %v24866_v19, %v24878_v27 }
 0x9fe   : > { %19672 = vmatpush3.msra.mxu1 %v24622_v7  ;;  %19636 = vmatprep.subr.mxu0 %v24605_v42  ;;  %v24899_v7 = vand.u32 4294901760, %v15943_v8 }
 0x9ff   : > { %19673 = vmatprep.subr.mxu1 %v24636_v41  ;;  %19637 = vmatpush3.msra.mxu0 %v24605_v42  ;;  %v11383_v42 = vand.u32 4294901760, %v11382_v37  ;;  %v24893_v30 = vand.u32 4294901760, %v24881_v24  ;;  %v11390_v20 = vand.u32 4294901760, %v11389_v36  ;;  %v11251_v36 = vld [vmem:[%s26083_s3 + $0x28] sm:$0xff] }
 0xa00   : > { %19674 = vmatpush3.msra.mxu1 %v24636_v41  ;;  %19638 = vmatprep.subr.mxu0 %v24620_v16  ;;  %v24913_v28 = vsub.f32 %v15943_v8, %v24899_v7 }
 0xa01   : > { %19675 = vmatprep.subr.mxu1 %v24652_v59  ;;  %19639 = vmatpush3.msra.mxu0 %v24620_v16  ;;  %v24896_v16 = vsub.f32 %v15944_v35, %v24883_v9  ;;  %v11396_v41 = vsub.f32 %v24881_v24, %v24893_v30 }
 0xa02   : > { %19676 = vmatpush3.msra.mxu1 %v24652_v59  ;;  %19640 = vmatprep.subr.mxu0 %v24640_v1 }
 0xa03   : > { %19677 = vmatprep.subr.mxu1 %v24669_v39  ;;  %19641 = vmatpush3.msra.mxu0 %v24640_v1  ;;  %v24908_v1 = vand.u32 4294901760, %v24896_v16  ;;  %v11397_v59 = vand.u32 4294901760, %v11396_v41  ;;  %v24978_v41 = vand.u32 4294901760, %v11251_v36 }
 0xa04   : > { %19678 = vmatpush3.msra.mxu1 %v24669_v39  ;;  %19642 = vmatprep.subr.mxu0 %v24647_v33  ;;  %v24923_v39 = vand.u32 4294901760, %v24913_v28 }
 0xa05   : > { %19679 = vmatprep.subr.mxu1 %v24685_v4  ;;  %19643 = vmatpush3.msra.mxu0 %v24647_v33  ;;  %v24910_v33 = vand.u32 4294901760, %v15942_v31 }
 0xa06   : > { %19680 = vmatpush3.msra.mxu1 %v24685_v4  ;;  %19644 = vmatprep.subr.mxu0 %v24664_v57  ;;  %v11410_v4 = vsub.f32 %v24913_v28, %v24923_v39 }
 0xa07   : > { %19681 = vmatprep.subr.mxu1 %v24696_v40  ;;  %19645 = vmatpush3.msra.mxu0 %v24664_v57  ;;  %v11403_v57 = vsub.f32 %v24896_v16, %v24908_v1  ;;  %v24919_v12 = vsub.f32 %v15942_v31, %v24910_v33 }
 0xa08   : > { %19682 = vmatpush3.msra.mxu1 %v24696_v40  ;;  %19646 = vmatprep.subr.mxu0 %v24679_v23  ;;  %v11411_v40 = vand.u32 4294901760, %v11410_v4  ;;  %v24997_v4 = vsub.f32 %v11251_v36, %v24978_v41 }
 0xa09   : > { %19684 = vmatmul.mubr.f32.vlgmr.msra.gmra.mxu1 %v24724_v45  ;;  %19647 = vmatpush3.msra.mxu0 %v24679_v23  ;;  %v11404_v23 = vand.u32 4294901760, %v11403_v57  ;;  %v24927_v48 = vand.u32 4294901760, %v24919_v12  ;;  %v11249_v57 = vld [vmem:[%s26083_s3 + $0x18] sm:$0xff] }
 0xa0a   : > { %19648 = vmatprep.subr.mxu0 %v24694_v0  ;;  %19701 = vmatprep.subr.mxu1 %v11383_v42 }
 0xa0b   : > { %19649 = vmatpush3.msra.mxu0 %v24694_v0  ;;  %19702 = vmatpush3.msra.mxu1 %v11383_v42  ;;  %v11417_v0 = vsub.f32 %v24919_v12, %v24927_v48 }
 0xa0c   : > { %19650 = vmatprep.subr.mxu0 %v24710_v18  ;;  %19703 = vmatprep.subr.mxu1 %v11390_v20 }
 0xa0d   : > { %19651 = vmatpush3.msra.mxu0 %v24710_v18  ;;  %19704 = vmatpush3.msra.mxu1 %v11390_v20  ;;  %v11418_v11 = vand.u32 4294901760, %v11417_v0  ;;  %v25004_v0 = vand.u32 4294901760, %v11249_v57 }
 0xa0e   : > { %19652 = vmatprep.subr.mxu0 %v24714_v15  ;;  %19705 = vmatprep.subr.mxu1 %v11397_v59 }
 0xa0f   : > { %19653 = vmatpush3.msra.mxu0 %v24714_v15  ;;  %19706 = vmatpush3.msra.mxu1 %v11397_v59  ;;  %v11250_v59 = vld [vmem:[%s26083_s3 + $0x20] sm:$0xff] }
 0xa10   : > { %19655 = vmatmul.mubr.f32.vlgmr.msra.gmra.mxu0 %v24724_v45  ;;  %19686 = vmatprep.subr.mxu0 %v24847_v5 }
 0xa11   : > { %19687 = vmatpush3.msra.mxu0 %v24847_v5  ;;  %19707 = vmatprep.subr.mxu1 %v11404_v23 }
 0xa12   : > { %19688 = vmatprep.subr.mxu0 %v24855_v38  ;;  %19708 = vmatpush3.msra.mxu1 %v11404_v23  ;;  %v24992_v23 = vand.u32 4294901760, %v11250_v59 }
 0xa13   : > { %19689 = vmatpush3.msra.mxu0 %v24855_v38  ;;  %19709 = vmatprep.subr.mxu1 %v11411_v40 }
 0xa14   : > { %19690 = vmatprep.subr.mxu0 %v24868_v44  ;;  %19710 = vmatpush3.msra.mxu1 %v11411_v40 }
 0xa15   : > { %19691 = vmatpush3.msra.mxu0 %v24868_v44  ;;  %19711 = vmatprep.subr.mxu1 %v11418_v11 }
 0xa16   : > { %19692 = vmatprep.subr.mxu0 %v24883_v9  ;;  %19712 = vmatpush3.msra.mxu1 %v11418_v11  ;;  %v25014_v11 = vsub.f32 %v11250_v59, %v24992_v23  ;;  %v15950_v59 = vld [vmem:[%s26083_s3 + $0x70] sm:$0xff] }
 0xa17   : > { %19693 = vmatpush3.msra.mxu0 %v24883_v9  ;;  %19731 = vmatprep.subr.mxu1 %v24847_v5 }
 0xa18   : > { %19694 = vmatprep.subr.mxu0 %v24899_v7 }
 0xa19   : > { %19695 = vmatpush3.msra.mxu0 %v24899_v7 }
 0xa1a   : > { %19696 = vmatprep.subr.mxu0 %v24910_v33 }
 0xa1b   : > { %19697 = vmatpush3.msra.mxu0 %v24910_v33 }
 0xa1c   : > { %19716 = vmatprep.subr.mxu0 %v24853_v2 }
 0xa92   : > { %v19569_v18 = vpop.f32.mrf.mxu1 }
 0xa94   : > { %v10827_v43 = vpop.f32.mrf.mxu1 }
 0xa9a   : > { %v19540_v47 = vpop.f32.mrf.mxu0 }
 0xa9b   : > { %v10834_v61 = vadd.f32 %v19569_v18, %v19540_v47  ;;  %v25021_v18 = vand.u32 4294901760, %v24997_v4 }
 0xa9c   : > { %v10681_v15 = vpop.f32.mrf.mxu0 }
 0xa9d   : > { %v10828_v29 = vadd.f32 %v10827_v43, %v10681_v15 }
 0xaad   : > { %v19627_v51 = vpop.f32.mrf.mxu1 }
 0xaaf   : > { %v11024_v22 = vpop.f32.mrf.mxu1 }
 0xab5   : > { %v19598_v53 = vpop.f32.mrf.mxu0 }
 0xab6   : > { %v10939_v14 = vadd.f32 %v19598_v53, %v10834_v61  ;;  %v11246_v53 = vld [vmem:[%s26083_s3] sm:$0xff]  ;;  %v11942_v61 = vsub.f32 %v24997_v4, %v25021_v18 }
 0xab7   : > { %v10931_v10 = vpop.f32.mrf.mxu0 }
 0xab8   : > { %v10932_v34 = vadd.f32 %v10931_v10, %v10828_v29  ;;  %v11033_v52 = vadd.f32 %v19627_v51, %v10939_v14  ;;  %v25050_v51 = vand.u32 4294901760, %v11246_v53 }
 0xaba   : > { %v11025_v45 = vadd.f32 %v11024_v22, %v10932_v34 }
 0xac9   : > { %v19685_v55 = vpop.f32.mrf.mxu1 }
 0xacb   : > { %v11232_v32 = vpop.f32.mrf.mxu1 }
 0xad0   : > { %v19656_v50 = vpop.f32.mrf.mxu0 }
 0xad1   : > { %v11149_v26 = vadd.f32 %v19656_v50, %v11033_v52 }
 0xad2   : > { %v11142_v21 = vpop.f32.mrf.mxu0 }
 0xad3   : > { %v11239_v60 = vadd.f32 %v19685_v55, %v11149_v26  ;;  %v11143_v49 = vadd.f32 %v11142_v21, %v11025_v45 }
 0xad5   : > { %11243 = vst.msk [vmem:[#allocation4 + $0x9] sm:$0xf] %vm5394_vm12, %v11239_v60  ;;  %v11233_v17 = vadd.f32 %v11232_v32, %v11143_v49 }
 0xad7   : > { %11242 = vst.msk [vmem:[#allocation4 + $0x1] sm:$0xff] %vm5392_vm13, %v11233_v17 }
 0xadc   : > { %v11253_v6 = vld [vmem:[#allocation4 + $0x9] sm:$0xf] }
 0xadd   : > { %v11265_v62 = vsel %vm5392_vm13, %v11253_v6, 0  ;;  %v15953_v6 = vld [vmem:[%s26083_s3 + $0x88] sm:$0xff] }
 0xade   : > { %v11252_v56 = vld [vmem:[#allocation4 + $0x1] sm:$0xff]  ;;  %v24939_v13 = vand.u32 4294901760, %v11265_v62 }
 0xadf   : > { %v11262_v25 = vsel %vm5392_vm13, %v11252_v56, 0  ;;  %v11244_v40 = vld [vmem:[#allocation4 + $0x2] sm:$0xff]  ;;  %v25154_v56 = vand.u32 4294901760, %v15953_v6 }
 0xae0   : > { %v24942_v63 = vand.u32 4294901760, %v11262_v25  ;;  %v24945_v46 = vsub.f32 %v11265_v62, %v24939_v13 }
 0xae1   : > { %v25173_v36 = vsub.f32 %v15953_v6, %v25154_v56 }
 0xae2   : > { %19713 = vmatprep.mubr.f32.mxu1 %v24942_v63  ;;  %v24949_v54 = vsub.f32 %v11262_v25, %v24942_v63  ;;  %v24952_v35 = vand.u32 4294901760, %v24945_v46  ;;  %v15952_v25 = vld [vmem:[%s26083_s3 + $0x80] sm:$0xff] }
 0xae3   : > { %19714 = vmatmul.mubr.f32.vlgmr.msra.gmra.mxu1 %v24939_v13 }
 0xae4   : > { %19732 = vmatpush3.msra.mxu1 %v24847_v5  ;;  %v24957_v37 = vand.u32 4294901760, %v24949_v54  ;;  %v11351_v8 = vsub.f32 %v24945_v46, %v24952_v35 }
 0xae5   : > { %19733 = vmatprep.subr.mxu1 %v24855_v38 }
 0xae6   : > { %19734 = vmatpush3.msra.mxu1 %v24855_v38  ;;  %19743 = vmatprep.mubr.f32.mxu1 %v24957_v37  ;;  %v11341_v42 = vsub.f32 %v24949_v54, %v24957_v37  ;;  %v24974_v20 = vand.u32 4294901760, %v11351_v8  ;;  %v15951_v8 = vld [vmem:[%s26083_s3 + $0x78] sm:$0xff] }
 0xae7   : > { %19735 = vmatprep.subr.mxu1 %v24868_v44 }
 0xae8   : > { %19736 = vmatpush3.msra.mxu1 %v24868_v44  ;;  %v24971_v31 = vand.u32 4294901760, %v11341_v42  ;;  %v25168_v42 = vand.u32 4294901760, %v15952_v25 }
 0xae9   : > { %19737 = vmatprep.subr.mxu1 %v24883_v9 }
 0xaea   : > { %19738 = vmatpush3.msra.mxu1 %v24883_v9  ;;  %19698 = vmatprep.mubr.f32.mxu0 %v24971_v31 }
 0xaeb   : > { %19739 = vmatprep.subr.mxu1 %v24899_v7  ;;  %19699 = vmatmul.mubr.f32.vlgmr.msra.gmra.mxu0 %v24974_v20 }
 0xaec   : > { %19717 = vmatpush3.msra.mxu0 %v24853_v2  ;;  %19740 = vmatpush3.msra.mxu1 %v24899_v7  ;;  %v11248_v2 = vld [vmem:[%s26083_s3 + $0x10] sm:$0xff] }
 0xaed   : > { %19718 = vmatprep.subr.mxu0 %v24866_v19  ;;  %19728 = vmatprep.mubr.f32.mxu0 %v24949_v54  ;;  %v25016_v47 = vand.u32 4294901760, %v11248_v2 }
 0xaee   : > { %19741 = vmatprep.subr.mxu1 %v24910_v33  ;;  %19719 = vmatpush3.msra.mxu0 %v24866_v19  ;;  %v11247_v19 = vld [vmem:[%s26083_s3 + $0x8] sm:$0xff] }
 0xaef   : > { %19742 = vmatpush3.msra.mxu1 %v24910_v33  ;;  %19720 = vmatprep.subr.mxu0 %v24881_v24  ;;  %v25029_v15 = vand.u32 4294901760, %v11247_v19  ;;  %v25042_v43 = vsub.f32 %v11248_v2, %v25016_v47  ;;  %v15949_v2 = vld [vmem:[%s26083_s3 + $0x68] sm:$0xff] }
 0xaf0   : > { %19744 = vmatmul.mubr.f32.vlgmr.msra.gmra.mxu1 %v24952_v35  ;;  %19761 = vmatprep.subr.mxu1 %v24847_v5 }
 0xaf1   : > { %19721 = vmatpush3.msra.mxu0 %v24881_v24  ;;  %19762 = vmatpush3.msra.mxu1 %v24847_v5  ;;  %v11822_v24 = vsel %vm5392_vm13, %v11244_v40, 0  ;;  %v25027_v5 = vsub.f32 %v11249_v57, %v25004_v0  ;;  %v25058_v10 = vsub.f32 %v11247_v19, %v25029_v15  ;;  %v25067_v29 = vand.u32 4294901760, %v25042_v43 }
 0xaf2   : > { %19773 = vmatprep.mubr.f32.mxu1 %v24942_v63  ;;  %19722 = vmatprep.subr.mxu0 %v24896_v16  ;;  %v25180_v57 = vand.u32 4294901760, %v15951_v8  ;;  %v25190_v40 = vsub.f32 %v15952_v25, %v25168_v42  ;;  %v25192_v19 = vand.u32 4294901760, %v15950_v59 }
 0xaf3   : > { %19763 = vmatprep.subr.mxu1 %v24855_v38  ;;  %19723 = vmatpush3.msra.mxu0 %v24896_v16  ;;  %v25039_v16 = vand.u32 4294901760, %v25014_v11  ;;  %v25082_v22 = vand.u32 4294901760, %v25058_v10 }
 0xaf4   : > { %19764 = vmatpush3.msra.mxu1 %v24855_v38  ;;  %19724 = vmatprep.subr.mxu0 %v24913_v28  ;;  %v25048_v38 = vand.u32 4294901760, %v11822_v24 }
 0xaf5   : > { %19765 = vmatprep.subr.mxu1 %v24868_v44  ;;  %19725 = vmatpush3.msra.mxu0 %v24913_v28  ;;  %v25055_v28 = vand.u32 4294901760, %v25027_v5 }
 0xaf6   : > { %19766 = vmatpush3.msra.mxu1 %v24868_v44  ;;  %19726 = vmatprep.subr.mxu0 %v24919_v12  ;;  %v11949_v44 = vsub.f32 %v25014_v11, %v25039_v16  ;;  %v25072_v14 = vsub.f32 %v11822_v24, %v25048_v38 }
 0xaf7   : > { %19767 = vmatprep.subr.mxu1 %v24883_v9  ;;  %19727 = vmatpush3.msra.mxu0 %v24919_v12  ;;  %v11943_v12 = vand.u32 4294901760, %v11942_v61  ;;  %v11956_v34 = vsub.f32 %v25027_v5, %v25055_v28  ;;  %v25218_v61 = vsub.f32 %v15950_v59, %v25192_v19 }
 0xaf8   : > { %19768 = vmatpush3.msra.mxu1 %v24883_v9  ;;  %19729 = vmatmul.mubr.f32.vlgmr.msra.gmra.mxu0 %v24945_v46  ;;  %v25075_v9 = vsub.f32 %v11246_v53, %v25050_v51  ;;  %v11950_v52 = vand.u32 4294901760, %v11949_v44  ;;  %v25092_v55 = vand.u32 4294901760, %v25072_v14  ;;  %v15948_v53 = vld [vmem:[%s26083_s3 + $0x60] sm:$0xff] }
 0xaf9   : > { %19746 = vmatprep.subr.mxu0 %v24863_v58  ;;  %19769 = vmatprep.subr.mxu1 %v24899_v7 }
 0xafa   : > { %19747 = vmatpush3.msra.mxu0 %v24863_v58  ;;  %19758 = vmatprep.mubr.f32.mxu0 %v24942_v63  ;;  %v11245_v58 = vld [vmem:[#allocation4 + $0xa] sm:$0xf]  ;;  %v25095_v50 = vand.u32 4294901760, %v25075_v9 }
 0xafb   : > { %19770 = vmatpush3.msra.mxu1 %v24899_v7  ;;  %19748 = vmatprep.subr.mxu0 %v24878_v27  ;;  %v11963_v7 = vsub.f32 %v25042_v43, %v25067_v29  ;;  %v11825_v26 = vsel %vm5392_vm13, %v11245_v58, 0  ;;  %v25243_v58 = vand.u32 4294901760, %v25218_v61 }
 0xafc   : > { %19771 = vmatprep.subr.mxu1 %v24910_v33  ;;  %19749 = vmatpush3.msra.mxu0 %v24878_v27  ;;  %v11957_v27 = vand.u32 4294901760, %v11956_v34  ;;  %v11977_v21 = vsub.f32 %v25075_v9, %v25095_v50  ;;  %v25109_v60 = vand.u32 4294901760, %v11825_v26 }
 0xafd   : > { %19772 = vmatpush3.msra.mxu1 %v24910_v33  ;;  %19750 = vmatprep.subr.mxu0 %v24893_v30  ;;  %v11970_v33 = vsub.f32 %v25058_v10, %v25082_v22  ;;  %v11964_v45 = vand.u32 4294901760, %v11963_v7 }
 0xafe   : > { %19774 = vmatmul.mubr.f32.vlgmr.msra.gmra.mxu1 %v24939_v13  ;;  %19791 = vmatprep.subr.mxu1 %v11943_v12  ;;  %v11978_v32 = vand.u32 4294901760, %v11977_v21  ;;  %v25118_v17 = vsub.f32 %v11825_v26, %v25109_v60 }
 0xaff   : > { %19751 = vmatpush3.msra.mxu0 %v24893_v30  ;;  %19792 = vmatpush3.msra.mxu1 %v11943_v12  ;;  %v11901_v30 = vsub.f32 %v25072_v14, %v25092_v55  ;;  %v11971_v49 = vand.u32 4294901760, %v11970_v33  ;;  %v25226_v12 = vand.u32 4294901760, %v15948_v53 }
 0xb00   : > { %19803 = vmatprep.mubr.f32.mxu1 %v25048_v38  ;;  %19752 = vmatprep.subr.mxu0 %v24908_v1 }
 0xb01   : > { %19793 = vmatprep.subr.mxu1 %v11950_v52  ;;  %19753 = vmatpush3.msra.mxu0 %v24908_v1  ;;  %v25115_v1 = vand.u32 4294901760, %v11901_v30 }
 0xb02   : > { %19794 = vmatpush3.msra.mxu1 %v11950_v52  ;;  %19754 = vmatprep.subr.mxu0 %v24923_v39 }
 0xb03   : > { %19795 = vmatprep.subr.mxu1 %v11957_v27  ;;  %19755 = vmatpush3.msra.mxu0 %v24923_v39  ;;  %v25126_v39 = vand.u32 4294901760, %v25118_v17 }
 0xb04   : > { %19796 = vmatpush3.msra.mxu1 %v11957_v27  ;;  %19756 = vmatprep.subr.mxu0 %v24927_v48 }
 0xb05   : > { %19797 = vmatprep.subr.mxu1 %v11964_v45  ;;  %19757 = vmatpush3.msra.mxu0 %v24927_v48  ;;  %v11911_v48 = vsub.f32 %v25118_v17, %v25126_v39 }
 0xb06   : > { %19798 = vmatpush3.msra.mxu1 %v11964_v45  ;;  %19759 = vmatmul.mubr.f32.vlgmr.msra.gmra.mxu0 %v24939_v13 }
 0xb07   : > { %19776 = vmatprep.subr.mxu0 %v24978_v41  ;;  %19799 = vmatprep.subr.mxu1 %v11971_v49  ;;  %v25148_v62 = vand.u32 4294901760, %v11911_v48 }
 0xb08   : > { %19777 = vmatpush3.msra.mxu0 %v24978_v41  ;;  %19788 = vmatprep.mubr.f32.mxu0 %v25115_v1 }
 0xb09   : > { %19800 = vmatpush3.msra.mxu1 %v11971_v49  ;;  %19778 = vmatprep.subr.mxu0 %v24992_v23 }
 0xb0a   : > { %19801 = vmatprep.subr.mxu1 %v11978_v32  ;;  %19779 = vmatpush3.msra.mxu0 %v24992_v23 }
 0xb0b   : > { %19802 = vmatpush3.msra.mxu1 %v11978_v32  ;;  %19780 = vmatprep.subr.mxu0 %v25004_v0 }
 0xb0c   : > { %19804 = vmatmul.mubr.f32.vlgmr.msra.gmra.mxu1 %v25109_v60  ;;  %19821 = vmatprep.subr.mxu1 %v24978_v41 }
 0xb0d   : > { %19781 = vmatpush3.msra.mxu0 %v25004_v0  ;;  %19822 = vmatpush3.msra.mxu1 %v24978_v41 }
 0xb0e   : > { %19833 = vmatprep.mubr.f32.mxu1 %v25092_v55  ;;  %19782 = vmatprep.subr.mxu0 %v25016_v47 }
 0xb0f   : > { %19823 = vmatprep.subr.mxu1 %v24992_v23  ;;  %19783 = vmatpush3.msra.mxu0 %v25016_v47 }
 0xb10   : > { %19824 = vmatpush3.msra.mxu1 %v24992_v23  ;;  %19784 = vmatprep.subr.mxu0 %v25029_v15 }
 0xb11   : > { %19825 = vmatprep.subr.mxu1 %v25004_v0  ;;  %19785 = vmatpush3.msra.mxu0 %v25029_v15 }
 0xb12   : > { %19826 = vmatpush3.msra.mxu1 %v25004_v0  ;;  %19786 = vmatprep.subr.mxu0 %v25050_v51 }
 0xb13   : > { %19827 = vmatprep.subr.mxu1 %v25016_v47  ;;  %19787 = vmatpush3.msra.mxu0 %v25050_v51 }
 0xb14   : > { %19828 = vmatpush3.msra.mxu1 %v25016_v47  ;;  %19789 = vmatmul.mubr.f32.vlgmr.msra.gmra.mxu0 %v25148_v62 }
 0xb15   : > { %19806 = vmatprep.subr.mxu0 %v24997_v4  ;;  %19829 = vmatprep.subr.mxu1 %v25029_v15 }
 0xb16   : > { %19807 = vmatpush3.msra.mxu0 %v24997_v4  ;;  %19818 = vmatprep.mubr.f32.mxu0 %v25072_v14  ;;  %v12381_v4 = vld [vmem:[#allocation4] sm:$0xff] }
 0xb17   : > { %19830 = vmatpush3.msra.mxu1 %v25029_v15  ;;  %19808 = vmatprep.subr.mxu0 %v25014_v11  ;;  %v12391_v24 = vsel %vm5392_vm13, %v12381_v4, 0 }
 0xb18   : > { %19831 = vmatprep.subr.mxu1 %v25050_v51  ;;  %19809 = vmatpush3.msra.mxu0 %v25014_v11  ;;  %v25197_v11 = vand.u32 4294901760, %v25173_v36 }
 0xb19   : > { %19832 = vmatpush3.msra.mxu1 %v25050_v51  ;;  %19810 = vmatprep.subr.mxu0 %v25027_v5 }
 0xb1a   : > { %19834 = vmatmul.mubr.f32.vlgmr.msra.gmra.mxu1 %v25126_v39  ;;  %19851 = vmatprep.subr.mxu1 %v24978_v41  ;;  %v12511_v44 = vsub.f32 %v25173_v36, %v25197_v11 }
 0xb1b   : > { %19811 = vmatpush3.msra.mxu0 %v25027_v5  ;;  %19852 = vmatpush3.msra.mxu1 %v24978_v41  ;;  %v25203_v41 = vsub.f32 %v15951_v8, %v25180_v57  ;;  %v25205_v5 = vand.u32 4294901760, %v15949_v2  ;;  %v15965_v8 = vld [vmem:[%s26083_s3 + $0xe8] sm:$0xff] }
 0xb1c   : > { %19863 = vmatprep.mubr.f32.mxu1 %v25048_v38  ;;  %19812 = vmatprep.subr.mxu0 %v25042_v43  ;;  %v25330_v4 = vand.u32 4294901760, %v15965_v8 }
 0xb1d   : > { %19853 = vmatprep.subr.mxu1 %v24992_v23  ;;  %19813 = vmatpush3.msra.mxu0 %v25042_v43  ;;  %v25215_v43 = vand.u32 4294901760, %v25190_v40  ;;  %v25234_v34 = vsub.f32 %v15949_v2, %v25205_v5  ;;  %v15964_v2 = vld [vmem:[%s26083_s3 + $0xe0] sm:$0xff] }
 0xb1e   : > { %19854 = vmatpush3.msra.mxu1 %v24992_v23  ;;  %19814 = vmatprep.subr.mxu0 %v25058_v10  ;;  %v25224_v23 = vand.u32 4294901760, %v12391_v24 }
 0xb1f   : > { %19855 = vmatprep.subr.mxu1 %v25004_v0  ;;  %19815 = vmatpush3.msra.mxu0 %v25058_v10  ;;  %v25231_v10 = vand.u32 4294901760, %v25203_v41  ;;  %v25258_v27 = vand.u32 4294901760, %v25234_v34 }
 0xb20   : > { %19856 = vmatpush3.msra.mxu1 %v25004_v0  ;;  %19816 = vmatprep.subr.mxu0 %v25075_v9  ;;  %v12518_v0 = vsub.f32 %v25190_v40, %v25215_v43  ;;  %v25248_v52 = vsub.f32 %v12391_v24, %v25224_v23  ;;  %v15963_v24 = vld [vmem:[%s26083_s3 + $0xd8] sm:$0xff] }
 0xb21   : > { %19857 = vmatprep.subr.mxu1 %v25016_v47  ;;  %19817 = vmatpush3.msra.mxu0 %v25075_v9  ;;  %v12512_v9 = vand.u32 4294901760, %v12511_v44  ;;  %v12525_v7 = vsub.f32 %v25203_v41, %v25231_v10  ;;  %v25349_v44 = vsub.f32 %v15965_v8, %v25330_v4 }
 0xb22   : > { %19858 = vmatpush3.msra.mxu1 %v25016_v47  ;;  %19819 = vmatmul.mubr.f32.vlgmr.msra.gmra.mxu0 %v25118_v17  ;;  %v25251_v47 = vsub.f32 %v15948_v53, %v25226_v12  ;;  %v12519_v33 = vand.u32 4294901760, %v12518_v0  ;;  %v25268_v26 = vand.u32 4294901760, %v25248_v52  ;;  %v25344_v53 = vand.u32 4294901760, %v15964_v2 }
 0xb23   : > { %19836 = vmatprep.subr.mxu0 %v25021_v18  ;;  %19859 = vmatprep.subr.mxu1 %v25029_v15  ;;  %v25356_v0 = vand.u32 4294901760, %v15963_v24 }
 0xb24   : > { %19837 = vmatpush3.msra.mxu0 %v25021_v18  ;;  %19848 = vmatprep.mubr.f32.mxu0 %v25048_v38  ;;  %v12382_v18 = vld [vmem:[#allocation4 + $0x8] sm:$0xf]  ;;  %v25271_v45 = vand.u32 4294901760, %v25251_v47 }
 0xb25   : > { %19860 = vmatpush3.msra.mxu1 %v25029_v15  ;;  %19838 = vmatprep.subr.mxu0 %v25039_v16  ;;  %v12532_v15 = vsub.f32 %v25218_v61, %v25243_v58  ;;  %v12394_v30 = vsel %vm5392_vm13, %v12382_v18, 0  ;;  %v25373_v18 = vand.u32 4294901760, %v25349_v44 }
 0xb26   : > { %19861 = vmatprep.subr.mxu1 %v25050_v51  ;;  %19839 = vmatpush3.msra.mxu0 %v25039_v16  ;;  %v12526_v16 = vand.u32 4294901760, %v12525_v7  ;;  %v12546_v49 = vsub.f32 %v25251_v47, %v25271_v45  ;;  %v25285_v32 = vand.u32 4294901760, %v12394_v30 }
 0xb27   : > { %19862 = vmatpush3.msra.mxu1 %v25050_v51  ;;  %19840 = vmatprep.subr.mxu0 %v25055_v28  ;;  %v12539_v51 = vsub.f32 %v25234_v34, %v25258_v27  ;;  %v12533_v21 = vand.u32 4294901760, %v12532_v15 }
 0xb28   : > { %19864 = vmatmul.mubr.f32.vlgmr.msra.gmra.mxu1 %v25109_v60  ;;  %19881 = vmatprep.subr.mxu1 %v12512_v9  ;;  %v12547_v6 = vand.u32 4294901760, %v12546_v49  ;;  %v25294_v25 = vsub.f32 %v12394_v30, %v25285_v32 }
 0xb29   : > { %19841 = vmatpush3.msra.mxu0 %v25055_v28  ;;  %19882 = vmatpush3.msra.mxu1 %v12512_v9  ;;  %v12470_v28 = vsub.f32 %v25248_v52, %v25268_v26  ;;  %v12540_v48 = vand.u32 4294901760, %v12539_v51  ;;  %v25366_v9 = vsub.f32 %v15964_v2, %v25344_v53  ;;  %v15955_v2 = vld [vmem:[%s26083_s3 + $0x98] sm:$0xff] }
 0xb2a   : > { %19893 = vmatprep.mubr.f32.mxu1 %v25224_v23  ;;  %19842 = vmatprep.subr.mxu0 %v25067_v29 }
 0xb2b   : > { %19883 = vmatprep.subr.mxu1 %v12519_v33  ;;  %19843 = vmatpush3.msra.mxu0 %v25067_v29  ;;  %v25291_v29 = vand.u32 4294901760, %v12470_v28  ;;  %v25390_v15 = vand.u32 4294901760, %v25366_v9 }
 0xb2c   : > { %19884 = vmatpush3.msra.mxu1 %v12519_v33  ;;  %19844 = vmatprep.subr.mxu0 %v25082_v22  ;;  %v15960_v33 = vld [vmem:[%s26083_s3 + $0xc0] sm:$0xff] }
 0xb2d   : > { %19885 = vmatprep.subr.mxu1 %v12526_v16  ;;  %19845 = vmatpush3.msra.mxu0 %v25082_v22  ;;  %v25302_v22 = vand.u32 4294901760, %v25294_v25 }
 0xb2e   : > { %19886 = vmatpush3.msra.mxu1 %v12526_v16  ;;  %19846 = vmatprep.subr.mxu0 %v25095_v50  ;;  %v13084_v16 = vsub.f32 %v25349_v44, %v25373_v18 }
 0xb2f   : > { %19887 = vmatprep.subr.mxu1 %v12533_v21  ;;  %19847 = vmatpush3.msra.mxu0 %v25095_v50  ;;  %v12480_v50 = vsub.f32 %v25294_v25, %v25302_v22 }
 0xb30   : > { %19888 = vmatpush3.msra.mxu1 %v12533_v21  ;;  %19849 = vmatmul.mubr.f32.vlgmr.msra.gmra.mxu0 %v25109_v60 }
 0xb31   : > { %19866 = vmatprep.subr.mxu0 %v25154_v56  ;;  %19889 = vmatprep.subr.mxu1 %v12540_v48  ;;  %v25324_v59 = vand.u32 4294901760, %v12480_v50 }
 0xb32   : > { %19867 = vmatpush3.msra.mxu0 %v25154_v56  ;;  %19878 = vmatprep.mubr.f32.mxu0 %v25291_v29 }
 0xb33   : > { %19890 = vmatpush3.msra.mxu1 %v12540_v48  ;;  %19868 = vmatprep.subr.mxu0 %v25168_v42 }
 0xb34   : > { %19891 = vmatprep.subr.mxu1 %v12547_v6  ;;  %19869 = vmatpush3.msra.mxu0 %v25168_v42 }
 0xb35   : > { %19892 = vmatpush3.msra.mxu1 %v12547_v6  ;;  %19870 = vmatprep.subr.mxu0 %v25180_v57 }
 0xb36   : > { %19894 = vmatmul.mubr.f32.vlgmr.msra.gmra.mxu1 %v25285_v32  ;;  %19911 = vmatprep.subr.mxu1 %v25154_v56 }
 0xb37   : > { %19871 = vmatpush3.msra.mxu0 %v25180_v57  ;;  %19912 = vmatpush3.msra.mxu1 %v25154_v56 }
 0xb38   : > { %19923 = vmatprep.mubr.f32.mxu1 %v25268_v26  ;;  %19872 = vmatprep.subr.mxu0 %v25192_v19 }
 0xb39   : > { %19913 = vmatprep.subr.mxu1 %v25168_v42  ;;  %19873 = vmatpush3.msra.mxu0 %v25192_v19 }
 0xb3a   : > { %19914 = vmatpush3.msra.mxu1 %v25168_v42  ;;  %19874 = vmatprep.subr.mxu0 %v25205_v5 }
 0xb3b   : > { %19915 = vmatprep.subr.mxu1 %v25180_v57  ;;  %19875 = vmatpush3.msra.mxu0 %v25205_v5 }
 0xb3c   : > { %19916 = vmatpush3.msra.mxu1 %v25180_v57  ;;  %19876 = vmatprep.subr.mxu0 %v25226_v12 }
 0xb3d   : > { %19917 = vmatprep.subr.mxu1 %v25192_v19  ;;  %19877 = vmatpush3.msra.mxu0 %v25226_v12 }
 0xb3e   : > { %19918 = vmatpush3.msra.mxu1 %v25192_v19  ;;  %19879 = vmatmul.mubr.f32.vlgmr.msra.gmra.mxu0 %v25324_v59 }
 0xb3f   : > { %19896 = vmatprep.subr.mxu0 %v25173_v36  ;;  %19919 = vmatprep.subr.mxu1 %v25205_v5 }
 0xb40   : > { %19897 = vmatpush3.msra.mxu0 %v25173_v36  ;;  %19908 = vmatprep.mubr.f32.mxu0 %v25248_v52  ;;  %v15962_v36 = vld [vmem:[%s26083_s3 + $0xd0] sm:$0xff] }
 0xb41   : > { %19920 = vmatpush3.msra.mxu1 %v25205_v5  ;;  %19898 = vmatprep.subr.mxu0 %v25190_v40  ;;  %v25368_v7 = vand.u32 4294901760, %v15962_v36 }
 0xb42   : > { %19921 = vmatprep.subr.mxu1 %v25226_v12  ;;  %19899 = vmatpush3.msra.mxu0 %v25190_v40  ;;  %v15961_v40 = vld [vmem:[%s26083_s3 + $0xc8] sm:$0xff] }
 0xb43   : > { %19922 = vmatpush3.msra.mxu1 %v25226_v12  ;;  %19900 = vmatprep.subr.mxu0 %v25203_v41 }
 0xb44   : > { %19924 = vmatmul.mubr.f32.vlgmr.msra.gmra.mxu1 %v25302_v22  ;;  %19941 = vmatprep.subr.mxu1 %v25154_v56 }
 0xb45   : > { %19901 = vmatpush3.msra.mxu0 %v25203_v41  ;;  %19942 = vmatpush3.msra.mxu1 %v25154_v56  ;;  %v25378_v41 = vsub.f32 %v15963_v24, %v25356_v0  ;;  %v25380_v56 = vand.u32 4294901760, %v15961_v40 }
 0xb46   : > { %19953 = vmatprep.mubr.f32.mxu1 %v25224_v23  ;;  %19902 = vmatprep.subr.mxu0 %v25218_v61 }
 0xb47   : > { %19943 = vmatprep.subr.mxu1 %v25168_v42  ;;  %19903 = vmatpush3.msra.mxu0 %v25218_v61  ;;  %v25393_v61 = vsub.f32 %v15962_v36, %v25368_v7  ;;  %v25407_v51 = vsub.f32 %v15961_v40, %v25380_v56  ;;  %v15954_v40 = vld [vmem:[%s26083_s3 + $0x90] sm:$0xff] }
 0xb48   : > { %19944 = vmatpush3.msra.mxu1 %v25168_v42  ;;  %19904 = vmatprep.subr.mxu0 %v25234_v34  ;;  %v25399_v42 = vand.u32 4294901760, %v15960_v33 }
 0xb49   : > { %19945 = vmatprep.subr.mxu1 %v25180_v57  ;;  %19905 = vmatpush3.msra.mxu0 %v25234_v34  ;;  %v25404_v34 = vand.u32 4294901760, %v25378_v41  ;;  %v25416_v30 = vand.u32 4294901760, %v25393_v61  ;;  %v25428_v28 = vand.u32 4294901760, %v25407_v51 }
 0xb4a   : > { %19946 = vmatpush3.msra.mxu1 %v25180_v57  ;;  %19906 = vmatprep.subr.mxu0 %v25251_v47  ;;  %v13091_v57 = vsub.f32 %v25366_v9, %v25390_v15  ;;  %v25421_v21 = vsub.f32 %v15960_v33, %v25399_v42 }
 0xb4b   : > { %19947 = vmatprep.subr.mxu1 %v25192_v19  ;;  %19907 = vmatpush3.msra.mxu0 %v25251_v47  ;;  %v13085_v47 = vand.u32 4294901760, %v13084_v16 }
 0xb4c   : > { %19948 = vmatpush3.msra.mxu1 %v25192_v19  ;;  %19909 = vmatmul.mubr.f32.vlgmr.msra.gmra.mxu0 %v25294_v25  ;;  %v13098_v19 = vsub.f32 %v25378_v41, %v25404_v34  ;;  %v25438_v49 = vand.u32 4294901760, %v25421_v21 }
 0xb4d   : > { %19926 = vmatprep.subr.mxu0 %v25197_v11  ;;  %19949 = vmatprep.subr.mxu1 %v25205_v5 }
 0xb4e   : > { %19927 = vmatpush3.msra.mxu0 %v25197_v11  ;;  %19938 = vmatprep.mubr.f32.mxu0 %v25224_v23  ;;  %v13092_v11 = vand.u32 4294901760, %v13091_v57  ;;  %v13099_v48 = vand.u32 4294901760, %v13098_v19  ;;  %v13119_v6 = vsub.f32 %v25421_v21, %v25438_v49 }
 0xb4f   : > { %19950 = vmatpush3.msra.mxu1 %v25205_v5  ;;  %19928 = vmatprep.subr.mxu0 %v25215_v43  ;;  %v13105_v5 = vsub.f32 %v25393_v61, %v25416_v30 }
 0xb50   : > { %19951 = vmatprep.subr.mxu1 %v25226_v12  ;;  %19929 = vmatpush3.msra.mxu0 %v25215_v43  ;;  %v13112_v43 = vsub.f32 %v25407_v51, %v25428_v28 }
 0xb51   : > { %19952 = vmatpush3.msra.mxu1 %v25226_v12  ;;  %19930 = vmatprep.subr.mxu0 %v25231_v10  ;;  %v13106_v12 = vand.u32 4294901760, %v13105_v5 }
 0xb52   : > { %19954 = vmatmul.mubr.f32.vlgmr.msra.gmra.mxu1 %v25285_v32  ;;  %19971 = vmatprep.subr.mxu1 %v13085_v47 }
 0xb53   : > { %19931 = vmatpush3.msra.mxu0 %v25231_v10  ;;  %19972 = vmatpush3.msra.mxu1 %v13085_v47  ;;  %v13113_v10 = vand.u32 4294901760, %v13112_v43 }
 0xb54   : > { %19983 = vmatprep.mubr.f32.mxu1 %v24942_v63  ;;  %19932 = vmatprep.subr.mxu0 %v25243_v58 }
 0xb55   : > { %19973 = vmatprep.subr.mxu1 %v13092_v11  ;;  %19933 = vmatpush3.msra.mxu0 %v25243_v58  ;;  %v13120_v58 = vand.u32 4294901760, %v13119_v6 }
 0xb56   : > { %19974 = vmatpush3.msra.mxu1 %v13092_v11  ;;  %19934 = vmatprep.subr.mxu0 %v25258_v27 }
 0xb57   : > { %19975 = vmatprep.subr.mxu1 %v13099_v48  ;;  %19935 = vmatpush3.msra.mxu0 %v25258_v27  ;;  %v15958_v27 = vld [vmem:[%s26083_s3 + $0xb0] sm:$0xff] }
 0xb58   : > { %19976 = vmatpush3.msra.mxu1 %v13099_v48  ;;  %19936 = vmatprep.subr.mxu0 %v25271_v45 }
 0xb59   : > { %19977 = vmatprep.subr.mxu1 %v13106_v12  ;;  %19937 = vmatpush3.msra.mxu0 %v25271_v45  ;;  %v15957_v45 = vld [vmem:[%s26083_s3 + $0xa8] sm:$0xff] }
 0xb5a   : > { %19978 = vmatpush3.msra.mxu1 %v13106_v12  ;;  %19939 = vmatmul.mubr.f32.vlgmr.msra.gmra.mxu0 %v25285_v32  ;;  %v25506_v8 = vand.u32 4294901760, %v15957_v45 }
 0xb5b   : > { %19956 = vmatprep.subr.mxu0 %v25330_v4  ;;  %19979 = vmatprep.subr.mxu1 %v13113_v10 }
 0xb5c   : > { %19957 = vmatpush3.msra.mxu0 %v25330_v4  ;;  %19968 = vmatprep.mubr.f32.mxu0 %v24971_v31  ;;  %v15959_v31 = vld [vmem:[%s26083_s3 + $0xb8] sm:$0xff]  ;;  %v25528_v36 = vsub.f32 %v15957_v45, %v25506_v8 }
 0xb5d   : > { %19980 = vmatpush3.msra.mxu1 %v13113_v10  ;;  %19958 = vmatprep.subr.mxu0 %v25344_v53  ;;  %v15966_v10 = vld [vmem:[%s26083_s3 + $0xf0] sm:$0xff] }
 0xb5e   : > { %19981 = vmatprep.subr.mxu1 %v13120_v58  ;;  %19959 = vmatpush3.msra.mxu0 %v25344_v53 }
 0xb5f   : > { %19982 = vmatpush3.msra.mxu1 %v13120_v58  ;;  %19960 = vmatprep.subr.mxu0 %v25356_v0 }
 0xb60   : > { %19984 = vmatmul.mubr.f32.vlgmr.msra.gmra.mxu1 %v24939_v13  ;;  %20001 = vmatprep.subr.mxu1 %v25330_v4 }
 0xb61   : > { %19961 = vmatpush3.msra.mxu0 %v25356_v0  ;;  %20002 = vmatpush3.msra.mxu1 %v25330_v4 }
 0xb62   : > { %20013 = vmatprep.mubr.f32.mxu1 %v24957_v37  ;;  %19962 = vmatprep.subr.mxu0 %v25368_v7  ;;  %v25480_v37 = vand.u32 4294901760, %v15959_v31 }
 0xb63   : > { %20003 = vmatprep.subr.mxu1 %v25344_v53  ;;  %19963 = vmatpush3.msra.mxu0 %v25368_v7 }
 0xb64   : > { %20004 = vmatpush3.msra.mxu1 %v25344_v53  ;;  %19964 = vmatprep.subr.mxu0 %v25380_v56  ;;  %v25499_v50 = vsub.f32 %v15959_v31, %v25480_v37 }
 0xb65   : > { %20005 = vmatprep.subr.mxu1 %v25356_v0  ;;  %19965 = vmatpush3.msra.mxu0 %v25380_v56 }
 0xb66   : > { %20006 = vmatpush3.msra.mxu1 %v25356_v0  ;;  %19966 = vmatprep.subr.mxu0 %v25399_v42 }
 0xb67   : > { %20007 = vmatprep.subr.mxu1 %v25368_v7  ;;  %19967 = vmatpush3.msra.mxu0 %v25399_v42 }
 0xb68   : > { %20008 = vmatpush3.msra.mxu1 %v25368_v7  ;;  %19969 = vmatmul.mubr.f32.vlgmr.msra.gmra.mxu0 %v24974_v20  ;;  %v25494_v20 = vand.u32 4294901760, %v15958_v27 }
 0xb69   : > { %19986 = vmatprep.subr.mxu0 %v25349_v44  ;;  %20009 = vmatprep.subr.mxu1 %v25380_v56 }
 0xb6a   : > { %19987 = vmatpush3.msra.mxu0 %v25349_v44  ;;  %19998 = vmatprep.mubr.f32.mxu0 %v24949_v54  ;;  %v15956_v54 = vld [vmem:[%s26083_s3 + $0xa0] sm:$0xff]  ;;  %v25516_v24 = vsub.f32 %v15958_v27, %v25494_v20  ;;  %v25699_v27 = vand.u32 4294901760, %v15966_v10 }
 0xb6b   : > { %20010 = vmatpush3.msra.mxu1 %v25380_v56  ;;  %19988 = vmatprep.subr.mxu0 %v25366_v9  ;;  %v25518_v44 = vand.u32 4294901760, %v15956_v54 }
 0xb6c   : > { %20011 = vmatprep.subr.mxu1 %v25399_v42  ;;  %19989 = vmatpush3.msra.mxu0 %v25366_v9  ;;  %v25540_v9 = vand.u32 4294901760, %v25516_v24 }
 0xb6d   : > { %20012 = vmatpush3.msra.mxu1 %v25399_v42  ;;  %19990 = vmatprep.subr.mxu0 %v25378_v41 }
 0xb6e   : > { %20014 = vmatmul.mubr.f32.vlgmr.msra.gmra.mxu1 %v24952_v35  ;;  %20031 = vmatprep.subr.mxu1 %v25330_v4  ;;  %v25523_v35 = vand.u32 4294901760, %v25499_v50 }
 0xb6f   : > { %19991 = vmatpush3.msra.mxu0 %v25378_v41  ;;  %20032 = vmatpush3.msra.mxu1 %v25330_v4  ;;  %v25530_v4 = vand.u32 4294901760, %v15955_v2  ;;  %v25543_v41 = vsub.f32 %v15956_v54, %v25518_v44 }
 0xb70   : > { %20043 = vmatprep.mubr.f32.mxu1 %v24942_v63  ;;  %19992 = vmatprep.subr.mxu0 %v25393_v61  ;;  %v13638_v33 = vsub.f32 %v25499_v50, %v25523_v35 }
 0xb71   : > { %20033 = vmatprep.subr.mxu1 %v25344_v53  ;;  %19993 = vmatpush3.msra.mxu0 %v25393_v61  ;;  %v25554_v61 = vand.u32 4294901760, %v25528_v36  ;;  %v25557_v16 = vsub.f32 %v15955_v2, %v25530_v4  ;;  %v25721_v2 = vsub.f32 %v15966_v10, %v25699_v27 }
 0xb72   : > { %20034 = vmatpush3.msra.mxu1 %v25344_v53  ;;  %19994 = vmatprep.subr.mxu0 %v25407_v51  ;;  %v25549_v53 = vand.u32 4294901760, %v15954_v40  ;;  %v13639_v57 = vand.u32 4294901760, %v13638_v33 }
 0xb73   : > { %20035 = vmatprep.subr.mxu1 %v25356_v0  ;;  %19995 = vmatpush3.msra.mxu0 %v25407_v51  ;;  %v25566_v51 = vand.u32 4294901760, %v25543_v41 }
 0xb74   : > { %20036 = vmatpush3.msra.mxu1 %v25356_v0  ;;  %19996 = vmatprep.subr.mxu0 %v25421_v21  ;;  %v13645_v0 = vsub.f32 %v25516_v24, %v25540_v9  ;;  %v25571_v47 = vsub.f32 %v15954_v40, %v25549_v53 }
 0xb75   : > { %20037 = vmatprep.subr.mxu1 %v25368_v7  ;;  %19997 = vmatpush3.msra.mxu0 %v25421_v21 }
 0xb76   : > { %20038 = vmatpush3.msra.mxu1 %v25368_v7  ;;  %19999 = vmatmul.mubr.f32.vlgmr.msra.gmra.mxu0 %v24945_v46  ;;  %v13652_v46 = vsub.f32 %v25528_v36, %v25554_v61  ;;  %v25578_v7 = vand.u32 4294901760, %v25557_v16 }
 0xb77   : > { %20016 = vmatprep.subr.mxu0 %v25373_v18  ;;  %20039 = vmatprep.subr.mxu1 %v25380_v56 }
 0xb78   : > { %20017 = vmatpush3.msra.mxu0 %v25373_v18  ;;  %20028 = vmatprep.mubr.f32.mxu0 %v24942_v63  ;;  %v13646_v63 = vand.u32 4294901760, %v13645_v0  ;;  %v13659_v18 = vsub.f32 %v25543_v41, %v25566_v51  ;;  %v13653_v21 = vand.u32 4294901760, %v13652_v46 }
 0xb79   : > { %20040 = vmatpush3.msra.mxu1 %v25380_v56  ;;  %20018 = vmatprep.subr.mxu0 %v25390_v15  ;;  %v25588_v56 = vand.u32 4294901760, %v25571_v47 }
 0xb7a   : > { %20041 = vmatprep.subr.mxu1 %v25399_v42  ;;  %20019 = vmatpush3.msra.mxu0 %v25390_v15  ;;  %v13666_v15 = vsub.f32 %v25557_v16, %v25578_v7 }
 0xb7b   : > { %20042 = vmatpush3.msra.mxu1 %v25399_v42  ;;  %20020 = vmatprep.subr.mxu0 %v25404_v34  ;;  %v13660_v42 = vand.u32 4294901760, %v13659_v18  ;;  %v13673_v19 = vsub.f32 %v25571_v47, %v25588_v56 }
 0xb7c   : > { %20044 = vmatmul.mubr.f32.vlgmr.msra.gmra.mxu1 %v24939_v13  ;;  %20061 = vmatprep.subr.mxu1 %v13639_v57 }
 0xb7d   : > { %20021 = vmatpush3.msra.mxu0 %v25404_v34  ;;  %20062 = vmatpush3.msra.mxu1 %v13639_v57  ;;  %v13667_v34 = vand.u32 4294901760, %v13666_v15 }
 0xb7e   : > { %20073 = vmatprep.mubr.f32.mxu1 %v25048_v38  ;;  %20022 = vmatprep.subr.mxu0 %v25416_v30 }
 0xb7f   : > { %20063 = vmatprep.subr.mxu1 %v13646_v63  ;;  %20023 = vmatpush3.msra.mxu0 %v25416_v30  ;;  %v13674_v30 = vand.u32 4294901760, %v13673_v19 }
 0xb80   : > { %20064 = vmatpush3.msra.mxu1 %v13646_v63  ;;  %20024 = vmatprep.subr.mxu0 %v25428_v28 }
 0xb81   : > { %20065 = vmatprep.subr.mxu1 %v13653_v21  ;;  %20025 = vmatpush3.msra.mxu0 %v25428_v28  ;;  %v15969_v28 = vld [vmem:[%s26083_s3 + $0x108] sm:$0xff] }
 0xb82   : > { %20066 = vmatpush3.msra.mxu1 %v13653_v21  ;;  %20026 = vmatprep.subr.mxu0 %v25438_v49  ;;  %v25656_v5 = vand.u32 4294901760, %v15969_v28 }
 0xb83   : > { %20067 = vmatprep.subr.mxu1 %v13660_v42  ;;  %20027 = vmatpush3.msra.mxu0 %v25438_v49  ;;  %v15967_v49 = vld [vmem:[%s26083_s3 + $0xf8] sm:$0xff] }
 0xb84   : > { %20068 = vmatpush3.msra.mxu1 %v13660_v42  ;;  %20029 = vmatmul.mubr.f32.vlgmr.msra.gmra.mxu0 %v24939_v13  ;;  %v15971_v13 = vld [vmem:[%s26083_s3 + $0x118] sm:$0xff]  ;;  %v25678_v12 = vsub.f32 %v15969_v28, %v25656_v5  ;;  %v25680_v6 = vand.u32 4294901760, %v15967_v49 }
 0xb85   : > { %20046 = vmatprep.subr.mxu0 %v25480_v37  ;;  %20069 = vmatprep.subr.mxu1 %v13667_v34 }
 0xb86   : > { %20047 = vmatpush3.msra.mxu0 %v25480_v37  ;;  %20058 = vmatprep.mubr.f32.mxu0 %v25115_v1  ;;  %v15970_v1 = vld [vmem:[%s26083_s3 + $0x110] sm:$0xff]  ;;  %v25704_v45 = vand.u32 4294901760, %v25678_v12 }
 0xb87   : > { %20070 = vmatpush3.msra.mxu1 %v13667_v34  ;;  %20048 = vmatprep.subr.mxu0 %v25494_v20 }
 0xb88   : > { %20071 = vmatprep.subr.mxu1 %v13674_v30  ;;  %20049 = vmatpush3.msra.mxu0 %v25494_v20 }
 0xb89   : > { %20072 = vmatpush3.msra.mxu1 %v13674_v30  ;;  %20050 = vmatprep.subr.mxu0 %v25506_v8 }
 0xb8a   : > { %20074 = vmatmul.mubr.f32.vlgmr.msra.gmra.mxu1 %v25109_v60  ;;  %20091 = vmatprep.subr.mxu1 %v25480_v37 }
 0xb8b   : > { %20051 = vmatpush3.msra.mxu0 %v25506_v8  ;;  %20092 = vmatpush3.msra.mxu1 %v25480_v37 }
 0xb8c   : > { %20103 = vmatprep.mubr.f32.mxu1 %v25092_v55  ;;  %20052 = vmatprep.subr.mxu0 %v25518_v44  ;;  %v25630_v55 = vand.u32 4294901760, %v15971_v13 }
 0xb8d   : > { %20093 = vmatprep.subr.mxu1 %v25494_v20  ;;  %20053 = vmatpush3.msra.mxu0 %v25518_v44 }
 0xb8e   : > { %20094 = vmatpush3.msra.mxu1 %v25494_v20  ;;  %20054 = vmatprep.subr.mxu0 %v25530_v4  ;;  %v25649_v11 = vsub.f32 %v15971_v13, %v25630_v55 }
 0xb8f   : > { %20095 = vmatprep.subr.mxu1 %v25506_v8  ;;  %20055 = vmatpush3.msra.mxu0 %v25530_v4 }
 0xb90   : > { %20096 = vmatpush3.msra.mxu1 %v25506_v8  ;;  %20056 = vmatprep.subr.mxu0 %v25549_v53 }
 0xb91   : > { %20097 = vmatprep.subr.mxu1 %v25518_v44  ;;  %20057 = vmatpush3.msra.mxu0 %v25549_v53 }
 0xb92   : > { %20098 = vmatpush3.msra.mxu1 %v25518_v44  ;;  %20059 = vmatmul.mubr.f32.vlgmr.msra.gmra.mxu0 %v25148_v62  ;;  %v25644_v62 = vand.u32 4294901760, %v15970_v1 }
 0xb93   : > { %20076 = vmatprep.subr.mxu0 %v25499_v50  ;;  %20099 = vmatprep.subr.mxu1 %v25530_v4 }
 0xb94   : > { %20077 = vmatpush3.msra.mxu0 %v25499_v50  ;;  %20088 = vmatprep.mubr.f32.mxu0 %v25072_v14  ;;  %v15968_v14 = vld [vmem:[%s26083_s3 + $0x100] sm:$0xff]  ;;  %v25666_v48 = vsub.f32 %v15970_v1, %v25644_v62 }
 0xb95   : > { %20100 = vmatpush3.msra.mxu1 %v25530_v4  ;;  %20078 = vmatprep.subr.mxu0 %v25516_v24  ;;  %v25668_v43 = vand.u32 4294901760, %v15968_v14 }
 0xb96   : > { %20101 = vmatprep.subr.mxu1 %v25549_v53  ;;  %20079 = vmatpush3.msra.mxu0 %v25516_v24  ;;  %v25690_v58 = vand.u32 4294901760, %v25666_v48 }
 0xb97   : > { %20102 = vmatpush3.msra.mxu1 %v25549_v53  ;;  %20080 = vmatprep.subr.mxu0 %v25528_v36  ;;  %v25693_v31 = vsub.f32 %v15968_v14, %v25668_v43 }
 0xb98   : > { %20104 = vmatmul.mubr.f32.vlgmr.msra.gmra.mxu1 %v25126_v39  ;;  %20121 = vmatprep.subr.mxu1 %v25480_v37  ;;  %v25673_v39 = vand.u32 4294901760, %v25649_v11  ;;  %v14206_v50 = vsub.f32 %v25666_v48, %v25690_v58 }
 0xb99   : > { %20081 = vmatpush3.msra.mxu0 %v25528_v36  ;;  %20122 = vmatpush3.msra.mxu1 %v25480_v37  ;;  %v25716_v54 = vand.u32 4294901760, %v25693_v31 }
 0xb9a   : > { %20133 = vmatprep.mubr.f32.mxu1 %v25048_v38  ;;  %20082 = vmatprep.subr.mxu0 %v25543_v41  ;;  %v14199_v37 = vsub.f32 %v25649_v11, %v25673_v39 }
 0xb9b   : > { %20123 = vmatprep.subr.mxu1 %v25494_v20  ;;  %20083 = vmatpush3.msra.mxu0 %v25543_v41 }
 0xb9c   : > { %20124 = vmatpush3.msra.mxu1 %v25494_v20  ;;  %20084 = vmatprep.subr.mxu0 %v25557_v16  ;;  %v25707_v20 = vsub.f32 %v15967_v49, %v25680_v6 }
 0xb9d   : > { %20125 = vmatprep.subr.mxu1 %v25506_v8  ;;  %20085 = vmatpush3.msra.mxu0 %v25557_v16 }
 0xb9e   : > { %20126 = vmatpush3.msra.mxu1 %v25506_v8  ;;  %20086 = vmatprep.subr.mxu0 %v25571_v47  ;;  %v14200_v8 = vand.u32 4294901760, %v14199_v37  ;;  %v25728_v24 = vand.u32 4294901760, %v25707_v20 }
 0xb9f   : > { %20127 = vmatprep.subr.mxu1 %v25518_v44  ;;  %20087 = vmatpush3.msra.mxu0 %v25571_v47 }
 0xba0   : > { %20128 = vmatpush3.msra.mxu1 %v25518_v44  ;;  %20089 = vmatmul.mubr.f32.vlgmr.msra.gmra.mxu0 %v25118_v17  ;;  %v14213_v17 = vsub.f32 %v25678_v12, %v25704_v45  ;;  %v14220_v44 = vsub.f32 %v25693_v31, %v25716_v54 }
 0xba1   : > { %20106 = vmatprep.subr.mxu0 %v25523_v35  ;;  %20129 = vmatprep.subr.mxu1 %v25530_v4 }
 0xba2   : > { %20107 = vmatpush3.msra.mxu0 %v25523_v35  ;;  %20118 = vmatprep.mubr.f32.mxu0 %v25048_v38  ;;  %v14207_v38 = vand.u32 4294901760, %v14206_v50  ;;  %v25738_v35 = vand.u32 4294901760, %v25721_v2  ;;  %v14214_v36 = vand.u32 4294901760, %v14213_v17  ;;  %v14221_v40 = vand.u32 4294901760, %v14220_v44 }
 0xba3   : > { %20130 = vmatpush3.msra.mxu1 %v25530_v4  ;;  %20108 = vmatprep.subr.mxu0 %v25540_v9  ;;  %v14227_v4 = vsub.f32 %v25707_v20, %v25728_v24 }
 0xba4   : > { %20131 = vmatprep.subr.mxu1 %v25549_v53  ;;  %20109 = vmatpush3.msra.mxu0 %v25540_v9  ;;  %v19715_v9 = vpop.f32.mrf.mxu1  ;;  %v14234_v41 = vsub.f32 %v25721_v2, %v25738_v35 }
 0xba5   : > { %20132 = vmatpush3.msra.mxu1 %v25549_v53  ;;  %20110 = vmatprep.subr.mxu0 %v25554_v61  ;;  %v14228_v33 = vand.u32 4294901760, %v14227_v4 }
 0xba6   : > { %20134 = vmatmul.mubr.f32.vlgmr.msra.gmra.mxu1 %v25109_v60  ;;  %20151 = vmatprep.subr.mxu1 %v14200_v8  ;;  %v11455_v16 = vpop.f32.mrf.mxu1 }
 0xba7   : > { %20111 = vmatpush3.msra.mxu0 %v25554_v61  ;;  %20152 = vmatpush3.msra.mxu1 %v14200_v8 }
 0xba8   : > { %20163 = vmatprep.mubr.f32.mxu1 %v25224_v23  ;;  %20112 = vmatprep.subr.mxu0 %v25566_v51 }
 0xba9   : > { %20153 = vmatprep.subr.mxu1 %v14207_v38  ;;  %20113 = vmatpush3.msra.mxu0 %v25566_v51  ;;  %v14235_v51 = vand.u32 4294901760, %v14234_v41 }
 0xbaa   : > { %20154 = vmatpush3.msra.mxu1 %v14207_v38  ;;  %20114 = vmatprep.subr.mxu0 %v25578_v7 }
 0xbab   : > { %20155 = vmatprep.subr.mxu1 %v14214_v36  ;;  %20115 = vmatpush3.msra.mxu0 %v25578_v7  ;;  %v19700_v53 = vpop.f32.mrf.mxu0 }
 0xbac   : > { %20156 = vmatpush3.msra.mxu1 %v14214_v36  ;;  %20116 = vmatprep.subr.mxu0 %v25588_v56  ;;  %v11462_v61 = vadd.f32 %v19715_v9, %v19700_v53 }
 0xbad   : > { %20157 = vmatprep.subr.mxu1 %v14221_v40  ;;  %20117 = vmatpush3.msra.mxu0 %v25588_v56  ;;  %v11344_v0 = vpop.f32.mrf.mxu0 }
 0xbae   : > { %20158 = vmatpush3.msra.mxu1 %v14221_v40  ;;  %20119 = vmatmul.mubr.f32.vlgmr.msra.gmra.mxu0 %v25109_v60  ;;  %v11456_v57 = vadd.f32 %v11455_v16, %v11344_v0 }
 0xbaf   : > { %20136 = vmatprep.subr.mxu0 %v25630_v55  ;;  %20159 = vmatprep.subr.mxu1 %v14228_v33 }
 0xbb0   : > { %20137 = vmatpush3.msra.mxu0 %v25630_v55  ;;  %20148 = vmatprep.mubr.f32.mxu0 %v25291_v29  ;;  %v19745_v60 = vpop.f32.mrf.mxu1 }
 0xbb1   : > { %20160 = vmatpush3.msra.mxu1 %v14228_v33  ;;  %20138 = vmatprep.subr.mxu0 %v25644_v62 }
 0xbb2   : > { %20161 = vmatprep.subr.mxu1 %v14235_v51  ;;  %20139 = vmatpush3.msra.mxu0 %v25644_v62  ;;  %v11631_v63 = vpop.f32.mrf.mxu1 }
 0xbb3   : > { %20162 = vmatpush3.msra.mxu1 %v14235_v51  ;;  %20140 = vmatprep.subr.mxu0 %v25656_v5 }
 0xbb4   : > { %20164 = vmatmul.mubr.f32.vlgmr.msra.gmra.mxu1 %v25285_v32  ;;  %20181 = vmatprep.subr.mxu1 %v25630_v55 }
 0xbb5   : > { %20141 = vmatpush3.msra.mxu0 %v25656_v5  ;;  %20182 = vmatpush3.msra.mxu1 %v25630_v55 }
 0xbb6   : > { %20193 = vmatprep.mubr.f32.mxu1 %v25268_v26  ;;  %20142 = vmatprep.subr.mxu0 %v25668_v43 }
 0xbb7   : > { %20183 = vmatprep.subr.mxu1 %v25644_v62  ;;  %20143 = vmatpush3.msra.mxu0 %v25668_v43 }
 0xbb8   : > { %20184 = vmatpush3.msra.mxu1 %v25644_v62  ;;  %20144 = vmatprep.subr.mxu0 %v25680_v6  ;;  %v19730_v29 = vpop.f32.mrf.mxu0 }
 0xbb9   : > { %20185 = vmatprep.subr.mxu1 %v25656_v5  ;;  %20145 = vmatpush3.msra.mxu0 %v25680_v6  ;;  %v11553_v47 = vadd.f32 %v19730_v29, %v11462_v61 }
 0xbba   : > { %20186 = vmatpush3.msra.mxu1 %v25656_v5  ;;  %20146 = vmatprep.subr.mxu0 %v25699_v27  ;;  %v11545_v26 = vpop.f32.mrf.mxu0 }
 0xbbb   : > { %20187 = vmatprep.subr.mxu1 %v25668_v43  ;;  %20147 = vmatpush3.msra.mxu0 %v25699_v27  ;;  %v11546_v46 = vadd.f32 %v11545_v26, %v11456_v57  ;;  %v11640_v7 = vadd.f32 %v19745_v60, %v11553_v47 }
 0xbbc   : > { %20188 = vmatpush3.msra.mxu1 %v25668_v43  ;;  %20149 = vmatmul.mubr.f32.vlgmr.msra.gmra.mxu0 %v25324_v59 }
 0xbbd   : > { %20166 = vmatprep.subr.mxu0 %v25649_v11  ;;  %20189 = vmatprep.subr.mxu1 %v25680_v6  ;;  %v11632_v18 = vadd.f32 %v11631_v63, %v11546_v46 }
 0xbbe   : > { %20167 = vmatpush3.msra.mxu0 %v25649_v11  ;;  %20178 = vmatprep.mubr.f32.mxu0 %v25248_v52  ;;  %v19775_v52 = vpop.f32.mrf.mxu1 }
 0xbbf   : > { %20190 = vmatpush3.msra.mxu1 %v25680_v6  ;;  %20168 = vmatprep.subr.mxu0 %v25666_v48 }
 0xbc0   : > { %20191 = vmatprep.subr.mxu1 %v25699_v27  ;;  %20169 = vmatpush3.msra.mxu0 %v25666_v48  ;;  %v11811_v42 = vpop.f32.mrf.mxu1 }
 0xbc1   : > { %20192 = vmatpush3.msra.mxu1 %v25699_v27  ;;  %20170 = vmatprep.subr.mxu0 %v25678_v12 }
 0xbc2   : > { %20194 = vmatmul.mubr.f32.vlgmr.msra.gmra.mxu1 %v25302_v22  ;;  %20211 = vmatprep.subr.mxu1 %v25630_v55 }
 0xbc3   : > { %20171 = vmatpush3.msra.mxu0 %v25678_v12  ;;  %20212 = vmatpush3.msra.mxu1 %v25630_v55 }
 0xbc4   : > { %20223 = vmatprep.mubr.f32.mxu1 %v25224_v23  ;;  %20172 = vmatprep.subr.mxu0 %v25693_v31 }
 0xbc5   : > { %20213 = vmatprep.subr.mxu1 %v25644_v62  ;;  %20173 = vmatpush3.msra.mxu0 %v25693_v31 }
 0xbc6   : > { %20214 = vmatpush3.msra.mxu1 %v25644_v62  ;;  %20174 = vmatprep.subr.mxu0 %v25707_v20  ;;  %v19760_v22 = vpop.f32.mrf.mxu0 }
 0xbc7   : > { %20215 = vmatprep.subr.mxu1 %v25656_v5  ;;  %20175 = vmatpush3.msra.mxu0 %v25707_v20  ;;  %v11735_v59 = vadd.f32 %v19760_v22, %v11640_v7 }
 0xbc8   : > { %20216 = vmatpush3.msra.mxu1 %v25656_v5  ;;  %20176 = vmatprep.subr.mxu0 %v25721_v2  ;;  %v11728_v56 = vpop.f32.mrf.mxu0 }
 0xbc9   : > { %20217 = vmatprep.subr.mxu1 %v25668_v43  ;;  %20177 = vmatpush3.msra.mxu0 %v25721_v2  ;;  %v11729_v21 = vadd.f32 %v11728_v56, %v11632_v18  ;;  %v11818_v15 = vadd.f32 %v19775_v52, %v11735_v59 }
 0xbca   : > { %20218 = vmatpush3.msra.mxu1 %v25668_v43  ;;  %20179 = vmatmul.mubr.f32.vlgmr.msra.gmra.mxu0 %v25294_v25 }
 0xbcb   : > { %20196 = vmatprep.subr.mxu0 %v25673_v39  ;;  %20219 = vmatprep.subr.mxu1 %v25680_v6  ;;  %v11812_v19 = vadd.f32 %v11811_v42, %v11729_v21 }
 0xbcc   : > { %20197 = vmatpush3.msra.mxu0 %v25673_v39  ;;  %20208 = vmatprep.mubr.f32.mxu0 %v25224_v23  ;;  %v19805_v23 = vpop.f32.mrf.mxu1 }
 0xbcd   : > { %20220 = vmatpush3.msra.mxu1 %v25680_v6  ;;  %20198 = vmatprep.subr.mxu0 %v25690_v58 }
 0xbce   : > { %20221 = vmatprep.subr.mxu1 %v25699_v27  ;;  %20199 = vmatpush3.msra.mxu0 %v25690_v58  ;;  %v12015_v1 = vpop.f32.mrf.mxu1 }
 0xbcf   : > { %20222 = vmatpush3.msra.mxu1 %v25699_v27  ;;  %20200 = vmatprep.subr.mxu0 %v25704_v45 }
 0xbd0   : > { %20224 = vmatmul.mubr.f32.vlgmr.msra.gmra.mxu1 %v25285_v32  ;;  %20201 = vmatpush3.msra.mxu0 %v25704_v45 }
 0xbd1   : > { %20202 = vmatprep.subr.mxu0 %v25716_v54  ;;  %20239 = vmatprep.subr.mxu1 %v20417_v3 }
 0xbd2   : > { %20203 = vmatpush3.msra.mxu0 %v25716_v54  ;;  %20243 = vmatprep.mubr.msk.f32.mxu1 %vm20418_vm0, %v20417_v3 }
 0xbd3   : > { %20204 = vmatprep.subr.mxu0 %v25728_v24 }
 0xbd4   : > { %20205 = vmatpush3.msra.mxu0 %v25728_v24  ;;  %v19790_v25 = vpop.f32.mrf.mxu0 }
 0xbd5   : > { %20206 = vmatprep.subr.mxu0 %v25738_v35  ;;  %v11915_v34 = vadd.f32 %v19790_v25, %v11818_v15 }
 0xbd6   : > { %20207 = vmatpush3.msra.mxu0 %v25738_v35  ;;  %v11904_v30 = vpop.f32.mrf.mxu0 }
 0xbd7   : > { %20209 = vmatmul.mubr.f32.vlgmr.msra.gmra.mxu0 %v25285_v32  ;;  %v11905_v13 = vadd.f32 %v11904_v30, %v11812_v19  ;;  %v12022_v55 = vadd.f32 %v19805_v23, %v11915_v34  ;;  %20226 = vmatprep.subr.mxu0 %v20417_v3 }
 0xbd8   : > { %20230 = vmatprep.mubr.msk.f32.mxu0 %vm20418_vm0, %v20417_v3 }
 0xbd9   : > { %v12016_v28 = vadd.f32 %v12015_v1, %v11905_v13 }
 0xbda   : > { %v19835_v62 = vpop.f32.mrf.mxu1 }
 0xbdc   : > { %v12191_v43 = vpop.f32.mrf.mxu1 }
 0xbe2   : > { %v19820_v11 = vpop.f32.mrf.mxu0 }
 0xbe3   : > { %v12113_v14 = vadd.f32 %v19820_v11, %v12022_v55 }
 0xbe4   : > { %v12105_v5 = vpop.f32.mrf.mxu0 }
 0xbe5   : > { %v12106_v49 = vadd.f32 %v12105_v5, %v12016_v28  ;;  %v12200_v48 = vadd.f32 %v19835_v62, %v12113_v14 }
 0xbe7   : > { %v12192_v39 = vadd.f32 %v12191_v43, %v12106_v49 }
 0xbe8   : > { %v19865_v12 = vpop.f32.mrf.mxu1 }
 0xbea   : > { %v12371_v37 = vpop.f32.mrf.mxu1 }
 0xbf0   : > { %v19850_v6 = vpop.f32.mrf.mxu0 }
 0xbf1   : > { %v12295_v32 = vadd.f32 %v19850_v6, %v12200_v48 }
 0xbf2   : > { %v12288_v10 = vpop.f32.mrf.mxu0 }
 0xbf3   : > { %v12378_v58 = vadd.f32 %v19865_v12, %v12295_v32  ;;  %v12289_v31 = vadd.f32 %v12288_v10, %v12192_v39  ;;  %v15972_v10 = vld [vmem:[%s26086_s6 + $0x18] sm:$0xff] }
 0xbf5   : > { %v12372_v27 = vadd.f32 %v12371_v37, %v12289_v31 }
 0xbf6   : > { %v19895_v45 = vpop.f32.mrf.mxu1 }
 0xbf8   : > { %v12584_v54 = vpop.f32.mrf.mxu1 }
 0xbfe   : > { %v19880_v20 = vpop.f32.mrf.mxu0 }
 0xbff   : > { %v12591_v50 = vadd.f32 %v19895_v45, %v19880_v20  ;;  %v14644_v20 = vsel %vm8796_vm14, %v15972_v10, 0 }
 0xc00   : > { %v12473_v8 = vpop.f32.mrf.mxu0 }
 0xc01   : > { %v12585_v2 = vadd.f32 %v12584_v54, %v12473_v8  ;;  %v15973_v54 = vld [vmem:[%s26086_s6 + $0x20] sm:$0xff] }
 0xc04   : > { %v19925_v17 = vpop.f32.mrf.mxu1 }
 0xc06   : > { %v12760_v4 = vpop.f32.mrf.mxu1 }
 0xc0c   : > { %v19910_v24 = vpop.f32.mrf.mxu0 }
 0xc0d   : > { %v12682_v38 = vadd.f32 %v19910_v24, %v12591_v50 }
 0xc0e   : > { %v12674_v44 = vpop.f32.mrf.mxu0 }
 0xc0f   : > { %v12675_v35 = vadd.f32 %v12674_v44, %v12585_v2  ;;  %v12769_v36 = vadd.f32 %v19925_v17, %v12682_v38  ;;  %v25841_v17 = vand.u32 4294901760, %v14644_v20 }
 0xc11   : > { %v12761_v40 = vadd.f32 %v12760_v4, %v12675_v35  ;;  %v14647_v35 = vsel %vm8796_vm14, %v15973_v54, 0 }
 0xc12   : > { %v19955_v9 = vpop.f32.mrf.mxu1 }
 0xc14   : > { %v12940_v0 = vpop.f32.mrf.mxu1 }
 0xc1a   : > { %v19940_v41 = vpop.f32.mrf.mxu0 }
 0xc1b   : > { %v12864_v33 = vadd.f32 %v19940_v41, %v12769_v36 }
 0xc1c   : > { %v12857_v53 = vpop.f32.mrf.mxu0 }
 0xc1d   : > { %v12947_v61 = vadd.f32 %v19955_v9, %v12864_v33  ;;  %v12858_v16 = vadd.f32 %v12857_v53, %v12761_v40  ;;  %v15974_v33 = vld [vmem:[%s26086_s6 + $0x28] sm:$0xff]  ;;  %v25848_v53 = vsub.f32 %v14644_v20, %v25841_v17 }
 0xc1f   : > { %v25830_v51 = vadd.f32 %v12947_v61, %v12378_v58  ;;  %v12941_v57 = vadd.f32 %v12940_v0, %v12858_v16  ;;  %v25850_v61 = vand.u32 4294901760, %v14647_v35 }
 0xc20   : > { %v19985_v47 = vpop.f32.mrf.mxu1 }
 0xc21   : > { %v25832_v60 = vadd.f32 %v12941_v57, %v12372_v27  ;;  %v15210_v54 = vsel %vm4189_vm9, %v25830_v51, 0 }
 0xc22   : > { %v13157_v7 = vpop.f32.mrf.mxu1 }
 0xc28   : > { %v19970_v29 = vpop.f32.mrf.mxu0 }
 0xc29   : > { %v13164_v25 = vadd.f32 %v19985_v47, %v19970_v29  ;;  %v14650_v29 = vsel %vm8796_vm14, %v15974_v33, 0 }
 0xc2a   : > { %v13046_v26 = vpop.f32.mrf.mxu0 }
 0xc2b   : > { %v13158_v30 = vadd.f32 %v13157_v7, %v13046_v26 }
 0xc2e   : > { %v20015_v63 = vpop.f32.mrf.mxu1 }
 0xc30   : > { %v13333_v22 = vpop.f32.mrf.mxu1 }
 0xc36   : > { %v20000_v46 = vpop.f32.mrf.mxu0 }
 0xc37   : > { %v13255_v13 = vadd.f32 %v20000_v46, %v13164_v25 }
 0xc38   : > { %v13247_v18 = vpop.f32.mrf.mxu0 }
 0xc39   : > { %v13248_v28 = vadd.f32 %v13247_v18, %v13158_v30  ;;  %v13342_v11 = vadd.f32 %v20015_v63, %v13255_v13  ;;  %v14724_v18 = vand.u32 4294901760, %v25848_v53 }
 0xc3b   : > { %v13334_v49 = vadd.f32 %v13333_v22, %v13248_v28 }
 0xc3c   : > { %v20045_v59 = vpop.f32.mrf.mxu1 }
 0xc3e   : > { %v13513_v15 = vpop.f32.mrf.mxu1 }
 0xc44   : > { %v20030_v52 = vpop.f32.mrf.mxu0 }
 0xc45   : > { %v13437_v5 = vadd.f32 %v20030_v52, %v13342_v11  ;;  %v25855_v52 = vsub.f32 %v14647_v35, %v25850_v61  ;;  %v12954_v35 = vld [vmem:[%s26086_s6 + $0x10] sm:$0xff] }
 0xc46   : > { %v13430_v56 = vpop.f32.mrf.mxu0 }
 0xc47   : > { %v13431_v39 = vadd.f32 %v13430_v56, %v13334_v49  ;;  %v13520_v6 = vadd.f32 %v20045_v59, %v13437_v5  ;;  %v14734_v30 = vand.u32 4294901760, %v25855_v52 }
 0xc49   : > { %v13514_v31 = vadd.f32 %v13513_v15, %v13431_v39 }
 0xc4a   : > { %v20075_v42 = vpop.f32.mrf.mxu1 }
 0xc4c   : > { %v13711_v34 = vpop.f32.mrf.mxu1 }
 0xc52   : > { %v20060_v21 = vpop.f32.mrf.mxu0 }
 0xc53   : > { %v13611_v58 = vadd.f32 %v20060_v21, %v13520_v6  ;;  %v25857_v21 = vand.u32 4294901760, %v14650_v29 }
 0xc54   : > { %v13600_v19 = vpop.f32.mrf.mxu0 }
 0xc55   : > { %v13601_v45 = vadd.f32 %v13600_v19, %v13514_v31  ;;  %v13718_v8 = vadd.f32 %v20075_v42, %v13611_v58  ;;  %v25864_v28 = vsub.f32 %v14650_v29, %v25857_v21 }
 0xc57   : > { %v13712_v38 = vadd.f32 %v13711_v34, %v13601_v45  ;;  %v14725_v34 = vsub.f32 %v25848_v53, %v14724_v18 }
 0xc58   : > { %v20105_v55 = vpop.f32.mrf.mxu1 }
 0xc59   : > { %v14726_v49 = vand.u32 4294901760, %v14725_v34 }
 0xc5a   : > { %v13887_v14 = vpop.f32.mrf.mxu1 }
 0xc60   : > { %v20090_v23 = vpop.f32.mrf.mxu0 }
 0xc61   : > { %v13809_v24 = vadd.f32 %v20090_v23, %v13718_v8 }
 0xc62   : > { %v13801_v1 = vpop.f32.mrf.mxu0 }
 0xc63   : > { %v13802_v40 = vadd.f32 %v13801_v1, %v13712_v38  ;;  %v13896_v16 = vadd.f32 %v20105_v55, %v13809_v24  ;;  %v25916_v24 = vand.u32 4294901760, %v15210_v54 }
 0xc65   : > { %v13888_v26 = vadd.f32 %v13887_v14, %v13802_v40 }
 0xc66   : > { %v20135_v48 = vpop.f32.mrf.mxu1 }
 0xc68   : > { %v14067_v32 = vpop.f32.mrf.mxu1 }
 0xc6e   : > { %v20120_v62 = vpop.f32.mrf.mxu0 }
 0xc6f   : > { %v13991_v47 = vadd.f32 %v20120_v62, %v13896_v16 }
 0xc70   : > { %v13984_v43 = vpop.f32.mrf.mxu0 }
 0xc71   : > { %v13985_v22 = vadd.f32 %v13984_v43, %v13888_v26  ;;  %v14074_v42 = vadd.f32 %v20135_v48, %v13991_v47  ;;  %v14735_v48 = vsub.f32 %v25855_v52, %v14734_v30  ;;  %v14744_v43 = vand.u32 4294901760, %v25864_v28 }
 0xc73   : > { %v14068_v13 = vadd.f32 %v14067_v32, %v13985_v22  ;;  %v14736_v32 = vand.u32 4294901760, %v14735_v48  ;;  %v14745_v58 = vsub.f32 %v25864_v28, %v14744_v43 }
 0xc74   : > { %v20165_v37 = vpop.f32.mrf.mxu1 }
 0xc75   : > { %v14746_v20 = vand.u32 4294901760, %v14745_v58 }
 0xc76   : > { %v14272_v2 = vpop.f32.mrf.mxu1 }
 0xc7c   : > { %v20150_v12 = vpop.f32.mrf.mxu0 }
 0xc7d   : > { %v14279_v44 = vadd.f32 %v20165_v37, %v20150_v12 }
 0xc7e   : > { %v14161_v27 = vpop.f32.mrf.mxu0 }
 0xc7f   : > { %v14273_v9 = vadd.f32 %v14272_v2, %v14161_v27  ;;  %v12953_v2 = vld [vmem:[%s26086_s6 + $0x8] sm:$0xff] }
 0xc80   : > { %v15204_v38 = vsel %vm8796_vm14, %v12953_v2, 0 }
 0xc81   : > { %v25942_v40 = vand.u32 4294901760, %v15204_v38 }
 0xc82   : > { %v20195_v36 = vpop.f32.mrf.mxu1 }
 0xc83   : > { %v25962_v16 = vsub.f32 %v15204_v38, %v25942_v40 }
 0xc84   : > { %v14448_v57 = vpop.f32.mrf.mxu1 }
 0xc85   : > { %v15291_v47 = vand.u32 4294901760, %v25962_v16 }
 0xc8a   : > { %v20180_v50 = vpop.f32.mrf.mxu0 }
 0xc8b   : > { %v14370_v41 = vadd.f32 %v20180_v50, %v14279_v44  ;;  %v12952_v50 = vld [vmem:[%s26086_s6] sm:$0xff]  ;;  %v25927_v44 = vand.u32 4294901760, %v25832_v60 }
 0xc8c   : > { %v14362_v4 = vpop.f32.mrf.mxu0  ;;  %v15201_v8 = vsel %vm8796_vm14, %v12952_v50, 0 }
 0xc8d   : > { %v14363_v0 = vadd.f32 %v14362_v4, %v14273_v9  ;;  %v14457_v46 = vadd.f32 %v20195_v36, %v14370_v41  ;;  %v25920_v51 = vand.u32 4294901760, %v15201_v8  ;;  %v25936_v36 = vsub.f32 %v15210_v54, %v25916_v24 }
 0xc8e   : > { %v15207_v9 = vsel %vm8796_vm14, %v12954_v35, 0  ;;  %v25951_v41 = vsub.f32 %v25832_v60, %v25927_v44 }
 0xc8f   : > { %v14449_v56 = vadd.f32 %v14448_v57, %v14363_v0  ;;  %v25940_v4 = vsub.f32 %v15201_v8, %v25920_v51  ;;  %v15340_v33 = vand.u32 4294901760, %v25936_v36  ;;  %v25964_v60 = vand.u32 4294901760, %v15207_v9 }
 0xc90   : > { %v20225_v7 = vpop.f32.mrf.mxu1  ;;  %v15347_v0 = vand.u32 4294901760, %v25951_v41 }
 0xc91   : > { %v15341_v57 = vsub.f32 %v25936_v36, %v15340_v33  ;;  %v25984_v26 = vsub.f32 %v15207_v9, %v25964_v60 }
 0xc92   : > { %v14628_v25 = vpop.f32.mrf.mxu1 }
 0xc97   : > { %v20210_v63 = vpop.f32.mrf.mxu0 }
 0xc98   : > { %v14552_v59 = vadd.f32 %v20210_v63, %v14457_v46  ;;  %v15348_v46 = vsub.f32 %v25951_v41, %v15347_v0 }
 0xc99   : > { %v14545_v15 = vpop.f32.mrf.mxu0 }
 0xc9a   : > { %v14635_v19 = vadd.f32 %v20225_v7, %v14552_v59  ;;  %v14546_v23 = vadd.f32 %v14545_v15, %v14449_v56  ;;  %v15342_v7 = vand.u32 4294901760, %v15341_v57  ;;  %v15349_v22 = vand.u32 4294901760, %v15348_v46 }
 0xc9c   : > { %v14639_v55 = vadd.f32 %v14635_v19, %v14074_v42  ;;  %v14629_v1 = vadd.f32 %v14628_v25, %v14546_v23 }
 0xc9e   : > { %v14653_v62 = vsel %vm4189_vm9, %v14639_v55, 0  ;;  %v14638_v11 = vadd.f32 %v14629_v1, %v14068_v13 }
 0xc9f   : > { %v25867_v14 = vand.u32 4294901760, %v14653_v62 }
 0xca0   : > { %v25869_v5 = vand.u32 4294901760, %v14638_v11 }
 0xca1   : > { %20227 = vmatpush3.msra.mxu0 %v25867_v14  ;;  %v14782_v39 = vsub.f32 %v14653_v62, %v25867_v14 }
 0xca2   : > { %v14789_v12 = vsub.f32 %v14638_v11, %v25869_v5  ;;  %20228 = vmatprep.subr.mxu0 %v20417_v3 }
 0xca3   : > { %20229 = vmatpush3.msra.mxu0 %v25869_v5  ;;  %v14783_v6 = vand.u32 4294901760, %v14782_v39 }
 0xca4   : > { %20231 = vmatmul.mubr.f32.vlgmr.msra.gmra.mxu0 %v14726_v49  ;;  %20252 = vmatprep.subr.mxu0 %v20417_v3  ;;  %v14790_v10 = vand.u32 4294901760, %v14789_v12 }
 0xca5   : > { %20253 = vmatpush3.msra.mxu0 %v14782_v39  ;;  %20233 = vmatprep.mubr.msk.f32.mxu0 %vm20418_vm0, %v20417_v3  ;;  %v14784_v31 = vsub.f32 %v14782_v39, %v14783_v6 }
 0xca6   : > { %20254 = vmatprep.subr.mxu0 %v20417_v3  ;;  %v14791_v37 = vsub.f32 %v14789_v12, %v14790_v10 }
 0xca7   : > { %20255 = vmatpush3.msra.mxu0 %v14789_v12  ;;  %v14785_v27 = vand.u32 4294901760, %v14784_v31 }
 0xca8   : > { %20234 = vmatmul.mubr.f32.gmra.mxu0 %v14736_v32  ;;  %v14792_v45 = vand.u32 4294901760, %v14791_v37  ;;  %20278 = vmatprep.subr.mxu0 %v20417_v3 }
 0xca9   : > { %20240 = vmatpush3.msra.mxu1 %v14785_v27  ;;  %20236 = vmatprep.mubr.msk.f32.mxu0 %vm20418_vm0, %v20417_v3 }
 0xcaa   : > { %20241 = vmatprep.subr.mxu1 %v20417_v3 }
 0xcab   : > { %20242 = vmatpush3.msra.mxu1 %v14792_v45 }
 0xcac   : > { %20237 = vmatmul.mubr.f32.gmra.mxu0 %v14746_v20  ;;  %20244 = vmatmul.mubr.f32.vlgmr.msra.gmra.mxu1 %v25841_v17 }
 0xcad   : > { %20265 = vmatprep.subr.mxu1 %v20417_v3  ;;  %20246 = vmatprep.mubr.msk.f32.mxu1 %vm20418_vm0, %v20417_v3 }
 0xcae   : > { %20266 = vmatpush3.msra.mxu1 %v25867_v14  ;;  %20256 = vmatprep.mubr.msk.f32.mxu0 %vm20418_vm0, %v20417_v3 }
 0xcaf   : > { %20267 = vmatprep.subr.mxu1 %v20417_v3 }
 0xcb0   : > { %20268 = vmatpush3.msra.mxu1 %v25869_v5  ;;  %20257 = vmatmul.mubr.f32.vlgmr.msra.gmra.mxu0 %v25848_v53  ;;  %v15281_v53 = vand.u32 4294901760, %v25940_v4 }
 0xcb1   : > { %20247 = vmatmul.mubr.f32.gmra.mxu1 %v25850_v61  ;;  %20279 = vmatpush3.msra.mxu0 %v14783_v6 }
 0xcb2   : > { %20280 = vmatprep.subr.mxu0 %v20417_v3  ;;  %20249 = vmatprep.mubr.msk.f32.mxu1 %vm20418_vm0, %v20417_v3  ;;  %v15282_v29 = vsub.f32 %v25940_v4, %v15281_v53 }
 0xcb3   : > { %20281 = vmatpush3.msra.mxu0 %v14790_v10  ;;  %20259 = vmatprep.mubr.msk.f32.mxu0 %vm20418_vm0, %v20417_v3 }
 0xcb4   : > { %20260 = vmatmul.mubr.f32.gmra.mxu0 %v25855_v52  ;;  %20291 = vmatprep.subr.mxu1 %v20417_v3  ;;  %v15283_v63 = vand.u32 4294901760, %v15282_v29  ;;  %v15301_v52 = vand.u32 4294901760, %v25984_v26 }
 0xcb5   : > { %20250 = vmatmul.mubr.f32.gmra.mxu1 %v25857_v21  ;;  %20262 = vmatprep.mubr.msk.f32.mxu0 %vm20418_vm0, %v20417_v3 }
 0xcb6   : > { %20269 = vmatprep.mubr.msk.f32.mxu1 %vm20418_vm0, %v20417_v3  ;;  %20304 = vmatprep.subr.mxu0 %v20417_v3  ;;  %v15302_v56 = vsub.f32 %v25984_v26, %v15301_v52 }
 0xcb8   : > { %20263 = vmatmul.mubr.f32.gmra.mxu0 %v25864_v28 }
 0xcb9   : > { %20270 = vmatmul.mubr.f32.vlgmr.msra.gmra.mxu1 %v14724_v18  ;;  %20282 = vmatprep.mubr.msk.f32.mxu0 %vm20418_vm0, %v20417_v3  ;;  %v15292_v18 = vsub.f32 %v25962_v16, %v15291_v47 }
 0xcba   : > { %20292 = vmatpush3.msra.mxu1 %v25867_v14  ;;  %20272 = vmatprep.mubr.msk.f32.mxu1 %vm20418_vm0, %v20417_v3 }
 0xcbb   : > { %20293 = vmatprep.subr.mxu1 %v20417_v3  ;;  %v15293_v59 = vand.u32 4294901760, %v15292_v18 }
 0xcbc   : > { %20294 = vmatpush3.msra.mxu1 %v25869_v5  ;;  %20283 = vmatmul.mubr.f32.vlgmr.msra.gmra.mxu0 %v25841_v17 }
 0xcbd   : > { %20273 = vmatmul.mubr.f32.gmra.mxu1 %v14734_v30  ;;  %20305 = vmatpush3.msra.mxu0 %v25916_v24 }
 0xcbe   : > { %20306 = vmatprep.subr.mxu0 %v20417_v3  ;;  %20275 = vmatprep.mubr.msk.f32.mxu1 %vm20418_vm0, %v20417_v3 }
 0xcbf   : > { %20307 = vmatpush3.msra.mxu0 %v25927_v44  ;;  %20285 = vmatprep.mubr.msk.f32.mxu0 %vm20418_vm0, %v20417_v3 }
 0xcc0   : > { %20286 = vmatmul.mubr.f32.gmra.mxu0 %v25850_v61  ;;  %20317 = vmatprep.subr.mxu1 %v20417_v3 }
 0xcc1   : > { %20276 = vmatmul.mubr.f32.gmra.mxu1 %v14744_v43  ;;  %20288 = vmatprep.mubr.msk.f32.mxu0 %vm20418_vm0, %v20417_v3 }
 0xcc2   : > { %20295 = vmatprep.mubr.msk.f32.mxu1 %vm20418_vm0, %v20417_v3  ;;  %20330 = vmatprep.subr.mxu0 %v20417_v3 }
 0xcc4   : > { %20289 = vmatmul.mubr.f32.gmra.mxu0 %v25857_v21 }
 0xcc5   : > { %20296 = vmatmul.mubr.f32.vlgmr.msra.gmra.mxu1 %v25841_v17  ;;  %20308 = vmatprep.mubr.msk.f32.mxu0 %vm20418_vm0, %v20417_v3  ;;  %v15303_v17 = vand.u32 4294901760, %v15302_v56 }
 0xcc6   : > { %20318 = vmatpush3.msra.mxu1 %v15342_v7  ;;  %20298 = vmatprep.mubr.msk.f32.mxu1 %vm20418_vm0, %v20417_v3 }
 0xcc7   : > { %20319 = vmatprep.subr.mxu1 %v20417_v3 }
 0xcc8   : > { %20320 = vmatpush3.msra.mxu1 %v15349_v22  ;;  %20309 = vmatmul.mubr.f32.vlgmr.msra.gmra.mxu0 %v15283_v63 }
 0xcc9   : > { %20299 = vmatmul.mubr.f32.gmra.mxu1 %v25850_v61  ;;  %20331 = vmatpush3.msra.mxu0 %v25936_v36 }
 0xcca   : > { %20332 = vmatprep.subr.mxu0 %v20417_v3  ;;  %20301 = vmatprep.mubr.msk.f32.mxu1 %vm20418_vm0, %v20417_v3 }
 0xccb   : > { %20333 = vmatpush3.msra.mxu0 %v25951_v41  ;;  %20311 = vmatprep.mubr.msk.f32.mxu0 %vm20418_vm0, %v20417_v3 }
 0xccc   : > { %20312 = vmatmul.mubr.f32.gmra.mxu0 %v15293_v59  ;;  %20343 = vmatprep.subr.mxu1 %v20417_v3 }
 0xccd   : > { %20302 = vmatmul.mubr.f32.gmra.mxu1 %v25857_v21  ;;  %20314 = vmatprep.mubr.msk.f32.mxu0 %vm20418_vm0, %v20417_v3 }
 0xcce   : > { %20321 = vmatprep.mubr.msk.f32.mxu1 %vm20418_vm0, %v20417_v3  ;;  %20356 = vmatprep.subr.mxu0 %v20417_v3 }
 0xcd0   : > { %20315 = vmatmul.mubr.f32.gmra.mxu0 %v15303_v17 }
 0xcd1   : > { %20322 = vmatmul.mubr.f32.vlgmr.msra.gmra.mxu1 %v25920_v51  ;;  %20334 = vmatprep.mubr.msk.f32.mxu0 %vm20418_vm0, %v20417_v3 }
 0xcd2   : > { %20344 = vmatpush3.msra.mxu1 %v25916_v24  ;;  %20324 = vmatprep.mubr.msk.f32.mxu1 %vm20418_vm0, %v20417_v3 }
 0xcd3   : > { %20345 = vmatprep.subr.mxu1 %v20417_v3 }
 0xcd4   : > { %20346 = vmatpush3.msra.mxu1 %v25927_v44  ;;  %20335 = vmatmul.mubr.f32.vlgmr.msra.gmra.mxu0 %v25940_v4 }
 0xcd5   : > { %20325 = vmatmul.mubr.f32.gmra.mxu1 %v25942_v40  ;;  %20357 = vmatpush3.msra.mxu0 %v15340_v33 }
 0xcd6   : > { %20358 = vmatprep.subr.mxu0 %v20417_v3  ;;  %20327 = vmatprep.mubr.msk.f32.mxu1 %vm20418_vm0, %v20417_v3 }
 0xcd7   : > { %20359 = vmatpush3.msra.mxu0 %v15347_v0  ;;  %20337 = vmatprep.mubr.msk.f32.mxu0 %vm20418_vm0, %v20417_v3 }
 0xcd8   : > { %20338 = vmatmul.mubr.f32.gmra.mxu0 %v25962_v16  ;;  %20369 = vmatprep.subr.mxu1 %v20417_v3 }
 0xcd9   : > { %20328 = vmatmul.mubr.f32.gmra.mxu1 %v25964_v60  ;;  %20340 = vmatprep.mubr.msk.f32.mxu0 %vm20418_vm0, %v20417_v3 }
 0xcda   : > { %20347 = vmatprep.mubr.msk.f32.mxu1 %vm20418_vm0, %v20417_v3 }
 0xcdc   : > { %20341 = vmatmul.mubr.f32.gmra.mxu0 %v25984_v26 }
 0xcdd   : > { %20348 = vmatmul.mubr.f32.vlgmr.msra.gmra.mxu1 %v15281_v53  ;;  %20360 = vmatprep.mubr.msk.f32.mxu0 %vm20418_vm0, %v20417_v3 }
 0xcde   : > { %20370 = vmatpush3.msra.mxu1 %v25916_v24  ;;  %20350 = vmatprep.mubr.msk.f32.mxu1 %vm20418_vm0, %v20417_v3 }
 0xcdf   : > { %20371 = vmatprep.subr.mxu1 %v20417_v3 }
 0xce0   : > { %20372 = vmatpush3.msra.mxu1 %v25927_v44  ;;  %20361 = vmatmul.mubr.f32.vlgmr.msra.gmra.mxu0 %v25920_v51 }
 0xce1   : > { %20351 = vmatmul.mubr.f32.gmra.mxu1 %v15291_v47  ;;  %20363 = vmatprep.mubr.msk.f32.mxu0 %vm20418_vm0, %v20417_v3 }
 0xce2   : > { %20353 = vmatprep.mubr.msk.f32.mxu1 %vm20418_vm0, %v20417_v3 }
 0xce4   : > { %20364 = vmatmul.mubr.f32.gmra.mxu0 %v25942_v40 }
 0xce5   : > { %20354 = vmatmul.mubr.f32.gmra.mxu1 %v15301_v52  ;;  %20366 = vmatprep.mubr.msk.f32.mxu0 %vm20418_vm0, %v20417_v3 }
 0xce6   : > { %20373 = vmatprep.mubr.msk.f32.mxu1 %vm20418_vm0, %v20417_v3 }
 0xce8   : > { %20367 = vmatmul.mubr.f32.gmra.mxu0 %v25964_v60 }
 0xce9   : > { %20374 = vmatmul.mubr.f32.vlgmr.msra.gmra.mxu1 %v25920_v51 }
 0xcea   : > { %20376 = vmatprep.mubr.msk.f32.mxu1 %vm20418_vm0, %v20417_v3 }
 0xced   : > { %20377 = vmatmul.mubr.f32.gmra.mxu1 %v25942_v40 }
 0xcee   : > { %20379 = vmatprep.mubr.msk.f32.mxu1 %vm20418_vm0, %v20417_v3 }
 0xcf1   : > { %20380 = vmatmul.mubr.f32.gmra.mxu1 %v25964_v60 }
 0xd64   : > { %v14728_v61 = vpop.f32.mrf.mxu0 }
 0xd66   : > { %v20232_v21 = vpop.f32.mrf.mxu0 }
 0xd68   : > { %v14738_v15 = vpop.f32.mrf.mxu0 }
 0xd6a   : > { %v20235_v42 = vpop.f32.mrf.mxu0 }
 0xd6c   : > { %v14748_v19 = vpop.f32.mrf.mxu0  ;;  %v14829_v23 = vpop.f32.mrf.mxu1 }
 0xd6d   : > { %v14830_v33 = vadd.f32 %v14829_v23, %v14728_v61 }
 0xd6e   : > { %v20238_v25 = vpop.f32.mrf.mxu0  ;;  %v20245_v34 = vpop.f32.mrf.mxu1 }
 0xd70   : > { %v14917_v30 = vpop.f32.mrf.mxu0 }
 0xd71   : > { %v14835_v13 = vpop.f32.mrf.mxu1  ;;  %v14918_v60 = vadd.f32 %v14917_v30, %v14830_v33 }
 0xd72   : > { %v20258_v55 = vpop.f32.mrf.mxu0  ;;  %v14836_v29 = vadd.f32 %v14835_v13, %v14738_v15 }
 0xd73   : > { %v20248_v1 = vpop.f32.mrf.mxu1 }
 0xd74   : > { %v14924_v28 = vpop.f32.mrf.mxu0 }
 0xd75   : > { %v14841_v62 = vpop.f32.mrf.mxu1  ;;  %v14925_v7 = vadd.f32 %v14924_v28, %v14836_v29 }
 0xd76   : > { %v20261_v11 = vpop.f32.mrf.mxu0  ;;  %v14842_v22 = vadd.f32 %v14841_v62, %v14748_v19 }
 0xd77   : > { %v20251_v14 = vpop.f32.mrf.mxu1 }
 0xd78   : > { %v14931_v5 = vpop.f32.mrf.mxu0 }
 0xd79   : > { %v15006_v3 = vpop.f32.mrf.mxu1  ;;  %v14932_v42 = vadd.f32 %v14931_v5, %v14842_v22 }
 0xd7a   : > { %v20264_v49 = vpop.f32.mrf.mxu0  ;;  %v15007_v47 = vadd.f32 %v15006_v3, %v14918_v60 }
 0xd7b   : > { %v20271_v48 = vpop.f32.mrf.mxu1 }
 0xd7c   : > { %v15099_v43 = vpop.f32.mrf.mxu0 }
 0xd7d   : > { %v15014_v39 = vpop.f32.mrf.mxu1  ;;  %v15100_v63 = vadd.f32 %v15099_v43, %v15007_v47 }
 0xd7e   : > { %v20284_v12 = vpop.f32.mrf.mxu0  ;;  %v15015_v59 = vadd.f32 %v15014_v39, %v14925_v7 }
 0xd7f   : > { %v20274_v6 = vpop.f32.mrf.mxu1 }
 0xd80   : > { %v15105_v32 = vpop.f32.mrf.mxu0 }
 0xd81   : > { %v15022_v10 = vpop.f32.mrf.mxu1  ;;  %v15106_v61 = vadd.f32 %v15105_v32, %v15015_v59 }
 0xd82   : > { %v20287_v58 = vpop.f32.mrf.mxu0  ;;  %v15023_v30 = vadd.f32 %v15022_v10, %v14932_v42  ;;  %v15975_v10 = vld [vmem:[%s26089_s9] ss:$0 sm:$0xff] }
 0xd83   : > { %v20277_v31 = vpop.f32.mrf.mxu1 }
 0xd84   : > { %v15111_v37 = vpop.f32.mrf.mxu0 }
 0xd85   : > { %v15184_v27 = vpop.f32.mrf.mxu1  ;;  %v15112_v11 = vadd.f32 %v15111_v37, %v15023_v30 }
 0xd86   : > { %v20290_v45 = vpop.f32.mrf.mxu0  ;;  %v15185_v56 = vadd.f32 %v15184_v27, %v15100_v63 }
 0xd87   : > { %v20297_v20 = vpop.f32.mrf.mxu1 }
 0xd88   : > { %v15285_v50 = vpop.f32.mrf.mxu0 }
 0xd89   : > { %v15190_v54 = vpop.f32.mrf.mxu1  ;;  %v15286_v23 = vadd.f32 %v15285_v50, %v15185_v56 }
 0xd8a   : > { %v20310_v8 = vpop.f32.mrf.mxu0  ;;  %v15191_v55 = vadd.f32 %v15190_v54, %v15106_v61 }
 0xd8b   : > { %v20300_v2 = vpop.f32.mrf.mxu1 }
 0xd8c   : > { %v15295_v24 = vpop.f32.mrf.mxu0 }
 0xd8d   : > { %v15196_v51 = vpop.f32.mrf.mxu1  ;;  %v15296_v28 = vadd.f32 %v15295_v24, %v15191_v55 }
 0xd8e   : > { %v20313_v38 = vpop.f32.mrf.mxu0  ;;  %v15197_v19 = vadd.f32 %v15196_v51, %v15112_v11 }
 0xd8f   : > { %v20303_v44 = vpop.f32.mrf.mxu1 }
 0xd90   : > { %v15305_v35 = vpop.f32.mrf.mxu0 }
 0xd91   : > { %v15386_v36 = vpop.f32.mrf.mxu1  ;;  %v15306_v5 = vadd.f32 %v15305_v35, %v15197_v19 }
 0xd92   : > { %v20316_v4 = vpop.f32.mrf.mxu0  ;;  %v15387_v15 = vadd.f32 %v15386_v36, %v15286_v23 }
 0xd93   : > { %v20323_v40 = vpop.f32.mrf.mxu1 }
 0xd94   : > { %v15474_v9 = vpop.f32.mrf.mxu0 }
 0xd95   : > { %v15392_v41 = vpop.f32.mrf.mxu1  ;;  %v15475_v14 = vadd.f32 %v15474_v9, %v15387_v15 }
 0xd96   : > { %v20336_v53 = vpop.f32.mrf.mxu0  ;;  %v15393_v62 = vadd.f32 %v15392_v41, %v15296_v28 }
 0xd97   : > { %v20326_v16 = vpop.f32.mrf.mxu1 }
 0xd98   : > { %v15481_v0 = vpop.f32.mrf.mxu0 }
 0xd99   : > { %v15398_v57 = vpop.f32.mrf.mxu1  ;;  %v15482_v12 = vadd.f32 %v15481_v0, %v15393_v62 }
 0xd9a   : > { %v20339_v26 = vpop.f32.mrf.mxu0  ;;  %v15399_v31 = vadd.f32 %v15398_v57, %v15306_v5 }
 0xd9b   : > { %v20329_v46 = vpop.f32.mrf.mxu1 }
 0xd9c   : > { %v15488_v18 = vpop.f32.mrf.mxu0 }
 0xd9d   : > { %v15563_v52 = vpop.f32.mrf.mxu1  ;;  %v15489_v50 = vadd.f32 %v15488_v18, %v15399_v31 }
 0xd9e   : > { %v20342_v17 = vpop.f32.mrf.mxu0  ;;  %v15564_v48 = vadd.f32 %v15563_v52, %v15475_v14 }
 0xd9f   : > { %v20349_v21 = vpop.f32.mrf.mxu1 }
 0xda0   : > { %v15656_v25 = vpop.f32.mrf.mxu0 }
 0xda1   : > { %v15571_v34 = vpop.f32.mrf.mxu1  ;;  %v15657_v6 = vadd.f32 %v15656_v25, %v15564_v48 }
 0xda2   : > { %v20362_v13 = vpop.f32.mrf.mxu0  ;;  %v15572_v37 = vadd.f32 %v15571_v34, %v15482_v12 }
 0xda3   : > { %v20352_v1 = vpop.f32.mrf.mxu1 }
 0xda4   : > { %v15662_v3 = vpop.f32.mrf.mxu0 }
 0xda5   : > { %v15579_v49 = vpop.f32.mrf.mxu1  ;;  %v15663_v54 = vadd.f32 %v15662_v3, %v15572_v37 }
 0xda6   : > { %v20365_v43 = vpop.f32.mrf.mxu0  ;;  %v15580_v24 = vadd.f32 %v15579_v49, %v15489_v50 }
 0xda7   : > { %v20355_v39 = vpop.f32.mrf.mxu1 }
 0xda8   : > { %v15668_v32 = vpop.f32.mrf.mxu0 }
 0xda9   : > { %v15741_v58 = vpop.f32.mrf.mxu1  ;;  %v15669_v35 = vadd.f32 %v15668_v32, %v15580_v24 }
 0xdaa   : > { %v15742_v27 = vadd.f32 %v15741_v58, %v15657_v6  ;;  %v20368_v45 = vpop.f32.mrf.mxu0 }
 0xdab   : > { %v20375_v20 = vpop.f32.mrf.mxu1 }
 0xdac   : > { %v15764_v8 = vadd.f32 %v15975_v10, %v15742_v27 }
 0xdad   : > { %v15747_v2 = vpop.f32.mrf.mxu1 }
 0xdae   : > { %v15767_v51 = vsub.f32 0.0, %v15764_v8  ;;  %v15748_v38 = vadd.f32 %v15747_v2, %v15663_v54 }
 0xdaf   : > { %v20378_v44 = vpop.f32.mrf.mxu1 }
 0xdb0   : > { %v15770_v36 = vmul.f32 1.442695, %v15767_v51  ;;  %v15765_v4 = vadd.f32 %v15975_v10, %v15748_v38 }
 0xdb1   : > { %v15753_v40 = vpop.f32.mrf.mxu1 }
 0xdb2   : > { %20397 = vpow2.f32 %v15770_v36  ;;  %v15768_v9 = vsub.f32 0.0, %v15765_v4  ;;  %v15754_v41 = vadd.f32 %v15753_v40, %v15669_v35 }
 0xdb3   : > { %v20381_v33 = vpop.f32.mrf.mxu1 }
 0xdb4   : > { %v15772_v53 = vmul.f32 1.442695, %v15768_v9  ;;  %v15766_v16 = vadd.f32 %v15975_v10, %v15754_v41 }
 0xdb6   : > { %20399 = vpow2.f32 %v15772_v53  ;;  %v15769_v60 = vsub.f32 0.0, %v15766_v16 }
 0xdb8   : > { %v15774_v0 = vmul.f32 1.442695, %v15769_v60 }
 0xdba   : > { %20401 = vpow2.f32 %v15774_v0 }
 0xdbf   : > { %v20398_v57 = vpop.eup %20397 }
 0xdc0   : > { %v15776_v29 = vadd.f32 1.0, %v20398_v57 }
 0xdc2   : > { %20403 = vrcp.f32 %v15776_v29 }
 0xdc3   : > { %v20400_v47 = vpop.eup %20399 }
 0xdc4   : > { %v15777_v26 = vadd.f32 1.0, %v20400_v47 }
 0xdc6   : > { %20405 = vrcp.f32 %v15777_v26 }
 0xdc7   : > { %v20402_v46 = vpop.eup %20401 }
 0xdc8   : > { %v15778_v7 = vadd.f32 1.0, %v20402_v46 }
 0xdca   : > { %20407 = vrcp.f32 %v15778_v7 }
 0xdcf   : > { %v20404_v63 = vpop.eup %20403 }
 0xdd0   : > { %15786 = vst.msk [vmem:[%s359_s23] sm:$0xff] %vm15785_vm15, %v20404_v63 }
 0xdd3   : > { %v20406_v18 = vpop.eup %20405 }
 0xdd4   : > { %15787 = vst.msk [vmem:[%s359_s23 + $0x8] sm:$0xff] %vm15785_vm15, %v20406_v18 }
 0xdd7   : > { %v20408_v52 = vpop.eup %20407 }
 0xdd8   : > { %15788 = vst.msk [vmem:[%s359_s23 + $0x10] sm:$0xff] %vm15785_vm15, %v20408_v52 }
 0xdd9 PF: > { %s20_s13 = sadd.s32 1, %s20415_s13  }
 0xdda   : > { %p17_p4 = scmp.ge.s32.totalorder %s20_s13, 4  }
 0xddc   :  { %19 = sbr.rel (!%p17_p4) target bundleno = 1 (0x1), region = 105 }

</bundles_post_ra>
